<compile_context>
chip_gen: v5e
topology: v5e:2x2
jax: 0.10.0
libtpu: 0.0.40
codegen_flags: <defaults>
</compile_context>

<pallas_src>
import functools

import jax
import jax.numpy as jnp
from jax.experimental import pallas as pl
from jax.experimental.pallas import tpu as pltpu


_VMEM = pl.BlockSpec(memory_space=pltpu.MemorySpace.VMEM)
_EPS = 1e-5
_SLOPE = 0.2
_LANE = 128


def _round_up(x, m):
    return (x + m - 1) // m * m


# ----------------------------------------------------------------------------
# In-kernel helpers
# ----------------------------------------------------------------------------
def _bn_lrelu(acc, mask, inv_n, gamma, beta):
    """Training-mode BatchNorm (stats over mask==1 rows, biased variance,
    eps=1e-5) + LeakyReLU(0.2).  acc: (Mp, C) f32, mask: (Mp, 1) f32."""
    mean = jnp.sum(acc * mask, axis=0, keepdims=True) * inv_n
    d = acc - mean
    var = jnp.sum(d * d * mask, axis=0, keepdims=True) * inv_n
    t = d * (gamma * jax.lax.rsqrt(var + _EPS)) + beta
    return jnp.maximum(t, _SLOPE * t)          # LeakyReLU as mul+max


# ----------------------------------------------------------------------------
# The single fused kernel
# ----------------------------------------------------------------------------
def _disc_kernel(a1_ref, w1_ref, b1_ref, g1_ref, be1_ref, bnm1_ref,
                 gstk_ref, w2_ref, b2_ref, g2_ref, be2_ref, bnm2_ref,
                 tmsk_ref, w3_ref, b3_ref, g3_ref, be3_ref,
                 w4_ref, b4_ref, o_ref, *, inv_n1, inv_n2, shifts):
    f32 = jnp.float32
    bf16 = jnp.bfloat16
    mp2 = o_ref.shape[0]
    c3 = w3_ref.shape[1]

    # ---- layer 1: Conv(4,2,2) as im2col GEMM + bias + BN + LeakyReLU -------
    acc1 = jnp.dot(a1_ref[...], w1_ref[...], preferred_element_type=f32)
    y1 = _bn_lrelu(acc1 + b1_ref[...], bnm1_ref[...], inv_n1,
                   g1_ref[...], be1_ref[...]).astype(bf16)

    # ---- layer 2: Conv(3,2,1) ----------------------------------------------
    # ONE stacked 0/1 gather GEMM (exact copies of y1 rows), taps
    # lane-concatenated, then ONE full-depth K=9*128 weight GEMM.
    xstk = jnp.dot(gstk_ref[...], y1, preferred_element_type=f32)   # (9*mp2,128)
    xcat2 = jnp.concatenate(
        [xstk[t * mp2:(t + 1) * mp2, :] for t in range(9)], axis=1)
    acc2 = jnp.dot(xcat2.astype(bf16), w2_ref[...], preferred_element_type=f32)
    y2 = _bn_lrelu(acc2 + b2_ref[...], bnm2_ref[...], inv_n2,
                   g2_ref[...], be2_ref[...])                        # f32, (mp2,128)

    # ---- layer 3: Conv(3,1,1) ----------------------------------------------
    # Stride-1 taps are fixed row shifts: sublane rolls (XLU) + 0/1 validity
    # masks (VPU) -- no MXU work for the gather -- then ONE K=9*128 GEMM.
    taps = []
    for t, s in enumerate(shifts):
        xt = y2 if s == 0 else pltpu.roll(y2, shift=(-s) % mp2, axis=0)
        taps.append(xt * tmsk_ref[t])
    xcat3 = jnp.concatenate(taps, axis=1).astype(bf16)               # (mp2, 9*128)
    acc3 = jnp.dot(xcat3, w3_ref[...], preferred_element_type=f32)
    y3 = _bn_lrelu(acc3 + b3_ref[...], bnm2_ref[...], inv_n2,
                   g3_ref[...], be3_ref[...])                        # f32, (mp2,256)

    # ---- layer 4: Conv(3,1,1) -> 1 channel + Sigmoid ------------------------
    # rolls + masks + per-tap f32 VPU multiply + lane reduce: zero MXU work.
    acc4 = jnp.zeros((mp2, c3), f32)
    for t, s in enumerate(shifts):
        xt = y3 if s == 0 else pltpu.roll(y3, shift=(-s) % mp2, axis=0)
        acc4 = acc4 + (xt * tmsk_ref[t]) * w4_ref[t:t + 1, :]
    z = jnp.sum(acc4, axis=-1, keepdims=True) + b4_ref[...]
    o_ref[...] = 1.0 / (1.0 + jnp.exp(-z))       # EUP exp; output in [0, 1]


# ----------------------------------------------------------------------------
# Host-side (one-time) preparation
# ----------------------------------------------------------------------------
def _im2col(x, kh, kw, stride, pad):
    """NHWC -> (N*OH*OW, kh*kw*C), tap-major then channel."""
    xp = jnp.pad(x, ((0, 0), (pad, pad), (pad, pad), (0, 0)))
    n, hp, wp, c = xp.shape
    oh = (hp - kh) // stride + 1
    ow = (wp - kw) // stride + 1
    patches = [xp[:, i:i + stride * oh:stride, j:j + stride * ow:stride, :]
               for i in range(kh) for j in range(kw)]
    cols = jnp.stack(patches, axis=3)            # (N, OH, OW, kh*kw, C)
    return cols.reshape(n * oh * ow, kh * kw * c), oh, ow


def _tap_gather_matrices(n, h, w, kh, kw, stride, pad, rows_pad, cols_pad):
    """Constant 0/1 matrices G (kh*kw, rows_pad, cols_pad):
    (G[t] @ Y)[r] == Y[src_row(r, t)] (or 0 at zero padding / padded rows),
    built by applying _im2col to a row-indicator basis so tap ordering matches
    the weight layout by construction.  Returns f32."""
    m_in = n * h * w
    eye = jnp.eye(cols_pad, dtype=jnp.float32)[:m_in]
    cols, oh, ow = _im2col(eye.reshape(n, h, w, cols_pad), kh, kw, stride, pad)
    m_out = n * oh * ow
    taps = cols.reshape(m_out, kh * kw, cols_pad).transpose(1, 0, 2)
    g = jnp.zeros((kh * kw, rows_pad, cols_pad), jnp.float32)
    g = g.at[:, :m_out, :].set(taps)
    return g


def prepare_params(params, batch, height, width):
    """Pad / reshape all weights into GEMM-ready lane-dense bf16 form, stack
    per-tap weights along K, and precompute gather matrix / tap masks / BN
    masks (all hoisted out of the forward)."""
    w1, w2, w3, w4 = params["w1"], params["w2"], params["w3"], params["w4"]
    c1, cin, kh1, kw1 = w1.shape            # (64, input_dim, 4, 4)
    c2 = w2.shape[0]                        # 128
    c3 = w3.shape[0]                        # 256

    # geometry
    oh1 = (height + 2 * 2 - kh1) // 2 + 1
    ow1 = (width + 2 * 2 - kw1) // 2 + 1
    m1 = batch * oh1 * ow1
    mp1 = _round_up(m1, 8)
    k1 = kh1 * kw1 * cin
    k1p = _round_up(k1, _LANE)
    c1p = _round_up(c1, _LANE)              # 64 -> 128: lane-dense layer-1 out
    oh2 = (oh1 + 2 - 3) // 2 + 1
    ow2 = (ow1 + 2 - 3) // 2 + 1
    m2 = batch * oh2 * ow2
    mp2 = _round_up(m2, 8)

    # conv1 as a GEMM matrix (kh*kw*cin, cout), zero-padded
    w1m = jnp.transpose(w1, (2, 3, 1, 0)).reshape(k1, c1)
    w1m = jnp.zeros((k1p, c1p), jnp.float32).at[:k1, :c1].set(w1m)
    b1p = jnp.zeros((1, c1p), jnp.float32).at[0, :c1].set(params["b1"])
    g1p = jnp.zeros((1, c1p), jnp.float32).at[0, :c1].set(params["g1"])
    be1p = jnp.zeros((1, c1p), jnp.float32).at[0, :c1].set(params["be1"])
    # (gamma padded with 0 => padded channels are exactly 0 after BN+LReLU)

    # BN row masks, precomputed (no in-kernel iota/compare/cast)
    bnm1 = (jnp.arange(mp1) < m1).astype(jnp.float32).reshape(mp1, 1)
    bnm2 = (jnp.arange(mp2) < m2).astype(jnp.float32).reshape(mp2, 1)

    # layer-2 gather: 9 taps stacked vertically into ONE (9*mp2, mp1) matrix
    gsel = _tap_gather_matrices(batch, oh1, ow1, 3, 3, 2, 1, mp2, mp1)
    gstk = gsel.reshape(9 * mp2, mp1).astype(jnp.bfloat16)

    # stride-1 (layers 3/4) tap validity masks + constant row shifts.
    # Masks are the row-sums of the validated stride-1 gather matrices, so
    # they agree exactly with the im2col tap ordering / zero-padding.
    tsel = _tap_gather_matrices(batch, oh2, ow2, 3, 3, 1, 1, mp2, mp2)
    tmsk = jnp.sum(tsel, axis=2, keepdims=True)       # (9, mp2, 1) in {0,1}
    shifts = tuple(int(di * ow2 + dj)
                   for di in (-1, 0, 1) for dj in (-1, 0, 1))

    # conv2/conv3 weights tap-stacked along K for one full-depth GEMM each
    w2t = jnp.transpose(w2, (2, 3, 1, 0))                       # (3,3,c1,c2)
    w2p = jnp.zeros((3, 3, c1p, c2), jnp.float32).at[:, :, :c1, :].set(w2t)
    w2stk = w2p.reshape(9 * c1p, c2).astype(jnp.bfloat16)       # (1152, 128)
    w3stk = jnp.transpose(w3, (2, 3, 1, 0)).reshape(9 * c2, c3) \
               .astype(jnp.bfloat16)                            # (1152, 256)
    # conv4 per-tap row vectors stay f32 (VPU math; v5e has no bf16 VPU)
    w4p = jnp.transpose(w4, (2, 3, 1, 0)).reshape(9, c3).astype(jnp.float32)
    b4p = jnp.asarray(params["b4"], jnp.float32).reshape(1, 1)

    return dict(
        w1m=w1m.astype(jnp.bfloat16), b1=b1p, g1=g1p, be1=be1p, bnm1=bnm1,
        gstk=gstk, w2=w2stk,
        b2=params["b2"].reshape(1, c2).astype(jnp.float32),
        g2=params["g2"].reshape(1, c2).astype(jnp.float32),
        be2=params["be2"].reshape(1, c2).astype(jnp.float32),
        bnm2=bnm2, tmsk=tmsk, w3=w3stk,
        b3=params["b3"].reshape(1, c3).astype(jnp.float32),
        g3=params["g3"].reshape(1, c3).astype(jnp.float32),
        be3=params["be3"].reshape(1, c3).astype(jnp.float32),
        w4=w4p, b4=b4p,
        m1=m1, mp1=mp1, k1=k1, k1p=k1p, m2=m2, mp2=mp2,
        oh2=oh2, ow2=ow2, shifts=shifts,
    )


# ----------------------------------------------------------------------------
# Forward
# ----------------------------------------------------------------------------
def _forward_impl(prep, inp_nchw, label_nchw):
    x = jnp.concatenate([inp_nchw, label_nchw], axis=1)        # NCHW concat
    x = jnp.transpose(x, (0, 2, 3, 1)).astype(jnp.float32)     # -> NHWC
    n = x.shape[0]

    # layer-1 im2col of the tiny raw input (only per-call XLA glue), bf16
    cols, _, _ = _im2col(x, 4, 4, 2, 2)                        # (m1, k1)
    a1 = jnp.zeros((prep["mp1"], prep["k1p"]), jnp.bfloat16)
    a1 = a1.at[:prep["m1"], :prep["k1"]].set(cols.astype(jnp.bfloat16))

    kernel = functools.partial(_disc_kernel,
                               inv_n1=1.0 / prep["m1"],
                               inv_n2=1.0 / prep["m2"],
                               shifts=prep["shifts"])
    out = pl.pallas_call(
        kernel,
        out_shape=jax.ShapeDtypeStruct((prep["mp2"], 1), jnp.float32),
        in_specs=[_VMEM] * 19,
        out_specs=_VMEM,
    )(a1, prep["w1m"], prep["b1"], prep["g1"], prep["be1"], prep["bnm1"],
      prep["gstk"], prep["w2"], prep["b2"], prep["g2"], prep["be2"],
      prep["bnm2"], prep["tmsk"], prep["w3"], prep["b3"], prep["g3"],
      prep["be3"], prep["w4"], prep["b4"])

    y = out[:prep["m2"], 0].reshape(n, prep["oh2"], prep["ow2"])
    return y[:, None, :, :]                                    # (N, 1, OH, OW)


def make_discriminator(params, batch, height, width):
    prep = prepare_params(params, batch, height, width)

    @jax.jit
    def forward(inp, label):
        return _forward_impl(prep, inp, label)

    return forward


# ----------------------------------------------------------------------------
# Pure-JAX reference (lax.conv based) with matching precision choices --
# used only for the correctness check.
# ----------------------------------------------------------------------------
def _reference_forward(params, inp, label):
    def conv(x, w, b, stride, pad):
        y = jax.lax.conv_general_dilated(
            x.astype(jnp.bfloat16), w.astype(jnp.bfloat16),
            window_strides=(stride, stride),
            padding=[(pad, pad), (pad, pad)],
            dimension_numbers=("NCHW", "OIHW", "NCHW"),
            preferred_element_type=jnp.float32)
        return y + b.astype(jnp.float32).reshape(1, -1, 1, 1)

    def bn_lrelu(y, g, be):
        mean = jnp.mean(y, axis=(0, 2, 3), keepdims=True)
        var = jnp.mean(jnp.square(y - mean), axis=(0, 2, 3), keepdims=True)
        t = (y - mean) * jax.lax.rsqrt(var + _EPS) * g.reshape(1, -1, 1, 1) \
            + be.reshape(1, -1, 1, 1)
        return jnp.maximum(t, _SLOPE * t)

    x = jnp.concatenate([inp, label], axis=1).astype(jnp.float32)
    x = bn_lrelu(conv(x, params["w1"], params["b1"], 2, 2), params["g1"], params["be1"])
    x = bn_lrelu(conv(x, params["w2"], params["b2"], 2, 1), params["g2"], params["be2"])
    x = bn_lrelu(conv(x, params["w3"], params["b3"], 1, 1), params["g3"], params["be3"])
    z = conv(x, params["w4"], params["b4"], 1, 1)
    return 1.0 / (1.0 + jnp.exp(-z))


# ----------------------------------------------------------------------------
# Parameter init (mirrors a freshly constructed torch module, random weights)
# ----------------------------------------------------------------------------
def init_params(key, input_dim):
    ks = jax.random.split(key, 16)

    def w(k, shape, fan_in):
        return jax.random.normal(k, shape, jnp.float32) / jnp.sqrt(fan_in)

    return {
        "w1": w(ks[0], (64, input_dim, 4, 4), input_dim * 16),
        "b1": 0.01 * jax.random.normal(ks[1], (64,), jnp.float32),
        "g1": 1.0 + 0.1 * jax.random.normal(ks[2], (64,), jnp.float32),
        "be1": 0.1 * jax.random.normal(ks[3], (64,), jnp.float32),
        "w2": w(ks[4], (128, 64, 3, 3), 64 * 9),
        "b2": 0.01 * jax.random.normal(ks[5], (128,), jnp.float32),
        "g2": 1.0 + 0.1 * jax.random.normal(ks[6], (128,), jnp.float32),
        "be2": 0.1 * jax.random.normal(ks[7], (128,), jnp.float32),
        "w3": w(ks[8], (256, 128, 3, 3), 128 * 9),
        "b3": 0.01 * jax.random.normal(ks[9], (256,), jnp.float32),
        "g3": 1.0 + 0.1 * jax.random.normal(ks[10], (256,), jnp.float32),
        "be3": 0.1 * jax.random.normal(ks[11], (256,), jnp.float32),
        "w4": w(ks[12], (1, 256, 3, 3), 256 * 9),
        "b4": 0.01 * jax.random.normal(ks[13], (1,), jnp.float32),
    }


if __name__ == "__main__":
    key = jax.random.PRNGKey(0)
    k_in, k_lab, k_par = jax.random.split(key, 3)

    # input_dim = 4 channels after concat: 2 image channels + 2 label channels
    batch, c_img, c_lab, hw = 2, 2, 2, 16
    inp = jax.random.normal(k_in, (batch, c_img, hw, hw), jnp.float32)
    lab = jax.random.normal(k_lab, (batch, c_lab, hw, hw), jnp.float32)
    params = init_params(k_par, c_img + c_lab)

    forward = make_discriminator(params, batch, hw, hw)
    out = jax.block_until_ready(forward(inp, lab))

    # 16x16 -> conv(4,2,2): 9x9 -> conv(3,2,1): 5x5 -> 5x5 -> 5x5, 1 channel
    assert out.shape == (batch, 1, 5, 5), out.shape
    assert bool(jnp.all(jnp.isfinite(out)))
    assert bool(jnp.all((out >= 0.0) & (out <= 1.0)))

    # correctness vs. a pure-JAX lax.conv reference (matching precision)
    ref = _reference_forward(params, inp, lab)
    max_diff = float(jnp.max(jnp.abs(out - ref)))
    assert max_diff < 3e-2, max_diff

    print("KERNEL_OK")
</pallas_src>

<mosaic_0001>
module attributes {stable_mosaic.version = 11 : i64} {
  func.func @_disc_kernel(%arg0: memref<168x128xbf16, #tpu.memory_space<vmem>>, %arg1: memref<128x128xbf16, #tpu.memory_space<vmem>>, %arg2: memref<1x128xf32, #tpu.memory_space<vmem>>, %arg3: memref<1x128xf32, #tpu.memory_space<vmem>>, %arg4: memref<1x128xf32, #tpu.memory_space<vmem>>, %arg5: memref<168x1xf32, #tpu.memory_space<vmem>>, %arg6: memref<504x168xbf16, #tpu.memory_space<vmem>>, %arg7: memref<1152x128xbf16, #tpu.memory_space<vmem>>, %arg8: memref<1x128xf32, #tpu.memory_space<vmem>>, %arg9: memref<1x128xf32, #tpu.memory_space<vmem>>, %arg10: memref<1x128xf32, #tpu.memory_space<vmem>>, %arg11: memref<56x1xf32, #tpu.memory_space<vmem>>, %arg12: memref<9x56x1xf32, #tpu.memory_space<vmem>>, %arg13: memref<1152x256xbf16, #tpu.memory_space<vmem>>, %arg14: memref<1x256xf32, #tpu.memory_space<vmem>>, %arg15: memref<1x256xf32, #tpu.memory_space<vmem>>, %arg16: memref<1x256xf32, #tpu.memory_space<vmem>>, %arg17: memref<9x256xf32, #tpu.memory_space<vmem>>, %arg18: memref<1x1xf32, #tpu.memory_space<vmem>>, %arg19: memref<56x1xf32, #tpu.memory_space<vmem>>) attributes {dimension_semantics = [], scalar_prefetch = 0 : i64, scratch_operands = 0 : i64, tpu.core_type = #tpu.core_type<tc>} {
    %c0 = arith.constant 0 : index
    %c0_0 = arith.constant 0 : index
    %0 = vector.load %arg0[%c0, %c0_0] : memref<168x128xbf16, #tpu.memory_space<vmem>>, vector<168x128xbf16>
    %c0_1 = arith.constant 0 : index
    %c0_2 = arith.constant 0 : index
    %1 = vector.load %arg1[%c0_1, %c0_2] : memref<128x128xbf16, #tpu.memory_space<vmem>>, vector<128x128xbf16>
    %cst = arith.constant dense<0.000000e+00> : vector<168x128xf32>
    %2 = tpu.matmul %0, %1, %cst {dimension_numbers = #tpu.dot_dimension_numbers<[1], [0], [0], [1], [0, 0, 1, 1], [], []>} : vector<168x128xbf16>, vector<128x128xbf16>, vector<168x128xf32> -> vector<168x128xf32>
    %c0_3 = arith.constant 0 : index
    %c0_4 = arith.constant 0 : index
    %3 = vector.load %arg2[%c0_3, %c0_4] : memref<1x128xf32, #tpu.memory_space<vmem>>, vector<1x128xf32>
    %4 = vector.broadcast %3 : vector<1x128xf32> to vector<168x128xf32>
    %5 = arith.addf %2, %4 : vector<168x128xf32>
    %c0_5 = arith.constant 0 : index
    %c0_6 = arith.constant 0 : index
    %6 = vector.load %arg5[%c0_5, %c0_6] : memref<168x1xf32, #tpu.memory_space<vmem>>, vector<168x1xf32>
    %c0_7 = arith.constant 0 : index
    %c0_8 = arith.constant 0 : index
    %7 = vector.load %arg3[%c0_7, %c0_8] : memref<1x128xf32, #tpu.memory_space<vmem>>, vector<1x128xf32>
    %c0_9 = arith.constant 0 : index
    %c0_10 = arith.constant 0 : index
    %8 = vector.load %arg4[%c0_9, %c0_10] : memref<1x128xf32, #tpu.memory_space<vmem>>, vector<1x128xf32>
    %9 = vector.broadcast %6 : vector<168x1xf32> to vector<168x128xf32>
    %10 = arith.mulf %5, %9 : vector<168x128xf32>
    %cst_11 = arith.constant dense<0.000000e+00> : vector<128xf32>
    %11 = vector.multi_reduction <add>, %10, %cst_11 [0] : vector<168x128xf32> to vector<128xf32>
    %12 = vector.shape_cast %11 : vector<128xf32> to vector<1x128xf32>
    %cst_12 = arith.constant 0.00617283955 : f32
    %13 = vector.broadcast %cst_12 : f32 to vector<1x128xf32>
    %14 = arith.mulf %12, %13 : vector<1x128xf32>
    %15 = vector.broadcast %14 : vector<1x128xf32> to vector<168x128xf32>
    %16 = arith.subf %5, %15 : vector<168x128xf32>
    %17 = arith.mulf %16, %16 : vector<168x128xf32>
    %18 = vector.broadcast %6 : vector<168x1xf32> to vector<168x128xf32>
    %19 = arith.mulf %17, %18 : vector<168x128xf32>
    %cst_13 = arith.constant dense<0.000000e+00> : vector<128xf32>
    %20 = vector.multi_reduction <add>, %19, %cst_13 [0] : vector<168x128xf32> to vector<128xf32>
    %21 = vector.shape_cast %20 : vector<128xf32> to vector<1x128xf32>
    %cst_14 = arith.constant 0.00617283955 : f32
    %22 = vector.broadcast %cst_14 : f32 to vector<1x128xf32>
    %23 = arith.mulf %21, %22 : vector<1x128xf32>
    %cst_15 = arith.constant 9.99999974E-6 : f32
    %24 = vector.broadcast %cst_15 : f32 to vector<1x128xf32>
    %25 = arith.addf %23, %24 : vector<1x128xf32>
    %26 = math.rsqrt %25 : vector<1x128xf32>
    %27 = arith.mulf %7, %26 : vector<1x128xf32>
    %28 = vector.broadcast %27 : vector<1x128xf32> to vector<168x128xf32>
    %29 = arith.mulf %16, %28 : vector<168x128xf32>
    %30 = vector.broadcast %8 : vector<1x128xf32> to vector<168x128xf32>
    %31 = arith.addf %29, %30 : vector<168x128xf32>
    %cst_16 = arith.constant 2.000000e-01 : f32
    %32 = vector.broadcast %cst_16 : f32 to vector<168x128xf32>
    %33 = arith.mulf %32, %31 : vector<168x128xf32>
    %34 = arith.maximumf %31, %33 : vector<168x128xf32>
    %35 = arith.truncf %34 : vector<168x128xf32> to vector<168x128xbf16>
    %c0_17 = arith.constant 0 : index
    %c0_18 = arith.constant 0 : index
    %36 = vector.load %arg6[%c0_17, %c0_18] : memref<504x168xbf16, #tpu.memory_space<vmem>>, vector<504x168xbf16>
    %cst_19 = arith.constant dense<0.000000e+00> : vector<504x128xf32>
    %37 = tpu.matmul %36, %35, %cst_19 {dimension_numbers = #tpu.dot_dimension_numbers<[1], [0], [0], [1], [0, 0, 1, 1], [], []>} : vector<504x168xbf16>, vector<168x128xbf16>, vector<504x128xf32> -> vector<504x128xf32>
    %38 = vector.extract_strided_slice %37 {offsets = [0, 0], sizes = [56, 128], strides = [1, 1]} : vector<504x128xf32> to vector<56x128xf32>
    %39 = vector.extract_strided_slice %37 {offsets = [56, 0], sizes = [56, 128], strides = [1, 1]} : vector<504x128xf32> to vector<56x128xf32>
    %40 = vector.extract_strided_slice %37 {offsets = [112, 0], sizes = [56, 128], strides = [1, 1]} : vector<504x128xf32> to vector<56x128xf32>
    %41 = vector.extract_strided_slice %37 {offsets = [168, 0], sizes = [56, 128], strides = [1, 1]} : vector<504x128xf32> to vector<56x128xf32>
    %42 = vector.extract_strided_slice %37 {offsets = [224, 0], sizes = [56, 128], strides = [1, 1]} : vector<504x128xf32> to vector<56x128xf32>
    %43 = vector.extract_strided_slice %37 {offsets = [280, 0], sizes = [56, 128], strides = [1, 1]} : vector<504x128xf32> to vector<56x128xf32>
    %44 = vector.extract_strided_slice %37 {offsets = [336, 0], sizes = [56, 128], strides = [1, 1]} : vector<504x128xf32> to vector<56x128xf32>
    %45 = vector.extract_strided_slice %37 {offsets = [392, 0], sizes = [56, 128], strides = [1, 1]} : vector<504x128xf32> to vector<56x128xf32>
    %46 = vector.extract_strided_slice %37 {offsets = [448, 0], sizes = [56, 128], strides = [1, 1]} : vector<504x128xf32> to vector<56x128xf32>
    %47 = tpu.concatenate %38, %39, %40, %41, %42, %43, %44, %45, %46 in 1 : vector<56x128xf32>, vector<56x128xf32>, vector<56x128xf32>, vector<56x128xf32>, vector<56x128xf32>, vector<56x128xf32>, vector<56x128xf32>, vector<56x128xf32>, vector<56x128xf32> -> vector<56x1152xf32>
    %48 = arith.truncf %47 : vector<56x1152xf32> to vector<56x1152xbf16>
    %c0_20 = arith.constant 0 : index
    %c0_21 = arith.constant 0 : index
    %49 = vector.load %arg7[%c0_20, %c0_21] : memref<1152x128xbf16, #tpu.memory_space<vmem>>, vector<1152x128xbf16>
    %cst_22 = arith.constant dense<0.000000e+00> : vector<56x128xf32>
    %50 = tpu.matmul %48, %49, %cst_22 {dimension_numbers = #tpu.dot_dimension_numbers<[1], [0], [0], [1], [0, 0, 1, 1], [], []>} : vector<56x1152xbf16>, vector<1152x128xbf16>, vector<56x128xf32> -> vector<56x128xf32>
    %c0_23 = arith.constant 0 : index
    %c0_24 = arith.constant 0 : index
    %51 = vector.load %arg8[%c0_23, %c0_24] : memref<1x128xf32, #tpu.memory_space<vmem>>, vector<1x128xf32>
    %52 = vector.broadcast %51 : vector<1x128xf32> to vector<56x128xf32>
    %53 = arith.addf %50, %52 : vector<56x128xf32>
    %c0_25 = arith.constant 0 : index
    %c0_26 = arith.constant 0 : index
    %54 = vector.load %arg11[%c0_25, %c0_26] : memref<56x1xf32, #tpu.memory_space<vmem>>, vector<56x1xf32>
    %c0_27 = arith.constant 0 : index
    %c0_28 = arith.constant 0 : index
    %55 = vector.load %arg9[%c0_27, %c0_28] : memref<1x128xf32, #tpu.memory_space<vmem>>, vector<1x128xf32>
    %c0_29 = arith.constant 0 : index
    %c0_30 = arith.constant 0 : index
    %56 = vector.load %arg10[%c0_29, %c0_30] : memref<1x128xf32, #tpu.memory_space<vmem>>, vector<1x128xf32>
    %57 = vector.broadcast %54 : vector<56x1xf32> to vector<56x128xf32>
    %58 = arith.mulf %53, %57 : vector<56x128xf32>
    %cst_31 = arith.constant dense<0.000000e+00> : vector<128xf32>
    %59 = vector.multi_reduction <add>, %58, %cst_31 [0] : vector<56x128xf32> to vector<128xf32>
    %60 = vector.shape_cast %59 : vector<128xf32> to vector<1x128xf32>
    %cst_32 = arith.constant 2.000000e-02 : f32
    %61 = vector.broadcast %cst_32 : f32 to vector<1x128xf32>
    %62 = arith.mulf %60, %61 : vector<1x128xf32>
    %63 = vector.broadcast %62 : vector<1x128xf32> to vector<56x128xf32>
    %64 = arith.subf %53, %63 : vector<56x128xf32>
    %65 = arith.mulf %64, %64 : vector<56x128xf32>
    %66 = vector.broadcast %54 : vector<56x1xf32> to vector<56x128xf32>
    %67 = arith.mulf %65, %66 : vector<56x128xf32>
    %cst_33 = arith.constant dense<0.000000e+00> : vector<128xf32>
    %68 = vector.multi_reduction <add>, %67, %cst_33 [0] : vector<56x128xf32> to vector<128xf32>
    %69 = vector.shape_cast %68 : vector<128xf32> to vector<1x128xf32>
    %cst_34 = arith.constant 2.000000e-02 : f32
    %70 = vector.broadcast %cst_34 : f32 to vector<1x128xf32>
    %71 = arith.mulf %69, %70 : vector<1x128xf32>
    %cst_35 = arith.constant 9.99999974E-6 : f32
    %72 = vector.broadcast %cst_35 : f32 to vector<1x128xf32>
    %73 = arith.addf %71, %72 : vector<1x128xf32>
    %74 = math.rsqrt %73 : vector<1x128xf32>
    %75 = arith.mulf %55, %74 : vector<1x128xf32>
    %76 = vector.broadcast %75 : vector<1x128xf32> to vector<56x128xf32>
    %77 = arith.mulf %64, %76 : vector<56x128xf32>
    %78 = vector.broadcast %56 : vector<1x128xf32> to vector<56x128xf32>
    %79 = arith.addf %77, %78 : vector<56x128xf32>
    %cst_36 = arith.constant 2.000000e-01 : f32
    %80 = vector.broadcast %cst_36 : f32 to vector<56x128xf32>
    %81 = arith.mulf %80, %79 : vector<56x128xf32>
    %82 = arith.maximumf %79, %81 : vector<56x128xf32>
    %c6_i32 = arith.constant 6 : i32
    %83 = tpu.dynamic_rotate %82 by %c6_i32 dim 0 : vector<56x128xf32>, i32 -> vector<56x128xf32>
    %c0_37 = arith.constant 0 : index
    %c0_38 = arith.constant 0 : index
    %c0_39 = arith.constant 0 : index
    %84 = vector.load %arg12[%c0_37, %c0_38, %c0_39] : memref<9x56x1xf32, #tpu.memory_space<vmem>>, vector<1x56x1xf32>
    %85 = vector.shape_cast %84 : vector<1x56x1xf32> to vector<56x1xf32>
    %86 = vector.broadcast %85 : vector<56x1xf32> to vector<56x128xf32>
    %87 = arith.mulf %83, %86 : vector<56x128xf32>
    %c5_i32 = arith.constant 5 : i32
    %88 = tpu.dynamic_rotate %82 by %c5_i32 dim 0 : vector<56x128xf32>, i32 -> vector<56x128xf32>
    %c1 = arith.constant 1 : index
    %c0_40 = arith.constant 0 : index
    %c0_41 = arith.constant 0 : index
    %89 = vector.load %arg12[%c1, %c0_40, %c0_41] : memref<9x56x1xf32, #tpu.memory_space<vmem>>, vector<1x56x1xf32>
    %90 = vector.shape_cast %89 : vector<1x56x1xf32> to vector<56x1xf32>
    %91 = vector.broadcast %90 : vector<56x1xf32> to vector<56x128xf32>
    %92 = arith.mulf %88, %91 : vector<56x128xf32>
    %c4_i32 = arith.constant 4 : i32
    %93 = tpu.dynamic_rotate %82 by %c4_i32 dim 0 : vector<56x128xf32>, i32 -> vector<56x128xf32>
    %c2 = arith.constant 2 : index
    %c0_42 = arith.constant 0 : index
    %c0_43 = arith.constant 0 : index
    %94 = vector.load %arg12[%c2, %c0_42, %c0_43] : memref<9x56x1xf32, #tpu.memory_space<vmem>>, vector<1x56x1xf32>
    %95 = vector.shape_cast %94 : vector<1x56x1xf32> to vector<56x1xf32>
    %96 = vector.broadcast %95 : vector<56x1xf32> to vector<56x128xf32>
    %97 = arith.mulf %93, %96 : vector<56x128xf32>
    %c1_i32 = arith.constant 1 : i32
    %98 = tpu.dynamic_rotate %82 by %c1_i32 dim 0 : vector<56x128xf32>, i32 -> vector<56x128xf32>
    %c3 = arith.constant 3 : index
    %c0_44 = arith.constant 0 : index
    %c0_45 = arith.constant 0 : index
    %99 = vector.load %arg12[%c3, %c0_44, %c0_45] : memref<9x56x1xf32, #tpu.memory_space<vmem>>, vector<1x56x1xf32>
    %100 = vector.shape_cast %99 : vector<1x56x1xf32> to vector<56x1xf32>
    %101 = vector.broadcast %100 : vector<56x1xf32> to vector<56x128xf32>
    %102 = arith.mulf %98, %101 : vector<56x128xf32>
    %c4 = arith.constant 4 : index
    %c0_46 = arith.constant 0 : index
    %c0_47 = arith.constant 0 : index
    %103 = vector.load %arg12[%c4, %c0_46, %c0_47] : memref<9x56x1xf32, #tpu.memory_space<vmem>>, vector<1x56x1xf32>
    %104 = vector.shape_cast %103 : vector<1x56x1xf32> to vector<56x1xf32>
    %105 = vector.broadcast %104 : vector<56x1xf32> to vector<56x128xf32>
    %106 = arith.mulf %82, %105 : vector<56x128xf32>
    %c55_i32 = arith.constant 55 : i32
    %107 = tpu.dynamic_rotate %82 by %c55_i32 dim 0 : vector<56x128xf32>, i32 -> vector<56x128xf32>
    %c5 = arith.constant 5 : index
    %c0_48 = arith.constant 0 : index
    %c0_49 = arith.constant 0 : index
    %108 = vector.load %arg12[%c5, %c0_48, %c0_49] : memref<9x56x1xf32, #tpu.memory_space<vmem>>, vector<1x56x1xf32>
    %109 = vector.shape_cast %108 : vector<1x56x1xf32> to vector<56x1xf32>
    %110 = vector.broadcast %109 : vector<56x1xf32> to vector<56x128xf32>
    %111 = arith.mulf %107, %110 : vector<56x128xf32>
    %c52_i32 = arith.constant 52 : i32
    %112 = tpu.dynamic_rotate %82 by %c52_i32 dim 0 : vector<56x128xf32>, i32 -> vector<56x128xf32>
    %c6 = arith.constant 6 : index
    %c0_50 = arith.constant 0 : index
    %c0_51 = arith.constant 0 : index
    %113 = vector.load %arg12[%c6, %c0_50, %c0_51] : memref<9x56x1xf32, #tpu.memory_space<vmem>>, vector<1x56x1xf32>
    %114 = vector.shape_cast %113 : vector<1x56x1xf32> to vector<56x1xf32>
    %115 = vector.broadcast %114 : vector<56x1xf32> to vector<56x128xf32>
    %116 = arith.mulf %112, %115 : vector<56x128xf32>
    %c51_i32 = arith.constant 51 : i32
    %117 = tpu.dynamic_rotate %82 by %c51_i32 dim 0 : vector<56x128xf32>, i32 -> vector<56x128xf32>
    %c7 = arith.constant 7 : index
    %c0_52 = arith.constant 0 : index
    %c0_53 = arith.constant 0 : index
    %118 = vector.load %arg12[%c7, %c0_52, %c0_53] : memref<9x56x1xf32, #tpu.memory_space<vmem>>, vector<1x56x1xf32>
    %119 = vector.shape_cast %118 : vector<1x56x1xf32> to vector<56x1xf32>
    %120 = vector.broadcast %119 : vector<56x1xf32> to vector<56x128xf32>
    %121 = arith.mulf %117, %120 : vector<56x128xf32>
    %c50_i32 = arith.constant 50 : i32
    %122 = tpu.dynamic_rotate %82 by %c50_i32 dim 0 : vector<56x128xf32>, i32 -> vector<56x128xf32>
    %c8 = arith.constant 8 : index
    %c0_54 = arith.constant 0 : index
    %c0_55 = arith.constant 0 : index
    %123 = vector.load %arg12[%c8, %c0_54, %c0_55] : memref<9x56x1xf32, #tpu.memory_space<vmem>>, vector<1x56x1xf32>
    %124 = vector.shape_cast %123 : vector<1x56x1xf32> to vector<56x1xf32>
    %125 = vector.broadcast %124 : vector<56x1xf32> to vector<56x128xf32>
    %126 = arith.mulf %122, %125 : vector<56x128xf32>
    %127 = tpu.concatenate %87, %92, %97, %102, %106, %111, %116, %121, %126 in 1 : vector<56x128xf32>, vector<56x128xf32>, vector<56x128xf32>, vector<56x128xf32>, vector<56x128xf32>, vector<56x128xf32>, vector<56x128xf32>, vector<56x128xf32>, vector<56x128xf32> -> vector<56x1152xf32>
    %128 = arith.truncf %127 : vector<56x1152xf32> to vector<56x1152xbf16>
    %c0_56 = arith.constant 0 : index
    %c0_57 = arith.constant 0 : index
    %129 = vector.load %arg13[%c0_56, %c0_57] : memref<1152x256xbf16, #tpu.memory_space<vmem>>, vector<1152x256xbf16>
    %cst_58 = arith.constant dense<0.000000e+00> : vector<56x256xf32>
    %130 = tpu.matmul %128, %129, %cst_58 {dimension_numbers = #tpu.dot_dimension_numbers<[1], [0], [0], [1], [0, 0, 1, 1], [], []>} : vector<56x1152xbf16>, vector<1152x256xbf16>, vector<56x256xf32> -> vector<56x256xf32>
    %c0_59 = arith.constant 0 : index
    %c0_60 = arith.constant 0 : index
    %131 = vector.load %arg14[%c0_59, %c0_60] : memref<1x256xf32, #tpu.memory_space<vmem>>, vector<1x256xf32>
    %132 = vector.broadcast %131 : vector<1x256xf32> to vector<56x256xf32>
    %133 = arith.addf %130, %132 : vector<56x256xf32>
    %c0_61 = arith.constant 0 : index
    %c0_62 = arith.constant 0 : index
    %134 = vector.load %arg11[%c0_61, %c0_62] : memref<56x1xf32, #tpu.memory_space<vmem>>, vector<56x1xf32>
    %c0_63 = arith.constant 0 : index
    %c0_64 = arith.constant 0 : index
    %135 = vector.load %arg15[%c0_63, %c0_64] : memref<1x256xf32, #tpu.memory_space<vmem>>, vector<1x256xf32>
    %c0_65 = arith.constant 0 : index
    %c0_66 = arith.constant 0 : index
    %136 = vector.load %arg16[%c0_65, %c0_66] : memref<1x256xf32, #tpu.memory_space<vmem>>, vector<1x256xf32>
    %137 = vector.broadcast %134 : vector<56x1xf32> to vector<56x256xf32>
    %138 = arith.mulf %133, %137 : vector<56x256xf32>
    %cst_67 = arith.constant dense<0.000000e+00> : vector<256xf32>
    %139 = vector.multi_reduction <add>, %138, %cst_67 [0] : vector<56x256xf32> to vector<256xf32>
    %140 = vector.shape_cast %139 : vector<256xf32> to vector<1x256xf32>
    %cst_68 = arith.constant 2.000000e-02 : f32
    %141 = vector.broadcast %cst_68 : f32 to vector<1x256xf32>
    %142 = arith.mulf %140, %141 : vector<1x256xf32>
    %143 = vector.broadcast %142 : vector<1x256xf32> to vector<56x256xf32>
    %144 = arith.subf %133, %143 : vector<56x256xf32>
    %145 = arith.mulf %144, %144 : vector<56x256xf32>
    %146 = vector.broadcast %134 : vector<56x1xf32> to vector<56x256xf32>
    %147 = arith.mulf %145, %146 : vector<56x256xf32>
    %cst_69 = arith.constant dense<0.000000e+00> : vector<256xf32>
    %148 = vector.multi_reduction <add>, %147, %cst_69 [0] : vector<56x256xf32> to vector<256xf32>
    %149 = vector.shape_cast %148 : vector<256xf32> to vector<1x256xf32>
    %cst_70 = arith.constant 2.000000e-02 : f32
    %150 = vector.broadcast %cst_70 : f32 to vector<1x256xf32>
    %151 = arith.mulf %149, %150 : vector<1x256xf32>
    %cst_71 = arith.constant 9.99999974E-6 : f32
    %152 = vector.broadcast %cst_71 : f32 to vector<1x256xf32>
    %153 = arith.addf %151, %152 : vector<1x256xf32>
    %154 = math.rsqrt %153 : vector<1x256xf32>
    %155 = arith.mulf %135, %154 : vector<1x256xf32>
    %156 = vector.broadcast %155 : vector<1x256xf32> to vector<56x256xf32>
    %157 = arith.mulf %144, %156 : vector<56x256xf32>
    %158 = vector.broadcast %136 : vector<1x256xf32> to vector<56x256xf32>
    %159 = arith.addf %157, %158 : vector<56x256xf32>
    %cst_72 = arith.constant 2.000000e-01 : f32
    %160 = vector.broadcast %cst_72 : f32 to vector<56x256xf32>
    %161 = arith.mulf %160, %159 : vector<56x256xf32>
    %162 = arith.maximumf %159, %161 : vector<56x256xf32>
    %cst_73 = arith.constant 0.000000e+00 : f32
    %163 = vector.broadcast %cst_73 : f32 to vector<56x256xf32>
    %c6_i32_74 = arith.constant 6 : i32
    %164 = tpu.dynamic_rotate %162 by %c6_i32_74 dim 0 : vector<56x256xf32>, i32 -> vector<56x256xf32>
    %c0_75 = arith.constant 0 : index
    %c0_76 = arith.constant 0 : index
    %c0_77 = arith.constant 0 : index
    %165 = vector.load %arg12[%c0_75, %c0_76, %c0_77] : memref<9x56x1xf32, #tpu.memory_space<vmem>>, vector<1x56x1xf32>
    %166 = vector.shape_cast %165 : vector<1x56x1xf32> to vector<56x1xf32>
    %167 = vector.broadcast %166 : vector<56x1xf32> to vector<56x256xf32>
    %168 = arith.mulf %164, %167 : vector<56x256xf32>
    %c0_78 = arith.constant 0 : index
    %c0_79 = arith.constant 0 : index
    %169 = vector.load %arg17[%c0_78, %c0_79] : memref<9x256xf32, #tpu.memory_space<vmem>>, vector<1x256xf32>
    %170 = vector.broadcast %169 : vector<1x256xf32> to vector<56x256xf32>
    %171 = arith.mulf %168, %170 : vector<56x256xf32>
    %172 = arith.addf %163, %171 : vector<56x256xf32>
    %c5_i32_80 = arith.constant 5 : i32
    %173 = tpu.dynamic_rotate %162 by %c5_i32_80 dim 0 : vector<56x256xf32>, i32 -> vector<56x256xf32>
    %c1_81 = arith.constant 1 : index
    %c0_82 = arith.constant 0 : index
    %c0_83 = arith.constant 0 : index
    %174 = vector.load %arg12[%c1_81, %c0_82, %c0_83] : memref<9x56x1xf32, #tpu.memory_space<vmem>>, vector<1x56x1xf32>
    %175 = vector.shape_cast %174 : vector<1x56x1xf32> to vector<56x1xf32>
    %176 = vector.broadcast %175 : vector<56x1xf32> to vector<56x256xf32>
    %177 = arith.mulf %173, %176 : vector<56x256xf32>
    %c1_84 = arith.constant 1 : index
    %c0_85 = arith.constant 0 : index
    %178 = vector.load %arg17[%c1_84, %c0_85] : memref<9x256xf32, #tpu.memory_space<vmem>>, vector<1x256xf32>
    %179 = vector.broadcast %178 : vector<1x256xf32> to vector<56x256xf32>
    %180 = arith.mulf %177, %179 : vector<56x256xf32>
    %181 = arith.addf %172, %180 : vector<56x256xf32>
    %c4_i32_86 = arith.constant 4 : i32
    %182 = tpu.dynamic_rotate %162 by %c4_i32_86 dim 0 : vector<56x256xf32>, i32 -> vector<56x256xf32>
    %c2_87 = arith.constant 2 : index
    %c0_88 = arith.constant 0 : index
    %c0_89 = arith.constant 0 : index
    %183 = vector.load %arg12[%c2_87, %c0_88, %c0_89] : memref<9x56x1xf32, #tpu.memory_space<vmem>>, vector<1x56x1xf32>
    %184 = vector.shape_cast %183 : vector<1x56x1xf32> to vector<56x1xf32>
    %185 = vector.broadcast %184 : vector<56x1xf32> to vector<56x256xf32>
    %186 = arith.mulf %182, %185 : vector<56x256xf32>
    %c2_90 = arith.constant 2 : index
    %c0_91 = arith.constant 0 : index
    %187 = vector.load %arg17[%c2_90, %c0_91] : memref<9x256xf32, #tpu.memory_space<vmem>>, vector<1x256xf32>
    %188 = vector.broadcast %187 : vector<1x256xf32> to vector<56x256xf32>
    %189 = arith.mulf %186, %188 : vector<56x256xf32>
    %190 = arith.addf %181, %189 : vector<56x256xf32>
    %c1_i32_92 = arith.constant 1 : i32
    %191 = tpu.dynamic_rotate %162 by %c1_i32_92 dim 0 : vector<56x256xf32>, i32 -> vector<56x256xf32>
    %c3_93 = arith.constant 3 : index
    %c0_94 = arith.constant 0 : index
    %c0_95 = arith.constant 0 : index
    %192 = vector.load %arg12[%c3_93, %c0_94, %c0_95] : memref<9x56x1xf32, #tpu.memory_space<vmem>>, vector<1x56x1xf32>
    %193 = vector.shape_cast %192 : vector<1x56x1xf32> to vector<56x1xf32>
    %194 = vector.broadcast %193 : vector<56x1xf32> to vector<56x256xf32>
    %195 = arith.mulf %191, %194 : vector<56x256xf32>
    %c3_96 = arith.constant 3 : index
    %c0_97 = arith.constant 0 : index
    %196 = vector.load %arg17[%c3_96, %c0_97] : memref<9x256xf32, #tpu.memory_space<vmem>>, vector<1x256xf32>
    %197 = vector.broadcast %196 : vector<1x256xf32> to vector<56x256xf32>
    %198 = arith.mulf %195, %197 : vector<56x256xf32>
    %199 = arith.addf %190, %198 : vector<56x256xf32>
    %c4_98 = arith.constant 4 : index
    %c0_99 = arith.constant 0 : index
    %c0_100 = arith.constant 0 : index
    %200 = vector.load %arg12[%c4_98, %c0_99, %c0_100] : memref<9x56x1xf32, #tpu.memory_space<vmem>>, vector<1x56x1xf32>
    %201 = vector.shape_cast %200 : vector<1x56x1xf32> to vector<56x1xf32>
    %202 = vector.broadcast %201 : vector<56x1xf32> to vector<56x256xf32>
    %203 = arith.mulf %162, %202 : vector<56x256xf32>
    %c4_101 = arith.constant 4 : index
    %c0_102 = arith.constant 0 : index
    %204 = vector.load %arg17[%c4_101, %c0_102] : memref<9x256xf32, #tpu.memory_space<vmem>>, vector<1x256xf32>
    %205 = vector.broadcast %204 : vector<1x256xf32> to vector<56x256xf32>
    %206 = arith.mulf %203, %205 : vector<56x256xf32>
    %207 = arith.addf %199, %206 : vector<56x256xf32>
    %c55_i32_103 = arith.constant 55 : i32
    %208 = tpu.dynamic_rotate %162 by %c55_i32_103 dim 0 : vector<56x256xf32>, i32 -> vector<56x256xf32>
    %c5_104 = arith.constant 5 : index
    %c0_105 = arith.constant 0 : index
    %c0_106 = arith.constant 0 : index
    %209 = vector.load %arg12[%c5_104, %c0_105, %c0_106] : memref<9x56x1xf32, #tpu.memory_space<vmem>>, vector<1x56x1xf32>
    %210 = vector.shape_cast %209 : vector<1x56x1xf32> to vector<56x1xf32>
    %211 = vector.broadcast %210 : vector<56x1xf32> to vector<56x256xf32>
    %212 = arith.mulf %208, %211 : vector<56x256xf32>
    %c5_107 = arith.constant 5 : index
    %c0_108 = arith.constant 0 : index
    %213 = vector.load %arg17[%c5_107, %c0_108] : memref<9x256xf32, #tpu.memory_space<vmem>>, vector<1x256xf32>
    %214 = vector.broadcast %213 : vector<1x256xf32> to vector<56x256xf32>
    %215 = arith.mulf %212, %214 : vector<56x256xf32>
    %216 = arith.addf %207, %215 : vector<56x256xf32>
    %c52_i32_109 = arith.constant 52 : i32
    %217 = tpu.dynamic_rotate %162 by %c52_i32_109 dim 0 : vector<56x256xf32>, i32 -> vector<56x256xf32>
    %c6_110 = arith.constant 6 : index
    %c0_111 = arith.constant 0 : index
    %c0_112 = arith.constant 0 : index
    %218 = vector.load %arg12[%c6_110, %c0_111, %c0_112] : memref<9x56x1xf32, #tpu.memory_space<vmem>>, vector<1x56x1xf32>
    %219 = vector.shape_cast %218 : vector<1x56x1xf32> to vector<56x1xf32>
    %220 = vector.broadcast %219 : vector<56x1xf32> to vector<56x256xf32>
    %221 = arith.mulf %217, %220 : vector<56x256xf32>
    %c6_113 = arith.constant 6 : index
    %c0_114 = arith.constant 0 : index
    %222 = vector.load %arg17[%c6_113, %c0_114] : memref<9x256xf32, #tpu.memory_space<vmem>>, vector<1x256xf32>
    %223 = vector.broadcast %222 : vector<1x256xf32> to vector<56x256xf32>
    %224 = arith.mulf %221, %223 : vector<56x256xf32>
    %225 = arith.addf %216, %224 : vector<56x256xf32>
    %c51_i32_115 = arith.constant 51 : i32
    %226 = tpu.dynamic_rotate %162 by %c51_i32_115 dim 0 : vector<56x256xf32>, i32 -> vector<56x256xf32>
    %c7_116 = arith.constant 7 : index
    %c0_117 = arith.constant 0 : index
    %c0_118 = arith.constant 0 : index
    %227 = vector.load %arg12[%c7_116, %c0_117, %c0_118] : memref<9x56x1xf32, #tpu.memory_space<vmem>>, vector<1x56x1xf32>
    %228 = vector.shape_cast %227 : vector<1x56x1xf32> to vector<56x1xf32>
    %229 = vector.broadcast %228 : vector<56x1xf32> to vector<56x256xf32>
    %230 = arith.mulf %226, %229 : vector<56x256xf32>
    %c7_119 = arith.constant 7 : index
    %c0_120 = arith.constant 0 : index
    %231 = vector.load %arg17[%c7_119, %c0_120] : memref<9x256xf32, #tpu.memory_space<vmem>>, vector<1x256xf32>
    %232 = vector.broadcast %231 : vector<1x256xf32> to vector<56x256xf32>
    %233 = arith.mulf %230, %232 : vector<56x256xf32>
    %234 = arith.addf %225, %233 : vector<56x256xf32>
    %c50_i32_121 = arith.constant 50 : i32
    %235 = tpu.dynamic_rotate %162 by %c50_i32_121 dim 0 : vector<56x256xf32>, i32 -> vector<56x256xf32>
    %c8_122 = arith.constant 8 : index
    %c0_123 = arith.constant 0 : index
    %c0_124 = arith.constant 0 : index
    %236 = vector.load %arg12[%c8_122, %c0_123, %c0_124] : memref<9x56x1xf32, #tpu.memory_space<vmem>>, vector<1x56x1xf32>
    %237 = vector.shape_cast %236 : vector<1x56x1xf32> to vector<56x1xf32>
    %238 = vector.broadcast %237 : vector<56x1xf32> to vector<56x256xf32>
    %239 = arith.mulf %235, %238 : vector<56x256xf32>
    %c8_125 = arith.constant 8 : index
    %c0_126 = arith.constant 0 : index
    %240 = vector.load %arg17[%c8_125, %c0_126] : memref<9x256xf32, #tpu.memory_space<vmem>>, vector<1x256xf32>
    %241 = vector.broadcast %240 : vector<1x256xf32> to vector<56x256xf32>
    %242 = arith.mulf %239, %241 : vector<56x256xf32>
    %243 = arith.addf %234, %242 : vector<56x256xf32>
    %cst_127 = arith.constant dense<0.000000e+00> : vector<56xf32>
    %244 = vector.multi_reduction <add>, %243, %cst_127 [1] : vector<56x256xf32> to vector<56xf32>
    %245 = vector.shape_cast %244 : vector<56xf32> to vector<56x1xf32>
    %c0_128 = arith.constant 0 : index
    %c0_129 = arith.constant 0 : index
    %246 = vector.load %arg18[%c0_128, %c0_129] : memref<1x1xf32, #tpu.memory_space<vmem>>, vector<1x1xf32>
    %247 = vector.broadcast %246 : vector<1x1xf32> to vector<56x1xf32>
    %248 = arith.addf %245, %247 : vector<56x1xf32>
    %cst_130 = arith.constant 0.000000e+00 : f32
    %249 = vector.broadcast %cst_130 : f32 to vector<56x1xf32>
    %250 = arith.subf %249, %248 : vector<56x1xf32>
    %251 = math.exp %250 : vector<56x1xf32>
    %cst_131 = arith.constant 1.000000e+00 : f32
    %252 = vector.broadcast %cst_131 : f32 to vector<56x1xf32>
    %253 = arith.addf %252, %251 : vector<56x1xf32>
    %cst_132 = arith.constant 1.000000e+00 : f32
    %254 = vector.broadcast %cst_132 : f32 to vector<56x1xf32>
    %255 = arith.divf %254, %253 : vector<56x1xf32>
    %c0_133 = arith.constant 0 : index
    %c0_134 = arith.constant 0 : index
    %256 = vector.load %arg19[%c0_133, %c0_134] : memref<56x1xf32, #tpu.memory_space<vmem>>, vector<56x1xf32>
    tpu.vector_store %arg19[%c0_133, %c0_134], %255 {strides = array<i32>} : memref<56x1xf32, #tpu.memory_space<vmem>>, vector<56x1xf32>,
    return
  }
}

</mosaic_0001>

<bundles_post_ra>
// kernel: squeeze.0
= control target key start
LH: loop header
LB: loop body
LE: loop exit
PB: predicated region body
PF: predicated region fallthrough
CT: control target
= control target key end

     0   :  { %s208_s0 = inlined_call_operand.vmem [shape: f32[50], index: 0, kind: input, shape index: {}]   ;;  %s209_s1 = inlined_call_operand.hbm [shape: f32[2,1,5,5], index: 1, kind: output, shape index: {}]  }
   0x1   :  { %v5_v0 = vld [vmem:[%s208_s0] sm:$0x1] }
   0x2   :  { %6 = vst [vmem:[#allocation3] sm:$0x1] %v5_v0 }
   0x3   :  { %2 = vsyncpa [#allocation1], 0  ;;  %s172_s0 = smov 113   ;;  %s173_s8 = smov 123   ;;  %vm8_vm0 = vcmask 39936  }
   0x4   :  { %s174_s9 = smov 103   ;;  %s175_s10 = smov 108  }
   0x5   :  { %s176_s11 = smov 118   ;;  %s177_s12 = smov 98  }
   0x6   :  { %s178_s13 = smov 88   ;;  %s179_s14 = smov 93  }
   0x7   :  { %s180_s15 = smov 83   ;;  %s181_s16 = smov [#allocation0]  }
   0x8   :  { %s127_s17 = sshll.u32 %s181_s16, 4  ;;  %s129_s1 = sshll.u32 %s209_s1, 4  ;;  %s128_s17 = int_to_ptr.vmem [resolvable:$true] %s127_s17  ;;  %s130_s1 = int_to_ptr.hbm [resolvable:$true] %s129_s1 }
   0x9   :  { %v22_v1 = vld [vmem:[#allocation3] sm:$0x1]  }
   0xa   :  { %v10_v2 = vld [vmem:[#allocation3] sm:$0x1]   ;;  %23 = vrot.lane.b32.xlu1 %v22_v1, %s172_s0 }
   0xb   :  { %11 = vrot.lane.b32.xlu0 %v10_v2, %s173_s8  ;;  %v34_v3 = vld [vmem:[#allocation3] sm:$0x1]  }
   0xc   :  { %35 = vrot.lane.b32.xlu2 %v34_v3, %s174_s9  ;;  %v28_v4 = vld [vmem:[#allocation3] sm:$0x1]  }
   0xd   :  { %v16_v5 = vld [vmem:[#allocation3] sm:$0x1]  }
   0xe   :  { %v40_v6 = vld [vmem:[#allocation3] sm:$0x1]  }
   0xf   :  { %v52_v7 = vld [vmem:[#allocation3] sm:$0x1]  }
  0x10   :  { %v46_v8 = vld [vmem:[#allocation3] sm:$0x1]  }
  0x11   :  { %v58_v9 = vld [vmem:[#allocation3] sm:$0x1]  }
  0x12   :  { %29 = vrot.lane.b32.xlu1 %v28_v4, %s175_s10  ;;  %v7_v13 = vld [vmem:[#allocation3] sm:$0x1]  }
  0x13   :  { %17 = vrot.lane.b32.xlu0 %v16_v5, %s176_s11  ;;  %9 = vst.msk [vmem:[#allocation2] sm:$0x1] %vm8_vm0, %v7_v13  }
  0x14   :  { %41 = vrot.lane.b32.xlu2 %v40_v6, %s177_s12 }
  0x1a   :  { %53 = vrot.lane.b32.xlu1 %v52_v7, %s178_s13  ;;  %v66_v16 = vld [vmem:[#allocation2] sm:$0x1] }
  0x1b   :  { %47 = vrot.lane.b32.xlu0 %v46_v8, %s179_s14  ;;  %69 = vst [vmem:[#allocation0] sm:$0x1] %v66_v16 }
  0x1c   :  { %59 = vrot.lane.b32.xlu2 %v58_v9, %s180_s15 }
  0x66   :  { %v36_v10 = vpop.permute.xlu2 %35  }
  0x67   :  { %39 = vst.msk [vmem:[#allocation2 + $0x28] sm:$0x1] %vm8_vm0, %v36_v10  }
  0x6e   :  { %v95_v11 = vld [vmem:[#allocation2 + $0x28] sm:$0x1]  ;;  %v42_v12 = vpop.permute.xlu2 %41  }
  0x6f   :  { %99 = vst [vmem:[#allocation0 + $0x5] sm:$0x1] %v95_v11 }
  0x70   :  { %45 = vst.msk [vmem:[#allocation2 + $0x30] sm:$0x1] %vm8_vm0, %v42_v12  }
  0x76   :  { %v60_v14 = vpop.permute.xlu2 %59  }
  0x77   :  { %v101_v15 = vld [vmem:[#allocation2 + $0x30] sm:$0x1]  ;;  %63 = vst.msk [vmem:[#allocation2 + $0x48] sm:$0x1] %vm8_vm0, %v60_v14  }
  0x78   :  { %105 = vst [vmem:[#allocation0 + $0x6] sm:$0x1] %v101_v15 }
  0x7c   :  { %v24_v17 = vpop.permute.xlu1 %23  }
  0x7d   :  { %v12_v18 = vpop.permute.xlu0 %11   ;;  %27 = vst.msk [vmem:[#allocation2 + $0x18] sm:$0x1] %vm8_vm0, %v24_v17  }
  0x7e   :  { %15 = vst.msk [vmem:[#allocation2 + $0x8] sm:$0x1] %vm8_vm0, %v12_v18   ;;  %v119_v19 = vld [vmem:[#allocation2 + $0x48] sm:$0x1] }
  0x7f   :  { %123 = vst [vmem:[#allocation0 + $0x9] sm:$0x1] %v119_v19 }
  0x84   :  { %v83_v20 = vld [vmem:[#allocation2 + $0x18] sm:$0x1]  ;;  %v30_v21 = vpop.permute.xlu1 %29  }
  0x85   :  { %v18_v22 = vpop.permute.xlu0 %17   ;;  %87 = vst [vmem:[#allocation0 + $0x3] sm:$0x1] %v83_v20  ;;  %v71_v23 = vld [vmem:[#allocation2 + $0x8] sm:$0x1] }
  0x86   :  { %75 = vst [vmem:[#allocation0 + $0x1] sm:$0x1] %v71_v23 }
  0x87   :  { %33 = vst.msk [vmem:[#allocation2 + $0x20] sm:$0x1] %vm8_vm0, %v30_v21  }
  0x88   :  { %21 = vst.msk [vmem:[#allocation2 + $0x10] sm:$0x1] %vm8_vm0, %v18_v22  }
  0x8c   :  { %v54_v24 = vpop.permute.xlu1 %53  }
  0x8d   :  { %v48_v25 = vpop.permute.xlu0 %47   ;;  %57 = vst.msk [vmem:[#allocation2 + $0x40] sm:$0x1] %vm8_vm0, %v54_v24  }
  0x8e   :  { %v89_v26 = vld [vmem:[#allocation2 + $0x20] sm:$0x1]  ;;  %51 = vst.msk [vmem:[#allocation2 + $0x38] sm:$0x1] %vm8_vm0, %v48_v25  }
  0x8f   :  { %93 = vst [vmem:[#allocation0 + $0x4] sm:$0x1] %v89_v26  ;;  %v77_v27 = vld [vmem:[#allocation2 + $0x10] sm:$0x1] }
  0x90   :  { %81 = vst [vmem:[#allocation0 + $0x2] sm:$0x1] %v77_v27 }
  0x94   :  { %v113_v28 = vld [vmem:[#allocation2 + $0x40] sm:$0x1] }
  0x95   :  { %117 = vst [vmem:[#allocation0 + $0x8] sm:$0x1] %v113_v28  ;;  %v107_v29 = vld [vmem:[#allocation2 + $0x38] sm:$0x1] }
  0x96   :  { %111 = vst [vmem:[#allocation0 + $0x7] sm:$0x1] %v107_v29 }
  0x97   :  { %132 = dma.vmem_to_hbm [thread:$0]  %s128_s17, 160, %s130_s1, [#allocation1]  }
  0x98   :  { %170 = dma.done.wait [#allocation1], 160  }
  0x99   :  { %171 = vsyncadd [#allocation1], 4294967136 }
  0x9a   :  { %135 = vsyncpa [#allocation1], 1 }

// kernel: forward.1
= control target key start
LH: loop header
LB: loop body
LE: loop exit
PB: predicated region body
PF: predicated region fallthrough
CT: control target
= control target key end

     0   :  { %v7078_v0 = vmov 0   ;;  %vm1105_vm3 = vcmask 1043456   ;;  %vm1008_vm4 = vcmask 326656   ;;  %s11725_s5 = inlined_call_operand.vmem [shape: f32[168,1], index: 5, kind: input, shape index: {}]   ;;  %s11726_s1 = inlined_call_operand.vmem [shape: bf16[128,128], index: 1, kind: input, shape index: {}]   ;;  %s11727_s0 = inlined_call_operand.vmem [shape: bf16[168,128], index: 0, kind: input, shape index: {}]   ;;  %s11728_s2 = inlined_call_operand.vmem [shape: f32[1,128], index: 2, kind: input, shape index: {}]   ;;  %s11729_s11 = inlined_call_operand.vmem [shape: f32[56,1], index: 11, kind: input, shape index: {}]   ;;  %s11730_s12 = inlined_call_operand.vmem [shape: f32[9,56,1], index: 12, kind: input, shape index: {}]   ;;  %s11731_s4 = inlined_call_operand.vmem [shape: f32[1,128], index: 4, kind: input, shape index: {}]   ;;  %s11732_s3 = inlined_call_operand.vmem [shape: f32[1,128], index: 3, kind: input, shape index: {}]   ;;  %s11733_s6 = inlined_call_operand.vmem [shape: bf16[504,168], index: 6, kind: input, shape index: {}]   ;;  %s11734_s7 = inlined_call_operand.vmem [shape: bf16[1152,128], index: 7, kind: input, shape index: {}]   ;;  %s11735_s8 = inlined_call_operand.vmem [shape: f32[1,128], index: 8, kind: input, shape index: {}]   ;;  %s11736_s13 = inlined_call_operand.vmem [shape: bf16[1152,256], index: 13, kind: input, shape index: {}]   ;;  %s11737_s10 = inlined_call_operand.vmem [shape: f32[1,128], index: 10, kind: input, shape index: {}]   ;;  %s11738_s9 = inlined_call_operand.vmem [shape: f32[1,128], index: 9, kind: input, shape index: {}]   ;;  %s11739_s14 = inlined_call_operand.vmem [shape: f32[1,256], index: 14, kind: input, shape index: {}]   ;;  %s11740_s16 = inlined_call_operand.vmem [shape: f32[1,256], index: 16, kind: input, shape index: {}]   ;;  %s11741_s15 = inlined_call_operand.vmem [shape: f32[1,256], index: 15, kind: input, shape index: {}]   ;;  %s11742_s17 = inlined_call_operand.vmem [shape: f32[9,256], index: 17, kind: input, shape index: {}]   ;;  %s11743_s18 = inlined_call_operand.<no memory space> [shape: f32[1,1], index: 18, kind: input, shape index: {}]   ;;  %s11744_s19 = inlined_call_operand.vmem [shape: f32[56,1], index: 19, kind: output, shape index: {}]  }
   0x1   :  { %11970 = sst [smem:[#allocation80_spill]] %s11725_s5  ;;  %7036 = vset.pattern.permute.xlu2 %v7078_v0  ;;  %7035 = vset.pattern.permute.xlu1 %v7078_v0  ;;  %v2315_v32 = vld [vmem:[%s11729_s11 + $0x10] sm:$0xff]  ;;  %v2314_v33 = vld [vmem:[%s11729_s11 + $0x8] sm:$0xff]  ;;  %v2313_v34 = vld [vmem:[%s11729_s11] sm:$0xff] }
   0x2   :  { %11971 = sst [smem:[#allocation81_spill]] %s11726_s1  ;;  %7034 = vset.pattern.permute.xlu0 %v7078_v0  ;;  %v2318_v35 = vld [vmem:[%s11729_s11 + $0x28] sm:$0xff]  ;;  %v2317_v36 = vld [vmem:[%s11729_s11 + $0x20] sm:$0xff]  ;;  %v2316_v37 = vld [vmem:[%s11729_s11 + $0x18] sm:$0xff] }
   0x3   :  { %11972 = sst [smem:[#allocation82_spill]] %s11727_s0  ;;  %v2475_v39 = vld [vmem:[%s11730_s12 + $0x8] sm:$0xff]  ;;  %v2474_v40 = vld [vmem:[%s11730_s12] sm:$0xff]  ;;  %v2319_v41 = vld [vmem:[%s11729_s11 + $0x30] sm:$0xff] }
   0x4   :  { %11973 = sst [smem:[#allocation83_spill]] %s11728_s2  ;;  %v2478_v42 = vld [vmem:[%s11730_s12 + $0x20] sm:$0xff]  ;;  %v2477_v43 = vld [vmem:[%s11730_s12 + $0x18] sm:$0xff]  ;;  %v2476_v44 = vld [vmem:[%s11730_s12 + $0x10] sm:$0xff] }
   0x5   :  { %s11974_s20 = sld [smem:[#allocation80_spill]]  ;;  %v6082_v46 = vld [vmem:[%s11730_s12 + $0x40] sm:$0xff]  ;;  %v6081_v47 = vld [vmem:[%s11730_s12 + $0x38] sm:$0xff]  ;;  %v2479_v48 = vld [vmem:[%s11730_s12 + $0x28] sm:$0xff] }
   0x6   :  { %s11975_s25 = sld [smem:[#allocation81_spill]]  ;;  %v6084_v49 = vld [vmem:[%s11730_s12 + $0x50] sm:$0xff]  ;;  %v6083_v50 = vld [vmem:[%s11730_s12 + $0x48] sm:$0xff]  ;;  %v6085_v53 = vld [vmem:[%s11730_s12 + $0x58] sm:$0xff] }
   0x7   :  { %s11976_s26 = sld [smem:[#allocation82_spill]]  ;;  %v2480_v51 = vld [vmem:[%s11730_s12 + $0x30] sm:$0xff]  ;;  %v6089_v54 = vld [vmem:[%s11730_s12 + $0x78] sm:$0xff]  ;;  %v6091_v56 = vld [vmem:[%s11730_s12 + $0x88] sm:$0xff] }
   0x8   :  { %v6088_v55 = vld [vmem:[%s11730_s12 + $0x70] sm:$0xff]  ;;  %v6090_v57 = vld [vmem:[%s11730_s12 + $0x80] sm:$0xff]  ;;  %v6093_v60 = vld [vmem:[%s11730_s12 + $0x98] sm:$0xff]  ;;  %s11977_s29 = sld [smem:[#allocation83_spill]] }
   0x9   :  { %v6086_v58 = vld [vmem:[%s11730_s12 + $0x60] sm:$0xff]  ;;  %v6092_v61 = vld [vmem:[%s11730_s12 + $0x90] sm:$0xff]  ;;  %v6087_v62 = vld [vmem:[%s11730_s12 + $0x68] sm:$0xff] }
   0xa   :  { %v6094_v63 = vld [vmem:[%s11730_s12 + $0xa0] sm:$0xff]  ;;  %v6096_v0 = vld [vmem:[%s11730_s12 + $0xb0] sm:$0xff] }
   0xb   :  { %v285_v1 = vld [vmem:[%s11974_s20 + $0x20] sm:$0xff]  ;;  %v283_v2 = vld [vmem:[%s11974_s20 + $0x10] sm:$0xff]  ;;  %v286_v6 = vld [vmem:[%s11974_s20 + $0x28] sm:$0xff] }
   0xc   :  { %v281_v3 = vld [vmem:[%s11974_s20] sm:$0xff]  ;;  %326 = vperm.xlu2 %7036, %v285_v1   ;;  %v6738_v4 = vld [vmem:[%s11975_s25 + $0x38] sm:$0xff]  ;;  %316 = vperm.xlu1 %7035, %v283_v2   ;;  %v6737_v5 = vld [vmem:[%s11975_s25 + $0x30] sm:$0xff] }
   0xd   :  { %306 = vperm.xlu0 %7034, %v281_v3   ;;  %218 = vmatpush.bf16.msra.mxu0 %v6738_v4  ;;  %v284_v7 = vld [vmem:[%s11974_s20 + $0x18] sm:$0xff]  ;;  %v282_v8 = vld [vmem:[%s11974_s20 + $0x8] sm:$0xff]  ;;  %v6735_v10 = vld [vmem:[%s11975_s25 + $0x20] sm:$0xff] }
   0xe   :  { %v6736_v9 = vld [vmem:[%s11975_s25 + $0x28] sm:$0xff]  ;;  %v289_v11 = vld [vmem:[%s11974_s20 + $0x40] sm:$0xff]  ;;  %v288_v12 = vld [vmem:[%s11974_s20 + $0x38] sm:$0xff] }
   0xf   :  { %v287_v13 = vld [vmem:[%s11974_s20 + $0x30] sm:$0xff]  ;;  %v6734_v14 = vld [vmem:[%s11975_s25 + $0x18] sm:$0xff]  ;;  %v290_v18 = vld [vmem:[%s11974_s20 + $0x48] sm:$0xff] }
  0x10   :  { %v6733_v15 = vld [vmem:[%s11975_s25 + $0x10] sm:$0xff]  ;;  %v292_v16 = vld [vmem:[%s11974_s20 + $0x58] sm:$0xff]  ;;  %v6732_v19 = vld [vmem:[%s11975_s25 + $0x8] sm:$0xff] }
  0x11   :  { %219 = vmatpush.bf16.msra.mxu0 %v6737_v5  ;;  %v291_v17 = vld [vmem:[%s11974_s20 + $0x50] sm:$0xff]  ;;  %v6731_v20 = vld [vmem:[%s11975_s25] sm:$0xff]  ;;  %v294_v22 = vld [vmem:[%s11974_s20 + $0x68] sm:$0xff] }
  0x12   :  { %v295_v21 = vld [vmem:[%s11974_s20 + $0x70] sm:$0xff]  ;;  %v293_v23 = vld [vmem:[%s11974_s20 + $0x60] sm:$0xff]  ;;  %v298_v25 = vld [vmem:[%s11974_s20 + $0x88] sm:$0xff] }
  0x13   :  { %v6721_v24 = vld [vmem:[%s11976_s26] sm:$0xff]  ;;  %v296_v27 = vld [vmem:[%s11974_s20 + $0x78] sm:$0xff]  ;;  %v299_v30 = vld [vmem:[%s11974_s20 + $0x90] sm:$0xff] }
  0x14   :  { %331 = vperm.xlu2 %7036, %v286_v6   ;;  %321 = vperm.xlu1 %7035, %v284_v7   ;;  %v297_v26 = vld [vmem:[%s11974_s20 + $0x80] sm:$0xff]  ;;  %v300_v29 = vld [vmem:[%s11974_s20 + $0x98] sm:$0xff]  ;;  %v6722_v31 = vld [vmem:[%s11976_s26 + $0x8] sm:$0xff] }
  0x15   :  { %311 = vperm.xlu0 %7034, %v282_v8   ;;  %220 = vmatpush.bf16.msra.mxu0 %v6736_v9  ;;  %v301_v28 = vld [vmem:[%s11974_s20 + $0xa0] sm:$0xff]  ;;  %v6723_v38 = vld [vmem:[%s11976_s26 + $0x10] sm:$0xff]  ;;  %v6724_v45 = vld [vmem:[%s11976_s26 + $0x18] sm:$0xff] }
  0x16   :  { %v6725_v52 = vld [vmem:[%s11976_s26 + $0x20] sm:$0xff]  ;;  %v6726_v59 = vld [vmem:[%s11976_s26 + $0x28] sm:$0xff]  ;;  %v6727_v2 = vld [vmem:[%s11976_s26 + $0x30] sm:$0xff] }
  0x17   :  { %v6095_v1 = vld [vmem:[%s11730_s12 + $0xa8] sm:$0xff]  ;;  %v6102_v3 = vld [vmem:[%s11730_s12 + $0xe0] sm:$0xff]  ;;  %v6097_v5 = vld [vmem:[%s11730_s12 + $0xb8] sm:$0xff] }
  0x18   :  { %v6098_v4 = vld [vmem:[%s11730_s12 + $0xc0] sm:$0xff]  ;;  %v6109_v7 = vld [vmem:[%s11730_s12 + $0x118] sm:$0xff]  ;;  %v6103_v8 = vld [vmem:[%s11730_s12 + $0xe8] sm:$0xff] }
  0x19   :  { %221 = vmatpush.bf16.msra.mxu0 %v6735_v10  ;;  %v6110_v6 = vld [vmem:[%s11730_s12 + $0x120] sm:$0xff]  ;;  %v6728_v9 = vld [vmem:[%s11976_s26 + $0x38] sm:$0xff]  ;;  %v6104_v10 = vld [vmem:[%s11730_s12 + $0xf0] sm:$0xff] }
  0x1c   :  { %346 = vperm.xlu2 %7036, %v289_v11   ;;  %341 = vperm.xlu1 %7035, %v288_v12   ;;  %v6100_v11 = vld [vmem:[%s11730_s12 + $0xd0] sm:$0xff]  ;;  %v6099_v12 = vld [vmem:[%s11730_s12 + $0xc8] sm:$0xff] }
  0x1d   :  { %336 = vperm.xlu0 %7034, %v287_v13   ;;  %222 = vmatpush.bf16.msra.mxu0 %v6734_v14  ;;  %v6112_v13 = vld [vmem:[%s11730_s12 + $0x130] sm:$0xff]  ;;  %v6111_v14 = vld [vmem:[%s11730_s12 + $0x128] sm:$0xff] }
  0x21   :  { %223 = vmatpush.bf16.msra.mxu0 %v6733_v15  ;;  %v6105_v15 = vld [vmem:[%s11730_s12 + $0xf8] sm:$0xff] }
  0x24   :  { %361 = vperm.xlu2 %7036, %v292_v16   ;;  %356 = vperm.xlu1 %7035, %v291_v17   ;;  %v6729_v16 = vld [vmem:[%s11976_s26 + $0x40] sm:$0xff] }
  0x25   :  { %351 = vperm.xlu0 %7034, %v290_v18   ;;  %224 = vmatpush.bf16.msra.mxu0 %v6732_v19  ;;  %v6107_v19 = vld [vmem:[%s11730_s12 + $0x108] sm:$0xff] }
  0x29   :  { %225 = vmatpush.bf16.msra.mxu0 %v6731_v20  ;;  %v6106_v20 = vld [vmem:[%s11730_s12 + $0x100] sm:$0xff] }
  0x2c   :  { %376 = vperm.xlu2 %7036, %v295_v21   ;;  %371 = vperm.xlu1 %7035, %v294_v22   ;;  %v6101_v21 = vld [vmem:[%s11730_s12 + $0xd8] sm:$0xff] }
  0x2d   :  { %366 = vperm.xlu0 %7034, %v293_v23   ;;  %226 = vmatmul.bf16.vlgmr.msra.gmra.mxu0 %v6721_v24  ;;  %v7433_v23 = vld [vmem:[%s11977_s29] ss:$0 sm:$0xff] }
  0x34   :  { %391 = vperm.xlu2 %7036, %v298_v25   ;;  %386 = vperm.xlu1 %7035, %v297_v26  }
  0x35   :  { %381 = vperm.xlu0 %7034, %v296_v27   ;;  %v6123_v27 = vld [vmem:[%s11730_s12 + $0x188] sm:$0xff] }
  0x3c   :  { %406 = vperm.xlu2 %7036, %v301_v28   ;;  %401 = vperm.xlu1 %7035, %v300_v29   ;;  %v6114_v29 = vld [vmem:[%s11730_s12 + $0x140] sm:$0xff] }
  0x3d   :  { %396 = vperm.xlu0 %7034, %v299_v30   ;;  %231 = vmatmul.bf16.gmra.mxu0 %v6722_v31  ;;  %v6113_v30 = vld [vmem:[%s11730_s12 + $0x138] sm:$0xff]  ;;  %v6730_v31 = vld [vmem:[%s11976_s26 + $0x48] sm:$0xff] }
  0x44   :  { %2334 = vperm.xlu2 %7036, %v2315_v32   ;;  %2329 = vperm.xlu1 %7035, %v2314_v33  }
  0x45   :  { %2324 = vperm.xlu0 %7034, %v2313_v34  }
  0x4c   :  { %2349 = vperm.xlu2 %7036, %v2318_v35   ;;  %2344 = vperm.xlu1 %7035, %v2317_v36  }
  0x4d   :  { %2339 = vperm.xlu0 %7034, %v2316_v37   ;;  %236 = vmatmul.bf16.gmra.mxu0 %v6723_v38 }
  0x54   :  { %2488 = vperm.xlu2 %7036, %v2475_v39   ;;  %2483 = vperm.xlu1 %7035, %v2474_v40   ;;  %v6115_v39 = vld [vmem:[%s11730_s12 + $0x148] sm:$0xff]  ;;  %v6108_v40 = vld [vmem:[%s11730_s12 + $0x110] sm:$0xff] }
  0x55   :  { %2354 = vperm.xlu0 %7034, %v2319_v41   ;;  %v6124_v41 = vld [vmem:[%s11730_s12 + $0x190] sm:$0xff] }
  0x5c   :  { %2503 = vperm.xlu2 %7036, %v2478_v42   ;;  %2498 = vperm.xlu1 %7035, %v2477_v43   ;;  %v85_v43 = vld [vmem:[%s11976_s26 + $0x50] sm:$0xf] }
  0x5d   :  { %2493 = vperm.xlu0 %7034, %v2476_v44   ;;  %241 = vmatmul.bf16.gmra.mxu0 %v6724_v45  ;;  %v147_v45 = vunpack.c.l.b16 %v85_v43 }
  0x64   :  { %2553 = vperm.xlu2 %7036, %v6082_v46   ;;  %2548 = vperm.xlu1 %7035, %v6081_v47   ;;  %v6116_v47 = vld [vmem:[%s11730_s12 + $0x150] sm:$0xff] }
  0x65   :  { %2508 = vperm.xlu0 %7034, %v2479_v48  }
  0x6c   :  { %2563 = vperm.xlu2 %7036, %v6084_v49   ;;  %2558 = vperm.xlu1 %7035, %v6083_v50   ;;  %v6126_v49 = vld [vmem:[%s11730_s12 + $0x1a0] sm:$0xff]  ;;  %v6125_v50 = vld [vmem:[%s11730_s12 + $0x198] sm:$0xff] }
  0x6d   :  { %2513 = vperm.xlu0 %7034, %v2480_v51   ;;  %246 = vmatmul.bf16.gmra.mxu0 %v6725_v52  ;;  %v158_v51 = vpack.c.b16 %v147_v45, %v147_v45 }
  0x74   :  { %2568 = vperm.xlu2 %7036, %v6085_v53   ;;  %2618 = vperm.xlu1 %7035, %v6089_v54   ;;  %v7497_v54 = vpop.permute.xlu2 %326 }
  0x75   :  { %2613 = vperm.xlu0 %7034, %v6088_v55  }
  0x7c   :  { %2628 = vperm.xlu2 %7036, %v6091_v56   ;;  %2623 = vperm.xlu1 %7035, %v6090_v57  }
  0x7d   :  { %2573 = vperm.xlu0 %7034, %v6086_v58   ;;  %251 = vmatmul.bf16.gmra.mxu0 %v6726_v59  ;;  %v6131_v58 = vld [vmem:[%s11730_s12 + $0x1c8] sm:$0xff]  ;;  %v6130_v59 = vld [vmem:[%s11730_s12 + $0x1c0] sm:$0xff] }
  0x7e   :  { %v7462_v35 = vpop.permute.xlu1 %316 }
  0x7f   :  { %v7419_v18 = vpop.permute.xlu0 %306 }
  0x84   :  { %2638 = vperm.xlu2 %7036, %v6093_v60   ;;  %2633 = vperm.xlu1 %7035, %v6092_v61   ;;  %v6117_v60 = vld [vmem:[%s11730_s12 + $0x158] sm:$0xff] }
  0x85   :  { %2578 = vperm.xlu0 %7034, %v6087_v62  }
  0x86   :  { %v7481_v46 = vpop.permute.xlu1 %321 }
  0x87   :  { %v7441_v26 = vpop.permute.xlu0 %311 }
  0x8c   :  { %2643 = vperm.xlu2 %7036, %v6094_v63   ;;  %2683 = vperm.xlu1 %7035, %v6096_v0   ;;  %v7513_v63 = vpop.permute.xlu2 %331  ;;  %v6118_v0 = vld [vmem:[%s11730_s12 + $0x160] sm:$0xff] }
  0x8d   :  { %2678 = vperm.xlu0 %7034, %v6095_v1   ;;  %256 = vmatmul.bf16.gmra.mxu0 %v6727_v2  ;;  %v6128_v2 = vld [vmem:[%s11730_s12 + $0x1b0] sm:$0xff] }
  0x94   :  { %2728 = vperm.xlu2 %7036, %v6102_v3   ;;  %2693 = vperm.xlu1 %7035, %v6098_v4   ;;  %v6127_v3 = vld [vmem:[%s11730_s12 + $0x1a8] sm:$0xff] }
  0x95   :  { %2688 = vperm.xlu0 %7034, %v6097_v5  }
  0x9c   :  { %2798 = vperm.xlu2 %7036, %v6110_v6   ;;  %2793 = vperm.xlu1 %7035, %v6109_v7   ;;  %v7529_v6 = vpop.permute.xlu0 %336 }
  0x9d   :  { %2733 = vperm.xlu0 %7034, %v6103_v8   ;;  %261 = vmatmul.bf16.gmra.mxu0 %v6728_v9 }
  0xa4   :  { %2738 = vperm.xlu2 %7036, %v6104_v10   ;;  %2703 = vperm.xlu1 %7035, %v6100_v11   ;;  %v6133_v10 = vld [vmem:[%s11730_s12 + $0x1d8] sm:$0xff]  ;;  %v6132_v11 = vld [vmem:[%s11730_s12 + $0x1d0] sm:$0xff] }
  0xa5   :  { %2698 = vperm.xlu0 %7034, %v6099_v12   ;;  %v6119_v12 = vld [vmem:[%s11730_s12 + $0x168] sm:$0xff] }
  0xaa   :  { %v227_v17 = vpop.f32.mrf.mxu0 }
  0xab   :  { %v7439_v25 = vadd.f32 %v7433_v23, %v227_v17 }
  0xac   :  { %2808 = vperm.xlu2 %7036, %v6112_v13   ;;  %2803 = vperm.xlu1 %7035, %v6111_v14  }
  0xad   :  { %2743 = vperm.xlu0 %7034, %v6105_v15   ;;  %266 = vmatmul.bf16.gmra.mxu0 %v6729_v16  ;;  %v409_v33 = vmul.f32 %v7419_v18, %v7439_v25  ;;  %v7545_v15 = vpop.permute.xlu1 %341  ;;  %v6121_v16 = vld [vmem:[%s11730_s12 + $0x178] sm:$0xff] }
  0xb2   :  { %v229_v22 = vpop.f32.mrf.mxu0 }
  0xb3   :  { %v7436_v24 = vadd.f32 %v7433_v23, %v229_v22 }
  0xb4   :  { %2753 = vperm.xlu2 %7036, %v6107_v19   ;;  %2748 = vperm.xlu1 %7035, %v6106_v20   ;;  %v6120_v19 = vld [vmem:[%s11730_s12 + $0x170] sm:$0xff]  ;;  %v6129_v20 = vld [vmem:[%s11730_s12 + $0x1b8] sm:$0xff] }
  0xb5   :  { %2708 = vperm.xlu0 %7034, %v6101_v21   ;;  %v410_v28 = vmul.f32 %v7441_v26, %v7436_v24  ;;  %v7587_v43 = vpop.permute.xlu1 %356 }
  0xb7   :  { %v430_v36 = vadd.f32 %v410_v28, %v409_v33  ;;  %v6134_v33 = vld [vmem:[%s11730_s12 + $0x1e0] sm:$0xff] }
  0xba   :  { %v232_v32 = vpop.f32.mrf.mxu0 }
  0xbb   :  { %v7460_v34 = vadd.f32 %v7433_v23, %v232_v32  ;;  %v6135_v32 = vld [vmem:[%s11730_s12 + $0x1e8] sm:$0xff] }
  0xbc   :  { %2908 = vperm.xlu2 %7036, %v6123_v27   ;;  %2818 = vperm.xlu1 %7035, %v6114_v29   ;;  %v7561_v27 = vpop.permute.xlu2 %346 }
  0xbd   :  { %2813 = vperm.xlu0 %7034, %v6113_v30   ;;  %v411_v37 = vmul.f32 %v7462_v35, %v7460_v34  ;;  %271 = vmatmul.bf16.gmra.mxu0 %v6730_v31  ;;  %v6122_v31 = vld [vmem:[%s11730_s12 + $0x180] sm:$0xff] }
  0xbf   :  { %v431_v38 = vadd.f32 %v430_v36, %v411_v37 }
  0xc2   :  { %v234_v42 = vpop.f32.mrf.mxu0 }
  0xc3   :  { %v7479_v44 = vadd.f32 %v7433_v23, %v234_v42 }
  0xc4   :  { %2823 = vperm.xlu2 %7036, %v6115_v39   ;;  %2758 = vperm.xlu1 %7035, %v6108_v40   ;;  %v6136_v40 = vld [vmem:[%s11730_s12 + $0x1f0] sm:$0xff] }
  0xc5   :  { %2913 = vperm.xlu0 %7034, %v6124_v41   ;;  %v412_v48 = vmul.f32 %v7481_v46, %v7479_v44 }
  0xc7   :  { %v432_v55 = vadd.f32 %v431_v38, %v412_v48  ;;  %v7577_v38 = vpop.permute.xlu0 %351 }
  0xca   :  { %v237_v52 = vpop.f32.mrf.mxu0 }
  0xcb   :  { %v7495_v53 = vadd.f32 %v7433_v23, %v237_v52 }
  0xcc   :  { %2843 = vperm.xlu2 %7036, %v6116_v47   ;;  %2923 = vperm.xlu1 %7035, %v6126_v49  }
  0xcd   :  { %2918 = vperm.xlu0 %7034, %v6125_v50   ;;  %v413_v56 = vmul.f32 %v7497_v54, %v7495_v53  ;;  %276 = vmatmul.bf16.gmra.mxu0 %v158_v51 }
  0xcf   :  { %v433_v57 = vadd.f32 %v432_v55, %v413_v56 }
  0xd2   :  { %v239_v61 = vpop.f32.mrf.mxu0 }
  0xd3   :  { %v7511_v62 = vadd.f32 %v7433_v23, %v239_v61 }
  0xd4   :  { %2978 = vperm.xlu2 %7036, %v6131_v58   ;;  %2973 = vperm.xlu1 %7035, %v6130_v59   ;;  %v7593_v58 = vpop.permute.xlu0 %366 }
  0xd5   :  { %2848 = vperm.xlu0 %7034, %v6117_v60   ;;  %v414_v1 = vmul.f32 %v7513_v63, %v7511_v62  ;;  %v7595_v60 = vpop.permute.xlu1 %371 }
  0xd7   :  { %v434_v7 = vadd.f32 %v433_v57, %v414_v1  ;;  %v7591_v57 = vpop.permute.xlu2 %361 }
  0xda   :  { %v242_v4 = vpop.f32.mrf.mxu0 }
  0xdb   :  { %v7527_v5 = vadd.f32 %v7433_v23, %v242_v4 }
  0xdc   :  { %2853 = vperm.xlu2 %7036, %v6118_v0   ;;  %2933 = vperm.xlu1 %7035, %v6128_v2  }
  0xdd   :  { %2928 = vperm.xlu0 %7034, %v6127_v3   ;;  %v415_v8 = vmul.f32 %v7529_v6, %v7527_v5 }
  0xdf   :  { %v435_v9 = vadd.f32 %v434_v7, %v415_v8  ;;  %v7601_v1 = vpop.permute.xlu2 %376 }
  0xe2   :  { %v244_v13 = vpop.f32.mrf.mxu0 }
  0xe3   :  { %v7543_v14 = vadd.f32 %v7433_v23, %v244_v13  ;;  %v7614_v13 = vpop.permute.xlu1 %386 }
  0xe4   :  { %2988 = vperm.xlu2 %7036, %v6133_v10   ;;  %2983 = vperm.xlu1 %7035, %v6132_v11  }
  0xe5   :  { %2858 = vperm.xlu0 %7034, %v6119_v12   ;;  %v416_v17 = vmul.f32 %v7545_v15, %v7543_v14 }
  0xe7   :  { %v436_v28 = vadd.f32 %v435_v9, %v416_v17  ;;  %v7608_v9 = vpop.permute.xlu0 %381 }
  0xea   :  { %v247_v21 = vpop.f32.mrf.mxu0 }
  0xeb   :  { %v7559_v22 = vadd.f32 %v7433_v23, %v247_v21 }
  0xec   :  { %2868 = vperm.xlu2 %7036, %v6121_v16   ;;  %2863 = vperm.xlu1 %7035, %v6120_v19  }
  0xed   :  { %2938 = vperm.xlu0 %7034, %v6129_v20   ;;  %v417_v29 = vmul.f32 %v7561_v27, %v7559_v22 }
  0xef   :  { %v437_v30 = vadd.f32 %v436_v28, %v417_v29  ;;  %v7625_v29 = vpop.permute.xlu2 %391 }
  0xf2   :  { %v249_v36 = vpop.f32.mrf.mxu0 }
  0xf3   :  { %v7575_v37 = vadd.f32 %v7433_v23, %v249_v36 }
  0xf4   :  { %2873 = vperm.xlu2 %7036, %v6122_v31   ;;  %2998 = vperm.xlu1 %7035, %v6135_v32  }
  0xf5   :  { %2993 = vperm.xlu0 %7034, %v6134_v33   ;;  %v418_v39 = vmul.f32 %v7577_v38, %v7575_v37 }
  0xf7   :  { %v438_v45 = vadd.f32 %v437_v30, %v418_v39 }
  0xfa   :  { %v252_v41 = vpop.f32.mrf.mxu0 }
  0xfb   :  { %v7585_v42 = vadd.f32 %v7433_v23, %v252_v41  ;;  %v7637_v41 = vpop.permute.xlu0 %396 }
  0xfd   :  { %3003 = vperm.xlu0 %7034, %v6136_v40   ;;  %v419_v47 = vmul.f32 %v7587_v43, %v7585_v42 }
  0xff   :  { %v439_v48 = vadd.f32 %v438_v45, %v419_v47 }
 0x102   :  { %v254_v49 = vpop.f32.mrf.mxu0 }
 0x103   :  { %v7598_v61 = vadd.f32 %v7433_v23, %v254_v49 }
 0x105   :  { %v420_v2 = vmul.f32 %v7591_v57, %v7598_v61 }
 0x107   :  { %v440_v10 = vadd.f32 %v439_v48, %v420_v2  ;;  %v7641_v48 = vpop.permute.xlu1 %401 }
 0x10a   :  { %v257_v50 = vpop.f32.mrf.mxu0 }
 0x10b   :  { %v258_v0 = vadd.f32 %v7433_v23, %v257_v50 }
 0x10d   :  { %v421_v7 = vmul.f32 %v7593_v58, %v258_v0 }
 0x10f   :  { %v441_v16 = vadd.f32 %v440_v10, %v421_v7 }
 0x112   :  { %v259_v51 = vpop.f32.mrf.mxu0 }
 0x113   :  { %v260_v3 = vadd.f32 %v7433_v23, %v259_v51 }
 0x115   :  { %v422_v11 = vmul.f32 %v7595_v60, %v260_v3 }
 0x117   :  { %v442_v20 = vadd.f32 %v441_v16, %v422_v11 }
 0x11a   :  { %v262_v52 = vpop.f32.mrf.mxu0 }
 0x11b   :  { %v263_v8 = vadd.f32 %v7433_v23, %v262_v52 }
 0x11d   :  { %v423_v17 = vmul.f32 %v7601_v1, %v263_v8 }
 0x11f   :  { %v443_v31 = vadd.f32 %v442_v20, %v423_v17 }
 0x122   :  { %v264_v55 = vpop.f32.mrf.mxu0 }
 0x123   :  { %v7612_v12 = vadd.f32 %v7433_v23, %v264_v55 }
 0x125   :  { %v424_v21 = vmul.f32 %v7608_v9, %v7612_v12 }
 0x127   :  { %v444_v36 = vadd.f32 %v443_v31, %v424_v21 }
 0x12a   :  { %v267_v56 = vpop.f32.mrf.mxu0 }
 0x12b   :  { %v7618_v19 = vadd.f32 %v7433_v23, %v267_v56  ;;  %v7648_v56 = vpop.permute.xlu2 %406 }
 0x12d   :  { %v425_v32 = vmul.f32 %v7614_v13, %v7618_v19 }
 0x12f   :  { %v445_v45 = vadd.f32 %v444_v36, %v425_v32 }
 0x132   :  { %v269_v59 = vpop.f32.mrf.mxu0 }
 0x133   :  { %v7623_v28 = vadd.f32 %v7433_v23, %v269_v59 }
 0x135   :  { %v426_v39 = vmul.f32 %v7625_v29, %v7623_v28 }
 0x137   :  { %v446_v49 = vadd.f32 %v445_v45, %v426_v39 }
 0x13a   :  { %v272_v4 = vpop.f32.mrf.mxu0 }
 0x13b   :  { %v7630_v33 = vadd.f32 %v7433_v23, %v272_v4 }
 0x13d   :  { %v427_v47 = vmul.f32 %v7637_v41, %v7630_v33 }
 0x13f   :  { %v447_v52 = vadd.f32 %v446_v49, %v427_v47 }
 0x142   :  { %v274_v30 = vpop.f32.mrf.mxu0 }
 0x143   :  { %v7635_v40 = vadd.f32 %v7433_v23, %v274_v30 }
 0x145   :  { %v428_v50 = vmul.f32 %v7641_v48, %v7635_v40 }
 0x147   :  { %v448_v59 = vadd.f32 %v447_v52, %v428_v50 }
 0x14a   :  { %v277_v51 = vpop.f32.mrf.mxu0 }
 0x14b   :  { %v7646_v55 = vadd.f32 %v7433_v23, %v277_v51 }
 0x14d   :  { %v429_v2 = vmul.f32 %v7648_v56, %v7646_v55 }
 0x14f   :  { %v449_v4 = vadd.f32 %v448_v59, %v429_v2 }
 0x151   :  { %v450_v7 = vrot.slane %v449_v4, 4 }
 0x152   :  { %v279_v10 = vpop.f32.mrf.mxu0 }
 0x153   :  { %v451_v11 = vadd.f32 %v450_v7, %v449_v4 }
 0x155   :  { %v452_v16 = vrot.slane %v451_v11, 2 }
 0x157   :  { %v453_v17 = vadd.f32 %v452_v16, %v451_v11 }
 0x159   :  { %v454_v20 = vrot.slane %v453_v17, 1 }
 0x15b   :  { %v455_v21 = vadd.f32 %v454_v20, %v453_v17 }
 0x15d   :  { %v7652_v30 = vmul.f32 0.0061728396, %v455_v21 }
 0x15f   :  { %v7656_v23 = vsub.f32 %v7439_v25, %v7652_v30  ;;  %v7660_v31 = vsub.f32 %v7460_v34, %v7652_v30  ;;  %v7664_v32 = vsub.f32 %v7495_v53, %v7652_v30  ;;  %v7668_v36 = vsub.f32 %v7527_v5, %v7652_v30 }
 0x160   :  { %v7672_v39 = vsub.f32 %v7559_v22, %v7652_v30  ;;  %v7676_v25 = vsub.f32 %v7585_v42, %v7652_v30  ;;  %v7680_v34 = vsub.f32 %v7436_v24, %v7652_v30  ;;  %v7683_v45 = vsub.f32 %v258_v0, %v7652_v30 }
 0x161   :  { %v7686_v53 = vsub.f32 %v260_v3, %v7652_v30  ;;  %v7689_v5 = vsub.f32 %v263_v8, %v7652_v30  ;;  %v478_v22 = vmul.f32 %v7656_v23, %v7656_v23  ;;  %v7697_v47 = vsub.f32 %v7479_v44, %v7652_v30 }
 0x162   :  { %v479_v42 = vmul.f32 %v7680_v34, %v7680_v34  ;;  %v490_v24 = vmul.f32 %v7683_v45, %v7683_v45  ;;  %v480_v8 = vmul.f32 %v7660_v31, %v7660_v31  ;;  %v7711_v44 = vsub.f32 %v7511_v62, %v7652_v30 }
 0x163   :  { %v491_v0 = vmul.f32 %v7686_v53, %v7686_v53  ;;  %v492_v3 = vmul.f32 %v7689_v5, %v7689_v5  ;;  %v499_v49 = vmul.f32 %v478_v22, %v7419_v18  ;;  %v481_v51 = vmul.f32 %v7697_v47, %v7697_v47 }
 0x164   :  { %v500_v50 = vmul.f32 %v479_v42, %v7441_v26  ;;  %v511_v52 = vmul.f32 %v490_v24, %v7593_v58  ;;  %v482_v4 = vmul.f32 %v7664_v32, %v7664_v32  ;;  %v501_v18 = vmul.f32 %v480_v8, %v7462_v35 }
 0x165   :  { %v512_v59 = vmul.f32 %v491_v0, %v7595_v60  ;;  %v513_v2 = vmul.f32 %v492_v3, %v7601_v1  ;;  %v7723_v26 = vsub.f32 %v7543_v14, %v7652_v30  ;;  %v483_v62 = vmul.f32 %v7711_v44, %v7711_v44 }
 0x166   :  { %v520_v7 = vadd.f32 %v500_v50, %v499_v49  ;;  %v502_v10 = vmul.f32 %v481_v51, %v7481_v46  ;;  %v484_v60 = vmul.f32 %v7668_v36, %v7668_v36  ;;  %v503_v1 = vmul.f32 %v482_v4, %v7497_v54 }
 0x167   :  { %v7733_v35 = vsub.f32 %v7575_v37, %v7652_v30  ;;  %v485_v14 = vmul.f32 %v7723_v26, %v7723_v26  ;;  %v504_v16 = vmul.f32 %v483_v62, %v7513_v63  ;;  %v486_v46 = vmul.f32 %v7672_v39, %v7672_v39 }
 0x168   :  { %v521_v58 = vadd.f32 %v520_v7, %v501_v18  ;;  %v505_v20 = vmul.f32 %v484_v60, %v7529_v6  ;;  %v7743_v54 = vsub.f32 %v7598_v61, %v7652_v30  ;;  %v488_v63 = vmul.f32 %v7676_v25, %v7676_v25 }
 0x169   :  { %v487_v37 = vmul.f32 %v7733_v35, %v7733_v35  ;;  %v506_v22 = vmul.f32 %v485_v14, %v7545_v15  ;;  %v507_v24 = vmul.f32 %v486_v46, %v7561_v27  ;;  %v472_v50 = vsub.f32 %v7612_v12, %v7652_v30 }
 0x16a   :  { %v522_v11 = vadd.f32 %v521_v58, %v502_v10  ;;  %v489_v6 = vmul.f32 %v7743_v54, %v7743_v54  ;;  %v509_v61 = vmul.f32 %v488_v63, %v7587_v43  ;;  %v7760_v4 = vsub.f32 %v7618_v19, %v7652_v30 }
 0x16b   :  { %v508_v3 = vmul.f32 %v487_v37, %v7577_v38  ;;  %v7764_v18 = vsub.f32 %v7623_v28, %v7652_v30  ;;  %v493_v38 = vmul.f32 %v472_v50, %v472_v50  ;;  %v475_v43 = vsub.f32 %v7630_v33, %v7652_v30 }
 0x16c   :  { %v523_v17 = vadd.f32 %v522_v11, %v503_v1  ;;  %v510_v15 = vmul.f32 %v489_v6, %v7591_v57  ;;  %v494_v12 = vmul.f32 %v7760_v4, %v7760_v4  ;;  %v476_v57 = vsub.f32 %v7635_v40, %v7652_v30 }
 0x16d   :  { %v495_v19 = vmul.f32 %v7764_v18, %v7764_v18  ;;  %v514_v10 = vmul.f32 %v493_v38, %v7608_v9  ;;  %v477_v28 = vsub.f32 %v7646_v55, %v7652_v30 }
 0x16e   :  { %v524_v21 = vadd.f32 %v523_v17, %v504_v16  ;;  %v515_v60 = vmul.f32 %v494_v12, %v7614_v13  ;;  %v497_v1 = vmul.f32 %v476_v57, %v476_v57 }
 0x16f   :  { %v516_v11 = vmul.f32 %v495_v19, %v7625_v29  ;;  %v498_v14 = vmul.f32 %v477_v28, %v477_v28 }
 0x170   :  { %v525_v42 = vadd.f32 %v524_v21, %v505_v20  ;;  %v518_v17 = vmul.f32 %v497_v1, %v7641_v48  ;;  %v302_v48 = vld [vmem:[%s11732_s3] sm:$0x1] }
 0x171   :  { %v519_v9 = vmul.f32 %v498_v14, %v7648_v56 }
 0x172   :  { %v526_v0 = vadd.f32 %v525_v42, %v506_v22 }
 0x174   :  { %v527_v8 = vadd.f32 %v526_v0, %v507_v24 }
 0x176   :  { %v528_v49 = vadd.f32 %v527_v8, %v508_v3 }
 0x178   :  { %v529_v51 = vadd.f32 %v528_v49, %v509_v61  ;;  %v7790_v49 = vld [vmem:[%s11731_s4] ss:$0 sm:$0xff] }
 0x17a   :  { %v530_v27 = vadd.f32 %v529_v51, %v510_v15 }
 0x17c   :  { %v531_v7 = vadd.f32 %v530_v27, %v511_v52  ;;  %v496_v52 = vmul.f32 %v475_v43, %v475_v43 }
 0x17e   :  { %v532_v62 = vadd.f32 %v531_v7, %v512_v59  ;;  %v517_v40 = vmul.f32 %v496_v52, %v7637_v41 }
 0x180   :  { %v533_v58 = vadd.f32 %v532_v62, %v513_v2 }
 0x182   :  { %v534_v33 = vadd.f32 %v533_v58, %v514_v10 }
 0x184   :  { %v535_v59 = vadd.f32 %v534_v33, %v515_v60 }
 0x186   :  { %v536_v16 = vadd.f32 %v535_v59, %v516_v11 }
 0x188   :  { %v537_v46 = vadd.f32 %v536_v16, %v517_v40 }
 0x18a   :  { %v538_v2 = vadd.f32 %v537_v46, %v518_v17 }
 0x18c   :  { %v539_v20 = vadd.f32 %v538_v2, %v519_v9 }
 0x18e   :  { %v540_v55 = vrot.slane %v539_v20, 4 }
 0x190   :  { %v541_v30 = vadd.f32 %v540_v55, %v539_v20 }
 0x192   :  { %v542_v21 = vrot.slane %v541_v30, 2 }
 0x194   :  { %v543_v13 = vadd.f32 %v542_v21, %v541_v30 }
 0x196   :  { %v544_v37 = vrot.slane %v543_v13, 1 }
 0x198   :  { %v545_v22 = vadd.f32 %v544_v37, %v543_v13 }
 0x19a   :  { %v546_v42 = vmul.f32 0.0061728396, %v545_v22 }
 0x19c   :  { %v547_v29 = vadd.f32 1e-05, %v546_v42 }
 0x19e   :  { %7042 = vrsqrt.f32 %v547_v29  ;;  %vm554_vm1 = vweird.f32 %v547_v29 }
 0x1a4   :  { %v7043_v63 = vpop.eup %7042 }
 0x1a5   :  { %v549_v24 = vmul.f32 %v7043_v63, %v547_v29  ;;  %vm555_vm0 = vweird.f32 %v7043_v63 }
 0x1a6   :  { %vm556_vm2 = vmor %vm554_vm1, %vm555_vm0 }
 0x1a7   :  { %v550_v41 = vmul.f32 %v7043_v63, %v549_v24 }
 0x1a9   :  { %v551_v0 = vmul.f32 0.5, %v550_v41 }
 0x1ab   :  { %v552_v6 = vsub.f32 1.5, %v551_v0 }
 0x1ad   :  { %v553_v56 = vmul.f32 %v7043_v63, %v552_v6 }
 0x1af   :  { %v557_v3 = vsel %vm556_vm2, %v7043_v63, %v553_v56 }
 0x1b0   :  { %v558_v8 = vmul.f32 %v557_v3, %v302_v48 }
 0x1b2   :  { %v7785_v61 = vperm.slane %v558_v8, 0 }
 0x1b4   :  { %v582_v15 = vmul.f32 %v7785_v61, %v477_v28  ;;  %v576_v51 = vmul.f32 %v7785_v61, %v7689_v5  ;;  %v577_v27 = vmul.f32 %v7785_v61, %v472_v50  ;;  %v574_v38 = vmul.f32 %v7785_v61, %v7683_v45 }
 0x1b5   :  { %v575_v7 = vmul.f32 %v7785_v61, %v7686_v53  ;;  %v580_v12 = vmul.f32 %v7785_v61, %v475_v43  ;;  %v581_v62 = vmul.f32 %v7785_v61, %v476_v57  ;;  %v572_v19 = vmul.f32 %v7785_v61, %v7676_v25 }
 0x1b6   :  { %v600_v10 = vadd.f32 %v7790_v49, %v576_v51  ;;  %v601_v58 = vadd.f32 %v7790_v49, %v577_v27  ;;  %v606_v5 = vadd.f32 %v7790_v49, %v582_v15  ;;  %v598_v50 = vadd.f32 %v7790_v49, %v574_v38 }
 0x1b7   :  { %v599_v45 = vadd.f32 %v7790_v49, %v575_v7  ;;  %v604_v28 = vadd.f32 %v7790_v49, %v580_v12  ;;  %v605_v53 = vadd.f32 %v7790_v49, %v581_v62  ;;  %v573_v43 = vmul.f32 %v7785_v61, %v7743_v54 }
 0x1b8   :  { %v621_v57 = vmul.f32 0.2, %v600_v10  ;;  %v622_v52 = vmul.f32 0.2, %v601_v58  ;;  %v627_v25 = vmul.f32 0.2, %v606_v5  ;;  %v596_v60 = vadd.f32 %v7790_v49, %v572_v19 }
 0x1b9   :  { %v619_v33 = vmul.f32 0.2, %v598_v50  ;;  %v620_v1 = vmul.f32 0.2, %v599_v45  ;;  %v625_v11 = vmul.f32 0.2, %v604_v28  ;;  %v597_v59 = vadd.f32 %v7790_v49, %v573_v43 }
 0x1ba   :  { %v642_v14 = vmax.f32 %v600_v10, %v621_v57  ;;  %v643_v40 = vmax.f32 %v601_v58, %v622_v52  ;;  %v648_v16 = vmax.f32 %v606_v5, %v627_v25  ;;  %v626_v17 = vmul.f32 0.2, %v605_v53  ;;  %v5517_v19 = vld [vmem:[%s11733_s6 + $0x8] sm:$0xf0] }
 0x1bb   :  { %v640_v46 = vmax.f32 %v598_v50, %v619_v33  ;;  %v641_v9 = vmax.f32 %v599_v45, %v620_v1  ;;  %v646_v2 = vmax.f32 %v604_v28, %v625_v11  ;;  %v617_v20 = vmul.f32 0.2, %v596_v60 }
 0x1bc   :  { %v656_v55 = vpack.c.bf16 %v643_v40, %v642_v14  ;;  %v659_v54 = vpack.c.bf16 %v648_v16, %v648_v16  ;;  %v647_v30 = vmax.f32 %v605_v53, %v626_v17  ;;  %v618_v21 = vmul.f32 0.2, %v597_v59 }
 0x1bd   :  { %v655_v13 = vpack.c.bf16 %v641_v9, %v640_v46  ;;  %v578_v37 = vmul.f32 %v7785_v61, %v7760_v4  ;;  %v579_v22 = vmul.f32 %v7785_v61, %v7764_v18  ;;  %v638_v63 = vmax.f32 %v596_v60, %v617_v20 }
 0x1be   :  { %1109 = vmatpush.bf16.msra.mxu1 %v656_v55  ;;  %v1107_v42 = vsel %vm1105_vm3, %v659_v54, 0  ;;  %v658_v29 = vpack.c.bf16 %v647_v30, %v646_v2  ;;  %v570_v24 = vmul.f32 %v7785_v61, %v7672_v39  ;;  %v571_v6 = vmul.f32 %v7785_v61, %v7733_v35 }
 0x1bf   :  { %1282 = vmatpush.bf16.msra.mxu2 %v1107_v42  ;;  %v602_v41 = vadd.f32 %v7790_v49, %v578_v37  ;;  %v603_v0 = vadd.f32 %v7790_v49, %v579_v22  ;;  %v568_v4 = vmul.f32 %v7785_v61, %v7668_v36  ;;  %v639_v18 = vmax.f32 %v597_v59, %v618_v21  ;;  %v6739_v36 = vld [vmem:[%s11733_s6 + $0x4] sm:$0xf]  ;;  %v6740_v37 = vld [vmem:[%s11733_s6 + $0x4] sm:$0xf0] }
 0x1c0   :  { %v594_v48 = vadd.f32 %v7790_v49, %v570_v24  ;;  %v569_v56 = vmul.f32 %v7785_v61, %v7723_v26  ;;  %v566_v39 = vmul.f32 %v7785_v61, %v7664_v32  ;;  %v595_v15 = vadd.f32 %v7790_v49, %v571_v6  ;;  %v5533_v24 = vld [vmem:[%s11733_s6 + $0x28] sm:$0xf0] }
 0x1c1   :  { %v623_v3 = vmul.f32 0.2, %v602_v41  ;;  %v624_v8 = vmul.f32 0.2, %v603_v0  ;;  %v592_v51 = vadd.f32 %v7790_v49, %v568_v4  ;;  %v567_v26 = vmul.f32 %v7785_v61, %v7711_v44 }
 0x1c2   :  { %1110 = vmatpush.bf16.msra.mxu1 %v655_v13  ;;  %v615_v35 = vmul.f32 0.2, %v594_v48  ;;  %v593_v27 = vadd.f32 %v7790_v49, %v569_v56  ;;  %v590_v38 = vadd.f32 %v7790_v49, %v566_v39  ;;  %v616_v12 = vmul.f32 0.2, %v595_v15  ;;  %v5531_v56 = vld [vmem:[%s11733_s6 + $0x20] sm:$0xf] }
 0x1c3   :  { %1283 = vmatpush.bf16.msra.mxu2 %v658_v29  ;;  %v644_v32 = vmax.f32 %v602_v41, %v623_v3  ;;  %v645_v7 = vmax.f32 %v603_v0, %v624_v8  ;;  %v613_v62 = vmul.f32 0.2, %v592_v51  ;;  %v654_v10 = vpack.c.bf16 %v639_v18, %v638_v63  ;;  %v6743_v63 = vld [vmem:[%s11733_s6 + $0x24] sm:$0xf]  ;;  %v5523_v41 = vld [vmem:[%s11733_s6 + $0x10] sm:$0xf] }
 0x1c4   :  { %v636_v58 = vmax.f32 %v594_v48, %v615_v35  ;;  %v614_v5 = vmul.f32 0.2, %v593_v27  ;;  %v591_v50 = vadd.f32 %v7790_v49, %v567_v26  ;;  %v637_v28 = vmax.f32 %v595_v15, %v616_v12  ;;  %v6742_v0 = vld [vmem:[%s11733_s6 + $0x14] sm:$0xf0]  ;;  %v6745_v18 = vld [vmem:[%s11733_s6 + $0x34] sm:$0xf] }
 0x1c5   :  { %v657_v45 = vpack.c.bf16 %v645_v7, %v644_v32  ;;  %v564_v44 = vmul.f32 %v7785_v61, %v7660_v31  ;;  %v5520_v53 = vor.u32 %v6739_v36, %v5517_v19  ;;  %v611_v43 = vmul.f32 0.2, %v590_v38  ;;  %v5541_v48 = vld [vmem:[%s11733_s6 + $0x38] sm:$0xf0]  ;;  %v6744_v39 = vld [vmem:[%s11733_s6 + $0x24] sm:$0xf0] }
 0x1c6   :  { %1111 = vmatpush.bf16.msra.mxu1 %v654_v10  ;;  %v565_v57 = vmul.f32 %v7785_v61, %v7697_v47  ;;  %v653_v52 = vpack.c.bf16 %v637_v28, %v636_v58  ;;  %v634_v25 = vmax.f32 %v592_v51, %v613_v62  ;;  %v635_v60 = vmax.f32 %v593_v27, %v614_v5  ;;  %v6747_v15 = vld [vmem:[%s11733_s6 + $0x44] sm:$0xf]  ;;  %v5549_v51 = vld [vmem:[%s11733_s6 + $0x48] sm:$0xf0]  ;;  %v5539_v35 = vld [vmem:[%s11733_s6 + $0x30] sm:$0xf] }
 0x1c7   :  { %1284 = vmatpush.bf16.msra.mxu2 %v657_v45  ;;  %v612_v33 = vmul.f32 0.2, %v591_v50  ;;  %v588_v1 = vadd.f32 %v7790_v49, %v564_v44  ;;  %v562_v59 = vmul.f32 %v7785_v61, %v7656_v23  ;;  %v563_v31 = vmul.f32 %v7785_v61, %v7680_v34  ;;  %v6741_v34 = vld [vmem:[%s11733_s6 + $0x14] sm:$0xf]  ;;  %v5525_v61 = vld [vmem:[%s11733_s6 + $0x18] sm:$0xf0] }
 0x1c8   :  { %v589_v11 = vadd.f32 %v7790_v49, %v565_v57  ;;  %v652_v14 = vpack.c.bf16 %v635_v60, %v634_v25  ;;  %v632_v47 = vmax.f32 %v590_v38, %v611_v43  ;;  %v5528_v22 = vor.u32 %v6741_v34, %v5525_v61  ;;  %v6746_v27 = vld [vmem:[%s11733_s6 + $0x34] sm:$0xf0]  ;;  %v6749_v38 = vld [vmem:[%s11733_s6 + $0x54] sm:$0xf]  ;;  %v5557_v32 = vld [vmem:[%s11733_s6 + $0x58] sm:$0xf0] }
 0x1c9   :  { %v633_v40 = vmax.f32 %v591_v50, %v612_v33  ;;  %v609_v16 = vmul.f32 0.2, %v588_v1  ;;  %v586_v46 = vadd.f32 %v7790_v49, %v562_v59  ;;  %v587_v9 = vadd.f32 %v7790_v49, %v563_v31  ;;  %v5515_v49 = vld [vmem:[%s11733_s6] sm:$0xf]  ;;  %v6748_v12 = vld [vmem:[%s11733_s6 + $0x44] sm:$0xf0] }
 0x1ca   :  { %1112 = vmatpush.bf16.msra.mxu1 %v653_v52  ;;  %5761 = vmatmul.msk.bf16.vlgmr.msra.gmra.mxu2 %vm1008_vm4, %v5520_v53  ;;  %v610_v17 = vmul.f32 0.2, %v589_v11  ;;  %v5516_v29 = vor.u32 %v6740_v37, %v5515_v49  ;;  %v5536_v6 = vor.u32 %v6743_v63, %v5533_v24  ;;  %v5524_v4 = vor.u32 %v6742_v0, %v5523_v41  ;;  %v5547_v7 = vld [vmem:[%s11733_s6 + $0x40] sm:$0xf]  ;;  %v6832_v10 = vld [vmem:[%s11734_s7 + $0xf8] sm:$0xff]  ;;  %v6807_v5 = vld [vmem:[%s11734_s7 + $0x30] sm:$0xff] }
 0x1cb   :  { %v651_v2 = vpack.c.bf16 %v633_v40, %v632_v47  ;;  %v630_v20 = vmax.f32 %v588_v1, %v609_v16  ;;  %v607_v23 = vmul.f32 0.2, %v586_v46  ;;  %v608_v54 = vmul.f32 0.2, %v587_v9  ;;  %v6808_v58 = vld [vmem:[%s11734_s7 + $0x38] sm:$0xff]  ;;  %2145 = vmatpush.bf16.msrb.mxu0 %v6832_v10  ;;  %v6806_v57 = vld [vmem:[%s11734_s7 + $0x28] sm:$0xff] }
 0x1cc   :  { %v631_v55 = vmax.f32 %v589_v11, %v610_v17  ;;  %v5544_v3 = vor.u32 %v6745_v18, %v5541_v48  ;;  %v5532_v8 = vor.u32 %v6744_v39, %v5531_v56  ;;  %v5552_v36 = vor.u32 %v6747_v15, %v5549_v51  ;;  %2061 = vmatpush.bf16.msra.mxu3 %v6808_v58  ;;  %v6751_v50 = vld [vmem:[%s11733_s6 + $0x64] sm:$0xf]  ;;  %v5565_v45 = vld [vmem:[%s11733_s6 + $0x68] sm:$0xf0]  ;;  %v5555_v28 = vld [vmem:[%s11733_s6 + $0x50] sm:$0xf] }
 0x1cd   :  { %v628_v21 = vmax.f32 %v586_v46, %v607_v23  ;;  %v629_v13 = vmax.f32 %v587_v9, %v608_v54  ;;  %v5540_v26 = vor.u32 %v6746_v27, %v5539_v35  ;;  %v5560_v62 = vor.u32 %v6749_v38, %v5557_v32  ;;  %v6750_v44 = vld [vmem:[%s11733_s6 + $0x54] sm:$0xf0]  ;;  %v6805_v52 = vld [vmem:[%s11734_s7 + $0x20] sm:$0xff]  ;;  %v6753_v25 = vld [vmem:[%s11733_s6 + $0x74] sm:$0xf] }
 0x1ce   :  { %1113 = vmatpush.bf16.msra.mxu1 %v652_v14  ;;  %v650_v30 = vpack.c.bf16 %v631_v55, %v630_v20  ;;  %v5548_v19 = vor.u32 %v6748_v12, %v5547_v7  ;;  %v5568_v53 = vor.u32 %v6751_v50, %v5565_v45  ;;  %v5556_v43 = vor.u32 %v6750_v44, %v5555_v28  ;;  %v5573_v60 = vld [vmem:[%s11733_s6 + $0x78] sm:$0xf0]  ;;  %v5563_v1 = vld [vmem:[%s11733_s6 + $0x60] sm:$0xf]  ;;  %v6752_v11 = vld [vmem:[%s11733_s6 + $0x64] sm:$0xf0] }
 0x1cf   :  { %v649_v42 = vpack.c.bf16 %v629_v13, %v628_v21  ;;  %v6804_v33 = vld [vmem:[%s11734_s7 + $0x18] sm:$0xff]  ;;  %v5576_v59 = vor.u32 %v6753_v25, %v5573_v60  ;;  %v5564_v31 = vor.u32 %v6752_v11, %v5563_v1  ;;  %v6803_v14 = vld [vmem:[%s11734_s7 + $0x10] sm:$0xff]  ;;  %v6802_v47 = vld [vmem:[%s11734_s7 + $0x8] sm:$0xff] }
 0x1d0   :  { %2062 = vmatpush.bf16.msra.mxu3 %v6807_v5  ;;  %v6755_v40 = vld [vmem:[%s11733_s6 + $0x84] sm:$0xf]  ;;  %v5581_v16 = vld [vmem:[%s11733_s6 + $0x88] sm:$0xf0]  ;;  %v5571_v46 = vld [vmem:[%s11733_s6 + $0x70] sm:$0xf] }
 0x1d1   :  { %v6801_v17 = vld [vmem:[%s11734_s7] sm:$0xff]  ;;  %v6754_v9 = vld [vmem:[%s11733_s6 + $0x74] sm:$0xf0]  ;;  %v6757_v23 = vld [vmem:[%s11733_s6 + $0x94] sm:$0xf] }
 0x1d2   :  { %1114 = vmatpush.bf16.msra.mxu1 %v651_v2  ;;  %v5584_v2 = vor.u32 %v6755_v40, %v5581_v16  ;;  %v5572_v20 = vor.u32 %v6754_v9, %v5571_v46  ;;  %v5589_v54 = vld [vmem:[%s11733_s6 + $0x98] sm:$0xf0]  ;;  %v5579_v61 = vld [vmem:[%s11733_s6 + $0x80] sm:$0xf]  ;;  %v6759_v63 = vld [vmem:[%s11733_s6 + $0xa4] sm:$0xf] }
 0x1d3   :  { %v5592_v21 = vor.u32 %v6757_v23, %v5589_v54  ;;  %v5597_v24 = vld [vmem:[%s11733_s6 + $0xa8] sm:$0xf0]  ;;  %v6831_v41 = vld [vmem:[%s11734_s7 + $0xf0] sm:$0xff]  ;;  %v6758_v18 = vld [vmem:[%s11733_s6 + $0x94] sm:$0xf0] }
 0x1d4   :  { %2063 = vmatpush.bf16.msra.mxu3 %v6806_v57  ;;  %2146 = vmatpush.bf16.msrb.mxu0 %v6831_v41  ;;  %v5600_v48 = vor.u32 %v6759_v63, %v5597_v24  ;;  %v6816_v56 = vld [vmem:[%s11734_s7 + $0x78] sm:$0xff]  ;;  %v6815_v15 = vld [vmem:[%s11734_s7 + $0x70] sm:$0xff]  ;;  %v6814_v51 = vld [vmem:[%s11734_s7 + $0x68] sm:$0xff] }
 0x1d5   :  { %v5605_v38 = vld [vmem:[%s11733_s6 + $0xb8] sm:$0xf0]  ;;  %v6813_v32 = vld [vmem:[%s11734_s7 + $0x60] sm:$0xff]  ;;  %v6811_v28 = vld [vmem:[%s11734_s7 + $0x50] sm:$0xff] }
 0x1d6   :  { %1115 = vmatpush.bf16.msra.mxu1 %v650_v30  ;;  %v6756_v30 = vld [vmem:[%s11733_s6 + $0x84] sm:$0xf0]  ;;  %v6812_v58 = vld [vmem:[%s11734_s7 + $0x58] sm:$0xff]  ;;  %v5613_v25 = vld [vmem:[%s11733_s6 + $0xc8] sm:$0xf0] }
 0x1d7   :  { %v5580_v13 = vor.u32 %v6756_v30, %v5579_v61  ;;  %v6810_v44 = vld [vmem:[%s11734_s7 + $0x48] sm:$0xff]  ;;  %v6809_v60 = vld [vmem:[%s11734_s7 + $0x40] sm:$0xff]  ;;  %v5603_v11 = vld [vmem:[%s11733_s6 + $0xb0] sm:$0xf] }
 0x1d8   :  { %2064 = vmatpush.bf16.msra.mxu3 %v6805_v52  ;;  %v6763_v52 = vld [vmem:[%s11733_s6 + $0xc4] sm:$0xf]  ;;  %v6765_v46 = vld [vmem:[%s11733_s6 + $0xd4] sm:$0xf]  ;;  %v5621_v9 = vld [vmem:[%s11733_s6 + $0xd8] sm:$0xf0] }
 0x1d9   :  { %v6764_v23 = vld [vmem:[%s11733_s6 + $0xc4] sm:$0xf0]  ;;  %v5624_v54 = vor.u32 %v6765_v46, %v5621_v9  ;;  %v5619_v24 = vld [vmem:[%s11733_s6 + $0xd0] sm:$0xf]  ;;  %v5643_v46 = vld [vmem:[%s11733_s6 + $0x100] sm:$0xf] }
 0x1da   :  { %1116 = vmatpush.bf16.msra.mxu1 %v649_v42  ;;  %5762 = vmatmul.msk.bf16.gmra.mxu2 %vm1008_vm4, %v5528_v22  ;;  %v6772_v9 = vld [vmem:[%s11733_s6 + $0x104] sm:$0xf0] }
 0x1dc   :  { %2065 = vmatpush.bf16.msra.mxu3 %v6804_v33 }
 0x1dd   :  { %1117 = vmatmul.bf16.vlgmr.msra.gmra.mxu1 %v5516_v29 }
 0x1de   :  { %7017 = vmatpush.bf16.msrb.mxu1 %v6832_v10 }
 0x1e0   :  { %2066 = vmatpush.bf16.msra.mxu3 %v6803_v14 }
 0x1e2   :  { %7018 = vmatpush.bf16.msrb.mxu1 %v6831_v41  ;;  %v6766_v41 = vld [vmem:[%s11733_s6 + $0xd4] sm:$0xf0] }
 0x1e4   :  { %2067 = vmatpush.bf16.msra.mxu3 %v6802_v47 }
 0x1e8   :  { %2068 = vmatpush.bf16.msra.mxu3 %v6801_v17 }
 0x1ea   :  { %5763 = vmatmul.msk.bf16.gmra.mxu2 %vm1008_vm4, %v5536_v6 }
 0x1ec   :  { %2089 = vmatpush.bf16.msrb.mxu3 %v6816_v56 }
 0x1ed   :  { %1122 = vmatmul.bf16.gmra.mxu1 %v5524_v4  ;;  %v5587_v4 = vld [vmem:[%s11733_s6 + $0x90] sm:$0xf] }
 0x1ee   :  { %v5588_v39 = vor.u32 %v6758_v18, %v5587_v4  ;;  %v5620_v4 = vor.u32 %v6766_v41, %v5619_v24  ;;  %v6826_v41 = vld [vmem:[%s11734_s7 + $0xc8] sm:$0xff] }
 0x1f0   :  { %2090 = vmatpush.bf16.msrb.mxu3 %v6815_v15 }
 0x1f4   :  { %2091 = vmatpush.bf16.msrb.mxu3 %v6814_v51  ;;  %v6769_v51 = vld [vmem:[%s11733_s6 + $0xf4] sm:$0xf] }
 0x1f8   :  { %2092 = vmatpush.bf16.msrb.mxu3 %v6813_v32  ;;  %v6768_v32 = vld [vmem:[%s11733_s6 + $0xe4] sm:$0xf0] }
 0x1fa   :  { %5764 = vmatmul.msk.bf16.gmra.mxu2 %vm1008_vm4, %v5544_v3 }
 0x1fc   :  { %2093 = vmatpush.bf16.msrb.mxu3 %v6812_v58 }
 0x1fd   :  { %1127 = vmatmul.bf16.gmra.mxu1 %v5532_v8 }
 0x200   :  { %2094 = vmatpush.bf16.msrb.mxu3 %v6811_v28 }
 0x204   :  { %2095 = vmatpush.bf16.msrb.mxu3 %v6810_v44  ;;  %v6771_v44 = vld [vmem:[%s11733_s6 + $0x104] sm:$0xf] }
 0x208   :  { %2096 = vmatpush.bf16.msrb.mxu3 %v6809_v60  ;;  %v6770_v60 = vld [vmem:[%s11733_s6 + $0xf4] sm:$0xf0] }
 0x20a   :  { %5765 = vmatmul.msk.bf16.gmra.mxu2 %vm1008_vm4, %v5552_v36 }
 0x20d   :  { %1132 = vmatmul.bf16.gmra.mxu1 %v5540_v26  ;;  %v6761_v26 = vld [vmem:[%s11733_s6 + $0xb4] sm:$0xf] }
 0x20e   :  { %v5608_v10 = vor.u32 %v6761_v26, %v5605_v38  ;;  %v6821_v26 = vld [vmem:[%s11734_s7 + $0xa0] sm:$0xff] }
 0x20f   :  { %v5627_v38 = vld [vmem:[%s11733_s6 + $0xe0] sm:$0xf] }
 0x21a   :  { %5766 = vmatmul.msk.bf16.gmra.mxu2 %vm1008_vm4, %v5560_v62  ;;  %v5595_v62 = vld [vmem:[%s11733_s6 + $0xa0] sm:$0xf] }
 0x21d   :  { %1137 = vmatmul.bf16.gmra.mxu1 %v5548_v19  ;;  %v6760_v19 = vld [vmem:[%s11733_s6 + $0xa4] sm:$0xf0] }
 0x21e   :  { %v5596_v5 = vor.u32 %v6760_v19, %v5595_v62  ;;  %v5628_v62 = vor.u32 %v6768_v32, %v5627_v38 }
 0x22a   :  { %5767 = vmatmul.msk.bf16.gmra.mxu2 %vm1008_vm4, %v5568_v53 }
 0x22d   :  { %1142 = vmatmul.bf16.gmra.mxu1 %v5556_v43 }
 0x23a   :  { %5768 = vmatmul.msk.bf16.gmra.mxu2 %vm1008_vm4, %v5576_v59  ;;  %v6762_v59 = vld [vmem:[%s11733_s6 + $0xb4] sm:$0xf0] }
 0x23b   :  { %v5604_v14 = vor.u32 %v6762_v59, %v5603_v11 }
 0x23d   :  { %1147 = vmatmul.bf16.gmra.mxu1 %v5564_v31  ;;  %v5616_v31 = vor.u32 %v6763_v52, %v5613_v25  ;;  %v5635_v25 = vld [vmem:[%s11733_s6 + $0xf0] sm:$0xf] }
 0x24a   :  { %5769 = vmatmul.msk.bf16.gmra.mxu2 %vm1008_vm4, %v5584_v2 }
 0x24d   :  { %1152 = vmatmul.bf16.gmra.mxu1 %v5572_v20  ;;  %v1286_v55 = vpop.f32.mrf.mxu2 }
 0x255   :  { %v1288_v34 = vpop.f32.mrf.mxu2 }
 0x25a   :  { %v1118_v49 = vpop.f32.mrf.mxu1  ;;  %5770 = vmatmul.msk.bf16.gmra.mxu2 %vm1008_vm4, %v5592_v21 }
 0x25b   :  { %v1287_v42 = vadd.f32 %v1286_v55, %v1118_v49  ;;  %v5611_v55 = vld [vmem:[%s11733_s6 + $0xc0] sm:$0xf] }
 0x25d   :  { %1157 = vmatmul.bf16.gmra.mxu1 %v5580_v13  ;;  %v1291_v37 = vpop.f32.mrf.mxu2 }
 0x262   :  { %v1120_v22 = vpop.f32.mrf.mxu1 }
 0x263   :  { %v1289_v29 = vadd.f32 %v1288_v34, %v1120_v22  ;;  %v5612_v34 = vor.u32 %v6764_v23, %v5611_v55  ;;  %v5629_v22 = vld [vmem:[%s11733_s6 + $0xe8] sm:$0xf0] }
 0x265   :  { %v1445_v0 = vpack.c.bf16 %v1289_v29, %v1287_v42  ;;  %v1293_v6 = vpop.f32.mrf.mxu2  ;;  %v6830_v42 = vld [vmem:[%s11734_s7 + $0xe8] sm:$0xff] }
 0x266   :  { %7019 = vmatpush.bf16.msrb.mxu1 %v6830_v42  ;;  %2147 = vmatpush.bf16.msrb.mxu0 %v6830_v42 }
 0x267   :  { %2069 = vmatmul.bf16.vlgmr.msra.gmra.mxu3 %v1445_v0 }
 0x26a   :  { %v1123_v3 = vpop.f32.mrf.mxu1  ;;  %5771 = vmatmul.msk.bf16.gmra.mxu2 %vm1008_vm4, %v5600_v48  ;;  %v6823_v48 = vld [vmem:[%s11734_s7 + $0xb0] sm:$0xff] }
 0x26b   :  { %v1292_v27 = vadd.f32 %v1291_v37, %v1123_v3  ;;  %v6767_v37 = vld [vmem:[%s11733_s6 + $0xe4] sm:$0xf] }
 0x26c   :  { %v5632_v0 = vor.u32 %v6767_v37, %v5629_v22  ;;  %v6827_v37 = vld [vmem:[%s11734_s7 + $0xd0] sm:$0xff] }
 0x26d   :  { %1162 = vmatmul.bf16.gmra.mxu1 %v5588_v39  ;;  %v1296_v8 = vpop.f32.mrf.mxu2  ;;  %v6822_v39 = vld [vmem:[%s11734_s7 + $0xa8] sm:$0xff] }
 0x272   :  { %v1125_v35 = vpop.f32.mrf.mxu1 }
 0x273   :  { %v1294_v36 = vadd.f32 %v1293_v6, %v1125_v35  ;;  %v6824_v6 = vld [vmem:[%s11734_s7 + $0xb8] sm:$0xff] }
 0x274   :  { %2117 = vmatpush.bf16.msra.mxu3 %v6824_v6  ;;  %v5637_v35 = vld [vmem:[%s11733_s6 + $0xf8] sm:$0xf0] }
 0x275   :  { %v1454_v7 = vpack.c.bf16 %v1294_v36, %v1292_v27  ;;  %v1298_v12 = vpop.f32.mrf.mxu2 }
 0x277   :  { %2074 = vmatmul.bf16.gmra.mxu3 %v1454_v7  ;;  %v5640_v7 = vor.u32 %v6769_v51, %v5637_v35  ;;  %v5669_v51 = vld [vmem:[%s11733_s6 + $0x138] sm:$0xf0] }
 0x278   :  { %2118 = vmatpush.bf16.msra.mxu3 %v6823_v48  ;;  %v6825_v48 = vld [vmem:[%s11734_s7 + $0xc0] sm:$0xff] }
 0x27a   :  { %v1128_v50 = vpop.f32.mrf.mxu1  ;;  %5772 = vmatmul.msk.bf16.gmra.mxu2 %vm1008_vm4, %v5608_v10  ;;  %v6819_v10 = vld [vmem:[%s11734_s7 + $0x90] sm:$0xff] }
 0x27b   :  { %v1297_v43 = vadd.f32 %v1296_v8, %v1128_v50 }
 0x27c   :  { %2119 = vmatpush.bf16.msra.mxu3 %v6822_v39 }
 0x27d   :  { %1167 = vmatmul.bf16.gmra.mxu1 %v5596_v5  ;;  %v1301_v45 = vpop.f32.mrf.mxu2  ;;  %v6818_v5 = vld [vmem:[%s11734_s7 + $0x88] sm:$0xff] }
 0x280   :  { %2120 = vmatpush.bf16.msra.mxu3 %v6821_v26  ;;  %v6776_v26 = vld [vmem:[%s11733_s6 + $0x124] sm:$0xf0] }
 0x282   :  { %v1130_v53 = vpop.f32.mrf.mxu1 }
 0x283   :  { %v1299_v57 = vadd.f32 %v1298_v12, %v1130_v53  ;;  %v6820_v12 = vld [vmem:[%s11734_s7 + $0x98] sm:$0xff]  ;;  %v5645_v53 = vld [vmem:[%s11733_s6 + $0x108] sm:$0xf0] }
 0x284   :  { %2121 = vmatpush.bf16.msra.mxu3 %v6820_v12 }
 0x285   :  { %v1463_v33 = vpack.c.bf16 %v1299_v57, %v1297_v43  ;;  %v1303_v1 = vpop.f32.mrf.mxu2  ;;  %v6817_v43 = vld [vmem:[%s11734_s7 + $0x80] sm:$0xff] }
 0x287   :  { %2079 = vmatmul.bf16.gmra.mxu3 %v1463_v33  ;;  %v5648_v33 = vor.u32 %v6771_v44, %v5645_v53 }
 0x288   :  { %2122 = vmatpush.bf16.msra.mxu3 %v6819_v10 }
 0x28a   :  { %v1133_v47 = vpop.f32.mrf.mxu1  ;;  %5773 = vmatmul.msk.bf16.gmra.mxu2 %vm1008_vm4, %v5616_v31 }
 0x28b   :  { %v1302_v16 = vadd.f32 %v1301_v45, %v1133_v47  ;;  %v6773_v47 = vld [vmem:[%s11733_s6 + $0x114] sm:$0xf] }
 0x28c   :  { %2123 = vmatpush.bf16.msra.mxu3 %v6818_v5 }
 0x28d   :  { %1172 = vmatmul.bf16.gmra.mxu1 %v5604_v14  ;;  %v1306_v40 = vpop.f32.mrf.mxu2  ;;  %v1472_v2 = vpack.c.bf16 %v1302_v16, %v1302_v16 }
 0x290   :  { %2124 = vmatpush.bf16.msra.mxu3 %v6817_v43  ;;  %v5667_v43 = vld [vmem:[%s11733_s6 + $0x130] sm:$0xf] }
 0x292   :  { %v1135_v17 = vpop.f32.mrf.mxu1 }
 0x293   :  { %v1304_v49 = vadd.f32 %v1303_v1, %v1135_v17  ;;  %v5636_v1 = vor.u32 %v6770_v60, %v5635_v25 }
 0x295   :  { %v1308_v20 = vpop.f32.mrf.mxu2 }
 0x297   :  { %2084 = vmatmul.bf16.gmra.mxu3 %v1472_v2 }
 0x29a   :  { %v1138_v61 = vpop.f32.mrf.mxu1  ;;  %5774 = vmatmul.msk.bf16.gmra.mxu2 %vm1008_vm4, %v5624_v54  ;;  %v6829_v54 = vld [vmem:[%s11734_s7 + $0xe0] sm:$0xff] }
 0x29b   :  { %v1307_v21 = vadd.f32 %v1306_v40, %v1138_v61  ;;  %v5653_v40 = vld [vmem:[%s11733_s6 + $0x118] sm:$0xf0]  ;;  %2148 = vmatpush.bf16.msrb.mxu0 %v6829_v54  ;;  %7020 = vmatpush.bf16.msrb.mxu1 %v6829_v54  ;;  %v6780_v54 = vld [vmem:[%s11733_s6 + $0x144] sm:$0xf0] }
 0x29c   :  { %v5656_v2 = vor.u32 %v6773_v47, %v5653_v40  ;;  %v6838_v47 = vld [vmem:[%s11734_s7 + $0x128] sm:$0xff] }
 0x29d   :  { %1177 = vmatmul.bf16.gmra.mxu1 %v5612_v34  ;;  %v1311_v30 = vpop.f32.mrf.mxu2  ;;  %v1446_v29 = vpack.c.bf16 %v1307_v21, %v1304_v49  ;;  %v6828_v34 = vld [vmem:[%s11734_s7 + $0xd8] sm:$0xff]  ;;  %v5661_v49 = vld [vmem:[%s11733_s6 + $0x128] sm:$0xf0] }
 0x29f   :  { %2149 = vmatpush.bf16.msrb.mxu0 %v6828_v34  ;;  %7021 = vmatpush.bf16.msrb.mxu1 %v6828_v34 }
 0x2a2   :  { %v1140_v13 = vpop.f32.mrf.mxu1 }
 0x2a3   :  { %v1309_v15 = vadd.f32 %v1308_v20, %v1140_v13  ;;  %v5644_v20 = vor.u32 %v6772_v9, %v5643_v46  ;;  %v6775_v13 = vld [vmem:[%s11733_s6 + $0x124] sm:$0xf]  ;;  %2150 = vmatpush.bf16.msrb.mxu0 %v6827_v37  ;;  %7022 = vmatpush.bf16.msrb.mxu1 %v6827_v37  ;;  %v6781_v46 = vld [vmem:[%s11733_s6 + $0x154] sm:$0xf]  ;;  %v5685_v9 = vld [vmem:[%s11733_s6 + $0x158] sm:$0xf0] }
 0x2a4   :  { %v5664_v24 = vor.u32 %v6775_v13, %v5661_v49  ;;  %v5688_v34 = vor.u32 %v6781_v46, %v5685_v9  ;;  %v6847_v9 = vld [vmem:[%s11734_s7 + $0x170] sm:$0xff] }
 0x2a5   :  { %v1313_v63 = vpop.f32.mrf.mxu2 }
 0x2a7   :  { %2097 = vmatmul.bf16.vlgmr.msrb.gmra.mxu3 %v1446_v29  ;;  %v5651_v29 = vld [vmem:[%s11733_s6 + $0x110] sm:$0xf]  ;;  %2151 = vmatpush.bf16.msrb.mxu0 %v6826_v41 }
 0x2a8   :  { %7023 = vmatpush.bf16.msrb.mxu1 %v6826_v41 }
 0x2aa   :  { %v1143_v18 = vpop.f32.mrf.mxu1  ;;  %5775 = vmatmul.msk.bf16.gmra.mxu2 %vm1008_vm4, %v5632_v0 }
 0x2ab   :  { %v1312_v3 = vadd.f32 %v1311_v30, %v1143_v18  ;;  %2152 = vmatpush.bf16.msrb.mxu0 %v6825_v48 }
 0x2ac   :  { %7024 = vmatpush.bf16.msrb.mxu1 %v6825_v48  ;;  %v8274_v48 = vld [vmem:[%s11735_s8] ss:$0 sm:$0xff] }
 0x2ad   :  { %1182 = vmatmul.bf16.gmra.mxu1 %v5620_v4  ;;  %v1316_v56 = vpop.f32.mrf.mxu2  ;;  %v1455_v27 = vpack.c.bf16 %v1312_v3, %v1309_v15  ;;  %v6777_v15 = vld [vmem:[%s11733_s6 + $0x134] sm:$0xf] }
 0x2ae   :  { %v5672_v38 = vor.u32 %v6777_v15, %v5669_v51  ;;  %v6782_v15 = vld [vmem:[%s11733_s6 + $0x154] sm:$0xf0] }
 0x2b2   :  { %v1145_v8 = vpop.f32.mrf.mxu1 }
 0x2b3   :  { %v1314_v28 = vadd.f32 %v1313_v63, %v1145_v8  ;;  %v6774_v63 = vld [vmem:[%s11733_s6 + $0x114] sm:$0xf0] }
 0x2b4   :  { %v5652_v0 = vor.u32 %v6774_v63, %v5651_v29  ;;  %v6834_v63 = vld [vmem:[%s11734_s7 + $0x108] sm:$0xff] }
 0x2b5   :  { %v1318_v36 = vpop.f32.mrf.mxu2 }
 0x2b7   :  { %2102 = vmatmul.bf16.gmra.mxu3 %v1455_v27 }
 0x2ba   :  { %v1148_v19 = vpop.f32.mrf.mxu1  ;;  %5776 = vmatmul.msk.bf16.gmra.mxu2 %vm1008_vm4, %v5640_v7 }
 0x2bb   :  { %v1317_v50 = vadd.f32 %v1316_v56, %v1148_v19 }
 0x2bd   :  { %1187 = vmatmul.bf16.gmra.mxu1 %v5628_v62  ;;  %v1321_v58 = vpop.f32.mrf.mxu2  ;;  %v1464_v57 = vpack.c.bf16 %v1317_v50, %v1314_v28  ;;  %v6779_v50 = vld [vmem:[%s11733_s6 + $0x144] sm:$0xf]  ;;  %v6840_v28 = vld [vmem:[%s11734_s7 + $0x138] sm:$0xff] }
 0x2be   :  { %2173 = vmatpush.bf16.msrb.mxu3 %v6840_v28  ;;  %v5691_v28 = vld [vmem:[%s11733_s6 + $0x160] sm:$0xf] }
 0x2c2   :  { %v1150_v45 = vpop.f32.mrf.mxu1 }
 0x2c3   :  { %v1319_v31 = vadd.f32 %v1318_v36, %v1150_v45  ;;  %v5659_v36 = vld [vmem:[%s11733_s6 + $0x120] sm:$0xf]  ;;  %v5677_v45 = vld [vmem:[%s11733_s6 + $0x148] sm:$0xf0] }
 0x2c4   :  { %v5660_v32 = vor.u32 %v6776_v26, %v5659_v36 }
 0x2c5   :  { %v1323_v52 = vpop.f32.mrf.mxu2  ;;  %v1473_v16 = vpack.c.bf16 %v1319_v31, %v1319_v31 }
 0x2c7   :  { %2107 = vmatmul.bf16.gmra.mxu3 %v1464_v57  ;;  %v6778_v57 = vld [vmem:[%s11733_s6 + $0x134] sm:$0xf0] }
 0x2c8   :  { %v5668_v25 = vor.u32 %v6778_v57, %v5667_v43 }
 0x2ca   :  { %v1153_v11 = vpop.f32.mrf.mxu1  ;;  %5777 = vmatmul.msk.bf16.gmra.mxu2 %vm1008_vm4, %v5648_v33 }
 0x2cb   :  { %v1322_v21 = vadd.f32 %v1321_v58, %v1153_v11 }
 0x2cd   :  { %1192 = vmatmul.bf16.gmra.mxu1 %v5636_v1  ;;  %v1326_v59 = vpop.f32.mrf.mxu2 }
 0x2d2   :  { %v1155_v14 = vpop.f32.mrf.mxu1 }
 0x2d3   :  { %v1324_v61 = vadd.f32 %v1323_v52, %v1155_v14  ;;  %v5680_v52 = vor.u32 %v6779_v50, %v5677_v45  ;;  %v6839_v14 = vld [vmem:[%s11734_s7 + $0x130] sm:$0xff]  ;;  %v5701_v50 = vld [vmem:[%s11733_s6 + $0x178] sm:$0xf0] }
 0x2d4   :  { %2174 = vmatpush.bf16.msrb.mxu3 %v6839_v14 }
 0x2d5   :  { %v1328_v17 = vpop.f32.mrf.mxu2  ;;  %v1447_v22 = vpack.c.bf16 %v1324_v61, %v1322_v21  ;;  %v6836_v61 = vld [vmem:[%s11734_s7 + $0x118] sm:$0xff] }
 0x2d7   :  { %2112 = vmatmul.bf16.gmra.mxu3 %v1473_v16 }
 0x2d8   :  { %2175 = vmatpush.bf16.msrb.mxu3 %v6838_v47 }
 0x2da   :  { %v1158_v55 = vpop.f32.mrf.mxu1  ;;  %5778 = vmatmul.msk.bf16.gmra.mxu2 %vm1008_vm4, %v5656_v2 }
 0x2db   :  { %v1327_v8 = vadd.f32 %v1326_v59, %v1158_v55  ;;  %v6837_v55 = vld [vmem:[%s11734_s7 + $0x120] sm:$0xff] }
 0x2dc   :  { %2176 = vmatpush.bf16.msrb.mxu3 %v6837_v55 }
 0x2dd   :  { %1197 = vmatmul.bf16.gmra.mxu1 %v5644_v20  ;;  %v1331_v23 = vpop.f32.mrf.mxu2 }
 0x2e0   :  { %2177 = vmatpush.bf16.msrb.mxu3 %v6836_v61 }
 0x2e2   :  { %v1160_v30 = vpop.f32.mrf.mxu1 }
 0x2e3   :  { %v1329_v56 = vadd.f32 %v1328_v17, %v1160_v30 }
 0x2e5   :  { %v1333_v42 = vpop.f32.mrf.mxu2  ;;  %v1456_v35 = vpack.c.bf16 %v1329_v56, %v1327_v8  ;;  %v5683_v8 = vld [vmem:[%s11733_s6 + $0x150] sm:$0xf] }
 0x2e7   :  { %2125 = vmatmul.bf16.vlgmr.msra.gmra.mxu3 %v1447_v22  ;;  %v6835_v22 = vld [vmem:[%s11734_s7 + $0x110] sm:$0xff] }
 0x2e8   :  { %2178 = vmatpush.bf16.msrb.mxu3 %v6835_v22  ;;  %v6844_v22 = vld [vmem:[%s11734_s7 + $0x158] sm:$0xff] }
 0x2ea   :  { %v1163_v6 = vpop.f32.mrf.mxu1  ;;  %v8185_v4 = vpop.f32.mrf.mxu3  ;;  %5779 = vmatmul.msk.bf16.gmra.mxu2 %vm1008_vm4, %v5664_v24 }
 0x2eb   :  { %v1332_v5 = vadd.f32 %v1331_v23, %v1163_v6  ;;  %v5675_v23 = vld [vmem:[%s11733_s6 + $0x140] sm:$0xf]  ;;  %v6783_v6 = vld [vmem:[%s11733_s6 + $0x164] sm:$0xf] }
 0x2ec   :  { %v5676_v30 = vor.u32 %v6780_v54, %v5675_v23  ;;  %2179 = vmatpush.bf16.msrb.mxu3 %v6834_v63  ;;  %v6846_v23 = vld [vmem:[%s11734_s7 + $0x168] sm:$0xff] }
 0x2ed   :  { %1202 = vmatmul.bf16.gmra.mxu1 %v5652_v0  ;;  %v1336_v18 = vpop.f32.mrf.mxu2 }
 0x2f2   :  { %v1165_v39 = vpop.f32.mrf.mxu1  ;;  %v8191_v3 = vpop.f32.mrf.mxu3 }
 0x2f3   :  { %v1334_v19 = vadd.f32 %v1333_v42, %v1165_v39  ;;  %v6833_v39 = vld [vmem:[%s11734_s7 + $0x100] sm:$0xff] }
 0x2f4   :  { %2180 = vmatpush.bf16.msrb.mxu3 %v6833_v39  ;;  %v5707_v39 = vld [vmem:[%s11733_s6 + $0x180] sm:$0xf] }
 0x2f5   :  { %v1338_v27 = vpop.f32.mrf.mxu2  ;;  %v1465_v44 = vpack.c.bf16 %v1334_v19, %v1332_v5 }
 0x2f7   :  { %2130 = vmatmul.bf16.gmra.mxu3 %v1456_v35  ;;  %v2071_v35 = vadd.f32 %v8274_v48, %v8185_v4  ;;  %v6785_v4 = vld [vmem:[%s11733_s6 + $0x174] sm:$0xf] }
 0x2fa   :  { %v1168_v7 = vpop.f32.mrf.mxu1  ;;  %v8205_v12 = vpop.f32.mrf.mxu3  ;;  %5780 = vmatmul.msk.bf16.gmra.mxu2 %vm1008_vm4, %v5672_v38 }
 0x2fb   :  { %v1337_v40 = vadd.f32 %v1336_v18, %v1168_v7  ;;  %v5693_v18 = vld [vmem:[%s11733_s6 + $0x168] sm:$0xf0]  ;;  %v2076_v43 = vadd.f32 %v8274_v48, %v8205_v12  ;;  %v6787_v12 = vld [vmem:[%s11733_s6 + $0x184] sm:$0xf] }
 0x2fc   :  { %v5696_v51 = vor.u32 %v6783_v6, %v5693_v18  ;;  %v6843_v6 = vld [vmem:[%s11734_s7 + $0x150] sm:$0xff] }
 0x2fd   :  { %1207 = vmatmul.bf16.gmra.mxu1 %v5660_v32  ;;  %v1341_v62 = vpop.f32.mrf.mxu2  ;;  %v1474_v2 = vpack.c.bf16 %v1337_v40, %v1337_v40  ;;  %v5709_v40 = vld [vmem:[%s11733_s6 + $0x188] sm:$0xf0] }
 0x2fe   :  { %v5712_v55 = vor.u32 %v6787_v12, %v5709_v40 }
 0x302   :  { %v1170_v10 = vpop.f32.mrf.mxu1  ;;  %v8208_v58 = vpop.f32.mrf.mxu3 }
 0x303   :  { %v1339_v1 = vadd.f32 %v1338_v27, %v1170_v10  ;;  %v5684_v27 = vor.u32 %v6782_v15, %v5683_v8  ;;  %v6788_v8 = vld [vmem:[%s11733_s6 + $0x184] sm:$0xf0] }
 0x305   :  { %v1343_v53 = vpop.f32.mrf.mxu2 }
 0x307   :  { %2135 = vmatmul.bf16.gmra.mxu3 %v1465_v44  ;;  %v6784_v44 = vld [vmem:[%s11733_s6 + $0x164] sm:$0xf0] }
 0x308   :  { %v5692_v57 = vor.u32 %v6784_v44, %v5691_v28 }
 0x30a   :  { %v1173_v60 = vpop.f32.mrf.mxu1  ;;  %v8225_v33 = vpop.f32.mrf.mxu3  ;;  %5781 = vmatmul.msk.bf16.gmra.mxu2 %vm1008_vm4, %v5680_v52 }
 0x30b   :  { %v1342_v11 = vadd.f32 %v1341_v62, %v1173_v60  ;;  %v2081_v54 = vadd.f32 %v8274_v48, %v8225_v33 }
 0x30d   :  { %v1448_v59 = vpack.c.bf16 %v1342_v11, %v1339_v1  ;;  %1212 = vmatmul.bf16.gmra.mxu1 %v5668_v25  ;;  %v1346_v31 = vpop.f32.mrf.mxu2  ;;  %v6848_v11 = vld [vmem:[%s11734_s7 + $0x178] sm:$0xff] }
 0x30e   :  { %2201 = vmatpush.bf16.msra.mxu0 %v6848_v11 }
 0x30f   :  { %2153 = vmatmul.bf16.vlgmr.msrb.gmra.mxu0 %v1448_v59 }
 0x312   :  { %v1175_v16 = vpop.f32.mrf.mxu1  ;;  %v8234_v17 = vpop.f32.mrf.mxu3  ;;  %2202 = vmatpush.bf16.msra.mxu0 %v6847_v9  ;;  %v6793_v9 = vld [vmem:[%s11733_s6 + $0x1b4] sm:$0xf] }
 0x313   :  { %v1344_v49 = vadd.f32 %v1343_v53, %v1175_v16  ;;  %v5704_v53 = vor.u32 %v6785_v4, %v5701_v50  ;;  %v6841_v4 = vld [vmem:[%s11734_s7 + $0x140] sm:$0xff] }
 0x315   :  { %v1348_v20 = vpop.f32.mrf.mxu2 }
 0x316   :  { %2203 = vmatpush.bf16.msra.mxu0 %v6846_v23  ;;  %v5723_v23 = vld [vmem:[%s11733_s6 + $0x1a0] sm:$0xf] }
 0x317   :  { %2140 = vmatmul.bf16.gmra.mxu3 %v1474_v2  ;;  %v5699_v2 = vld [vmem:[%s11733_s6 + $0x170] sm:$0xf] }
 0x31a   :  { %v1178_v21 = vpop.f32.mrf.mxu1  ;;  %v8254_v13 = vpop.f32.mrf.mxu3  ;;  %5782 = vmatmul.msk.bf16.gmra.mxu2 %vm1008_vm4, %v5688_v34 }
 0x31b   :  { %v1347_v37 = vadd.f32 %v1346_v31, %v1178_v21 }
 0x31d   :  { %v1457_v42 = vpack.c.bf16 %v1347_v37, %v1344_v49  ;;  %1217 = vmatmul.bf16.gmra.mxu1 %v5676_v30  ;;  %v1351_v29 = vpop.f32.mrf.mxu2  ;;  %v6845_v37 = vld [vmem:[%s11734_s7 + $0x160] sm:$0xff] }
 0x31e   :  { %2204 = vmatpush.bf16.msra.mxu0 %v6845_v37 }
 0x31f   :  { %2158 = vmatmul.bf16.gmra.mxu0 %v1457_v42 }
 0x322   :  { %v1180_v24 = vpop.f32.mrf.mxu1  ;;  %v2087_v41 = vpop.f32.mrf.mxu3  ;;  %2205 = vmatpush.bf16.msra.mxu0 %v6844_v22 }
 0x323   :  { %v8263_v0 = vadd.f32 %v1348_v20, %v1180_v24  ;;  %v6786_v20 = vld [vmem:[%s11733_s6 + $0x174] sm:$0xf0]  ;;  %v6789_v24 = vld [vmem:[%s11733_s6 + $0x194] sm:$0xf]  ;;  %v5717_v41 = vld [vmem:[%s11733_s6 + $0x198] sm:$0xf0] }
 0x324   :  { %v5700_v34 = vor.u32 %v6786_v20, %v5699_v2  ;;  %v5720_v15 = vor.u32 %v6789_v24, %v5717_v41  ;;  %v5733_v2 = vld [vmem:[%s11733_s6 + $0x1b8] sm:$0xf0]  ;;  %v6855_v24 = vld [vmem:[%s11734_s7 + $0x1b0] sm:$0xff]  ;;  %v6854_v41 = vld [vmem:[%s11734_s7 + $0x1a8] sm:$0xff] }
 0x325   :  { %v1353_v56 = vpop.f32.mrf.mxu2 }
 0x326   :  { %2206 = vmatpush.bf16.msra.mxu0 %v6843_v6 }
 0x32a   :  { %v1183_v36 = vpop.f32.mrf.mxu1  ;;  %v2098_v26 = vpop.f32.mrf.mxu3  ;;  %5783 = vmatmul.msk.bf16.gmra.mxu2 %vm1008_vm4, %v5696_v51  ;;  %v6842_v51 = vld [vmem:[%s11734_s7 + $0x148] sm:$0xff] }
 0x32b   :  { %v8288_v38 = vadd.f32 %v1351_v29, %v1183_v36  ;;  %v8290_v32 = vadd.f32 %v2098_v26, %v2071_v35  ;;  %v2086_v35 = vadd.f32 %v8274_v48, %v8254_v13  ;;  %2207 = vmatpush.bf16.msra.mxu0 %v6842_v51  ;;  %v6791_v13 = vld [vmem:[%s11733_s6 + $0x1a4] sm:$0xf]  ;;  %v6794_v51 = vld [vmem:[%s11733_s6 + $0x1b4] sm:$0xf0] }
 0x32d   :  { %v1466_v7 = vpack.c.bf16 %v8288_v38, %v8263_v0  ;;  %1222 = vmatmul.bf16.gmra.mxu1 %v5684_v27  ;;  %v1356_v62 = vpop.f32.mrf.mxu2  ;;  %v5708_v27 = vor.u32 %v6788_v8, %v5707_v39  ;;  %v6853_v8 = vld [vmem:[%s11734_s7 + $0x1a0] sm:$0xff] }
 0x32f   :  { %2208 = vmatpush.bf16.msra.mxu0 %v6841_v4 }
 0x332   :  { %v1185_v19 = vpop.f32.mrf.mxu1  ;;  %v8294_v10 = vpop.f32.mrf.mxu3 }
 0x333   :  { %v8296_v5 = vadd.f32 %v1353_v56, %v1185_v19 }
 0x335   :  { %v1358_v45 = vpop.f32.mrf.mxu2 }
 0x33a   :  { %v1188_v52 = vpop.f32.mrf.mxu1  ;;  %v2103_v25 = vpop.f32.mrf.mxu3  ;;  %5784 = vmatmul.msk.bf16.gmra.mxu2 %vm1008_vm4, %v5704_v53  ;;  %v5725_v53 = vld [vmem:[%s11733_s6 + $0x1a8] sm:$0xf0] }
 0x33b   :  { %v8313_v60 = vadd.f32 %v2103_v25, %v2076_v43  ;;  %v1357_v14 = vadd.f32 %v1356_v62, %v1188_v52  ;;  %v5715_v52 = vld [vmem:[%s11733_s6 + $0x190] sm:$0xf]  ;;  %v6790_v25 = vld [vmem:[%s11733_s6 + $0x194] sm:$0xf0] }
 0x33c   :  { %v5716_v11 = vor.u32 %v6790_v25, %v5715_v52  ;;  %v6797_v25 = vld [vmem:[%s11733_s6 + $0x1d4] sm:$0xf] }
 0x33d   :  { %1227 = vmatmul.bf16.gmra.mxu1 %v5692_v57  ;;  %v1361_v1 = vpop.f32.mrf.mxu2 }
 0x342   :  { %v1190_v59 = vpop.f32.mrf.mxu1  ;;  %v8318_v31 = vpop.f32.mrf.mxu3 }
 0x343   :  { %v1359_v47 = vadd.f32 %v1358_v45, %v1190_v59 }
 0x345   :  { %v1449_v16 = vpack.c.bf16 %v1359_v47, %v1357_v14  ;;  %v1363_v46 = vpop.f32.mrf.mxu2 }
 0x347   :  { %2181 = vmatmul.bf16.vlgmr.msrb.gmra.mxu3 %v1449_v16 }
 0x34a   :  { %v1193_v61 = vpop.f32.mrf.mxu1  ;;  %v2108_v30 = vpop.f32.mrf.mxu3  ;;  %5785 = vmatmul.msk.bf16.gmra.mxu2 %vm1008_vm4, %v5712_v55 }
 0x34b   :  { %v8341_v21 = vadd.f32 %v2108_v30, %v2081_v54  ;;  %v1362_v29 = vadd.f32 %v1361_v1, %v1193_v61  ;;  %v5728_v1 = vor.u32 %v6791_v13, %v5725_v53  ;;  %v6792_v54 = vld [vmem:[%s11733_s6 + $0x1a4] sm:$0xf0] }
 0x34c   :  { %v5724_v61 = vor.u32 %v6792_v54, %v5723_v23 }
 0x34d   :  { %1232 = vmatmul.bf16.gmra.mxu1 %v5700_v34  ;;  %v1366_v49 = vpop.f32.mrf.mxu2  ;;  %v5736_v34 = vor.u32 %v6793_v9, %v5733_v2 }
 0x352   :  { %v1195_v33 = vpop.f32.mrf.mxu1  ;;  %v8349_v42 = vpop.f32.mrf.mxu3 }
 0x353   :  { %v1364_v63 = vadd.f32 %v1363_v46, %v1195_v33 }
 0x355   :  { %v1458_v18 = vpack.c.bf16 %v1364_v63, %v1362_v29  ;;  %v1368_v56 = vpop.f32.mrf.mxu2 }
 0x357   :  { %2186 = vmatmul.bf16.gmra.mxu3 %v1458_v18 }
 0x35a   :  { %v1198_v36 = vpop.f32.mrf.mxu1  ;;  %v2113_v26 = vpop.f32.mrf.mxu3  ;;  %5786 = vmatmul.msk.bf16.gmra.mxu2 %vm1008_vm4, %v5720_v15  ;;  %v5731_v15 = vld [vmem:[%s11733_s6 + $0x1b0] sm:$0xf] }
 0x35b   :  { %v8372_v62 = vadd.f32 %v2113_v26, %v2086_v35  ;;  %v1367_v28 = vadd.f32 %v1366_v49, %v1198_v36  ;;  %v5732_v36 = vor.u32 %v6794_v51, %v5731_v15  ;;  %v6864_v51 = vld [vmem:[%s11734_s7 + $0x1f8] sm:$0xff] }
 0x35c   :  { %2257 = vmatpush.bf16.msrb.mxu0 %v6864_v51 }
 0x35d   :  { %1237 = vmatmul.bf16.gmra.mxu1 %v5708_v27  ;;  %v1371_v19 = vpop.f32.mrf.mxu2  ;;  %v6852_v27 = vld [vmem:[%s11734_s7 + $0x198] sm:$0xff] }
 0x362   :  { %v1200_v50 = vpop.f32.mrf.mxu1  ;;  %v2115_v45 = vpop.f32.mrf.mxu3 }
 0x363   :  { %v1369_v44 = vadd.f32 %v1368_v56, %v1200_v50  ;;  %v5741_v56 = vld [vmem:[%s11733_s6 + $0x1c8] sm:$0xf0] }
 0x365   :  { %v1467_v43 = vpack.c.bf16 %v1369_v44, %v1367_v28  ;;  %v1373_v57 = vpop.f32.mrf.mxu2  ;;  %v6851_v28 = vld [vmem:[%s11734_s7 + $0x190] sm:$0xff] }
 0x367   :  { %2191 = vmatmul.bf16.gmra.mxu3 %v1467_v43 }
 0x36a   :  { %v1203_v59 = vpop.f32.mrf.mxu1  ;;  %v2126_v14 = vpop.f32.mrf.mxu3  ;;  %5787 = vmatmul.msk.bf16.gmra.mxu2 %vm1008_vm4, %v5728_v1  ;;  %v5749_v1 = vld [vmem:[%s11733_s6 + $0x1d8] sm:$0xf0] }
 0x36b   :  { %v2127_v47 = vadd.f32 %v2126_v14, %v8290_v32  ;;  %v1372_v40 = vadd.f32 %v1371_v19, %v1203_v59  ;;  %v6856_v32 = vld [vmem:[%s11734_s7 + $0x1b8] sm:$0xff]  ;;  %v6849_v14 = vld [vmem:[%s11734_s7 + $0x180] sm:$0xff]  ;;  %v5752_v9 = vor.u32 %v6797_v25, %v5749_v1 }
 0x36c   :  { %2229 = vmatpush.bf16.msra.mxu3 %v6856_v32 }
 0x36d   :  { %1242 = vmatmul.bf16.gmra.mxu1 %v5716_v11  ;;  %v1376_v12 = vpop.f32.mrf.mxu2  ;;  %v1476_v20 = vpack.c.bf16 %v1372_v40, %v1372_v40  ;;  %v5739_v40 = vld [vmem:[%s11733_s6 + $0x1c0] sm:$0xf] }
 0x370   :  { %2230 = vmatpush.bf16.msra.mxu3 %v6855_v24  ;;  %v5757_v24 = vld [vmem:[%s11733_s6 + $0x1e8] sm:$0xf0] }
 0x372   :  { %v1205_v16 = vpop.f32.mrf.mxu1  ;;  %v8391_v46 = vpop.f32.mrf.mxu3 }
 0x373   :  { %v1374_v37 = vadd.f32 %v1373_v57, %v1205_v16  ;;  %v6850_v57 = vld [vmem:[%s11734_s7 + $0x188] sm:$0xff] }
 0x374   :  { %2231 = vmatpush.bf16.msra.mxu3 %v6854_v41  ;;  %v6796_v16 = vld [vmem:[%s11733_s6 + $0x1c4] sm:$0xf0]  ;;  %v5747_v41 = vld [vmem:[%s11733_s6 + $0x1d0] sm:$0xf] }
 0x375   :  { %v1378_v55 = vpop.f32.mrf.mxu2 }
 0x377   :  { %2196 = vmatmul.bf16.gmra.mxu3 %v1476_v20  ;;  %v5740_v20 = vor.u32 %v6796_v16, %v5739_v40  ;;  %v6859_v16 = vld [vmem:[%s11734_s7 + $0x1d0] sm:$0xff] }
 0x378   :  { %2232 = vmatpush.bf16.msra.mxu3 %v6853_v8 }
 0x37a   :  { %v1208_v30 = vpop.f32.mrf.mxu1  ;;  %v2131_v49 = vpop.f32.mrf.mxu3  ;;  %5788 = vmatmul.msk.bf16.gmra.mxu2 %vm1008_vm4, %v5736_v34 }
 0x37b   :  { %v1377_v22 = vadd.f32 %v1376_v12, %v1208_v30  ;;  %v8410_v33 = vadd.f32 %v2131_v49, %v8313_v60  ;;  %v6795_v60 = vld [vmem:[%s11733_s6 + $0x1c4] sm:$0xf]  ;;  %v6952_v12 = vld [vmem:[%s11736_s13 + $0x274] sm:$0xf0] }
 0x37c   :  { %v5744_v35 = vor.u32 %v6795_v60, %v5741_v56  ;;  %2233 = vmatpush.bf16.msra.mxu3 %v6852_v27 }
 0x37d   :  { %v1450_v29 = vpack.c.bf16 %v1377_v22, %v1374_v37  ;;  %1247 = vmatmul.bf16.gmra.mxu1 %v5724_v61  ;;  %v1381_v63 = vpop.f32.mrf.mxu2 }
 0x37f   :  { %2209 = vmatmul.bf16.vlgmr.msra.gmra.mxu0 %v1450_v29 }
 0x380   :  { %2234 = vmatpush.bf16.msra.mxu3 %v6851_v28  ;;  %v6863_v28 = vld [vmem:[%s11734_s7 + $0x1f0] sm:$0xff] }
 0x381   :  { %2258 = vmatpush.bf16.msrb.mxu0 %v6863_v28 }
 0x382   :  { %v1210_v6 = vpop.f32.mrf.mxu1  ;;  %v8418_v18 = vpop.f32.mrf.mxu3 }
 0x383   :  { %v1379_v4 = vadd.f32 %v1378_v55, %v1210_v6 }
 0x384   :  { %2235 = vmatpush.bf16.msra.mxu3 %v6850_v57  ;;  %v6862_v57 = vld [vmem:[%s11734_s7 + $0x1e8] sm:$0xff] }
 0x385   :  { %v1383_v39 = vpop.f32.mrf.mxu2  ;;  %2259 = vmatpush.bf16.msrb.mxu0 %v6862_v57  ;;  %v6867_v57 = vld [vmem:[%s11734_s7 + $0x210] sm:$0xff] }
 0x388   :  { %2236 = vmatpush.bf16.msra.mxu3 %v6849_v14  ;;  %v6860_v14 = vld [vmem:[%s11734_s7 + $0x1d8] sm:$0xff] }
 0x38a   :  { %v1213_v26 = vpop.f32.mrf.mxu1  ;;  %v2136_v19 = vpop.f32.mrf.mxu3  ;;  %5789 = vmatmul.msk.bf16.gmra.mxu2 %vm1008_vm4, %v5744_v35  ;;  %v722_v35 = vld [vmem:[%s11733_s6 + $0x1f0] sm:$0xff] }
 0x38b   :  { %v1382_v50 = vadd.f32 %v1381_v63, %v1213_v26  ;;  %v8440_v45 = vadd.f32 %v2136_v19, %v8341_v21  ;;  %v6799_v63 = vld [vmem:[%s11733_s6 + $0x1e4] sm:$0xf] }
 0x38c   :  { %v2154_v44 = vpop.f32.mrf.mxu0  ;;  %v5760_v6 = vor.u32 %v6799_v63, %v5757_v24 }
 0x38d   :  { %v1459_v13 = vpack.c.bf16 %v1382_v50, %v1379_v4  ;;  %v8445_v53 = vadd.f32 %v2154_v44, %v2127_v47  ;;  %1252 = vmatmul.bf16.gmra.mxu1 %v5732_v36  ;;  %v1386_v43 = vpop.f32.mrf.mxu2  ;;  %v6451_v47 = vld [vmem:[%s11736_s13 + $0x270] sm:$0xf]  ;;  %v911_v36 = vunpack.c.h.b16 %v722_v35  ;;  %v5755_v44 = vld [vmem:[%s11733_s6 + $0x1e0] sm:$0xf] }
 0x38e   :  { %v6452_v2 = vor.u32 %v6952_v12, %v6451_v47 }
 0x38f   :  { %2214 = vmatmul.bf16.gmra.mxu0 %v1459_v13  ;;  %v6800_v13 = vld [vmem:[%s11733_s6 + $0x1e4] sm:$0xf0] }
 0x390   :  { %4031 = vmatpush.bf16.msrb.mxu2 %v6452_v2 }
 0x392   :  { %v1215_v52 = vpop.f32.mrf.mxu1  ;;  %v8450_v21 = vpop.f32.mrf.mxu3 }
 0x393   :  { %v1384_v23 = vadd.f32 %v1383_v39, %v1215_v52  ;;  %v5756_v52 = vor.u32 %v6800_v13, %v5755_v44 }
 0x394   :  { %v8458_v11 = vpop.f32.mrf.mxu0 }
 0x395   :  { %v1388_v59 = vpop.f32.mrf.mxu2 }
 0x39a   :  { %v1218_v55 = vpop.f32.mrf.mxu1  ;;  %v2141_v32 = vpop.f32.mrf.mxu3  ;;  %5790 = vmatmul.msk.bf16.gmra.mxu2 %vm1008_vm4, %v5752_v9 }
 0x39b   :  { %v1387_v54 = vadd.f32 %v1386_v43, %v1218_v55  ;;  %v8477_v34 = vadd.f32 %v2141_v32, %v8372_v62  ;;  %v975_v43 = vpack.c.b16 %v911_v36, %v911_v36  ;;  %v6872_v55 = vld [vmem:[%s11734_s7 + $0x238] sm:$0xff]  ;;  %v6858_v32 = vld [vmem:[%s11734_s7 + $0x1c8] sm:$0xff] }
 0x39c   :  { %v2159_v61 = vpop.f32.mrf.mxu0  ;;  %2285 = vmatpush.bf16.msrb.mxu3 %v6872_v55  ;;  %v6865_v55 = vld [vmem:[%s11734_s7 + $0x200] sm:$0xff] }
 0x39d   :  { %v1468_v30 = vpack.c.bf16 %v1387_v54, %v1384_v23  ;;  %v8480_v49 = vadd.f32 %v2159_v61, %v8410_v33  ;;  %1257 = vmatmul.bf16.gmra.mxu1 %v5740_v20  ;;  %v1391_v37 = vpop.f32.mrf.mxu2  ;;  %v6798_v33 = vld [vmem:[%s11733_s6 + $0x1d4] sm:$0xf0]  ;;  %v910_v20 = vunpack.c.l.b16 %v722_v35 }
 0x39e   :  { %v5748_v56 = vor.u32 %v6798_v33, %v5747_v41  ;;  %v6950_v33 = vld [vmem:[%s11736_s13 + $0x264] sm:$0xf0] }
 0x39f   :  { %2219 = vmatmul.bf16.gmra.mxu0 %v1468_v30  ;;  %v974_v23 = vpack.c.b16 %v910_v20, %v910_v20 }
 0x3a2   :  { %v1220_v22 = vpop.f32.mrf.mxu1  ;;  %v2143_v29 = vpop.f32.mrf.mxu3 }
 0x3a3   :  { %v1389_v60 = vadd.f32 %v1388_v59, %v1220_v22  ;;  %v6861_v59 = vld [vmem:[%s11734_s7 + $0x1e0] sm:$0xff]  ;;  %v6871_v29 = vld [vmem:[%s11734_s7 + $0x230] sm:$0xff] }
 0x3a4   :  { %2260 = vmatpush.bf16.msrb.mxu0 %v6861_v59  ;;  %v6857_v22 = vld [vmem:[%s11734_s7 + $0x1c0] sm:$0xff]  ;;  %2286 = vmatpush.bf16.msrb.mxu3 %v6871_v29 }
 0x3a5   :  { %v1393_v62 = vpop.f32.mrf.mxu2  ;;  %v1477_v8 = vpack.c.bf16 %v1389_v60, %v1389_v60 }
 0x3a8   :  { %2261 = vmatpush.bf16.msrb.mxu0 %v6860_v14 }
 0x3aa   :  { %v1223_v39 = vpop.f32.mrf.mxu1  ;;  %5791 = vmatmul.msk.bf16.gmra.mxu2 %vm1008_vm4, %v5760_v6  ;;  %v6870_v6 = vld [vmem:[%s11734_s7 + $0x228] sm:$0xff] }
 0x3ab   :  { %v1392_v26 = vadd.f32 %v1391_v37, %v1223_v39  ;;  %2287 = vmatpush.bf16.msrb.mxu3 %v6870_v6 }
 0x3ac   :  { %2262 = vmatpush.bf16.msrb.mxu0 %v6859_v16 }
 0x3ad   :  { %1262 = vmatmul.bf16.gmra.mxu1 %v5748_v56  ;;  %v1396_v15 = vpop.f32.mrf.mxu2 }
 0x3af   :  { %2224 = vmatmul.bf16.gmra.mxu0 %v1477_v8 }
 0x3b0   :  { %2263 = vmatpush.bf16.msrb.mxu0 %v6858_v32 }
 0x3b2   :  { %v1225_v27 = vpop.f32.mrf.mxu1 }
 0x3b3   :  { %v1394_v19 = vadd.f32 %v1393_v62, %v1225_v27  ;;  %v6869_v27 = vld [vmem:[%s11734_s7 + $0x220] sm:$0xff] }
 0x3b4   :  { %2264 = vmatpush.bf16.msrb.mxu0 %v6857_v22  ;;  %2288 = vmatpush.bf16.msrb.mxu3 %v6869_v27 }
 0x3b5   :  { %v1451_v4 = vpack.c.bf16 %v1394_v19, %v1392_v26  ;;  %v1398_v50 = vpop.f32.mrf.mxu2 }
 0x3b7   :  { %2237 = vmatmul.bf16.vlgmr.msra.gmra.mxu3 %v1451_v4 }
 0x3ba   :  { %v1228_v25 = vpop.f32.mrf.mxu1  ;;  %5792 = vmatmul.msk.bf16.gmra.mxu2 %vm1008_vm4, %v975_v43  ;;  %vm4558_vm4 = vcmask 1040384  }
 0x3bb   :  { %v1397_v12 = vadd.f32 %v1396_v15, %v1228_v25 }
 0x3bd   :  { %1267 = vmatmul.bf16.gmra.mxu1 %v5756_v52  ;;  %v1401_v1 = vpop.f32.mrf.mxu2 }
 0x3c2   :  { %v1230_v47 = vpop.f32.mrf.mxu1 }
 0x3c3   :  { %v1399_v40 = vadd.f32 %v1398_v50, %v1230_v47 }
 0x3c5   :  { %v1460_v9 = vpack.c.bf16 %v1399_v40, %v1397_v12  ;;  %v1403_v2 = vpop.f32.mrf.mxu2 }
 0x3c7   :  { %2242 = vmatmul.bf16.gmra.mxu3 %v1460_v9 }
 0x3ca   :  { %v1233_v54 = vpop.f32.mrf.mxu1  ;;  %v2182_v61 = vpop.f32.mrf.mxu3 }
 0x3cb   :  { %v2183_v30 = vadd.f32 %v2182_v61, %v8445_v53  ;;  %v1402_v62 = vadd.f32 %v1401_v1, %v1233_v54  ;;  %v6443_v53 = vld [vmem:[%s11736_s13 + $0x260] sm:$0xf]  ;;  %v8568_v1 = vpop.f32.mrf.mxu0 }
 0x3cc   :  { %v6444_v60 = vor.u32 %v6950_v33, %v6443_v53 }
 0x3cd   :  { %1272 = vmatmul.bf16.gmra.mxu1 %v974_v23  ;;  %v1406_v37 = vpop.f32.mrf.mxu2 }
 0x3ce   :  { %4032 = vmatpush.bf16.msrb.mxu2 %v6444_v60  ;;  %v6435_v60 = vld [vmem:[%s11736_s13 + $0x250] sm:$0xf] }
 0x3d2   :  { %v1235_v63 = vpop.f32.mrf.mxu1  ;;  %v8536_v24 = vpop.f32.mrf.mxu3 }
 0x3d3   :  { %v1404_v41 = vadd.f32 %v1403_v2, %v1235_v63 }
 0x3d5   :  { %v1469_v56 = vpack.c.bf16 %v1404_v41, %v1402_v62  ;;  %v1408_v39 = vpop.f32.mrf.mxu2 }
 0x3d7   :  { %2247 = vmatmul.bf16.gmra.mxu3 %v1469_v56  ;;  %v6948_v56 = vld [vmem:[%s11736_s13 + $0x254] sm:$0xf0] }
 0x3da   :  { %v1238_v8 = vpop.f32.mrf.mxu1  ;;  %v2187_v15 = vpop.f32.mrf.mxu3 }
 0x3db   :  { %v2188_v51 = vadd.f32 %v2187_v15, %v8480_v49  ;;  %v1407_v36 = vadd.f32 %v1406_v37, %v1238_v8  ;;  %v6868_v49 = vld [vmem:[%s11734_s7 + $0x218] sm:$0xff] }
 0x3dc   :  { %2289 = vmatpush.bf16.msrb.mxu3 %v6868_v49 }
 0x3dd   :  { %2163 = vmatmul.bf16.vlgmr.msrb.gmra.mxu1 %v1466_v7  ;;  %v1411_v35 = vpop.f32.mrf.mxu2  ;;  %v1478_v4 = vpack.c.bf16 %v1407_v36, %v1407_v36  ;;  %v1475_v7 = vpack.c.bf16 %v8296_v5, %v8296_v5  ;;  %v6866_v5 = vld [vmem:[%s11734_s7 + $0x208] sm:$0xff] }
 0x3e0   :  { %2290 = vmatpush.bf16.msrb.mxu3 %v6867_v57 }
 0x3e2   :  { %v1240_v26 = vpop.f32.mrf.mxu1  ;;  %v8554_v19 = vpop.f32.mrf.mxu3 }
 0x3e3   :  { %v1409_v28 = vadd.f32 %v1408_v39, %v1240_v26  ;;  %v6436_v39 = vor.u32 %v6948_v56, %v6435_v60 }
 0x3e4   :  { %2291 = vmatpush.bf16.msrb.mxu3 %v6866_v5 }
 0x3e5   :  { %v1413_v50 = vpop.f32.mrf.mxu2  ;;  %4033 = vmatpush.bf16.msrb.mxu2 %v6436_v39 }
 0x3e7   :  { %2252 = vmatmul.bf16.gmra.mxu3 %v1478_v4 }
 0x3e8   :  { %2292 = vmatpush.bf16.msrb.mxu3 %v6865_v55 }
 0x3ea   :  { %v1243_v0 = vpop.f32.mrf.mxu1  ;;  %v8559_v38 = vpop.f32.mrf.mxu3 }
 0x3eb   :  { %v1412_v44 = vadd.f32 %v1411_v35, %v1243_v0 }
 0x3ed   :  { %v1452_v13 = vpack.c.bf16 %v1412_v44, %v1409_v28  ;;  %2168 = vmatmul.bf16.gmra.mxu1 %v1475_v7  ;;  %v1416_v43 = vpop.f32.mrf.mxu2 }
 0x3ef   :  { %2265 = vmatmul.bf16.vlgmr.msrb.gmra.mxu0 %v1452_v13 }
 0x3f2   :  { %v1245_v52 = vpop.f32.mrf.mxu1  ;;  %v8566_v25 = vpop.f32.mrf.mxu3 }
 0x3f3   :  { %v1414_v12 = vadd.f32 %v1413_v50, %v1245_v52 }
 0x3f5   :  { %v1418_v59 = vpop.f32.mrf.mxu2 }
 0x3fa   :  { %v1248_v14 = vpop.f32.mrf.mxu1  ;;  %v8573_v47 = vpop.f32.mrf.mxu3 }
 0x3fb   :  { %v1417_v40 = vadd.f32 %v1416_v43, %v1248_v14 }
 0x3fc   :  { %v2210_v16 = vpop.f32.mrf.mxu0 }
 0x3fd   :  { %v1461_v9 = vpack.c.bf16 %v1417_v40, %v1414_v12  ;;  %v2211_v2 = vadd.f32 %v2210_v16, %v2183_v30  ;;  %v1421_v20 = vpop.f32.mrf.mxu2 }
 0x3ff   :  { %2270 = vmatmul.bf16.gmra.mxu0 %v1461_v9 }
 0x402   :  { %v1250_v32 = vpop.f32.mrf.mxu1  ;;  %v2199_v23 = vpop.f32.mrf.mxu3 }
 0x403   :  { %v1419_v22 = vadd.f32 %v1418_v59, %v1250_v32 }
 0x404   :  { %v8578_v54 = vpop.f32.mrf.mxu0 }
 0x405   :  { %v1423_v61 = vpop.f32.mrf.mxu2 }
 0x40a   :  { %v1253_v37 = vpop.f32.mrf.mxu1 }
 0x40b   :  { %v1422_v29 = vadd.f32 %v1421_v20, %v1253_v37 }
 0x40c   :  { %v2215_v63 = vpop.f32.mrf.mxu0 }
 0x40d   :  { %v1470_v62 = vpack.c.bf16 %v1422_v29, %v1419_v22  ;;  %v2216_v41 = vadd.f32 %v2215_v63, %v2188_v51  ;;  %v1426_v53 = vpop.f32.mrf.mxu2 }
 0x40f   :  { %2275 = vmatmul.bf16.gmra.mxu0 %v1470_v62 }
 0x412   :  { %v1255_v30 = vpop.f32.mrf.mxu1 }
 0x413   :  { %v1424_v8 = vadd.f32 %v1423_v61, %v1255_v30 }
 0x414   :  { %v8580_v33 = vpop.f32.mrf.mxu0 }
 0x415   :  { %v1428_v6 = vpop.f32.mrf.mxu2  ;;  %v1479_v51 = vpack.c.bf16 %v1424_v8, %v1424_v8 }
 0x41a   :  { %v1258_v15 = vpop.f32.mrf.mxu1 }
 0x41b   :  { %v1427_v26 = vadd.f32 %v1426_v53, %v1258_v15 }
 0x41c   :  { %v2220_v35 = vpop.f32.mrf.mxu0 }
 0x41d   :  { %v1431_v27 = vpop.f32.mrf.mxu2 }
 0x41f   :  { %2280 = vmatmul.bf16.gmra.mxu0 %v1479_v51 }
 0x422   :  { %v1260_v36 = vpop.f32.mrf.mxu1 }
 0x423   :  { %v1429_v4 = vadd.f32 %v1428_v6, %v1260_v36  ;;  %v6946_v6 = vld [vmem:[%s11736_s13 + $0x244] sm:$0xf0] }
 0x424   :  { %v8588_v50 = vpop.f32.mrf.mxu0 }
 0x425   :  { %v1453_v49 = vpack.c.bf16 %v1429_v4, %v1427_v26  ;;  %v1433_v0 = vpop.f32.mrf.mxu2 }
 0x427   :  { %2293 = vmatmul.bf16.vlgmr.msrb.gmra.mxu3 %v1453_v49 }
 0x42a   :  { %v1263_v7 = vpop.f32.mrf.mxu1 }
 0x42b   :  { %v1432_v43 = vadd.f32 %v1431_v27, %v1263_v7 }
 0x42c   :  { %v2225_v28 = vpop.f32.mrf.mxu0 }
 0x42d   :  { %v1436_v44 = vpop.f32.mrf.mxu2 }
 0x432   :  { %v1265_v13 = vpop.f32.mrf.mxu1 }
 0x433   :  { %v1434_v57 = vadd.f32 %v1433_v0, %v1265_v13  ;;  %v8608_v13 = vpop.permute.xlu2 %2334 }
 0x434   :  { %v2227_v52 = vpop.f32.mrf.mxu0  ;;  %11978 = vst [vmem:[#allocation3_spill] sm:$0xff] %v8608_v13 }
 0x435   :  { %v1462_v59 = vpack.c.bf16 %v1434_v57, %v1432_v43  ;;  %v1438_v5 = vpop.f32.mrf.mxu2  ;;  %v8610_v43 = vpop.permute.xlu1 %2329 }
 0x436   :  { %11979 = vst [vmem:[#allocation4_spill] sm:$0xff] %v8610_v43  ;;  %v8614_v52 = vpop.permute.xlu0 %2324 }
 0x437   :  { %2298 = vmatmul.bf16.gmra.mxu3 %v1462_v59  ;;  %11980 = vst [vmem:[#allocation5_spill] sm:$0xff] %v8614_v52 }
 0x43a   :  { %v1268_v14 = vpop.f32.mrf.mxu1  ;;  %v2238_v12 = vpop.f32.mrf.mxu3 }
 0x43b   :  { %v2239_v40 = vadd.f32 %v2238_v12, %v2211_v2  ;;  %v1437_v55 = vadd.f32 %v1436_v44, %v1268_v14  ;;  %v6427_v2 = vld [vmem:[%s11736_s13 + $0x240] sm:$0xf] }
 0x43c   :  { %v6428_v60 = vor.u32 %v6946_v6, %v6427_v2 }
 0x43d   :  { %v1441_v16 = vpop.f32.mrf.mxu2  ;;  %v8618_v14 = vpop.permute.xlu1 %2344 }
 0x43e   :  { %4034 = vmatpush.bf16.msrb.mxu2 %v6428_v60  ;;  %11982 = vst [vmem:[#allocation7_spill] sm:$0xff] %v8618_v14  ;;  %v8620_v12 = vpop.permute.xlu0 %2339 }
 0x43f   :  { %11983 = vst [vmem:[#allocation8_spill] sm:$0xff] %v8620_v12 }
 0x442   :  { %v1270_v9 = vpop.f32.mrf.mxu1  ;;  %v8590_v20 = vpop.f32.mrf.mxu3 }
 0x443   :  { %v1439_v32 = vadd.f32 %v1438_v5, %v1270_v9  ;;  %v8616_v5 = vpop.permute.xlu2 %2349 }
 0x444   :  { %11981 = vst [vmem:[#allocation6_spill] sm:$0xff] %v8616_v5 }
 0x445   :  { %v1471_v23 = vpack.c.bf16 %v1439_v32, %v1437_v55  ;;  %v1443_v61 = vpop.f32.mrf.mxu2 }
 0x446   :  { %v8626_v9 = vpop.permute.xlu0 %2354 }
 0x447   :  { %2303 = vmatmul.bf16.gmra.mxu3 %v1471_v23  ;;  %11986 = vst [vmem:[#allocation11_spill] sm:$0xff] %v8626_v9 }
 0x44a   :  { %v1273_v37 = vpop.f32.mrf.mxu1  ;;  %v2243_v22 = vpop.f32.mrf.mxu3 }
 0x44b   :  { %v2244_v29 = vadd.f32 %v2243_v22, %v2216_v41  ;;  %v1442_v63 = vadd.f32 %v1441_v16, %v1273_v37  ;;  %v8624_v16 = vpop.permute.xlu1 %2483 }
 0x44c   :  { %11985 = vst [vmem:[#allocation10_spill] sm:$0xff] %v8624_v16 }
 0x44d   :  { %v1480_v30 = vpack.c.bf16 %v1442_v63, %v1442_v63 }
 0x44e   :  { %v8632_v37 = vpop.permute.xlu0 %2493 }
 0x44f   :  { %11989 = vst [vmem:[#allocation14_spill] sm:$0xff] %v8632_v37 }
 0x452   :  { %v1275_v62 = vpop.f32.mrf.mxu1  ;;  %v8592_v53 = vpop.f32.mrf.mxu3 }
 0x453   :  { %v8630_v23 = vpop.permute.xlu1 %2498  ;;  %v6419_v62 = vld [vmem:[%s11736_s13 + $0x230] sm:$0xf] }
 0x454   :  { %11988 = vst [vmem:[#allocation13_spill] sm:$0xff] %v8630_v23 }
 0x456   :  { %v8646_v6 = vpop.permute.xlu0 %2508 }
 0x457   :  { %2308 = vmatmul.bf16.gmra.mxu3 %v1480_v30  ;;  %v6944_v30 = vld [vmem:[%s11736_s13 + $0x234] sm:$0xf0]  ;;  %11992 = vst [vmem:[#allocation17_spill] sm:$0xff] %v8646_v6 }
 0x458   :  { %v6420_v2 = vor.u32 %v6944_v30, %v6419_v62  ;;  %v2078_v62 = vadd.f32 %v8274_v48, %v8208_v58 }
 0x45a   :  { %v2164_v56 = vpop.f32.mrf.mxu1  ;;  %v2248_v39 = vpop.f32.mrf.mxu3  ;;  %4035 = vmatpush.bf16.msrb.mxu2 %v6420_v2 }
 0x45b   :  { %v2165_v41 = vadd.f32 %v2164_v56, %v8440_v45 }
 0x45d   :  { %v2193_v8 = vadd.f32 %v8559_v38, %v2165_v41 }
 0x45f   :  { %v2221_v15 = vadd.f32 %v2220_v35, %v2193_v8  ;;  %v8654_v8 = vpop.permute.xlu0 %2513 }
 0x460   :  { %11995 = vst [vmem:[#allocation20_spill] sm:$0xff] %v8654_v8 }
 0x461   :  { %v2249_v51 = vadd.f32 %v2248_v39, %v2221_v15  ;;  %v2073_v15 = vadd.f32 %v8274_v48, %v8191_v3 }
 0x462   :  { %v8602_v27 = vpop.f32.mrf.mxu1  ;;  %v8604_v36 = vpop.f32.mrf.mxu3 }
 0x46a   :  { %v2169_v26 = vpop.f32.mrf.mxu1  ;;  %v2253_v4 = vpop.f32.mrf.mxu3 }
 0x46b   :  { %v2170_v49 = vadd.f32 %v2169_v26, %v8477_v34 }
 0x46c   :  { %v2266_v0 = vpop.f32.mrf.mxu0 }
 0x46d   :  { %v2198_v7 = vadd.f32 %v8573_v47, %v2170_v49  ;;  %v2267_v44 = vadd.f32 %v2266_v0, %v2239_v40  ;;  %v8622_v40 = vpop.permute.xlu2 %2488 }
 0x46e   :  { %11984 = vst [vmem:[#allocation9_spill] sm:$0xff] %v8622_v40 }
 0x46f   :  { %v2226_v45 = vadd.f32 %v2225_v28, %v2198_v7 }
 0x471   :  { %v8612_v38 = vadd.f32 %v2253_v4, %v2226_v45 }
 0x472   :  { %v2171_v35 = vpop.f32.mrf.mxu1  ;;  %v2255_v57 = vpop.f32.mrf.mxu3 }
 0x473   :  { %v8666_v35 = vpop.permute.xlu0 %2613 }
 0x474   :  { %v2268_v59 = vpop.f32.mrf.mxu0  ;;  %11998 = vst [vmem:[#allocation23_spill] sm:$0xff] %v8666_v35 }
 0x475   :  { %v8628_v55 = vpop.permute.xlu2 %2503 }
 0x476   :  { %11987 = vst [vmem:[#allocation12_spill] sm:$0xff] %v8628_v55 }
 0x47b   :  { %v8681_v2 = vpop.permute.xlu0 %2573 }
 0x47c   :  { %v2271_v34 = vpop.f32.mrf.mxu0  ;;  %12001 = vst [vmem:[#allocation26_spill] sm:$0xff] %v8681_v2 }
 0x47d   :  { %v2272_v47 = vadd.f32 %v2271_v34, %v2244_v29  ;;  %v8636_v63 = vpop.permute.xlu2 %2553  ;;  %v8638_v29 = vpop.permute.xlu1 %2548 }
 0x47e   :  { %11990 = vst [vmem:[#allocation15_spill] sm:$0xff] %v8636_v63 }
 0x47f   :  { %11991 = vst [vmem:[#allocation16_spill] sm:$0xff] %v8638_v29 }
 0x484   :  { %v2273_v28 = vpop.f32.mrf.mxu0 }
 0x485   :  { %v8650_v56 = vpop.permute.xlu2 %2563  ;;  %v8652_v39 = vpop.permute.xlu1 %2558 }
 0x486   :  { %11993 = vst [vmem:[#allocation18_spill] sm:$0xff] %v8650_v56 }
 0x487   :  { %11994 = vst [vmem:[#allocation19_spill] sm:$0xff] %v8652_v39 }
 0x48c   :  { %v2276_v32 = vpop.f32.mrf.mxu0 }
 0x48d   :  { %v2277_v61 = vadd.f32 %v2276_v32, %v2249_v51  ;;  %v2101_v51 = vadd.f32 %v8294_v10, %v2073_v15  ;;  %v8660_v4 = vpop.permute.xlu2 %2568  ;;  %v8662_v0 = vpop.permute.xlu1 %2618 }
 0x48e   :  { %11996 = vst [vmem:[#allocation21_spill] sm:$0xff] %v8660_v4 }
 0x48f   :  { %v2129_v26 = vadd.f32 %v8391_v46, %v2101_v51  ;;  %11997 = vst [vmem:[#allocation22_spill] sm:$0xff] %v8662_v0 }
 0x491   :  { %v2157_v7 = vadd.f32 %v8458_v11, %v2129_v26  ;;  %v2106_v11 = vadd.f32 %v8318_v31, %v2078_v62 }
 0x493   :  { %v2185_v45 = vadd.f32 %v8536_v24, %v2157_v7 }
 0x494   :  { %v8634_v22 = vpop.f32.mrf.mxu0 }
 0x495   :  { %v2213_v57 = vadd.f32 %v8578_v54, %v2185_v45  ;;  %v8670_v10 = vpop.permute.xlu2 %2628  ;;  %v8672_v46 = vpop.permute.xlu1 %2623  ;;  %v2134_v54 = vadd.f32 %v8418_v18, %v2106_v11  ;;  %v2083_v18 = vadd.f32 %v8274_v48, %v8234_v17 }
 0x496   :  { %11999 = vst [vmem:[#allocation24_spill] sm:$0xff] %v8670_v10 }
 0x497   :  { %v2241_v34 = vadd.f32 %v8590_v20, %v2213_v57  ;;  %12000 = vst [vmem:[#allocation25_spill] sm:$0xff] %v8672_v46 }
 0x499   :  { %v2269_v32 = vadd.f32 %v2268_v59, %v2241_v34  ;;  %v8700_v34 = vpop.permute.xlu0 %2578 }
 0x49a   :  { %12004 = vst [vmem:[#allocation29_spill] sm:$0xff] %v8700_v34 }
 0x49c   :  { %v8648_v60 = vpop.f32.mrf.mxu0 }
 0x4a4   :  { %v2283_v41 = vpop.f32.mrf.mxu0 }
 0x4a5   :  { %v2162_v41 = vadd.f32 %v8568_v1, %v2134_v54  ;;  %v2111_v1 = vadd.f32 %v8349_v42, %v2083_v18 }
 0x4a7   :  { %v2190_v51 = vadd.f32 %v8554_v19, %v2162_v41  ;;  %v2139_v19 = vadd.f32 %v8450_v21, %v2111_v1 }
 0x4a9   :  { %v2218_v7 = vadd.f32 %v8580_v33, %v2190_v51 }
 0x4aa   :  { %v2294_v49 = vpop.f32.mrf.mxu3 }
 0x4ab   :  { %v8679_v24 = vadd.f32 %v2294_v49, %v2267_v44  ;;  %v8691_v44 = vpop.permute.xlu2 %2638  ;;  %v8693_v49 = vpop.permute.xlu1 %2633  ;;  %v2246_v57 = vadd.f32 %v8592_v53, %v2218_v7 }
 0x4ac   :  { %12002 = vst [vmem:[#allocation27_spill] sm:$0xff] %v8691_v44  ;;  %v8710_v53 = vpop.permute.xlu0 %2678 }
 0x4ad   :  { %v2357_v15 = vmul.f32 %v8614_v52, %v8679_v24  ;;  %12003 = vst [vmem:[#allocation28_spill] sm:$0xff] %v8693_v49 }
 0x4ae   :  { %12007 = vst [vmem:[#allocation32_spill] sm:$0xff] %v8710_v53 }
 0x4b2   :  { %v2296_v3 = vpop.f32.mrf.mxu3 }
 0x4b3   :  { %v8676_v30 = vadd.f32 %v2296_v3, %v2269_v32  ;;  %v2274_v3 = vadd.f32 %v2273_v28, %v2246_v57  ;;  %v2167_v32 = vadd.f32 %v8602_v27, %v2139_v19  ;;  %v8704_v11 = vpop.permute.xlu2 %2643  ;;  %v8706_v54 = vpop.permute.xlu1 %2683 }
 0x4b4   :  { %12005 = vst [vmem:[#allocation30_spill] sm:$0xff] %v8704_v11 }
 0x4b5   :  { %v2358_v20 = vmul.f32 %v8610_v43, %v8676_v30  ;;  %12006 = vst [vmem:[#allocation31_spill] sm:$0xff] %v8706_v54  ;;  %v2195_v17 = vadd.f32 %v8566_v25, %v2167_v32 }
 0x4b7   :  { %v2364_v26 = vadd.f32 %v2358_v20, %v2357_v15  ;;  %v2223_v20 = vadd.f32 %v8588_v50, %v2195_v17 }
 0x4b9   :  { %v2251_v27 = vadd.f32 %v8604_v36, %v2223_v20 }
 0x4ba   :  { %v2299_v59 = vpop.f32.mrf.mxu3 }
 0x4bb   :  { %v2300_v58 = vadd.f32 %v2299_v59, %v2272_v47  ;;  %v8715_v41 = vpop.permute.xlu2 %2728  ;;  %v8717_v51 = vpop.permute.xlu1 %2693  ;;  %v2279_v25 = vadd.f32 %v8634_v22, %v2251_v27 }
 0x4bc   :  { %12008 = vst [vmem:[#allocation33_spill] sm:$0xff] %v8715_v41 }
 0x4bd   :  { %v2359_v31 = vmul.f32 %v8608_v13, %v2300_v58  ;;  %12009 = vst [vmem:[#allocation34_spill] sm:$0xff] %v8717_v51 }
 0x4bf   :  { %v2365_v45 = vadd.f32 %v2364_v26, %v2359_v31  ;;  %v8720_v31 = vpop.permute.xlu0 %2688 }
 0x4c0   :  { %12010 = vst [vmem:[#allocation35_spill] sm:$0xff] %v8720_v31 }
 0x4c2   :  { %v2301_v47 = vpop.f32.mrf.mxu3 }
 0x4c3   :  { %v2302_v62 = vadd.f32 %v2301_v47, %v2274_v3  ;;  %v8727_v36 = vpop.permute.xlu1 %2793 }
 0x4c4   :  { %12012 = vst [vmem:[#allocation37_spill] sm:$0xff] %v8727_v36  ;;  %v6892_v36 = vld [vmem:[%s11736_s13 + $0x94] sm:$0xf0] }
 0x4c5   :  { %v2360_v48 = vmul.f32 %v8620_v12, %v2302_v62 }
 0x4c7   :  { %v2366_v59 = vadd.f32 %v2365_v45, %v2360_v48  ;;  %v8725_v45 = vpop.permute.xlu2 %2798  ;;  %v8730_v19 = vpop.permute.xlu0 %2733 }
 0x4c8   :  { %12011 = vst [vmem:[#allocation36_spill] sm:$0xff] %v8725_v45  ;;  %v6211_v45 = vld [vmem:[%s11736_s13 + $0x90] sm:$0xf] }
 0x4c9   :  { %12013 = vst [vmem:[#allocation38_spill] sm:$0xff] %v8730_v19 }
 0x4ca   :  { %v2304_v42 = vpop.f32.mrf.mxu3 }
 0x4cb   :  { %v2305_v33 = vadd.f32 %v2304_v42, %v2277_v61  ;;  %v2282_v61 = vadd.f32 %v8648_v60, %v8612_v38  ;;  %v8734_v38 = vpop.permute.xlu1 %2703 }
 0x4cc   :  { %12015 = vst [vmem:[#allocation40_spill] sm:$0xff] %v8734_v38 }
 0x4cd   :  { %v2361_v21 = vmul.f32 %v8618_v14, %v2305_v33 }
 0x4cf   :  { %v2367_v28 = vadd.f32 %v2366_v59, %v2361_v21  ;;  %v8732_v48 = vpop.permute.xlu2 %2738  ;;  %v8736_v20 = vpop.permute.xlu0 %2698 }
 0x4d0   :  { %12014 = vst [vmem:[#allocation39_spill] sm:$0xff] %v8732_v48 }
 0x4d1   :  { %12016 = vst [vmem:[#allocation41_spill] sm:$0xff] %v8736_v20  ;;  %v6890_v20 = vld [vmem:[%s11736_s13 + $0x84] sm:$0xf0] }
 0x4d2   :  { %v2306_v15 = vpop.f32.mrf.mxu3 }
 0x4d3   :  { %v2307_v26 = vadd.f32 %v2306_v15, %v2279_v25 }
 0x4d5   :  { %v2362_v50 = vmul.f32 %v8616_v5, %v2307_v26 }
 0x4d7   :  { %v2368_v1 = vadd.f32 %v2367_v28, %v2362_v50 }
 0x4da   :  { %v2309_v18 = vpop.f32.mrf.mxu3 }
 0x4db   :  { %v2310_v7 = vadd.f32 %v2309_v18, %v2282_v61  ;;  %v8748_v61 = vpop.permute.xlu2 %2808 }
 0x4dc   :  { %12017 = vst [vmem:[#allocation42_spill] sm:$0xff] %v8748_v61  ;;  %v6147_v61 = vld [vmem:[%s11736_s13 + $0x10] sm:$0xf] }
 0x4dd   :  { %v2363_v57 = vmul.f32 %v8626_v9, %v2310_v7 }
 0x4df   :  { %v2369_v47 = vadd.f32 %v2368_v1, %v2363_v57  ;;  %v8754_v1 = vpop.permute.xlu1 %2803 }
 0x4e0   :  { %12018 = vst [vmem:[#allocation43_spill] sm:$0xff] %v8754_v1 }
 0x4e1   :  { %v2370_v22 = vrot.slane %v2369_v47, 4 }
 0x4e2   :  { %v2311_v3 = vpop.f32.mrf.mxu3 }
 0x4e3   :  { %v2371_v32 = vadd.f32 %v2370_v22, %v2369_v47  ;;  %v8768_v47 = vpop.permute.xlu0 %2743 }
 0x4e4   :  { %12019 = vst [vmem:[#allocation44_spill] sm:$0xff] %v8768_v47 }
 0x4e5   :  { %v2372_v17 = vrot.slane %v2371_v32, 2 }
 0x4e7   :  { %v2373_v60 = vadd.f32 %v2372_v17, %v2371_v32 }
 0x4e9   :  { %v2374_v42 = vrot.slane %v2373_v60, 1 }
 0x4eb   :  { %v2375_v59 = vadd.f32 %v2374_v42, %v2373_v60 }
 0x4ed   :  { %v2376_v21 = vmul.f32 0.02, %v2375_v59 }
 0x4ef   :  { %v8739_v28 = vsub.f32 %v8679_v24, %v2376_v21  ;;  %v8742_v27 = vsub.f32 %v8676_v30, %v2376_v21  ;;  %v8744_v15 = vsub.f32 %v2300_v58, %v2376_v21  ;;  %v8746_v25 = vsub.f32 %v2302_v62, %v2376_v21 }
 0x4f0   :  { %v8750_v50 = vsub.f32 %v2305_v33, %v2376_v21  ;;  %v8752_v18 = vsub.f32 %v2310_v7, %v2376_v21  ;;  %v8762_v58 = vsub.f32 %v2307_v26, %v2376_v21 }
 0x4f1   :  { %v2384_v57 = vmul.f32 %v8739_v28, %v8739_v28  ;;  %v2385_v24 = vmul.f32 %v8742_v27, %v8742_v27  ;;  %v2386_v30 = vmul.f32 %v8744_v15, %v8744_v15  ;;  %v2387_v62 = vmul.f32 %v8746_v25, %v8746_v25 }
 0x4f2   :  { %v2388_v22 = vmul.f32 %v8750_v50, %v8750_v50  ;;  %v2389_v17 = vmul.f32 %v8762_v58, %v8762_v58  ;;  %v2390_v42 = vmul.f32 %v8752_v18, %v8752_v18 }
 0x4f3   :  { %v2391_v33 = vmul.f32 %v2384_v57, %v8614_v52  ;;  %v2392_v7 = vmul.f32 %v2385_v24, %v8610_v43  ;;  %v2393_v3 = vmul.f32 %v2386_v30, %v8608_v13  ;;  %v2394_v26 = vmul.f32 %v2387_v62, %v8620_v12  ;;  %v8779_v57 = vpop.permute.xlu2 %2753  ;;  %v8781_v24 = vpop.permute.xlu1 %2748 }
 0x4f4   :  { %v2395_v59 = vmul.f32 %v2388_v22, %v8618_v14  ;;  %12020 = vst [vmem:[#allocation45_spill] sm:$0xff] %v8779_v57  ;;  %v2396_v43 = vmul.f32 %v2389_v17, %v8616_v5  ;;  %v8785_v13 = vpop.permute.xlu0 %2708  ;;  %v6888_v17 = vld [vmem:[%s11736_s13 + $0x74] sm:$0xf0] }
 0x4f5   :  { %v2398_v32 = vadd.f32 %v2392_v7, %v2391_v33  ;;  %12021 = vst [vmem:[#allocation46_spill] sm:$0xff] %v8781_v24  ;;  %v2397_v33 = vmul.f32 %v2390_v42, %v8626_v9  ;;  %v6942_v9 = vld [vmem:[%s11736_s13 + $0x224] sm:$0xf0] }
 0x4f6   :  { %12022 = vst [vmem:[#allocation47_spill] sm:$0xff] %v8785_v13 }
 0x4f7   :  { %v2399_v60 = vadd.f32 %v2398_v32, %v2393_v3 }
 0x4f9   :  { %v2400_v21 = vadd.f32 %v2399_v60, %v2394_v26  ;;  %v6195_v60 = vld [vmem:[%s11736_s13 + $0x70] sm:$0xf] }
 0x4fa   :  { %v6196_v42 = vor.u32 %v6888_v17, %v6195_v60  ;;  %v6886_v60 = vld [vmem:[%s11736_s13 + $0x64] sm:$0xf0]  ;;  %v6251_v17 = vld [vmem:[%s11736_s13 + $0xe0] sm:$0xf] }
 0x4fb   :  { %v2401_v30 = vadd.f32 %v2400_v21, %v2395_v59  ;;  %v8787_v12 = vpop.permute.xlu2 %2908  ;;  %v8789_v52 = vpop.permute.xlu1 %2818  ;;  %v6904_v59 = vld [vmem:[%s11736_s13 + $0xf4] sm:$0xf0]  ;;  %v6579_v21 = vld [vmem:[%s11736_s13 + $0x370] sm:$0xf] }
 0x4fc   :  { %12023 = vst [vmem:[#allocation48_spill] sm:$0xff] %v8787_v12  ;;  %3919 = vmatpush.bf16.msra.mxu0 %v6196_v42  ;;  %v6902_v42 = vld [vmem:[%s11736_s13 + $0xe4] sm:$0xf0] }
 0x4fd   :  { %v2402_v7 = vadd.f32 %v2401_v30, %v2396_v43  ;;  %12024 = vst [vmem:[#allocation49_spill] sm:$0xff] %v8789_v52  ;;  %v6259_v43 = vld [vmem:[%s11736_s13 + $0xf0] sm:$0xf]  ;;  %v8806_v30 = vpop.permute.xlu0 %2813 }
 0x4fe   :  { %12025 = vst [vmem:[#allocation50_spill] sm:$0xff] %v8806_v30  ;;  %v6547_v52 = vld [vmem:[%s11736_s13 + $0x330] sm:$0xf] }
 0x4ff   :  { %v2403_v62 = vadd.f32 %v2402_v7, %v2397_v33  ;;  %v6260_v7 = vor.u32 %v6904_v59, %v6259_v43  ;;  %v6982_v59 = vld [vmem:[%s11736_s13 + $0x364] sm:$0xf0] }
 0x501   :  { %v2404_v3 = vrot.slane %v2403_v62, 4  ;;  %3947 = vmatpush.bf16.msra.mxu3 %v6260_v7 }
 0x503   :  { %v2405_v32 = vadd.f32 %v2404_v3, %v2403_v62  ;;  %v6984_v62 = vld [vmem:[%s11736_s13 + $0x374] sm:$0xf0] }
 0x504   :  { %v6580_v3 = vor.u32 %v6984_v62, %v6579_v21  ;;  %v8829_v62 = vpop.permute.xlu2 %2823 }
 0x505   :  { %v2406_v22 = vrot.slane %v2405_v32, 2  ;;  %12026 = vst [vmem:[#allocation51_spill] sm:$0xff] %v8829_v62  ;;  %v6235_v62 = vld [vmem:[%s11736_s13 + $0xc0] sm:$0xf] }
 0x506   :  { %4087 = vmatpush.bf16.msra.mxu1 %v6580_v3 }
 0x507   :  { %v2407_v26 = vadd.f32 %v2406_v22, %v2405_v32  ;;  %v6187_v22 = vld [vmem:[%s11736_s13 + $0x60] sm:$0xf] }
 0x508   :  { %v6188_v43 = vor.u32 %v6886_v60, %v6187_v22  ;;  %v8831_v22 = vpop.permute.xlu1 %2758  ;;  %v6411_v60 = vld [vmem:[%s11736_s13 + $0x220] sm:$0xf] }
 0x509   :  { %v2408_v33 = vrot.slane %v2407_v26, 1  ;;  %12027 = vst [vmem:[#allocation52_spill] sm:$0xff] %v8831_v22  ;;  %v6412_v5 = vor.u32 %v6942_v9, %v6411_v60  ;;  %v6882_v9 = vld [vmem:[%s11736_s13 + $0x44] sm:$0xf0]  ;;  %v6563_v60 = vld [vmem:[%s11736_s13 + $0x350] sm:$0xf] }
 0x50a   :  { %3920 = vmatpush.bf16.msra.mxu0 %v6188_v43  ;;  %v6171_v43 = vld [vmem:[%s11736_s13 + $0x40] sm:$0xf] }
 0x50b   :  { %v2409_v32 = vadd.f32 %v2408_v33, %v2407_v26  ;;  %v6571_v26 = vld [vmem:[%s11736_s13 + $0x360] sm:$0xf]  ;;  %v6252_v33 = vor.u32 %v6902_v42, %v6251_v17  ;;  %v6884_v17 = vld [vmem:[%s11736_s13 + $0x54] sm:$0xf0]  ;;  %4036 = vmatpush.bf16.msrb.mxu2 %v6412_v5 }
 0x50c   :  { %v6572_v7 = vor.u32 %v6982_v59, %v6571_v26  ;;  %v6163_v26 = vld [vmem:[%s11736_s13 + $0x30] sm:$0xf]  ;;  %v6880_v59 = vld [vmem:[%s11736_s13 + $0x34] sm:$0xf0] }
 0x50d   :  { %v2410_v21 = vmul.f32 0.02, %v2409_v32  ;;  %3948 = vmatpush.bf16.msra.mxu3 %v6252_v33  ;;  %v6179_v32 = vld [vmem:[%s11736_s13 + $0x50] sm:$0xf]  ;;  %v8863_v33 = vpop.permute.xlu0 %2913  ;;  %v6900_v5 = vld [vmem:[%s11736_s13 + $0xd4] sm:$0xf0]  ;;  %v6164_v11 = vor.u32 %v6880_v59, %v6163_v26 }
 0x50e   :  { %4088 = vmatpush.bf16.msra.mxu1 %v6572_v7  ;;  %v6180_v42 = vor.u32 %v6884_v17, %v6179_v32  ;;  %12028 = vst [vmem:[#allocation53_spill] sm:$0xff] %v8863_v33  ;;  %v6172_v7 = vor.u32 %v6882_v9, %v6171_v43  ;;  %v6980_v32 = vld [vmem:[%s11736_s13 + $0x354] sm:$0xf0]  ;;  %v6898_v43 = vld [vmem:[%s11736_s13 + $0xc4] sm:$0xf0] }
 0x50f   :  { %v8833_v3 = vadd.f32 1e-05, %v2410_v21  ;;  %v6243_v21 = vld [vmem:[%s11736_s13 + $0xd0] sm:$0xf]  ;;  %v6564_v14 = vor.u32 %v6980_v32, %v6563_v60  ;;  %v6978_v9 = vld [vmem:[%s11736_s13 + $0x344] sm:$0xf0] }
 0x510   :  { %3921 = vmatpush.bf16.msra.mxu0 %v6180_v42  ;;  %v6244_v17 = vor.u32 %v6900_v5, %v6243_v21  ;;  %v6555_v42 = vld [vmem:[%s11736_s13 + $0x340] sm:$0xf]  ;;  %v6236_v21 = vor.u32 %v6898_v43, %v6235_v62  ;;  %v6227_v60 = vld [vmem:[%s11736_s13 + $0xb0] sm:$0xf]  ;;  %v6896_v32 = vld [vmem:[%s11736_s13 + $0xb4] sm:$0xf0]  ;;  %v8900_v62 = vpop.permute.xlu2 %2843 }
 0x511   :  { %7044 = vrsqrt.f32 %v8833_v3  ;;  %v6556_v5 = vor.u32 %v6978_v9, %v6555_v42  ;;  %12029 = vst [vmem:[#allocation54_spill] sm:$0xff] %v8900_v62  ;;  %v6155_v43 = vld [vmem:[%s11736_s13 + $0x20] sm:$0xf]  ;;  %v6878_v26 = vld [vmem:[%s11736_s13 + $0x24] sm:$0xf0]  ;;  %v6228_v42 = vor.u32 %v6896_v32, %v6227_v60  ;;  %vm2418_vm6 = vweird.f32 %v8833_v3 }
 0x512   :  { %3949 = vmatpush.bf16.msra.mxu3 %v6244_v17  ;;  %4089 = vmatpush.bf16.msra.mxu1 %v6564_v14  ;;  %v6976_v14 = vld [vmem:[%s11736_s13 + $0x334] sm:$0xf0]  ;;  %v6403_v59 = vld [vmem:[%s11736_s13 + $0x210] sm:$0xf]  ;;  %v6219_v33 = vld [vmem:[%s11736_s13 + $0xa0] sm:$0xf] }
 0x513   :  { %v6940_v9 = vld [vmem:[%s11736_s13 + $0x214] sm:$0xf0]  ;;  %v6548_v1 = vor.u32 %v6976_v14, %v6547_v52  ;;  %v6894_v60 = vld [vmem:[%s11736_s13 + $0xa4] sm:$0xf0]  ;;  %v6395_v52 = vld [vmem:[%s11736_s13 + $0x200] sm:$0xf] }
 0x514   :  { %3922 = vmatpush.bf16.msra.mxu0 %v6172_v7  ;;  %v8913_v7 = vpop.permute.xlu1 %2923  ;;  %v6404_v32 = vor.u32 %v6940_v9, %v6403_v59  ;;  %v2464_v59 = vlaneseq  ;;  %v6220_v12 = vor.u32 %v6894_v60, %v6219_v33  ;;  %v2320_v33 = vld [vmem:[%s11738_s9] sm:$0x1]  ;;  %v6323_v60 = vld [vmem:[%s11736_s13 + $0x170] sm:$0xf] }
 0x515   :  { %12030 = vst [vmem:[#allocation55_spill] sm:$0xff] %v8913_v7  ;;  %v6156_v7 = vor.u32 %v6878_v26, %v6155_v43  ;;  %v8943_v43 = vpop.permute.xlu0 %2918 }
 0x516   :  { %3950 = vmatpush.bf16.msra.mxu3 %v6236_v21  ;;  %4090 = vmatpush.bf16.msra.mxu1 %v6556_v5  ;;  %v6539_v21 = vld [vmem:[%s11736_s13 + $0x320] sm:$0xf]  ;;  %v6974_v5 = vld [vmem:[%s11736_s13 + $0x324] sm:$0xf0]  ;;  %12031 = vst [vmem:[#allocation56_spill] sm:$0xff] %v8943_v43 }
 0x517   :  { %v8892_v13 = vpop.eup %7044  ;;  %4037 = vmatpush.bf16.msrb.mxu2 %v6404_v32 }
 0x518   :  { %v2413_v17 = vmul.f32 %v8892_v13, %v8833_v3  ;;  %3923 = vmatpush.bf16.msra.mxu0 %v6164_v11  ;;  %v6938_v11 = vld [vmem:[%s11736_s13 + $0x204] sm:$0xf0]  ;;  %vm2419_vm5 = vweird.f32 %v8892_v13  ;;  %v6920_v3 = vld [vmem:[%s11736_s13 + $0x174] sm:$0xf0] }
 0x519   :  { %v6396_v26 = vor.u32 %v6938_v11, %v6395_v52  ;;  %v6531_v52 = vld [vmem:[%s11736_s13 + $0x310] sm:$0xf]  ;;  %vm2420_vm7 = vmor %vm2418_vm6, %vm2419_vm5  ;;  %v6203_v11 = vld [vmem:[%s11736_s13 + $0x80] sm:$0xf] }
 0x51a   :  { %v2414_v30 = vmul.f32 %v8892_v13, %v2413_v17  ;;  %v6876_v17 = vld [vmem:[%s11736_s13 + $0x14] sm:$0xf0]  ;;  %3951 = vmatpush.bf16.msra.mxu3 %v6228_v42  ;;  %4091 = vmatpush.bf16.msra.mxu1 %v6548_v1 }
 0x51b   :  { %v6148_v32 = vor.u32 %v6876_v17, %v6147_v61  ;;  %v6972_v1 = vld [vmem:[%s11736_s13 + $0x314] sm:$0xf0]  ;;  %v6139_v61 = vld [vmem:[%s11736_s13] sm:$0xf]  ;;  %4038 = vmatpush.bf16.msrb.mxu2 %v6396_v26  ;;  %v8983_v26 = vshrl.u32 %v2464_v59, 7 }
 0x51c   :  { %v2415_v14 = vmul.f32 0.5, %v2414_v30  ;;  %v6540_v30 = vor.u32 %v6974_v5, %v6539_v21  ;;  %3924 = vmatpush.bf16.msra.mxu0 %v6156_v7  ;;  %v6874_v7 = vld [vmem:[%s11736_s13 + $0x4] sm:$0xf0]  ;;  %v8977_v21 = vpop.permute.xlu2 %2978  ;;  %v6532_v17 = vor.u32 %v6972_v1, %v6531_v52  ;;  %v6204_v52 = vor.u32 %v6890_v20, %v6203_v11 }
 0x51d   :  { %12032 = vst [vmem:[#allocation57_spill] sm:$0xff] %v8977_v21  ;;  %v6140_v38 = vor.u32 %v6874_v7, %v6139_v61  ;;  %vm2466_vm8 = vcmp.lt.s32.totalorder %v8983_v26, 6  ;;  %vm2530_vm9 = vcmp.lt.s32.totalorder %v8983_v26, 5  ;;  %vm2595_vm10 = vcmp.lt.s32.totalorder %v8983_v26, 4 }
 0x51e   :  { %v2416_v9 = vsub.f32 1.5, %v2415_v14  ;;  %3952 = vmatpush.bf16.msra.mxu3 %v6220_v12  ;;  %4092 = vmatpush.bf16.msra.mxu1 %v6540_v30  ;;  %v6212_v14 = vor.u32 %v6892_v36, %v6211_v45  ;;  %12033 = vst [vmem:[#allocation58_spill] sm:$0xff] %v8983_v26  ;;  %v6970_v12 = vld [vmem:[%s11736_s13 + $0x304] sm:$0xf0]  ;;  %v7040_v45 = vld [vmem:[%s11737_s10] ss:$0 sm:$0xff]  ;;  %v6324_v36 = vor.u32 %v6920_v3, %v6323_v60 }
 0x51f   :  { %v6315_v30 = vld [vmem:[%s11736_s13 + $0x160] sm:$0xf]  ;;  %vm2955_vm11 = vcmp.lt.s32.totalorder %v8983_v26, 2  ;;  %vm2660_vm12 = vcmp.lt.s32.totalorder %v8983_v26, 1  ;;  %vm2775_vm13 = vcmp.lt.s32.totalorder %v8983_v26, 7  ;;  %vm2890_vm14 = vcmp.lt.s32.totalorder %v8983_v26, 3 }
 0x520   :  { %v2417_v42 = vmul.f32 %v8892_v13, %v2416_v9  ;;  %v8985_v9 = vpop.permute.xlu1 %2973  ;;  %3925 = vmatpush.bf16.msra.mxu0 %v6148_v32  ;;  %v6918_v32 = vld [vmem:[%s11736_s13 + $0x164] sm:$0xf0] }
 0x521   :  { %12034 = vst [vmem:[#allocation59_spill] sm:$0xff] %v8985_v9 }
 0x522   :  { %v2421_v5 = vsel %vm2420_vm7, %v8892_v13, %v2417_v42  ;;  %v6523_v13 = vld [vmem:[%s11736_s13 + $0x300] sm:$0xf]  ;;  %3953 = vmatpush.bf16.msra.mxu3 %v6212_v14  ;;  %4093 = vmatpush.bf16.msra.mxu1 %v6532_v17 }
 0x523   :  { %v2422_v43 = vmul.f32 %v2421_v5, %v2320_v33  ;;  %v6524_v1 = vor.u32 %v6970_v12, %v6523_v13  ;;  %v9005_v33 = vpop.permute.xlu0 %2848  ;;  %v6316_v5 = vor.u32 %v6918_v32, %v6315_v30 }
 0x524   :  { %12035 = vst [vmem:[#allocation60_spill] sm:$0xff] %v9005_v33  ;;  %3926 = vmatpush.bf16.msra.mxu0 %v6140_v38  ;;  %v6307_v38 = vld [vmem:[%s11736_s13 + $0x150] sm:$0xf] }
 0x525   :  { %v2424_v59 = vperm.slane %v2422_v43, 0 }
 0x526   :  { %3954 = vmatpush.bf16.msra.mxu3 %v6204_v52  ;;  %4094 = vmatpush.bf16.msra.mxu1 %v6524_v1 }
 0x527   :  { %v2426_v42 = vmul.f32 %v2424_v59, %v8739_v28  ;;  %v2427_v61 = vmul.f32 %v2424_v59, %v8742_v27  ;;  %v2428_v43 = vmul.f32 %v2424_v59, %v8744_v15  ;;  %v2429_v7 = vmul.f32 %v2424_v59, %v8746_v25  ;;  %v6916_v15 = vld [vmem:[%s11736_s13 + $0x154] sm:$0xf0] }
 0x528   :  { %v2430_v60 = vmul.f32 %v2424_v59, %v8750_v50  ;;  %v2431_v20 = vmul.f32 %v2424_v59, %v8762_v58  ;;  %v2432_v3 = vmul.f32 %v2424_v59, %v8752_v18  ;;  %3975 = vmatpush.bf16.msrb.mxu0 %v6324_v36  ;;  %v6299_v18 = vld [vmem:[%s11736_s13 + $0x140] sm:$0xf]  ;;  %v6914_v58 = vld [vmem:[%s11736_s13 + $0x144] sm:$0xf0]  ;;  %v9029_v59 = vpop.permute.xlu2 %2853  ;;  %v6308_v52 = vor.u32 %v6916_v15, %v6307_v38  ;;  %v9031_v1 = vpop.permute.xlu1 %2933 }
 0x529   :  { %v2436_v28 = vadd.f32 %v7040_v45, %v2426_v42  ;;  %v2437_v14 = vadd.f32 %v7040_v45, %v2427_v61  ;;  %v2438_v27 = vadd.f32 %v7040_v45, %v2428_v43  ;;  %v2439_v17 = vadd.f32 %v7040_v45, %v2429_v7  ;;  %12036 = vst [vmem:[#allocation61_spill] sm:$0xff] %v9029_v59 }
 0x52a   :  { %v2440_v25 = vadd.f32 %v7040_v45, %v2430_v60  ;;  %v2441_v50 = vadd.f32 %v7040_v45, %v2431_v20  ;;  %v2442_v11 = vadd.f32 %v7040_v45, %v2432_v3  ;;  %12037 = vst [vmem:[#allocation62_spill] sm:$0xff] %v9031_v1  ;;  %v6300_v7 = vor.u32 %v6914_v58, %v6299_v18 }
 0x52b   :  { %v2443_v13 = vmul.f32 0.2, %v2436_v28  ;;  %v2444_v12 = vmul.f32 0.2, %v2437_v14  ;;  %v2445_v36 = vmul.f32 0.2, %v2438_v27 }
 0x52c   :  { %v2446_v30 = vmul.f32 0.2, %v2439_v17  ;;  %v2447_v32 = vmul.f32 0.2, %v2440_v25  ;;  %v2448_v45 = vmul.f32 0.2, %v2441_v50  ;;  %3976 = vmatpush.bf16.msrb.mxu0 %v6316_v5 }
 0x52d   :  { %v2449_v42 = vmul.f32 0.2, %v2442_v11  ;;  %v9033_v61 = vmax.f32 %v2436_v28, %v2443_v13  ;;  %v9035_v43 = vmax.f32 %v2437_v14, %v2444_v12  ;;  %v9037_v60 = vmax.f32 %v2438_v27, %v2445_v36 }
 0x52e   :  { %v9039_v20 = vmax.f32 %v2439_v17, %v2446_v30  ;;  %v9041_v3 = vmax.f32 %v2440_v25, %v2447_v32  ;;  %v9043_v51 = vmax.f32 %v2441_v50, %v2448_v45  ;;  %v9056_v25 = vpop.permute.xlu0 %2928 }
 0x52f   :  { %v9045_v31 = vmax.f32 %v2442_v11, %v2449_v42  ;;  %v2761_v5 = vmul.f32 %v8715_v41, %v9033_v61  ;;  %v2762_v28 = vmul.f32 %v8730_v19, %v9035_v43  ;;  %v2457_v14 = vrot.slane %v9033_v61, 2  ;;  %12038 = vst [vmem:[#allocation63_spill] sm:$0xff] %v9056_v25 }
 0x530   :  { %v2458_v38 = vrot.slane %v9035_v43, 2  ;;  %v2523_v27 = vrot.slane %v9033_v61, 3  ;;  %v2524_v17 = vrot.slane %v9035_v43, 3  ;;  %3977 = vmatpush.bf16.msrb.mxu0 %v6308_v52  ;;  %v2589_v58 = vrot.slane %v9035_v43, 4 }
 0x531   :  { %v9058_v50 = vpack.c.bf16 %v2762_v28, %v2761_v5  ;;  %v11782_v11 = vrot.slane %v9045_v31, 2  ;;  %v11781_v18 = vrot.slane %v9045_v31, 3  ;;  %v2590_v36 = vrot.slane %v9037_v60, 4 }
 0x532   :  { %v2472_v13 = vsel %vm2466_vm8, %v2457_v14, %v2458_v38  ;;  %v2536_v12 = vsel %vm2530_vm9, %v2523_v27, %v2524_v17  ;;  %v2763_v30 = vmul.f32 %v8732_v48, %v9037_v60  ;;  %v12040_v19 = vrot.slane %v9033_v61, 4  ;;  %v7014_v48 = vld [vmem:[%s11736_s13 + $0x464] sm:$0xf0] }
 0x533   :  { %12039 = vst [vmem:[#allocation64_spill] sm:$0xff] %v9058_v50  ;;  %4039 = vmatmul.bf16.vlgmr.msrb.gmra.mxu2 %v9058_v50  ;;  %v2473_v32 = vsel %vm2466_vm8, %v11782_v11, %v2457_v14  ;;  %v2517_v45 = vmul.f32 %v8622_v40, %v2472_v13  ;;  %v2537_v52 = vsel %vm2530_vm9, %v11781_v18, %v2523_v27  ;;  %v2526_v40 = vrot.slane %v9039_v20, 3 }
 0x534   :  { %v2582_v42 = vmul.f32 %v8636_v63, %v2536_v12  ;;  %v2516_v5 = vmul.f32 %v8624_v16, %v2473_v32  ;;  %v2581_v28 = vmul.f32 %v8638_v29, %v2537_v52  ;;  %v9085_v15 = vsel %vm2595_vm10, %v2589_v58, %v2590_v36  ;;  %3978 = vmatpush.bf16.msrb.mxu0 %v6300_v7  ;;  %v9100_v52 = vpop.permute.xlu2 %2988 }
 0x535   :  { %v9091_v14 = vsel %vm2595_vm10, %v12040_v19, %v2589_v58  ;;  %v2877_v13 = vmul.f32 %v9005_v33, %v9085_v15  ;;  %v2764_v12 = vmul.f32 %v8768_v47, %v9039_v20  ;;  %v2459_v32 = vrot.slane %v9037_v60, 2  ;;  %12041 = vst [vmem:[#allocation65_spill] sm:$0xff] %v9100_v52  ;;  %v9108_v58 = vpop.permute.xlu1 %2983 }
 0x536   :  { %v2876_v27 = vmul.f32 %v8900_v62, %v9091_v14  ;;  %v9102_v18 = vpack.c.bf16 %v2517_v45, %v2516_v5  ;;  %v9104_v11 = vpack.c.bf16 %v2582_v42, %v2581_v28  ;;  %v2460_v19 = vrot.slane %v9039_v20, 2  ;;  %12042 = vst [vmem:[#allocation66_spill] sm:$0xff] %v9108_v58  ;;  %v7016_v28 = vld [vmem:[%s11736_s13 + $0x474] sm:$0xf0] }
 0x537   :  { %v2525_v7 = vrot.slane %v9037_v60, 3  ;;  %v9112_v33 = vpack.c.bf16 %v2764_v12, %v2763_v30  ;;  %v2471_v47 = vsel %vm2466_vm8, %v2458_v38, %v2459_v32  ;;  %v2591_v30 = vrot.slane %v9039_v20, 4  ;;  %v6707_v38 = vld [vmem:[%s11736_s13 + $0x470] sm:$0xf] }
 0x538   :  { %v9110_v63 = vpack.c.bf16 %v2877_v13, %v2876_v27  ;;  %3927 = vmatmul.bf16.vlgmr.msra.gmra.mxu0 %v9102_v18  ;;  %3955 = vmatmul.bf16.vlgmr.msra.gmra.mxu3 %v9104_v11  ;;  %v2470_v45 = vsel %vm2466_vm8, %v2459_v32, %v2460_v19  ;;  %v2518_v42 = vmul.f32 %v8632_v37, %v2471_v47  ;;  %v2461_v16 = vrot.slane %v9041_v3, 2 }
 0x539   :  { %12044 = vst [vmem:[#allocation68_spill] sm:$0xff] %v9112_v33  ;;  %v2535_v5 = vsel %vm2530_vm9, %v2524_v17, %v2525_v7  ;;  %v2519_v27 = vmul.f32 %v8630_v23, %v2470_v45  ;;  %v2534_v47 = vsel %vm2530_vm9, %v2525_v7, %v2526_v40  ;;  %v2592_v17 = vrot.slane %v9041_v3, 4  ;;  %v6291_v7 = vld [vmem:[%s11736_s13 + $0x130] sm:$0xf]  ;;  %v6912_v45 = vld [vmem:[%s11736_s13 + $0x134] sm:$0xf0] }
 0x53a   :  { %12043 = vst [vmem:[#allocation67_spill] sm:$0xff] %v9110_v63  ;;  %4095 = vmatmul.bf16.vlgmr.msra.gmra.mxu1 %v9110_v63  ;;  %v2583_v13 = vmul.f32 %v8652_v39, %v2535_v5  ;;  %v2584_v12 = vmul.f32 %v8650_v56, %v2534_v47  ;;  %v9140_v32 = vsel %vm2595_vm10, %v2590_v36, %v2591_v30  ;;  %v9152_v5 = vpop.permute.xlu0 %2858 }
 0x53b   :  { %v2765_v62 = vmul.f32 %v8781_v24, %v9041_v3  ;;  %v2766_v41 = vmul.f32 %v8779_v57, %v9043_v51  ;;  %12045 = vst [vmem:[#allocation69_spill] sm:$0xff] %v9152_v5  ;;  %v9154_v47 = vpack.c.bf16 %v2519_v27, %v2518_v42  ;;  %v9158_v36 = vsel %vm2595_vm10, %v2591_v30, %v2592_v17  ;;  %v6387_v42 = vld [vmem:[%s11736_s13 + $0x1f0] sm:$0xf] }
 0x53c   :  { %v2878_v56 = vmul.f32 %v9029_v59, %v9140_v32  ;;  %v6708_v57 = vor.u32 %v7016_v28, %v6707_v38  ;;  %v9162_v23 = vpack.c.bf16 %v2584_v12, %v2583_v13  ;;  %v2879_v24 = vmul.f32 %v9152_v5, %v9158_v36  ;;  %v6936_v13 = vld [vmem:[%s11736_s13 + $0x1f4] sm:$0xf0]  ;;  %v6903_v5 = vld [vmem:[%s11736_s13 + $0xf4] sm:$0xf]  ;;  %v6699_v59 = vld [vmem:[%s11736_s13 + $0x460] sm:$0xf]  ;;  %v9203_v39 = vpop.permute.xlu2 %2868 }
 0x53d   :  { %12046 = vst [vmem:[#allocation70_spill] sm:$0xff] %v9154_v47  ;;  %v9166_v29 = vpack.c.bf16 %v2766_v41, %v2765_v62  ;;  %v2462_v30 = vrot.slane %v9043_v51, 2  ;;  %v2527_v27 = vrot.slane %v9041_v3, 3  ;;  %v2528_v38 = vrot.slane %v9043_v51, 3  ;;  %v9218_v37 = vpop.permute.xlu1 %2863 }
 0x53e   :  { %4143 = vmatpush.bf16.msra.mxu2 %v6708_v57  ;;  %v6292_v28 = vor.u32 %v6912_v45, %v6291_v7  ;;  %v9178_v41 = vpack.c.bf16 %v2879_v24, %v2878_v56  ;;  %v2469_v62 = vsel %vm2466_vm8, %v2460_v19, %v2461_v16  ;;  %v2593_v12 = vrot.slane %v9043_v51, 4  ;;  %v6261_v7 = vld [vmem:[%s11736_s13 + $0xf8] sm:$0xf0]  ;;  %12047 = vst [vmem:[#allocation71_spill] sm:$0xff] %v9203_v39 }
 0x53f   :  { %v2594_v57 = vrot.slane %v9045_v31, 4  ;;  %v2468_v45 = vsel %vm2466_vm8, %v2461_v16, %v2462_v30  ;;  %v2520_v56 = vmul.f32 %v8628_v55, %v2469_v62  ;;  %v2532_v24 = vsel %vm2530_vm9, %v2527_v27, %v2528_v38  ;;  %12048 = vst [vmem:[#allocation72_spill] sm:$0xff] %v9218_v37 }
 0x540   :  { %v2533_v19 = vsel %vm2530_vm9, %v2526_v40, %v2527_v27  ;;  %3979 = vmatpush.bf16.msrb.mxu0 %v6292_v28  ;;  %v2521_v16 = vmul.f32 %v8646_v6, %v2468_v45  ;;  %v2586_v55 = vmul.f32 %v8681_v2, %v2532_v24  ;;  %v6379_v27 = vld [vmem:[%s11736_s13 + $0x1e0] sm:$0xf]  ;;  %v6934_v28 = vld [vmem:[%s11736_s13 + $0x1e4] sm:$0xf0]  ;;  %v9222_v45 = vsel %vm2595_vm10, %v2592_v17, %v2593_v12 }
 0x541   :  { %v2585_v62 = vmul.f32 %v8660_v4, %v2533_v19  ;;  %v9210_v40 = vsel %vm2595_vm10, %v2593_v12, %v2594_v57  ;;  %v6388_v19 = vor.u32 %v6936_v13, %v6387_v42  ;;  %v6264_v2 = vor.u32 %v6903_v5, %v6261_v7  ;;  %v6283_v6 = vld [vmem:[%s11736_s13 + $0x120] sm:$0xf]  ;;  %v6910_v4 = vld [vmem:[%s11736_s13 + $0x124] sm:$0xf0]  ;;  %v6691_v5 = vld [vmem:[%s11736_s13 + $0x450] sm:$0xf] }
 0x542   :  { %v2881_v24 = vmul.f32 %v9203_v39, %v9210_v40  ;;  %v9232_v63 = vpack.c.bf16 %v2521_v16, %v2520_v56  ;;  %v2880_v17 = vmul.f32 %v9218_v37, %v9222_v45  ;;  %v6700_v12 = vor.u32 %v7014_v48, %v6699_v59  ;;  %v7012_v42 = vld [vmem:[%s11736_s13 + $0x454] sm:$0xf0]  ;;  %v6253_v48 = vld [vmem:[%s11736_s13 + $0xe8] sm:$0xf0]  ;;  %v6371_v56 = vld [vmem:[%s11736_s13 + $0x1d0] sm:$0xf] }
 0x543   :  { %v9234_v50 = vpack.c.bf16 %v2586_v55, %v2585_v62  ;;  %4044 = vmatmul.bf16.gmra.mxu2 %v9112_v33  ;;  %4003 = vmatpush.bf16.msrb.mxu3 %v6388_v19  ;;  %v6380_v13 = vor.u32 %v6934_v28, %v6379_v27  ;;  %v6901_v55 = vld [vmem:[%s11736_s13 + $0xe4] sm:$0xf]  ;;  %v6284_v7 = vor.u32 %v6910_v4, %v6283_v6  ;;  %v6932_v16 = vld [vmem:[%s11736_s13 + $0x1d4] sm:$0xf0]  ;;  %v9262_v27 = vld [vmem:[%s11736_s13 + $0xd4] sm:$0xf] }
 0x544   :  { %v9251_v59 = vpack.c.bf16 %v2881_v24, %v2880_v17  ;;  %4199 = vmatpush.bf16.msrb.mxu1 %v6264_v2  ;;  %4144 = vmatpush.bf16.msra.mxu2 %v6700_v12  ;;  %v6692_v62 = vor.u32 %v7012_v42, %v6691_v5  ;;  %v6245_v2 = vld [vmem:[%s11736_s13 + $0xd8] sm:$0xf0]  ;;  %v6683_v6 = vld [vmem:[%s11736_s13 + $0x440] sm:$0xf]  ;;  %v7010_v4 = vld [vmem:[%s11736_s13 + $0x444] sm:$0xf0]  ;;  %v6256_v28 = vor.u32 %v6901_v55, %v6253_v48 }
 0x545   :  { %3980 = vmatpush.bf16.msrb.mxu0 %v6284_v7  ;;  %v9276_v24 = vld [vmem:[%s11736_s13 + $0x1c0] sm:$0xf]  ;;  %v9281_v19 = vld [vmem:[%s11736_s13 + $0x1c4] sm:$0xf0]  ;;  %v9286_v17 = vld [vmem:[%s11736_s13 + $0xc4] sm:$0xf]  ;;  %v6372_v7 = vor.u32 %v6932_v16, %v6371_v56 }
 0x546   :  { %v9291_v12 = vld [vmem:[%s11736_s13 + $0xc8] sm:$0xf0]  ;;  %v12049_v5 = vrot.slane %v9045_v31, 2  ;;  %v12050_v55 = vrot.slane %v9045_v31, 3  ;;  %v9304_v39 = vld [vmem:[%s11736_s13 + $0x430] sm:$0xf] }
 0x547   :  { %4004 = vmatpush.bf16.msrb.mxu3 %v6380_v13  ;;  %v9309_v37 = vld [vmem:[%s11736_s13 + $0x434] sm:$0xf0]  ;;  %v12051_v33 = vrot.slane %v9033_v61, 4  ;;  %v2767_v13 = vmul.f32 %v8831_v22, %v9045_v31  ;;  %v6275_v56 = vld [vmem:[%s11736_s13 + $0x110] sm:$0xf] }
 0x548   :  { %v2467_v42 = vsel %vm2466_vm8, %v2462_v30, %v12049_v5  ;;  %v2531_v48 = vsel %vm2530_vm9, %v2528_v38, %v12050_v55  ;;  %3932 = vmatmul.bf16.gmra.mxu0 %v9154_v47  ;;  %3960 = vmatmul.bf16.gmra.mxu3 %v9162_v23  ;;  %v6908_v16 = vld [vmem:[%s11736_s13 + $0x114] sm:$0xf0]  ;;  %v6684_v55 = vor.u32 %v7010_v4, %v6683_v6  ;;  %v9337_v22 = vld [vmem:[%s11736_s13 + $0x1b0] sm:$0xf]  ;;  %v9355_v4 = vld [vmem:[%s11736_s13 + $0xb8] sm:$0xf0] }
 0x549   :  { %v9315_v30 = vsel %vm2595_vm10, %v2594_v57, %v12051_v33  ;;  %v2647_v57 = vmul.f32 %v8662_v0, %v9091_v14  ;;  %4145 = vmatpush.bf16.msra.mxu2 %v6692_v62  ;;  %v6276_v38 = vor.u32 %v6908_v16, %v6275_v56  ;;  %v9342_v47 = vld [vmem:[%s11736_s13 + $0x1b4] sm:$0xf0]  ;;  %v9347_v14 = vld [vmem:[%s11736_s13 + $0xb4] sm:$0xf]  ;;  %4200 = vmatpush.bf16.msrb.mxu1 %v6256_v28  ;;  %v9360_v56 = vld [vmem:[%s11736_s13 + $0x420] sm:$0xf] }
 0x54a   :  { %v2646_v33 = vmul.f32 %v8666_v35, %v9315_v30  ;;  %4100 = vmatmul.bf16.gmra.mxu1 %v9178_v41  ;;  %v6248_v62 = vor.u32 %v9262_v27, %v6245_v2  ;;  %v9365_v16 = vld [vmem:[%s11736_s13 + $0x424] sm:$0xf0]  ;;  %v2648_v27 = vmul.f32 %v8672_v46, %v9085_v15  ;;  %v6364_v2 = vor.u32 %v9281_v19, %v9276_v24  ;;  %v9386_v15 = vld [vmem:[%s11736_s13 + $0xa4] sm:$0xf]  ;;  %v6267_v0 = vld [vmem:[%s11736_s13 + $0x100] sm:$0xf] }
 0x54b   :  { %4005 = vmatpush.bf16.msrb.mxu3 %v6372_v7  ;;  %v6240_v28 = vor.u32 %v9286_v17, %v9291_v12  ;;  %3981 = vmatpush.bf16.msrb.mxu0 %v6276_v38  ;;  %v2649_v24 = vmul.f32 %v8670_v10, %v9140_v32  ;;  %v9390_v19 = vpack.c.bf16 %v2767_v13, %v2767_v13  ;;  %v9397_v12 = vld [vmem:[%s11736_s13 + $0xa8] sm:$0xf0]  ;;  %v9402_v7 = vld [vmem:[%s11736_s13 + $0x410] sm:$0xf]  ;;  %v9407_v38 = vld [vmem:[%s11736_s13 + $0x414] sm:$0xf0] }
 0x54c   :  { %v9350_v6 = vpack.c.bf16 %v2647_v57, %v2646_v33  ;;  %v9376_v33 = vld [vmem:[%s11736_s13 + $0x1a0] sm:$0xf]  ;;  %v9381_v57 = vld [vmem:[%s11736_s13 + $0x1a4] sm:$0xf0]  ;;  %v6676_v17 = vor.u32 %v9309_v37, %v9304_v39  ;;  %v2650_v32 = vmul.f32 %v8693_v49, %v9158_v36  ;;  %v2651_v37 = vmul.f32 %v8691_v44, %v9222_v45  ;;  %v9430_v45 = vld [vmem:[%s11736_s13 + $0x190] sm:$0xf] }
 0x54d   :  { %4146 = vmatpush.bf16.msra.mxu2 %v6684_v55  ;;  %v9414_v39 = vmul.f32 %v8654_v8, %v2467_v42  ;;  %v9417_v13 = vmul.f32 %v8700_v34, %v2531_v48  ;;  %v6356_v5 = vor.u32 %v9342_v47, %v9337_v22  ;;  %v6906_v36 = vld [vmem:[%s11736_s13 + $0x104] sm:$0xf0]  ;;  %v9432_v42 = vpack.c.bf16 %v2649_v24, %v2648_v27  ;;  %v9441_v55 = vld [vmem:[%s11736_s13 + $0x194] sm:$0xf0]  ;;  %v9446_v44 = vld [vmem:[%s11736_s13 + $0x94] sm:$0xf] }
 0x54e   :  { %4201 = vmatpush.bf16.msrb.mxu1 %v6248_v62  ;;  %v6232_v48 = vor.u32 %v9347_v14, %v9355_v4  ;;  %v6668_v22 = vor.u32 %v9365_v16, %v9360_v56  ;;  %v6268_v47 = vor.u32 %v6906_v36, %v6267_v0  ;;  %v9451_v62 = vld [vmem:[%s11736_s13 + $0x98] sm:$0xf0]  ;;  %v9453_v14 = vpack.c.bf16 %v2651_v37, %v2650_v32  ;;  %v9466_v27 = vld [vmem:[%s11736_s13 + $0x400] sm:$0xf]  ;;  %v9490_v37 = vld [vmem:[%s11736_s13 + $0x184] sm:$0xf0] }
 0x54f   :  { %4006 = vmatpush.bf16.msrb.mxu3 %v6364_v2  ;;  %v6348_v0 = vor.u32 %v9381_v57, %v9376_v33  ;;  %v6660_v56 = vor.u32 %v9407_v38, %v9402_v7  ;;  %v9471_v2 = vld [vmem:[%s11736_s13 + $0x404] sm:$0xf0]  ;;  %v9473_v33 = vpop.permute.xlu0 %2938  ;;  %v2950_v24 = vrot.slane %v9037_v60, 6  ;;  %v2653_v7 = vrot.slane %v9033_v61, 7  ;;  %v9485_v32 = vld [vmem:[%s11736_s13 + $0x180] sm:$0xf] }
 0x550   :  { %12052 = vst [vmem:[#allocation73_spill] sm:$0xff] %v9473_v33  ;;  %3982 = vmatpush.bf16.msrb.mxu0 %v6268_v47  ;;  %v12053_v36 = vrot.slane %v9035_v43, 6  ;;  %v12054_v47 = vrot.slane %v9033_v61, 6  ;;  %v2654_v57 = vrot.slane %v9035_v43, 7  ;;  %v11849_v38 = vrot.slane %v9045_v31, 7 }
 0x551   :  { %4147 = vmatpush.bf16.msra.mxu2 %v6676_v17  ;;  %v2951_v34 = vrot.slane %v9039_v20, 6  ;;  %v12065_v46 = vrot.slane %v9033_v61, 6 }
 0x552   :  { %v2961_v17 = vsel %vm2955_vm11, %v12054_v47, %v12053_v36  ;;  %4202 = vmatpush.bf16.msrb.mxu1 %v6240_v28  ;;  %v12055_v16 = vmov %v12053_v36  ;;  %v2666_v47 = vsel %vm2660_vm12, %v2653_v7, %v2654_v57  ;;  %v2667_v28 = vsel %vm2660_vm12, %v11849_v38, %v2653_v7 }
 0x553   :  { %v2960_v4 = vsel %vm2955_vm11, %v12055_v16, %v2950_v24  ;;  %v3006_v49 = vmul.f32 %v8985_v9, %v2961_v17  ;;  %4049 = vmatmul.bf16.gmra.mxu2 %v9166_v29  ;;  %4007 = vmatpush.bf16.msrb.mxu3 %v6356_v5  ;;  %v2952_v16 = vrot.slane %v9041_v3, 6  ;;  %v2711_v8 = vmul.f32 %v8710_v53, %v2667_v28 }
 0x554   :  { %v3007_v36 = vmul.f32 %v8977_v21, %v2960_v4  ;;  %v2712_v9 = vmul.f32 %v8706_v54, %v2666_v47  ;;  %v2959_v5 = vsel %vm2955_vm11, %v2950_v24, %v2951_v34  ;;  %v2655_v38 = vrot.slane %v9037_v60, 7  ;;  %v6507_v54 = vld [vmem:[%s11736_s13 + $0x2e0] sm:$0xf] }
 0x555   :  { %4148 = vmatpush.bf16.msra.mxu2 %v6668_v22  ;;  %v2958_v21 = vsel %vm2955_vm11, %v2951_v34, %v2952_v16  ;;  %v3008_v7 = vmul.f32 %v9108_v58, %v2959_v5  ;;  %v2656_v47 = vrot.slane %v9039_v20, 7  ;;  %v2953_v17 = vrot.slane %v9043_v51, 6  ;;  %v9552_v5 = vpop.permute.xlu1 %2998 }
 0x556   :  { %v9522_v4 = vpack.c.bf16 %v3007_v36, %v3006_v49  ;;  %4203 = vmatpush.bf16.msrb.mxu1 %v6232_v48  ;;  %v9528_v35 = vpack.c.bf16 %v2712_v9, %v2711_v8  ;;  %v3009_v28 = vmul.f32 %v9100_v52, %v2958_v21  ;;  %v2665_v49 = vsel %vm2660_vm12, %v2654_v57, %v2655_v38  ;;  %v6515_v8 = vld [vmem:[%s11736_s13 + $0x2f0] sm:$0xf]  ;;  %v6968_v21 = vld [vmem:[%s11736_s13 + $0x2f4] sm:$0xf0] }
 0x557   :  { %4008 = vmatpush.bf16.msrb.mxu3 %v6348_v0  ;;  %v2954_v22 = vrot.slane %v9045_v31, 6  ;;  %v2657_v34 = vrot.slane %v9041_v3, 7  ;;  %v2658_v24 = vrot.slane %v9043_v51, 7  ;;  %v2664_v48 = vsel %vm2660_vm12, %v2655_v38, %v2656_v47  ;;  %v12056_v0 = vld [vmem:[#allocation35_spill] sm:$0xff]  ;;  %12057 = vst [vmem:[#allocation74_spill] sm:$0xff] %v9552_v5  ;;  %v9565_v53 = vpop.permute.xlu0 %2993 }
 0x558   :  { %3937 = vmatmul.bf16.gmra.mxu0 %v9232_v63  ;;  %3965 = vmatmul.bf16.gmra.mxu3 %v9234_v50  ;;  %v9546_v9 = vpack.c.bf16 %v3009_v28, %v3008_v7  ;;  %v2713_v57 = vmul.f32 %v12056_v0, %v2665_v49  ;;  %v6516_v52 = vor.u32 %v6968_v21, %v6515_v8  ;;  %v6966_v7 = vld [vmem:[%s11736_s13 + $0x2e4] sm:$0xf0]  ;;  %v12058_v28 = vld [vmem:[#allocation34_spill] sm:$0xff]  ;;  %v2769_v36 = vrot.slane %v9035_v43, 1  ;;  %v6889_v8 = vld [vmem:[%s11736_s13 + $0x84] sm:$0xf] }
 0x559   :  { %4149 = vmatpush.bf16.msra.mxu2 %v6660_v56  ;;  %v2714_v38 = vmul.f32 %v12058_v28, %v2664_v48  ;;  %v2956_v49 = vsel %vm2955_vm11, %v2953_v17, %v2954_v22  ;;  %12059 = vst [vmem:[#allocation75_spill] sm:$0xff] %v9565_v53  ;;  %v12060_v56 = vor.u32 %v9386_v15, %v9397_v12  ;;  %v6205_v21 = vld [vmem:[%s11736_s13 + $0x88] sm:$0xf0] }
 0x55a   :  { %4105 = vmatmul.bf16.gmra.mxu1 %v9251_v59  ;;  %v6508_v48 = vor.u32 %v6966_v7, %v6507_v54  ;;  %v2957_v28 = vsel %vm2955_vm11, %v2952_v16, %v2953_v17  ;;  %v3011_v58 = vmul.f32 %v9552_v5, %v2956_v49  ;;  %v2662_v0 = vsel %vm2660_vm12, %v2657_v34, %v2658_v24  ;;  %v9590_v16 = vpop.permute.xlu2 %2873  ;;  %v12063_v17 = vld [vmem:[#allocation41_spill] sm:$0xff]  ;;  %v12064_v5 = vld [vmem:[#allocation40_spill] sm:$0xff] }
 0x55b   :  { %4204 = vmatpush.bf16.msrb.mxu1 %v12060_v56  ;;  %v12061_v15 = vor.u32 %v9441_v55, %v9430_v45  ;;  %4059 = vmatpush.bf16.msra.mxu0 %v6516_v52  ;;  %v9584_v12 = vpack.c.bf16 %v2714_v38, %v2713_v57  ;;  %v3010_v56 = vmul.f32 %v9565_v53, %v2957_v28  ;;  %v2770_v7 = vrot.slane %v9037_v60, 1 }
 0x55c   :  { %v2663_v54 = vsel %vm2660_vm12, %v2656_v47, %v2657_v34  ;;  %12062 = vst [vmem:[#allocation76_spill] sm:$0xff] %v9590_v16  ;;  %v2716_v10 = vmul.f32 %v12064_v5, %v2662_v0  ;;  %v9598_v52 = vsel %vm2955_vm11, %v2954_v22, %v12065_v46  ;;  %v12066_v45 = vrot.slane %v9045_v31, 7  ;;  %v6915_v5 = vld [vmem:[%s11736_s13 + $0x154] sm:$0xf] }
 0x55d   :  { %4009 = vmatpush.bf16.msrb.mxu3 %v12061_v15  ;;  %v2715_v49 = vmul.f32 %v12063_v17, %v2663_v54  ;;  %v2882_v47 = vmul.f32 %v9590_v16, %v9315_v30  ;;  %v12067_v34 = vor.u32 %v9471_v2, %v9466_v27  ;;  %v6208_v0 = vor.u32 %v6889_v8, %v6205_v21  ;;  %v6907_v16 = vld [vmem:[%s11736_s13 + $0x114] sm:$0xf] }
 0x55e   :  { %v9604_v55 = vsel %vm2660_vm12, %v2658_v24, %v12066_v45  ;;  %v9611_v57 = vpack.c.bf16 %v3011_v58, %v3010_v56  ;;  %v12069_v46 = vor.u32 %v9446_v44, %v9451_v62  ;;  %v2780_v24 = vsel %vm2775_vm13, %v2769_v36, %v2770_v7  ;;  %v12072_v62 = vld [vmem:[#allocation37_spill] sm:$0xff] }
 0x55f   :  { %4150 = vmatpush.bf16.msra.mxu2 %v12067_v34  ;;  %v9617_v22 = vpack.c.bf16 %v2716_v10, %v2715_v49  ;;  %v12070_v30 = vrot.slane %v9033_v61, 1  ;;  %v2883_v2 = vrot.slane %v9033_v61, 5  ;;  %v9628_v58 = vpack.c.bf16 %v9414_v39, %v9414_v39  ;;  %4060 = vmatpush.bf16.msra.mxu0 %v6508_v48  ;;  %v12075_v49 = vld [vmem:[#allocation53_spill] sm:$0xff]  ;;  %v12076_v34 = vld [vmem:[#allocation43_spill] sm:$0xff] }
 0x560   :  { %12068 = vst [vmem:[#allocation77_spill] sm:$0xff] %v9611_v57  ;;  %4205 = vmatpush.bf16.msrb.mxu1 %v12069_v46  ;;  %v9632_v44 = vpack.c.bf16 %v9417_v13, %v9417_v13  ;;  %v12071_v10 = vor.u32 %v9490_v37, %v9485_v32  ;;  %v2884_v38 = vrot.slane %v9035_v43, 5  ;;  %v2885_v21 = vrot.slane %v9037_v60, 5  ;;  %v12074_v60 = vld [vmem:[#allocation48_spill] sm:$0xff]  ;;  %v12077_v46 = vld [vmem:[#allocation42_spill] sm:$0xff] }
 0x561   :  { %v2781_v27 = vsel %vm2775_vm13, %v12070_v30, %v2769_v36  ;;  %v12073_v36 = vld [vmem:[#allocation36_spill] sm:$0xff]  ;;  %v2771_v39 = vrot.slane %v9039_v20, 1  ;;  %v2772_v15 = vrot.slane %v9041_v3, 1  ;;  %v2886_v32 = vrot.slane %v9039_v20, 5 }
 0x562   :  { %4010 = vmatpush.bf16.msrb.mxu3 %v12071_v10  ;;  %v2826_v28 = vmul.f32 %v12072_v62, %v2781_v27  ;;  %v2827_v8 = vmul.f32 %v12073_v36, %v2780_v24  ;;  %v2896_v13 = vsel %vm2890_vm14, %v2883_v2, %v2884_v38  ;;  %v2887_v37 = vrot.slane %v9041_v3, 5  ;;  %v12078_v27 = vld [vmem:[#allocation55_spill] sm:$0xff] }
 0x563   :  { %v2895_v43 = vsel %vm2890_vm14, %v2884_v38, %v2885_v21  ;;  %v2941_v56 = vmul.f32 %v12074_v60, %v2896_v13  ;;  %v2779_v54 = vsel %vm2775_vm13, %v2770_v7, %v2771_v39  ;;  %4054 = vmatmul.bf16.gmra.mxu2 %v9390_v19  ;;  %v2778_v20 = vsel %vm2775_vm13, %v2771_v39, %v2772_v15  ;;  %v12079_v38 = vld [vmem:[#allocation56_spill] sm:$0xff]  ;;  %v6949_v60 = vld [vmem:[%s11736_s13 + $0x264] sm:$0xf] }
 0x564   :  { %4206 = vmatpush.bf16.msrb.mxu1 %v6208_v0  ;;  %v9648_v48 = vpack.c.bf16 %v2827_v8, %v2826_v28  ;;  %v2942_v45 = vmul.f32 %v12075_v49, %v2895_v43  ;;  %v2828_v3 = vmul.f32 %v12076_v34, %v2779_v54  ;;  %v2893_v0 = vsel %vm2890_vm14, %v2886_v32, %v2887_v37 }
 0x565   :  { %v2829_v24 = vmul.f32 %v12077_v46, %v2778_v20  ;;  %v2894_v30 = vsel %vm2890_vm14, %v2885_v21, %v2886_v32  ;;  %v2944_v10 = vmul.f32 %v12078_v27, %v2893_v0  ;;  %v2773_v7 = vrot.slane %v9043_v51, 1 }
 0x566   :  { %v9667_v28 = vpack.c.bf16 %v2942_v45, %v2941_v56  ;;  %v2943_v8 = vmul.f32 %v12079_v38, %v2894_v30  ;;  %v2774_v39 = vrot.slane %v9045_v31, 1  ;;  %v2888_v13 = vrot.slane %v9043_v51, 5  ;;  %v12080_v45 = vld [vmem:[#allocation50_spill] sm:$0xff]  ;;  %v6499_v51 = vld [vmem:[%s11736_s13 + $0x2d0] sm:$0xf] }
 0x567   :  { %v9672_v43 = vpack.c.bf16 %v2882_v47, %v2882_v47  ;;  %v9674_v54 = vpack.c.bf16 %v2829_v24, %v2828_v3  ;;  %v2777_v20 = vsel %vm2775_vm13, %v2772_v15, %v2773_v7  ;;  %v2889_v21 = vrot.slane %v9045_v31, 5  ;;  %v6964_v31 = vld [vmem:[%s11736_s13 + $0x2d4] sm:$0xf0] }
 0x568   :  { %v9679_v32 = vpack.c.bf16 %v2944_v10, %v2943_v8  ;;  %v2776_v56 = vsel %vm2775_vm13, %v2773_v7, %v2774_v39  ;;  %v2830_v0 = vmul.f32 %v12080_v45, %v2777_v20  ;;  %v2892_v30 = vsel %vm2890_vm14, %v2887_v37, %v2888_v13  ;;  %3942 = vmatmul.bf16.gmra.mxu0 %v9628_v58  ;;  %v12081_v47 = vld [vmem:[#allocation49_spill] sm:$0xff]  ;;  %v6491_v10 = vld [vmem:[%s11736_s13 + $0x2c0] sm:$0xf]  ;;  %v6962_v7 = vld [vmem:[%s11736_s13 + $0x2c4] sm:$0xf0] }
 0x569   :  { %3970 = vmatmul.bf16.gmra.mxu3 %v9632_v44  ;;  %v2831_v15 = vmul.f32 %v12081_v47, %v2776_v56  ;;  %v2891_v3 = vsel %vm2890_vm14, %v2888_v13, %v2889_v21  ;;  %v2945_v24 = vmul.f32 %v9056_v25, %v2892_v30  ;;  %v6500_v37 = vor.u32 %v6964_v31, %v6499_v51 }
 0x56a   :  { %4110 = vmatmul.bf16.gmra.mxu1 %v9672_v43  ;;  %v2946_v8 = vmul.f32 %v9031_v1, %v2891_v3  ;;  %v12082_v20 = vrot.slane %v9033_v61, 1  ;;  %v9714_v56 = vsel %vm2890_vm14, %v2889_v21, %v2883_v2  ;;  %v6492_v51 = vor.u32 %v6962_v7, %v6491_v10  ;;  %v6935_v61 = vld [vmem:[%s11736_s13 + $0x1f4] sm:$0xf]  ;;  %v6483_v2 = vld [vmem:[%s11736_s13 + $0x2b0] sm:$0xf] }
 0x56b   :  { %v9716_v30 = vpack.c.bf16 %v2831_v15, %v2830_v0  ;;  %4061 = vmatpush.bf16.msra.mxu0 %v6500_v37  ;;  %v6960_v21 = vld [vmem:[%s11736_s13 + $0x2b4] sm:$0xf0]  ;;  %v6643_v15 = vld [vmem:[%s11736_s13 + $0x3f0] sm:$0xf]  ;;  %v6967_v37 = vld [vmem:[%s11736_s13 + $0x2f4] sm:$0xf] }
 0x56c   :  { %v9710_v13 = vsel %vm2775_vm13, %v2774_v39, %v12082_v20  ;;  %v9718_v31 = vpack.c.bf16 %v2946_v8, %v2945_v24  ;;  %v6389_v39 = vld [vmem:[%s11736_s13 + $0x1f8] sm:$0xf0]  ;;  %v6484_v0 = vor.u32 %v6960_v21, %v6483_v2  ;;  %v7000_v24 = vld [vmem:[%s11736_s13 + $0x3f4] sm:$0xf0]  ;;  %v6381_v8 = vld [vmem:[%s11736_s13 + $0x1e8] sm:$0xf0] }
 0x56d   :  { %v6392_v3 = vor.u32 %v6935_v61, %v6389_v39  ;;  %v6644_v10 = vor.u32 %v7000_v24, %v6643_v15  ;;  %v6517_v7 = vld [vmem:[%s11736_s13 + $0x2f8] sm:$0xf0]  ;;  %v6635_v61 = vld [vmem:[%s11736_s13 + $0x3e0] sm:$0xf]  ;;  %v6998_v39 = vld [vmem:[%s11736_s13 + $0x3e4] sm:$0xf0] }
 0x56e   :  { %v6520_v20 = vor.u32 %v6967_v37, %v6517_v7  ;;  %v6636_v2 = vor.u32 %v6998_v39, %v6635_v61  ;;  %v6509_v21 = vld [vmem:[%s11736_s13 + $0x2e8] sm:$0xf0]  ;;  %v6373_v15 = vld [vmem:[%s11736_s13 + $0x1d8] sm:$0xf0]  ;;  %v6958_v7 = vld [vmem:[%s11736_s13 + $0x2a4] sm:$0xf0] }
 0x56f   :  { %4062 = vmatpush.bf16.msra.mxu0 %v6492_v51  ;;  %4255 = vmatpush.bf16.msrb.mxu2 %v6392_v3  ;;  %v6965_v3 = vld [vmem:[%s11736_s13 + $0x2e4] sm:$0xf]  ;;  %v6501_v61 = vld [vmem:[%s11736_s13 + $0x2d8] sm:$0xf0] }
 0x570   :  { %4115 = vmatpush.bf16.msra.mxu3 %v6644_v10  ;;  %4311 = vmatpush.bf16.msra.mxu1 %v6520_v20  ;;  %v6512_v24 = vor.u32 %v6965_v3, %v6509_v21  ;;  %v6475_v10 = vld [vmem:[%s11736_s13 + $0x2a0] sm:$0xf]  ;;  %v6996_v20 = vld [vmem:[%s11736_s13 + $0x3d4] sm:$0xf0]  ;;  %v6929_v39 = vld [vmem:[%s11736_s13 + $0x1c4] sm:$0xf] }
 0x571   :  { %v6365_v3 = vld [vmem:[%s11736_s13 + $0x1c8] sm:$0xf0] }
 0x573   :  { %4151 = vmatmul.bf16.vlgmr.msra.gmra.mxu2 %v9522_v4  ;;  %4063 = vmatpush.bf16.msra.mxu0 %v6484_v0  ;;  %v6931_v0 = vld [vmem:[%s11736_s13 + $0x1d4] sm:$0xf] }
 0x574   :  { %v6376_v37 = vor.u32 %v6931_v0, %v6373_v15  ;;  %4116 = vmatpush.bf16.msra.mxu3 %v6636_v2  ;;  %4312 = vmatpush.bf16.msra.mxu1 %v6512_v24  ;;  %v6368_v15 = vor.u32 %v6929_v39, %v6365_v3  ;;  %v6961_v2 = vld [vmem:[%s11736_s13 + $0x2c4] sm:$0xf]  ;;  %v6493_v24 = vld [vmem:[%s11736_s13 + $0x2c8] sm:$0xf0]  ;;  %v6956_v39 = vld [vmem:[%s11736_s13 + $0x294] sm:$0xf0] }
 0x578   :  { %3983 = vmatmul.bf16.vlgmr.msrb.gmra.mxu0 %v9350_v6 }
 0x579   :  { %4011 = vmatmul.bf16.vlgmr.msrb.gmra.mxu3 %v9528_v35 }
 0x57a   :  { %4207 = vmatmul.bf16.vlgmr.msrb.gmra.mxu1 %v9104_v11  ;;  %v6933_v11 = vld [vmem:[%s11736_s13 + $0x1e4] sm:$0xf] }
 0x57b   :  { %v6384_v51 = vor.u32 %v6933_v11, %v6381_v8  ;;  %v6627_v11 = vld [vmem:[%s11736_s13 + $0x3d0] sm:$0xf]  ;;  %v6476_v8 = vor.u32 %v6958_v7, %v6475_v10  ;;  %v6619_v10 = vld [vmem:[%s11736_s13 + $0x3c0] sm:$0xf]  ;;  %v6994_v7 = vld [vmem:[%s11736_s13 + $0x3c4] sm:$0xf0] }
 0x57c   :  { %v6628_v21 = vor.u32 %v6996_v20, %v6627_v11  ;;  %v6357_v11 = vld [vmem:[%s11736_s13 + $0x1b8] sm:$0xf0]  ;;  %v6496_v20 = vor.u32 %v6961_v2, %v6493_v24  ;;  %v6349_v2 = vld [vmem:[%s11736_s13 + $0x1a8] sm:$0xf0] }
 0x57d   :  { %4256 = vmatpush.bf16.msrb.mxu2 %v6384_v51  ;;  %v6963_v51 = vld [vmem:[%s11736_s13 + $0x2d4] sm:$0xf]  ;;  %4064 = vmatpush.bf16.msra.mxu0 %v6476_v8  ;;  %v6620_v8 = vor.u32 %v6994_v7, %v6619_v10  ;;  %v6925_v7 = vld [vmem:[%s11736_s13 + $0x1a4] sm:$0xf] }
 0x57e   :  { %v6504_v0 = vor.u32 %v6963_v51, %v6501_v61  ;;  %4117 = vmatpush.bf16.msra.mxu3 %v6628_v21  ;;  %v6467_v61 = vld [vmem:[%s11736_s13 + $0x290] sm:$0xf] }
 0x57f   :  { %v6468_v3 = vor.u32 %v6956_v39, %v6467_v61  ;;  %v6611_v21 = vld [vmem:[%s11736_s13 + $0x3b0] sm:$0xf]  ;;  %v6923_v61 = vld [vmem:[%s11736_s13 + $0x194] sm:$0xf]  ;;  %v6341_v39 = vld [vmem:[%s11736_s13 + $0x198] sm:$0xf0] }
 0x580   :  { %4313 = vmatpush.bf16.msra.mxu1 %v6504_v0  ;;  %v6992_v0 = vld [vmem:[%s11736_s13 + $0x3b4] sm:$0xf0] }
 0x581   :  { %4257 = vmatpush.bf16.msrb.mxu2 %v6376_v37  ;;  %v6927_v37 = vld [vmem:[%s11736_s13 + $0x1b4] sm:$0xf]  ;;  %v6612_v10 = vor.u32 %v6992_v0, %v6611_v21  ;;  %4065 = vmatpush.bf16.msra.mxu0 %v6468_v3  ;;  %v6459_v21 = vld [vmem:[%s11736_s13 + $0x280] sm:$0xf]  ;;  %v6954_v0 = vld [vmem:[%s11736_s13 + $0x284] sm:$0xf0] }
 0x582   :  { %v6360_v51 = vor.u32 %v6927_v37, %v6357_v11  ;;  %4118 = vmatpush.bf16.msra.mxu3 %v6620_v8  ;;  %v6352_v37 = vor.u32 %v6925_v7, %v6349_v2  ;;  %v6603_v11 = vld [vmem:[%s11736_s13 + $0x3a0] sm:$0xf]  ;;  %v6990_v8 = vld [vmem:[%s11736_s13 + $0x3a4] sm:$0xf0]  ;;  %v6460_v7 = vor.u32 %v6954_v0, %v6459_v21  ;;  %v6595_v2 = vld [vmem:[%s11736_s13 + $0x390] sm:$0xf] }
 0x583   :  { %4156 = vmatmul.bf16.gmra.mxu2 %v9546_v9  ;;  %v6604_v3 = vor.u32 %v6990_v8, %v6603_v11  ;;  %v6955_v11 = vld [vmem:[%s11736_s13 + $0x294] sm:$0xf]  ;;  %v6333_v8 = vld [vmem:[%s11736_s13 + $0x188] sm:$0xf0]  ;;  %v6986_v21 = vld [vmem:[%s11736_s13 + $0x384] sm:$0xf0] }
 0x584   :  { %4314 = vmatpush.bf16.msra.mxu1 %v6496_v20  ;;  %v6957_v20 = vld [vmem:[%s11736_s13 + $0x2a4] sm:$0xf] }
 0x585   :  { %4258 = vmatpush.bf16.msrb.mxu2 %v6368_v15  ;;  %v6959_v15 = vld [vmem:[%s11736_s13 + $0x2b4] sm:$0xf]  ;;  %4066 = vmatpush.bf16.msra.mxu0 %v6460_v7 }
 0x586   :  { %4119 = vmatpush.bf16.msra.mxu3 %v6612_v10  ;;  %v6988_v10 = vld [vmem:[%s11736_s13 + $0x394] sm:$0xf0]  ;;  %v6887_v7 = vld [vmem:[%s11736_s13 + $0x74] sm:$0xf] }
 0x588   :  { %3988 = vmatmul.bf16.gmra.mxu0 %v9432_v42 }
 0x589   :  { %4016 = vmatmul.bf16.gmra.mxu3 %v9584_v12  ;;  %4259 = vmatpush.bf16.msrb.mxu2 %v6360_v51  ;;  %v6477_v51 = vld [vmem:[%s11736_s13 + $0x2a8] sm:$0xf0] }
 0x58a   :  { %4212 = vmatmul.bf16.gmra.mxu1 %v9162_v23  ;;  %v6485_v23 = vld [vmem:[%s11736_s13 + $0x2b8] sm:$0xf0]  ;;  %4120 = vmatpush.bf16.msra.mxu3 %v6604_v3  ;;  %v6953_v3 = vld [vmem:[%s11736_s13 + $0x284] sm:$0xf] }
 0x58b   :  { %v6488_v24 = vor.u32 %v6959_v15, %v6485_v23  ;;  %v6480_v15 = vor.u32 %v6957_v20, %v6477_v51  ;;  %v6344_v23 = vor.u32 %v6923_v61, %v6341_v39  ;;  %v6596_v20 = vor.u32 %v6988_v10, %v6595_v2  ;;  %v6587_v39 = vld [vmem:[%s11736_s13 + $0x380] sm:$0xf]  ;;  %v6197_v2 = vld [vmem:[%s11736_s13 + $0x78] sm:$0xf0] }
 0x58c   :  { %v6588_v0 = vor.u32 %v6986_v21, %v6587_v39  ;;  %v6200_v10 = vor.u32 %v6887_v7, %v6197_v2  ;;  %v12086_v39 = vld [vmem:[#allocation47_spill] sm:$0xff] }
 0x58d   :  { %4315 = vmatpush.bf16.msra.mxu1 %v6488_v24  ;;  %4260 = vmatpush.bf16.msrb.mxu2 %v6352_v37  ;;  %v6469_v24 = vld [vmem:[%s11736_s13 + $0x298] sm:$0xf0]  ;;  %v6921_v37 = vld [vmem:[%s11736_s13 + $0x184] sm:$0xf]  ;;  %v2717_v21 = vmul.f32 %v12086_v39, %v9604_v55  ;;  %v9945_v2 = vld [vmem:[%s11739_s14] sm:$0x3] }
 0x58e   :  { %v6472_v51 = vor.u32 %v6955_v11, %v6469_v24  ;;  %v6336_v61 = vor.u32 %v6921_v37, %v6333_v8  ;;  %4121 = vmatpush.bf16.msra.mxu3 %v6596_v20  ;;  %4171 = vmatpush.bf16.msrb.mxu0 %v6200_v10  ;;  %v9906_v11 = vpop.permute.xlu0 %3003  ;;  %v6885_v37 = vld [vmem:[%s11736_s13 + $0x64] sm:$0xf]  ;;  %v6189_v8 = vld [vmem:[%s11736_s13 + $0x68] sm:$0xf0]  ;;  %v9949_v10 = vperm.slane %v9945_v2, 0 }
 0x58f   :  { %12083 = vst [vmem:[#allocation78_spill] sm:$0xff] %v9906_v11  ;;  %v3012_v24 = vmul.f32 %v9906_v11, %v9598_v52  ;;  %v6192_v20 = vor.u32 %v6885_v37, %v6189_v8  ;;  %v6999_v8 = vld [vmem:[%s11736_s13 + $0x3f4] sm:$0xf] }
 0x591   :  { %4316 = vmatpush.bf16.msra.mxu1 %v6480_v15  ;;  %4261 = vmatpush.bf16.msrb.mxu2 %v6344_v23  ;;  %v6461_v15 = vld [vmem:[%s11736_s13 + $0x288] sm:$0xf0] }
 0x592   :  { %v6464_v23 = vor.u32 %v6953_v3, %v6461_v15  ;;  %4122 = vmatpush.bf16.msra.mxu3 %v6588_v0  ;;  %4172 = vmatpush.bf16.msrb.mxu0 %v6192_v20  ;;  %v9925_v3 = vpack.c.bf16 %v2717_v21, %v2717_v21  ;;  %v6883_v0 = vld [vmem:[%s11736_s13 + $0x54] sm:$0xf]  ;;  %v6881_v15 = vld [vmem:[%s11736_s13 + $0x44] sm:$0xf]  ;;  %v6645_v20 = vld [vmem:[%s11736_s13 + $0x3f8] sm:$0xf0] }
 0x593   :  { %4161 = vmatmul.bf16.gmra.mxu2 %v9611_v57  ;;  %v6165_v21 = vld [vmem:[%s11736_s13 + $0x38] sm:$0xf0] }
 0x595   :  { %4317 = vmatpush.bf16.msra.mxu1 %v6472_v51  ;;  %4262 = vmatpush.bf16.msrb.mxu2 %v6336_v61  ;;  %v9916_v51 = vpack.c.bf16 %v3012_v24, %v3012_v24 }
 0x597   :  { %12084 = vst [vmem:[#allocation79_spill] sm:$0xff] %v9916_v51 }
 0x598   :  { %3993 = vmatmul.bf16.gmra.mxu0 %v9453_v14 }
 0x599   :  { %4021 = vmatmul.bf16.gmra.mxu3 %v9617_v22  ;;  %4318 = vmatpush.bf16.msra.mxu1 %v6464_v23  ;;  %v6173_v23 = vld [vmem:[%s11736_s13 + $0x48] sm:$0xf0] }
 0x59a   :  { %4217 = vmatmul.bf16.gmra.mxu1 %v9234_v50  ;;  %v12085_v50 = vld [vmem:[#allocation30_spill] sm:$0xff]  ;;  %v6176_v7 = vor.u32 %v6881_v15, %v6173_v23  ;;  %v6997_v15 = vld [vmem:[%s11736_s13 + $0x3e4] sm:$0xf] }
 0x59b   :  { %v2652_v61 = vmul.f32 %v12085_v50, %v9210_v40  ;;  %v6181_v40 = vld [vmem:[%s11736_s13 + $0x58] sm:$0xf0] }
 0x59c   :  { %v6184_v55 = vor.u32 %v6883_v0, %v6181_v40  ;;  %v6919_v40 = vld [vmem:[%s11736_s13 + $0x174] sm:$0xf] }
 0x59d   :  { %v9923_v52 = vpack.c.bf16 %v2652_v61, %v2652_v61  ;;  %v9961_v61 = vor.u32 %v6999_v8, %v6645_v20 }
 0x59e   :  { %4173 = vmatpush.bf16.msrb.mxu0 %v6184_v55  ;;  %v6325_v55 = vld [vmem:[%s11736_s13 + $0x178] sm:$0xf0] }
 0x59f   :  { %4367 = vmatpush.bf16.msra.mxu2 %v9961_v61 }
 0x5a2   :  { %4174 = vmatpush.bf16.msrb.mxu0 %v6176_v7  ;;  %v6328_v7 = vor.u32 %v6919_v40, %v6325_v55  ;;  %v6995_v40 = vld [vmem:[%s11736_s13 + $0x3d4] sm:$0xf] }
 0x5a3   :  { %4166 = vmatmul.bf16.gmra.mxu2 %v9916_v51 }
 0x5a4   :  { %4227 = vmatpush.bf16.msrb.mxu3 %v6328_v7  ;;  %v6157_v7 = vld [vmem:[%s11736_s13 + $0x28] sm:$0xf0] }
 0x5a8   :  { %3998 = vmatmul.bf16.gmra.mxu0 %v9923_v52 }
 0x5a9   :  { %4026 = vmatmul.bf16.gmra.mxu3 %v9925_v3 }
 0x5aa   :  { %4222 = vmatmul.bf16.gmra.mxu1 %v9632_v44 }
 0x5b3   :  { %4263 = vmatmul.bf16.vlgmr.msrb.gmra.mxu2 %v9528_v35  ;;  %v6879_v35 = vld [vmem:[%s11736_s13 + $0x34] sm:$0xf] }
 0x5b4   :  { %v6168_v0 = vor.u32 %v6879_v35, %v6165_v21 }
 0x5b5   :  { %v3928_v44 = vpop.f32.mrf.mxu0 }
 0x5b6   :  { %v9953_v37 = vpop.f32.mrf.mxu2  ;;  %v3929_v23 = vadd.f32 %v3928_v44, %v9949_v10  ;;  %4175 = vmatpush.bf16.msrb.mxu0 %v6168_v0  ;;  %v6917_v44 = vld [vmem:[%s11736_s13 + $0x164] sm:$0xf]  ;;  %v6317_v0 = vld [vmem:[%s11736_s13 + $0x168] sm:$0xf0] }
 0x5b7   :  { %v9951_v24 = vpop.f32.mrf.mxu1  ;;  %v6320_v55 = vor.u32 %v6917_v44, %v6317_v0  ;;  %v6309_v44 = vld [vmem:[%s11736_s13 + $0x158] sm:$0xf0]  ;;  %v6993_v0 = vld [vmem:[%s11736_s13 + $0x3c4] sm:$0xf] }
 0x5b8   :  { %4067 = vmatmul.bf16.vlgmr.msra.gmra.mxu0 %v9648_v48  ;;  %v6312_v27 = vor.u32 %v6915_v5, %v6309_v44 }
 0x5b9   :  { %4123 = vmatmul.bf16.vlgmr.msra.gmra.mxu3 %v9667_v28 }
 0x5ba   :  { %4319 = vmatmul.bf16.vlgmr.msra.gmra.mxu1 %v9648_v48  ;;  %v6637_v48 = vld [vmem:[%s11736_s13 + $0x3e8] sm:$0xf0]  ;;  %4228 = vmatpush.bf16.msrb.mxu3 %v6320_v55 }
 0x5bb   :  { %v3956_v8 = vpop.f32.mrf.mxu3  ;;  %v9986_v20 = vor.u32 %v6997_v15, %v6637_v48  ;;  %v6629_v15 = vld [vmem:[%s11736_s13 + $0x3d8] sm:$0xf0] }
 0x5bc   :  { %v9988_v35 = vadd.f32 %v3956_v8, %v3929_v23  ;;  %v6877_v23 = vld [vmem:[%s11736_s13 + $0x24] sm:$0xf]  ;;  %v10013_v48 = vor.u32 %v6995_v40, %v6629_v15  ;;  %v6621_v40 = vld [vmem:[%s11736_s13 + $0x3c8] sm:$0xf0] }
 0x5bd   :  { %v3930_v21 = vpop.f32.mrf.mxu0  ;;  %4368 = vmatpush.bf16.msra.mxu2 %v9986_v20  ;;  %v6160_v8 = vor.u32 %v6877_v23, %v6157_v7  ;;  %v10029_v23 = vor.u32 %v6993_v0, %v6621_v40  ;;  %v6875_v40 = vld [vmem:[%s11736_s13 + $0x14] sm:$0xf] }
 0x5be   :  { %v9993_v47 = vpop.f32.mrf.mxu2  ;;  %v3931_v15 = vadd.f32 %v3930_v21, %v9949_v10  ;;  %4229 = vmatpush.bf16.msrb.mxu3 %v6312_v27  ;;  %v6913_v21 = vld [vmem:[%s11736_s13 + $0x144] sm:$0xf]  ;;  %v6613_v27 = vld [vmem:[%s11736_s13 + $0x3b8] sm:$0xf0] }
 0x5bf   :  { %v9991_v1 = vpop.f32.mrf.mxu1  ;;  %4176 = vmatpush.bf16.msrb.mxu0 %v6160_v8  ;;  %v6301_v8 = vld [vmem:[%s11736_s13 + $0x148] sm:$0xf0] }
 0x5c0   :  { %v6304_v44 = vor.u32 %v6913_v21, %v6301_v8  ;;  %v6911_v21 = vld [vmem:[%s11736_s13 + $0x134] sm:$0xf]  ;;  %v6293_v8 = vld [vmem:[%s11736_s13 + $0x138] sm:$0xf0] }
 0x5c1   :  { %4369 = vmatpush.bf16.msra.mxu2 %v10013_v48  ;;  %v6296_v25 = vor.u32 %v6911_v21, %v6293_v8  ;;  %v6987_v21 = vld [vmem:[%s11736_s13 + $0x394] sm:$0xf] }
 0x5c2   :  { %4230 = vmatpush.bf16.msrb.mxu3 %v6304_v44 }
 0x5c3   :  { %v3958_v7 = vpop.f32.mrf.mxu3  ;;  %4268 = vmatmul.bf16.gmra.mxu2 %v9584_v12  ;;  %v6991_v12 = vld [vmem:[%s11736_s13 + $0x3b4] sm:$0xf] }
 0x5c4   :  { %v10032_v46 = vadd.f32 %v3958_v7, %v3931_v15  ;;  %v10053_v0 = vor.u32 %v6991_v12, %v6613_v27  ;;  %v6149_v15 = vld [vmem:[%s11736_s13 + $0x18] sm:$0xf0]  ;;  %v6989_v12 = vld [vmem:[%s11736_s13 + $0x3a4] sm:$0xf] }
 0x5c5   :  { %v3933_v53 = vpop.f32.mrf.mxu0  ;;  %4370 = vmatpush.bf16.msra.mxu2 %v10029_v23  ;;  %v6152_v7 = vor.u32 %v6875_v40, %v6149_v15 }
 0x5c6   :  { %v10036_v5 = vpop.f32.mrf.mxu2  ;;  %v3934_v27 = vadd.f32 %v3933_v53, %v9949_v10  ;;  %4231 = vmatpush.bf16.msrb.mxu3 %v6296_v25  ;;  %v6909_v53 = vld [vmem:[%s11736_s13 + $0x124] sm:$0xf]  ;;  %v6597_v25 = vld [vmem:[%s11736_s13 + $0x398] sm:$0xf0] }
 0x5c7   :  { %v10034_v55 = vpop.f32.mrf.mxu1  ;;  %4177 = vmatpush.bf16.msrb.mxu0 %v6152_v7  ;;  %v6285_v7 = vld [vmem:[%s11736_s13 + $0x128] sm:$0xf0] }
 0x5c8   :  { %4072 = vmatmul.bf16.gmra.mxu0 %v9674_v54  ;;  %v6288_v8 = vor.u32 %v6909_v53, %v6285_v7  ;;  %v6277_v53 = vld [vmem:[%s11736_s13 + $0x118] sm:$0xf0]  ;;  %v6985_v7 = vld [vmem:[%s11736_s13 + $0x384] sm:$0xf] }
 0x5c9   :  { %4128 = vmatmul.bf16.gmra.mxu3 %v9679_v32  ;;  %4371 = vmatpush.bf16.msra.mxu2 %v10053_v0  ;;  %v6280_v39 = vor.u32 %v6907_v16, %v6277_v53 }
 0x5ca   :  { %4324 = vmatmul.bf16.gmra.mxu1 %v9674_v54  ;;  %v6605_v54 = vld [vmem:[%s11736_s13 + $0x3a8] sm:$0xf0]  ;;  %4232 = vmatpush.bf16.msrb.mxu3 %v6288_v8 }
 0x5cb   :  { %v3961_v44 = vpop.f32.mrf.mxu3  ;;  %v10076_v40 = vor.u32 %v6989_v12, %v6605_v54  ;;  %v6873_v12 = vld [vmem:[%s11736_s13 + $0x4] sm:$0xf]  ;;  %v10103_v54 = vor.u32 %v6987_v21, %v6597_v25  ;;  %v6589_v21 = vld [vmem:[%s11736_s13 + $0x388] sm:$0xf0] }
 0x5cc   :  { %v10078_v15 = vadd.f32 %v3961_v44, %v3934_v27  ;;  %v6141_v27 = vld [vmem:[%s11736_s13 + $0x8] sm:$0xf0] }
 0x5cd   :  { %v3935_v45 = vpop.f32.mrf.mxu0  ;;  %4372 = vmatpush.bf16.msra.mxu2 %v10076_v40  ;;  %v6144_v44 = vor.u32 %v6873_v12, %v6141_v27  ;;  %v10119_v12 = vor.u32 %v6985_v7, %v6589_v21 }
 0x5ce   :  { %v10082_v11 = vpop.f32.mrf.mxu2  ;;  %v3936_v25 = vadd.f32 %v3935_v45, %v9949_v10  ;;  %4233 = vmatpush.bf16.msrb.mxu3 %v6280_v39  ;;  %v6905_v45 = vld [vmem:[%s11736_s13 + $0x104] sm:$0xf]  ;;  %v6453_v39 = vld [vmem:[%s11736_s13 + $0x278] sm:$0xf0] }
 0x5cf   :  { %v10080_v17 = vpop.f32.mrf.mxu1  ;;  %4178 = vmatpush.bf16.msrb.mxu0 %v6144_v44  ;;  %v6269_v44 = vld [vmem:[%s11736_s13 + $0x108] sm:$0xf0] }
 0x5d0   :  { %v6272_v53 = vor.u32 %v6905_v45, %v6269_v44 }
 0x5d1   :  { %4373 = vmatpush.bf16.msra.mxu2 %v10103_v54 }
 0x5d2   :  { %4234 = vmatpush.bf16.msrb.mxu3 %v6272_v53 }
 0x5d3   :  { %v3963_v27 = vpop.f32.mrf.mxu3  ;;  %4273 = vmatmul.bf16.gmra.mxu2 %v9617_v22  ;;  %v6951_v22 = vld [vmem:[%s11736_s13 + $0x274] sm:$0xf] }
 0x5d4   :  { %v10122_v50 = vadd.f32 %v3963_v27, %v3936_v25  ;;  %v6456_v7 = vor.u32 %v6951_v22, %v6453_v39  ;;  %v12087_v22 = vld [vmem:[#allocation51_spill] sm:$0xff] }
 0x5d5   :  { %v3938_v49 = vpop.f32.mrf.mxu0  ;;  %4374 = vmatpush.bf16.msra.mxu2 %v10119_v12  ;;  %v2832_v39 = vmul.f32 %v12087_v22, %v9710_v13  ;;  %v6947_v13 = vld [vmem:[%s11736_s13 + $0x254] sm:$0xf]  ;;  %v6429_v22 = vld [vmem:[%s11736_s13 + $0x248] sm:$0xf0] }
 0x5d6   :  { %v10126_v16 = vpop.f32.mrf.mxu2  ;;  %v3939_v21 = vadd.f32 %v3938_v49, %v9949_v10  ;;  %4283 = vmatpush.bf16.msra.mxu0 %v6456_v7  ;;  %v2947_v7 = vmul.f32 %v9473_v33, %v9714_v56  ;;  %v6437_v56 = vld [vmem:[%s11736_s13 + $0x258] sm:$0xf0]  ;;  %v6945_v33 = vld [vmem:[%s11736_s13 + $0x244] sm:$0xf] }
 0x5d7   :  { %v10124_v8 = vpop.f32.mrf.mxu1  ;;  %v6432_v26 = vor.u32 %v6945_v33, %v6429_v22  ;;  %v6983_v33 = vld [vmem:[%s11736_s13 + $0x374] sm:$0xf] }
 0x5d8   :  { %4077 = vmatmul.bf16.gmra.mxu0 %v9716_v30 }
 0x5d9   :  { %4133 = vmatmul.bf16.gmra.mxu3 %v9718_v31 }
 0x5da   :  { %4329 = vmatmul.bf16.gmra.mxu1 %v9716_v30  ;;  %v6445_v30 = vld [vmem:[%s11736_s13 + $0x268] sm:$0xf0] }
 0x5db   :  { %v3966_v25 = vpop.f32.mrf.mxu3  ;;  %v6448_v53 = vor.u32 %v6949_v60, %v6445_v30  ;;  %v3045_v60 = vpack.c.bf16 %v2832_v39, %v2832_v39  ;;  %v10169_v30 = vpack.c.bf16 %v2947_v7, %v2947_v7 }
 0x5dc   :  { %v10145_v27 = vadd.f32 %v3966_v25, %v3939_v21 }
 0x5dd   :  { %v3940_v45 = vpop.f32.mrf.mxu0  ;;  %4284 = vmatpush.bf16.msra.mxu0 %v6448_v53 }
 0x5de   :  { %v10149_v36 = vpop.f32.mrf.mxu2  ;;  %v3941_v49 = vadd.f32 %v3940_v45, %v9949_v10 }
 0x5df   :  { %v10147_v44 = vpop.f32.mrf.mxu1 }
 0x5e3   :  { %v3968_v21 = vpop.f32.mrf.mxu3  ;;  %4278 = vmatmul.bf16.gmra.mxu2 %v9925_v3  ;;  %v6440_v3 = vor.u32 %v6947_v13, %v6437_v56 }
 0x5e4   :  { %v10163_v25 = vadd.f32 %v3968_v21, %v3941_v49 }
 0x5e5   :  { %v3943_v62 = vpop.f32.mrf.mxu0  ;;  %4285 = vmatpush.bf16.msra.mxu0 %v6440_v3  ;;  %v6943_v3 = vld [vmem:[%s11736_s13 + $0x234] sm:$0xf] }
 0x5e6   :  { %v10167_v34 = vpop.f32.mrf.mxu2  ;;  %v3944_v45 = vadd.f32 %v3943_v62, %v9949_v10 }
 0x5e7   :  { %v10165_v38 = vpop.f32.mrf.mxu1 }
 0x5e8   :  { %4082 = vmatmul.bf16.gmra.mxu0 %v3045_v60 }
 0x5e9   :  { %4138 = vmatmul.bf16.gmra.mxu3 %v10169_v30  ;;  %4286 = vmatpush.bf16.msra.mxu0 %v6432_v26  ;;  %v6421_v26 = vld [vmem:[%s11736_s13 + $0x238] sm:$0xf0] }
 0x5ea   :  { %4334 = vmatmul.bf16.gmra.mxu1 %v3045_v60 }
 0x5ec   :  { %v3971_v53 = vpop.f32.mrf.mxu3 }
 0x5ed   :  { %v10179_v49 = vadd.f32 %v3971_v53, %v3944_v45  ;;  %v3945_v39 = vpop.f32.mrf.mxu0 }
 0x5ee   :  { %v4057_v21 = vpop.f32.mrf.mxu2 }
 0x5ef   :  { %v4113_v7 = vpop.f32.mrf.mxu1  ;;  %v6981_v21 = vld [vmem:[%s11736_s13 + $0x364] sm:$0xf] }
 0x5f3   :  { %4375 = vmatmul.bf16.vlgmr.msra.gmra.mxu2 %v9667_v28  ;;  %v6424_v28 = vor.u32 %v6943_v3, %v6421_v26  ;;  %v6979_v3 = vld [vmem:[%s11736_s13 + $0x354] sm:$0xf]  ;;  %v6565_v26 = vld [vmem:[%s11736_s13 + $0x358] sm:$0xf0] }
 0x5f4   :  { %v3973_v60 = vpop.f32.mrf.mxu3 }
 0x5f5   :  { %v3984_v62 = vpop.f32.mrf.mxu0  ;;  %4287 = vmatpush.bf16.msra.mxu0 %v6424_v28  ;;  %v6573_v60 = vld [vmem:[%s11736_s13 + $0x368] sm:$0xf0]  ;;  %v6568_v28 = vor.u32 %v6979_v3, %v6565_v26  ;;  %v6975_v3 = vld [vmem:[%s11736_s13 + $0x334] sm:$0xf] }
 0x5f6   :  { %v3985_v10 = vadd.f32 %v3984_v62, %v9988_v35  ;;  %v10191_v56 = vpop.f32.mrf.mxu2  ;;  %v6581_v35 = vld [vmem:[%s11736_s13 + $0x378] sm:$0xf0]  ;;  %v6941_v62 = vld [vmem:[%s11736_s13 + $0x224] sm:$0xf] }
 0x5f7   :  { %v10189_v13 = vpop.f32.mrf.mxu1 }
 0x5f8   :  { %4179 = vmatmul.bf16.vlgmr.msrb.gmra.mxu0 %v9102_v18  ;;  %v6584_v18 = vor.u32 %v6983_v33, %v6581_v35 }
 0x5f9   :  { %4235 = vmatmul.bf16.vlgmr.msrb.gmra.mxu3 %v9350_v6 }
 0x5fa   :  { %4339 = vmatpush.bf16.msra.mxu3 %v6584_v18 }
 0x5fc   :  { %v4012_v22 = vpop.f32.mrf.mxu3 }
 0x5fd   :  { %v10207_v6 = vadd.f32 %v4012_v22, %v3985_v10  ;;  %v3986_v45 = vpop.f32.mrf.mxu0  ;;  %v6576_v10 = vor.u32 %v6981_v21, %v6573_v60 }
 0x5fe   :  { %v3987_v53 = vadd.f32 %v3986_v45, %v10032_v46  ;;  %v10212_v7 = vpop.f32.mrf.mxu2  ;;  %v6413_v46 = vld [vmem:[%s11736_s13 + $0x228] sm:$0xf0] }
 0x5ff   :  { %v10210_v39 = vpop.f32.mrf.mxu1  ;;  %v6416_v33 = vor.u32 %v6941_v62, %v6413_v46  ;;  %4340 = vmatpush.bf16.msra.mxu3 %v6576_v10  ;;  %v6977_v62 = vld [vmem:[%s11736_s13 + $0x344] sm:$0xf]  ;;  %v6557_v10 = vld [vmem:[%s11736_s13 + $0x348] sm:$0xf0] }
 0x600   :  { %v6560_v46 = vor.u32 %v6977_v62, %v6557_v10 }
 0x601   :  { %4288 = vmatpush.bf16.msra.mxu0 %v6416_v33  ;;  %v6549_v33 = vld [vmem:[%s11736_s13 + $0x338] sm:$0xf0] }
 0x603   :  { %4380 = vmatmul.bf16.gmra.mxu2 %v9679_v32  ;;  %4341 = vmatpush.bf16.msra.mxu3 %v6568_v28  ;;  %v12088_v32 = vld [vmem:[#allocation70_spill] sm:$0xff]  ;;  %v6552_v28 = vor.u32 %v6975_v3, %v6549_v33  ;;  %v6971_v3 = vld [vmem:[%s11736_s13 + $0x314] sm:$0xf] }
 0x604   :  { %v4014_v35 = vpop.f32.mrf.mxu3 }
 0x605   :  { %v10233_v18 = vadd.f32 %v4014_v35, %v3987_v53  ;;  %v3989_v22 = vpop.f32.mrf.mxu0  ;;  %v6405_v53 = vld [vmem:[%s11736_s13 + $0x218] sm:$0xf0] }
 0x606   :  { %v3990_v45 = vadd.f32 %v3989_v22, %v10078_v15  ;;  %v10238_v60 = vpop.f32.mrf.mxu2  ;;  %v6939_v15 = vld [vmem:[%s11736_s13 + $0x214] sm:$0xf] }
 0x607   :  { %v10236_v21 = vpop.f32.mrf.mxu1  ;;  %4342 = vmatpush.bf16.msra.mxu3 %v6560_v46  ;;  %v6408_v26 = vor.u32 %v6939_v15, %v6405_v53  ;;  %v6973_v46 = vld [vmem:[%s11736_s13 + $0x324] sm:$0xf]  ;;  %v6541_v15 = vld [vmem:[%s11736_s13 + $0x328] sm:$0xf0] }
 0x608   :  { %4184 = vmatmul.bf16.gmra.mxu0 %v12088_v32  ;;  %v6544_v53 = vor.u32 %v6973_v46, %v6541_v15 }
 0x609   :  { %4240 = vmatmul.bf16.gmra.mxu3 %v9432_v42  ;;  %4289 = vmatpush.bf16.msra.mxu0 %v6408_v26  ;;  %v6533_v26 = vld [vmem:[%s11736_s13 + $0x318] sm:$0xf0] }
 0x60b   :  { %4343 = vmatpush.bf16.msra.mxu3 %v6552_v28  ;;  %v6536_v28 = vor.u32 %v6971_v3, %v6533_v26 }
 0x60c   :  { %v4017_v42 = vpop.f32.mrf.mxu3 }
 0x60d   :  { %v10260_v35 = vadd.f32 %v4017_v42, %v3990_v45  ;;  %v3991_v22 = vpop.f32.mrf.mxu0  ;;  %v6937_v45 = vld [vmem:[%s11736_s13 + $0x204] sm:$0xf] }
 0x60e   :  { %v3992_v62 = vadd.f32 %v3991_v22, %v10122_v50  ;;  %v10265_v32 = vpop.f32.mrf.mxu2  ;;  %v6397_v50 = vld [vmem:[%s11736_s13 + $0x208] sm:$0xf0] }
 0x60f   :  { %v10263_v10 = vpop.f32.mrf.mxu1  ;;  %v6400_v33 = vor.u32 %v6937_v45, %v6397_v50  ;;  %4344 = vmatpush.bf16.msra.mxu3 %v6544_v53  ;;  %v6969_v45 = vld [vmem:[%s11736_s13 + $0x304] sm:$0xf]  ;;  %v6525_v53 = vld [vmem:[%s11736_s13 + $0x308] sm:$0xf0] }
 0x610   :  { %v6528_v50 = vor.u32 %v6969_v45, %v6525_v53 }
 0x611   :  { %4290 = vmatpush.bf16.msra.mxu0 %v6400_v33 }
 0x613   :  { %4385 = vmatmul.bf16.gmra.mxu2 %v9718_v31  ;;  %4345 = vmatpush.bf16.msra.mxu3 %v6536_v28  ;;  %v7015_v31 = vld [vmem:[%s11736_s13 + $0x474] sm:$0xf] }
 0x614   :  { %v4019_v42 = vpop.f32.mrf.mxu3 }
 0x615   :  { %v10286_v22 = vadd.f32 %v4019_v42, %v3992_v62  ;;  %v3994_v46 = vpop.f32.mrf.mxu0  ;;  %v7013_v42 = vld [vmem:[%s11736_s13 + $0x464] sm:$0xf] }
 0x616   :  { %v3995_v15 = vadd.f32 %v3994_v46, %v10145_v27  ;;  %v10291_v57 = vpop.f32.mrf.mxu2  ;;  %v6709_v27 = vld [vmem:[%s11736_s13 + $0x478] sm:$0xf0] }
 0x617   :  { %v10289_v51 = vpop.f32.mrf.mxu1  ;;  %4346 = vmatpush.bf16.msra.mxu3 %v6528_v50  ;;  %v6712_v62 = vor.u32 %v7015_v31, %v6709_v27  ;;  %v6693_v31 = vld [vmem:[%s11736_s13 + $0x458] sm:$0xf0] }
 0x618   :  { %4189 = vmatmul.bf16.gmra.mxu0 %v9232_v63 }
 0x619   :  { %4245 = vmatmul.bf16.gmra.mxu3 %v9453_v14  ;;  %4395 = vmatpush.bf16.msrb.mxu0 %v6712_v62 }
 0x61b   :  { %7025 = vmatpush.bf16.msrb.mxu3 %v9961_v61  ;;  %v6701_v61 = vld [vmem:[%s11736_s13 + $0x468] sm:$0xf0] }
 0x61c   :  { %v4022_v3 = vpop.f32.mrf.mxu3  ;;  %v6704_v46 = vor.u32 %v7013_v42, %v6701_v61  ;;  %v4041_v42 = vadd.f32 %v9953_v37, %v10207_v6  ;;  %v6677_v37 = vld [vmem:[%s11736_s13 + $0x438] sm:$0xf0] }
 0x61d   :  { %v10308_v26 = vadd.f32 %v4022_v3, %v3995_v15  ;;  %v3996_v33 = vpop.f32.mrf.mxu0 }
 0x61e   :  { %v3997_v63 = vadd.f32 %v3996_v33, %v10163_v25  ;;  %v10313_v28 = vpop.f32.mrf.mxu2  ;;  %4396 = vmatpush.bf16.msrb.mxu0 %v6704_v46  ;;  %v6685_v33 = vld [vmem:[%s11736_s13 + $0x448] sm:$0xf0] }
 0x61f   :  { %v10311_v14 = vpop.f32.mrf.mxu1  ;;  %7026 = vmatpush.bf16.msrb.mxu3 %v9986_v20 }
 0x623   :  { %7027 = vmatpush.bf16.msrb.mxu3 %v10013_v48  ;;  %v7011_v48 = vld [vmem:[%s11736_s13 + $0x454] sm:$0xf] }
 0x624   :  { %v4024_v15 = vpop.f32.mrf.mxu3  ;;  %v6696_v27 = vor.u32 %v7011_v48, %v6693_v31  ;;  %v7007_v48 = vld [vmem:[%s11736_s13 + $0x434] sm:$0xf] }
 0x625   :  { %v10323_v25 = vadd.f32 %v4024_v15, %v3997_v63  ;;  %v3999_v45 = vpop.f32.mrf.mxu0  ;;  %v6680_v31 = vor.u32 %v7007_v48, %v6677_v37  ;;  %v12092_v48 = vld [vmem:[#allocation4_spill] sm:$0xff] }
 0x626   :  { %v4000_v53 = vadd.f32 %v3999_v45, %v10179_v49  ;;  %v10328_v20 = vpop.f32.mrf.mxu2  ;;  %4397 = vmatpush.bf16.msrb.mxu0 %v6696_v27  ;;  %v12089_v45 = vld [vmem:[#allocation64_spill] sm:$0xff] }
 0x627   :  { %v10326_v50 = vpop.f32.mrf.mxu1  ;;  %7028 = vmatpush.bf16.msrb.mxu3 %v10029_v23 }
 0x628   :  { %4194 = vmatmul.bf16.gmra.mxu0 %v9628_v58 }
 0x629   :  { %4250 = vmatmul.bf16.gmra.mxu3 %v9923_v52  ;;  %v7009_v52 = vld [vmem:[%s11736_s13 + $0x444] sm:$0xf] }
 0x62a   :  { %v6688_v63 = vor.u32 %v7009_v52, %v6685_v33  ;;  %v7005_v33 = vld [vmem:[%s11736_s13 + $0x424] sm:$0xf] }
 0x62b   :  { %7029 = vmatpush.bf16.msrb.mxu3 %v10053_v0 }
 0x62c   :  { %v4027_v49 = vpop.f32.mrf.mxu3  ;;  %4398 = vmatpush.bf16.msrb.mxu0 %v6688_v63 }
 0x62d   :  { %v10340_v62 = vadd.f32 %v4027_v49, %v4000_v53  ;;  %v4001_v3 = vpop.f32.mrf.mxu0  ;;  %v12090_v53 = vld [vmem:[#allocation67_spill] sm:$0xff] }
 0x62e   :  { %v4169_v58 = vpop.f32.mrf.mxu2 }
 0x62f   :  { %v4225_v23 = vpop.f32.mrf.mxu1  ;;  %7030 = vmatpush.bf16.msrb.mxu3 %v10076_v40 }
 0x630   :  { %4399 = vmatpush.bf16.msrb.mxu0 %v6680_v31  ;;  %v6661_v31 = vld [vmem:[%s11736_s13 + $0x418] sm:$0xf0] }
 0x633   :  { %7031 = vmatpush.bf16.msrb.mxu3 %v10103_v54 }
 0x634   :  { %v4029_v0 = vpop.f32.mrf.mxu3 }
 0x635   :  { %v4068_v61 = vpop.f32.mrf.mxu0 }
 0x636   :  { %v4069_v46 = vadd.f32 %v4068_v61, %v4041_v42  ;;  %v10354_v40 = vpop.f32.mrf.mxu2 }
 0x637   :  { %v10352_v15 = vpop.f32.mrf.mxu1  ;;  %7032 = vmatpush.bf16.msrb.mxu3 %v10119_v12  ;;  %v4043_v12 = vadd.f32 %v9993_v47, %v10233_v18  ;;  %v6669_v47 = vld [vmem:[%s11736_s13 + $0x428] sm:$0xf0] }
 0x638   :  { %4291 = vmatmul.bf16.vlgmr.msra.gmra.mxu0 %v12089_v45  ;;  %v4097_v54 = vadd.f32 %v9951_v24, %v4069_v46  ;;  %v6672_v0 = vor.u32 %v7005_v33, %v6669_v47 }
 0x639   :  { %4347 = vmatmul.bf16.vlgmr.msra.gmra.mxu3 %v12090_v53  ;;  %v12091_v53 = vld [vmem:[#allocation5_spill] sm:$0xff] }
 0x63a   :  { %4400 = vmatpush.bf16.msrb.mxu0 %v6672_v0 }
 0x63c   :  { %v4124_v6 = vpop.f32.mrf.mxu3 }
 0x63d   :  { %v4125_v49 = vadd.f32 %v4124_v6, %v4097_v54  ;;  %v4070_v27 = vpop.f32.mrf.mxu0  ;;  %v12093_v6 = vld [vmem:[#allocation68_spill] sm:$0xff] }
 0x63e   :  { %v4071_v24 = vadd.f32 %v4070_v27, %v4043_v12  ;;  %v10373_v58 = vpop.f32.mrf.mxu2 }
 0x63f   :  { %v10369_v3 = vadd.f32 %v10191_v56, %v4125_v49  ;;  %v10371_v23 = vpop.f32.mrf.mxu1  ;;  %v4046_v56 = vadd.f32 %v10036_v5, %v10260_v35 }
 0x640   :  { %v4099_v52 = vadd.f32 %v9991_v1, %v4071_v24  ;;  %v4048_v24 = vadd.f32 %v10082_v11, %v10286_v22  ;;  %v4051_v11 = vadd.f32 %v10126_v16, %v10308_v26  ;;  %v4053_v16 = vadd.f32 %v10149_v36, %v10323_v25 }
 0x641   :  { %v4425_v54 = vmul.f32 %v10369_v3, %v12091_v53 }
 0x644   :  { %v4126_v18 = vpop.f32.mrf.mxu3 }
 0x645   :  { %v4127_v63 = vadd.f32 %v4126_v18, %v4099_v52  ;;  %v4073_v42 = vpop.f32.mrf.mxu0  ;;  %v12094_v18 = vld [vmem:[#allocation3_spill] sm:$0xff] }
 0x646   :  { %v4074_v1 = vadd.f32 %v4073_v42, %v4046_v56  ;;  %v10389_v45 = vpop.f32.mrf.mxu2 }
 0x647   :  { %v10385_v61 = vadd.f32 %v10212_v7, %v4127_v63  ;;  %v10387_v46 = vpop.f32.mrf.mxu1  ;;  %v7003_v7 = vld [vmem:[%s11736_s13 + $0x414] sm:$0xf] }
 0x648   :  { %4296 = vmatmul.bf16.gmra.mxu0 %v12093_v6  ;;  %v4102_v35 = vadd.f32 %v10034_v55, %v4074_v1  ;;  %v6664_v12 = vor.u32 %v7003_v7, %v6661_v31 }
 0x649   :  { %v4427_v37 = vmul.f32 %v10385_v61, %v12092_v48  ;;  %4352 = vmatmul.bf16.gmra.mxu3 %v9178_v41 }
 0x64a   :  { %4401 = vmatpush.bf16.msrb.mxu0 %v6664_v12 }
 0x64b   :  { %v4439_v5 = vadd.f32 %v4427_v37, %v4425_v54 }
 0x64c   :  { %v4129_v49 = vpop.f32.mrf.mxu3 }
 0x64d   :  { %v4130_v27 = vadd.f32 %v4129_v49, %v4102_v35  ;;  %v4075_v52 = vpop.f32.mrf.mxu0  ;;  %v12095_v35 = vld [vmem:[#allocation8_spill] sm:$0xff] }
 0x64e   :  { %v4076_v55 = vadd.f32 %v4075_v52, %v4048_v24  ;;  %v10411_v47 = vpop.f32.mrf.mxu2  ;;  %v12096_v52 = vld [vmem:[#allocation7_spill] sm:$0xff] }
 0x64f   :  { %v10407_v41 = vadd.f32 %v10238_v60, %v4130_v27  ;;  %v10409_v33 = vpop.f32.mrf.mxu1 }
 0x650   :  { %v4104_v56 = vadd.f32 %v10080_v17, %v4076_v55 }
 0x651   :  { %v4429_v0 = vmul.f32 %v10407_v41, %v12094_v18 }
 0x653   :  { %v4440_v63 = vadd.f32 %v4439_v5, %v4429_v0 }
 0x654   :  { %v4131_v42 = vpop.f32.mrf.mxu3 }
 0x655   :  { %v4132_v1 = vadd.f32 %v4131_v42, %v4104_v56  ;;  %v4078_v22 = vpop.f32.mrf.mxu0 }
 0x656   :  { %v4079_v54 = vadd.f32 %v4078_v22, %v4051_v11  ;;  %v10421_v6 = vpop.f32.mrf.mxu2 }
 0x657   :  { %v4160_v60 = vadd.f32 %v10265_v32, %v4132_v1  ;;  %v10419_v37 = vpop.f32.mrf.mxu1  ;;  %v12097_v1 = vld [vmem:[#allocation6_spill] sm:$0xff] }
 0x658   :  { %4301 = vmatmul.bf16.gmra.mxu0 %v9166_v29  ;;  %v4107_v5 = vadd.f32 %v10124_v8, %v4079_v54 }
 0x659   :  { %v4431_v7 = vmul.f32 %v4160_v60, %v12095_v35  ;;  %4357 = vmatmul.bf16.gmra.mxu3 %v9251_v59 }
 0x65b   :  { %v4441_v17 = vadd.f32 %v4440_v63, %v4431_v7  ;;  %v4056_v63 = vadd.f32 %v10167_v34, %v10340_v62 }
 0x65c   :  { %v4134_v31 = vpop.f32.mrf.mxu3 }
 0x65d   :  { %v4135_v49 = vadd.f32 %v4134_v31, %v4107_v5  ;;  %v4080_v32 = vpop.f32.mrf.mxu0  ;;  %v12098_v5 = vld [vmem:[#allocation11_spill] sm:$0xff] }
 0x65e   :  { %v4081_v12 = vadd.f32 %v4080_v32, %v4053_v16  ;;  %v10432_v24 = vpop.f32.mrf.mxu2 }
 0x65f   :  { %v4163_v26 = vadd.f32 %v10291_v57, %v4135_v49  ;;  %v10430_v27 = vpop.f32.mrf.mxu1 }
 0x660   :  { %v4109_v59 = vadd.f32 %v10147_v44, %v4081_v12 }
 0x661   :  { %v4433_v29 = vmul.f32 %v4163_v26, %v12096_v52 }
 0x663   :  { %v4442_v55 = vadd.f32 %v4441_v17, %v4433_v29 }
 0x664   :  { %v4136_v0 = vpop.f32.mrf.mxu3 }
 0x665   :  { %v4137_v8 = vadd.f32 %v4136_v0, %v4109_v59  ;;  %v4083_v56 = vpop.f32.mrf.mxu0 }
 0x666   :  { %v4084_v25 = vadd.f32 %v4083_v56, %v4056_v63  ;;  %v10441_v42 = vpop.f32.mrf.mxu2 }
 0x667   :  { %v4165_v36 = vadd.f32 %v10313_v28, %v4137_v8  ;;  %v10439_v57 = vpop.f32.mrf.mxu1 }
 0x668   :  { %4306 = vmatmul.bf16.gmra.mxu0 %v9390_v19  ;;  %v4112_v22 = vadd.f32 %v10165_v38, %v4084_v25 }
 0x669   :  { %v4435_v11 = vmul.f32 %v4165_v36, %v12097_v1  ;;  %4362 = vmatmul.bf16.gmra.mxu3 %v9672_v43 }
 0x66b   :  { %v4443_v44 = vadd.f32 %v4442_v55, %v4435_v11 }
 0x66c   :  { %v4139_v54 = vpop.f32.mrf.mxu3 }
 0x66d   :  { %v4140_v7 = vadd.f32 %v4139_v54, %v4112_v22  ;;  %v4085_v34 = vpop.f32.mrf.mxu0  ;;  %v6653_v22 = vld [vmem:[%s11736_s13 + $0x408] sm:$0xf0] }
 0x66e   :  { %v4281_v17 = vpop.f32.mrf.mxu2 }
 0x66f   :  { %v4168_v62 = vadd.f32 %v10328_v20, %v4140_v7  ;;  %v4337_v28 = vpop.f32.mrf.mxu1 }
 0x671   :  { %v4437_v31 = vmul.f32 %v4168_v62, %v12098_v5 }
 0x673   :  { %v4444_v49 = vadd.f32 %v4443_v44, %v4437_v31  ;;  %v7001_v44 = vld [vmem:[%s11736_s13 + $0x404] sm:$0xf] }
 0x674   :  { %v4141_v16 = vpop.f32.mrf.mxu3  ;;  %v6656_v54 = vor.u32 %v7001_v44, %v6653_v22  ;;  %v12099_v44 = vld [vmem:[#allocation77_spill] sm:$0xff] }
 0x675   :  { %v4445_v32 = vrot.slane %v4444_v49, 4  ;;  %v4180_v28 = vpop.f32.mrf.mxu0 }
 0x676   :  { %4402 = vmatpush.bf16.msrb.mxu0 %v6656_v54 }
 0x677   :  { %v4446_v12 = vadd.f32 %v4445_v32, %v4444_v49 }
 0x679   :  { %v4447_v29 = vrot.slane %v4446_v12, 2  ;;  %4390 = vmatmul.bf16.vlgmr.msrb.gmra.mxu3 %v10169_v30  ;;  %4403 = vmatmul.bf16.vlgmr.msrb.gmra.mxu0 %v9522_v4 }
 0x67b   :  { %v4448_v19 = vadd.f32 %v4447_v29, %v4446_v12 }
 0x67c   :  { %v4236_v16 = vpop.f32.mrf.mxu3 }
 0x67d   :  { %v4449_v43 = vrot.slane %v4448_v19, 1  ;;  %v4182_v12 = vpop.f32.mrf.mxu0 }
 0x67f   :  { %v4450_v55 = vadd.f32 %v4449_v43, %v4448_v19 }
 0x681   :  { %v4463_v38 = vmul.f32 0.02, %v4450_v55 }
 0x683   :  { %v10451_v59 = vsub.f32 %v10369_v3, %v4463_v38  ;;  %v10454_v20 = vsub.f32 %v10385_v61, %v4463_v38  ;;  %v10457_v0 = vsub.f32 %v10407_v41, %v4463_v38  ;;  %v10459_v8 = vsub.f32 %v4160_v60, %v4463_v38 }
 0x684   :  { %v10461_v63 = vsub.f32 %v4163_v26, %v4463_v38  ;;  %v10463_v56 = vsub.f32 %v4165_v36, %v4463_v38  ;;  %v10465_v30 = vsub.f32 %v4168_v62, %v4463_v38  ;;  %v3196_v62 = vperm.slane %v9945_v2, 1  ;;  %v4238_v43 = vpop.f32.mrf.mxu3 }
 0x685   :  { %v4479_v25 = vmul.f32 %v10451_v59, %v10451_v59  ;;  %v4481_v3 = vmul.f32 %v10454_v20, %v10454_v20  ;;  %v4483_v61 = vmul.f32 %v10457_v0, %v10457_v0  ;;  %v4485_v41 = vmul.f32 %v10459_v8, %v10459_v8  ;;  %v4185_v38 = vpop.f32.mrf.mxu0 }
 0x686   :  { %v4181_v31 = vadd.f32 %v4180_v28, %v3196_v62  ;;  %v4183_v29 = vadd.f32 %v4182_v12, %v3196_v62 }
 0x687   :  { %v4493_v60 = vmul.f32 %v4479_v25, %v12091_v53  ;;  %v4495_v26 = vmul.f32 %v4481_v3, %v12092_v48  ;;  %v4497_v36 = vmul.f32 %v4483_v61, %v12094_v18  ;;  %v4499_v7 = vmul.f32 %v4485_v41, %v12095_v35 }
 0x688   :  { %v4209_v49 = vadd.f32 %v10189_v13, %v4181_v31  ;;  %v4211_v19 = vadd.f32 %v10210_v39, %v4183_v29  ;;  %v4186_v25 = vadd.f32 %v4185_v38, %v3196_v62 }
 0x689   :  { %v4507_v11 = vadd.f32 %v4495_v26, %v4493_v60  ;;  %4408 = vmatmul.bf16.gmra.mxu0 %v9546_v9 }
 0x68a   :  { %v4237_v32 = vadd.f32 %v4236_v16, %v4209_v49  ;;  %v4239_v55 = vadd.f32 %v4238_v43, %v4211_v19  ;;  %v4214_v2 = vadd.f32 %v10236_v21, %v4186_v25  ;;  %v12100_v16 = vld [vmem:[#allocation79_spill] sm:$0xff] }
 0x68b   :  { %v4508_v34 = vadd.f32 %v4507_v11, %v4497_v36 }
 0x68c   :  { %v4241_v3 = vpop.f32.mrf.mxu3 }
 0x68d   :  { %v10486_v17 = vadd.f32 %v4508_v34, %v4499_v7  ;;  %v4242_v61 = vadd.f32 %v4241_v3, %v4214_v2  ;;  %v4187_v41 = vpop.f32.mrf.mxu0 }
 0x68e   :  { %v4188_v4 = vadd.f32 %v4187_v41, %v3196_v62  ;;  %v4267_v41 = vadd.f32 %v10373_v58, %v4239_v55 }
 0x690   :  { %v4216_v13 = vadd.f32 %v10263_v10, %v4188_v4 }
 0x694   :  { %v4243_v60 = vpop.f32.mrf.mxu3 }
 0x695   :  { %v4244_v26 = vadd.f32 %v4243_v60, %v4216_v13  ;;  %v4190_v36 = vpop.f32.mrf.mxu0 }
 0x696   :  { %v4191_v11 = vadd.f32 %v4190_v36, %v3196_v62  ;;  %v4270_v36 = vadd.f32 %v10389_v45, %v4242_v61 }
 0x698   :  { %v4219_v39 = vadd.f32 %v10289_v51, %v4191_v11  ;;  %v4265_v51 = vadd.f32 %v10354_v40, %v4237_v32 }
 0x699   :  { %4413 = vmatmul.bf16.gmra.mxu0 %v12099_v44 }
 0x69c   :  { %v4246_v22 = vpop.f32.mrf.mxu3 }
 0x69d   :  { %v4247_v54 = vadd.f32 %v4246_v22, %v4219_v39  ;;  %v4192_v7 = vpop.f32.mrf.mxu0 }
 0x69e   :  { %v4193_v9 = vadd.f32 %v4192_v7, %v3196_v62 }
 0x6a0   :  { %v4221_v21 = vadd.f32 %v10311_v14, %v4193_v9 }
 0x6a4   :  { %v4248_v34 = vpop.f32.mrf.mxu3 }
 0x6a5   :  { %v4249_v28 = vadd.f32 %v4248_v34, %v4221_v21  ;;  %v4195_v31 = vpop.f32.mrf.mxu0 }
 0x6a6   :  { %v4196_v49 = vadd.f32 %v4195_v31, %v3196_v62 }
 0x6a8   :  { %v4224_v10 = vadd.f32 %v10326_v50, %v4196_v49 }
 0x6a9   :  { %4418 = vmatmul.bf16.gmra.mxu0 %v12100_v16 }
 0x6ac   :  { %v4251_v12 = vpop.f32.mrf.mxu3 }
 0x6ad   :  { %v4252_v29 = vadd.f32 %v4251_v12, %v4224_v10  ;;  %v4197_v19 = vpop.f32.mrf.mxu0 }
 0x6b4   :  { %v4253_v43 = vpop.f32.mrf.mxu3 }
 0x6b5   :  { %v4292_v38 = vpop.f32.mrf.mxu0  ;;  %v4376_v43 = vpop.f32.mrf.mxu2 }
 0x6b6   :  { %v4293_v25 = vadd.f32 %v4292_v38, %v4265_v51 }
 0x6b8   :  { %v4321_v2 = vadd.f32 %v10352_v15, %v4293_v25  ;;  %v4272_v15 = vadd.f32 %v10411_v47, %v4244_v26 }
 0x6bc   :  { %v4348_v3 = vpop.f32.mrf.mxu3 }
 0x6bd   :  { %v4349_v14 = vadd.f32 %v4348_v3, %v4321_v2  ;;  %v4294_v4 = vpop.f32.mrf.mxu0  ;;  %v4378_v38 = vpop.f32.mrf.mxu2 }
 0x6be   :  { %v4295_v62 = vadd.f32 %v4294_v4, %v4267_v41 }
 0x6c0   :  { %v4323_v13 = vadd.f32 %v10371_v23, %v4295_v62  ;;  %v4275_v23 = vadd.f32 %v10421_v6, %v4247_v54 }
 0x6c4   :  { %v4350_v60 = vpop.f32.mrf.mxu3 }
 0x6c5   :  { %v4351_v50 = vadd.f32 %v4350_v60, %v4323_v13  ;;  %v4297_v11 = vpop.f32.mrf.mxu0 }
 0x6c6   :  { %v4298_v44 = vadd.f32 %v4297_v11, %v4270_v36 }
 0x6c7   :  { %v4379_v41 = vadd.f32 %v4378_v38, %v4351_v50 }
 0x6c8   :  { %v4326_v40 = vadd.f32 %v10387_v46, %v4298_v44  ;;  %v4277_v46 = vadd.f32 %v10432_v24, %v4249_v28  ;;  %v4377_v24 = vadd.f32 %v4376_v43, %v4349_v14 }
 0x6cc   :  { %v4353_v32 = vpop.f32.mrf.mxu3 }
 0x6cd   :  { %v4354_v39 = vadd.f32 %v4353_v32, %v4326_v40  ;;  %v4299_v22 = vpop.f32.mrf.mxu0 }
 0x6ce   :  { %v4300_v7 = vadd.f32 %v4299_v22, %v4272_v15 }
 0x6d0   :  { %v4328_v58 = vadd.f32 %v10409_v33, %v4300_v7  ;;  %v4280_v33 = vadd.f32 %v10441_v42, %v4252_v29 }
 0x6d4   :  { %v4355_v55 = vpop.f32.mrf.mxu3 }
 0x6d5   :  { %v4356_v9 = vadd.f32 %v4355_v55, %v4328_v58  ;;  %v4302_v21 = vpop.f32.mrf.mxu0 }
 0x6d6   :  { %v4303_v34 = vadd.f32 %v4302_v21, %v4275_v23 }
 0x6d8   :  { %v4331_v45 = vadd.f32 %v10419_v37, %v4303_v34 }
 0x6dc   :  { %v4358_v61 = vpop.f32.mrf.mxu3 }
 0x6dd   :  { %v4359_v31 = vadd.f32 %v4358_v61, %v4331_v45  ;;  %v4304_v49 = vpop.f32.mrf.mxu0 }
 0x6de   :  { %v4305_v16 = vadd.f32 %v4304_v49, %v4277_v46 }
 0x6e0   :  { %v4333_v47 = vadd.f32 %v10430_v27, %v4305_v16  ;;  %v4381_v27 = vpop.f32.mrf.mxu2  ;;  %v4487_v16 = vmul.f32 %v10461_v63, %v10461_v63 }
 0x6e4   :  { %v4360_v26 = vpop.f32.mrf.mxu3 }
 0x6e5   :  { %v4361_v10 = vadd.f32 %v4360_v26, %v4333_v47  ;;  %v4307_v12 = vpop.f32.mrf.mxu0  ;;  %v4489_v26 = vmul.f32 %v10463_v56, %v10463_v56 }
 0x6e6   :  { %v4308_v19 = vadd.f32 %v4307_v12, %v4280_v33 }
 0x6e8   :  { %v4336_v6 = vadd.f32 %v10439_v57, %v4308_v19  ;;  %v4382_v57 = vadd.f32 %v4381_v27, %v4354_v39  ;;  %v4383_v44 = vpop.f32.mrf.mxu2 }
 0x6e9   :  { %v4384_v14 = vadd.f32 %v4383_v44, %v4356_v9 }
 0x6ec   :  { %v4363_v54 = vpop.f32.mrf.mxu3 }
 0x6ed   :  { %v4364_v51 = vadd.f32 %v4363_v54, %v4336_v6  ;;  %v4309_v37 = vpop.f32.mrf.mxu0  ;;  %v4503_v6 = vmul.f32 %v4489_v26, %v12097_v1 }
 0x6f0   :  { %v4386_v7 = vpop.f32.mrf.mxu2 }
 0x6f1   :  { %v4387_v55 = vadd.f32 %v4386_v7, %v4359_v31  ;;  %v4501_v31 = vmul.f32 %v4487_v16, %v12096_v52 }
 0x6f3   :  { %v4510_v12 = vadd.f32 %v10486_v17, %v4501_v31 }
 0x6f4   :  { %v4365_v25 = vpop.f32.mrf.mxu3 }
 0x6f5   :  { %v4511_v37 = vadd.f32 %v4510_v12, %v4503_v6 }
 0x6f6   :  { %v4404_v2 = vpop.f32.mrf.mxu0 }
 0x6f7   :  { %v4405_v3 = vadd.f32 %v4404_v2, %v4377_v24 }
 0x6f8   :  { %v4388_v39 = vpop.f32.mrf.mxu2 }
 0x6f9   :  { %v4426_v42 = vmul.f32 %v4405_v3, %v12091_v53  ;;  %v4389_v61 = vadd.f32 %v4388_v39, %v4361_v10  ;;  %v4491_v10 = vmul.f32 %v10465_v30, %v10465_v30 }
 0x6fb   :  { %v4505_v25 = vmul.f32 %v4491_v10, %v12098_v5 }
 0x6fc   :  { %v4391_v28 = vpop.f32.mrf.mxu3 }
 0x6fd   :  { %v4392_v33 = vadd.f32 %v4391_v28, %v4364_v51  ;;  %v4512_v24 = vadd.f32 %v4511_v37, %v4505_v25 }
 0x6fe   :  { %v4406_v4 = vpop.f32.mrf.mxu0 }
 0x6ff   :  { %v4407_v62 = vadd.f32 %v4406_v4, %v4379_v41  ;;  %v4513_v28 = vrot.slane %v4512_v24, 4 }
 0x701   :  { %v4428_v29 = vmul.f32 %v4407_v62, %v12092_v48 }
 0x703   :  { %v4451_v13 = vadd.f32 %v4428_v29, %v4426_v42  ;;  %v4514_v42 = vadd.f32 %v4513_v28, %v4512_v24 }
 0x704   :  { %v4393_v60 = vpop.f32.mrf.mxu3 }
 0x705   :  { %v4515_v60 = vrot.slane %v4514_v42, 2 }
 0x706   :  { %v4409_v36 = vpop.f32.mrf.mxu0 }
 0x707   :  { %v4410_v11 = vadd.f32 %v4409_v36, %v4382_v57 }
 0x709   :  { %v4430_v40 = vmul.f32 %v4410_v11, %v12094_v18 }
 0x70b   :  { %v4452_v32 = vadd.f32 %v4451_v13, %v4430_v40 }
 0x70e   :  { %v4411_v15 = vpop.f32.mrf.mxu0 }
 0x70f   :  { %v4412_v22 = vadd.f32 %v4411_v15, %v4384_v14 }
 0x711   :  { %v4432_v50 = vmul.f32 %v4412_v22, %v12095_v35 }
 0x713   :  { %v4453_v58 = vadd.f32 %v4452_v32, %v4432_v50 }
 0x716   :  { %v4414_v23 = vpop.f32.mrf.mxu0 }
 0x717   :  { %v4415_v21 = vadd.f32 %v4414_v23, %v4387_v55 }
 0x719   :  { %v4434_v34 = vmul.f32 %v4415_v21, %v12096_v52 }
 0x71b   :  { %v4454_v45 = vadd.f32 %v4453_v58, %v4434_v34 }
 0x71e   :  { %v4416_v46 = vpop.f32.mrf.mxu0 }
 0x71f   :  { %v4417_v49 = vadd.f32 %v4416_v46, %v4389_v61 }
 0x721   :  { %v4436_v9 = vmul.f32 %v4417_v49, %v12097_v1 }
 0x723   :  { %v4455_v47 = vadd.f32 %v4454_v45, %v4436_v9 }
 0x726   :  { %v4419_v19 = vpop.f32.mrf.mxu0 }
 0x727   :  { %v4420_v43 = vadd.f32 %v4419_v19, %v4392_v33 }
 0x729   :  { %v4438_v54 = vmul.f32 %v4420_v43, %v12098_v5 }
 0x72b   :  { %v4456_v38 = vadd.f32 %v4455_v47, %v4438_v54 }
 0x72d   :  { %v4457_v2 = vrot.slane %v4456_v38, 4 }
 0x72e   :  { %v4421_v41 = vpop.f32.mrf.mxu0 }
 0x72f   :  { %v4458_v27 = vadd.f32 %v4457_v2, %v4456_v38 }
 0x731   :  { %v4459_v51 = vrot.slane %v4458_v27, 2 }
 0x733   :  { %v4460_v17 = vadd.f32 %v4459_v51, %v4458_v27 }
 0x735   :  { %v4461_v4 = vrot.slane %v4460_v17, 1 }
 0x737   :  { %v4462_v29 = vadd.f32 %v4461_v4, %v4460_v17  ;;  %v4424_v4 = vld [vmem:[%s11740_s16] sm:$0x3] }
 0x739   :  { %v4464_v13 = vmul.f32 0.02, %v4462_v29  ;;  %v4423_v29 = vld [vmem:[%s11741_s15] sm:$0x3] }
 0x73b   :  { %v10530_v57 = vsub.f32 %v4405_v3, %v4464_v13  ;;  %v10532_v36 = vsub.f32 %v4407_v62, %v4464_v13  ;;  %v10534_v44 = vsub.f32 %v4410_v11, %v4464_v13  ;;  %v10536_v40 = vsub.f32 %v4412_v22, %v4464_v13 }
 0x73c   :  { %v10538_v32 = vsub.f32 %v4415_v21, %v4464_v13  ;;  %v10540_v14 = vsub.f32 %v4417_v49, %v4464_v13  ;;  %v10542_v15 = vsub.f32 %v4420_v43, %v4464_v13  ;;  %v4516_v62 = vadd.f32 %v4515_v60, %v4514_v42 }
 0x73d   :  { %v4480_v50 = vmul.f32 %v10530_v57, %v10530_v57  ;;  %v4482_v7 = vmul.f32 %v10532_v36, %v10532_v36  ;;  %v4484_v3 = vmul.f32 %v10534_v44, %v10534_v44  ;;  %v4486_v11 = vmul.f32 %v10536_v40, %v10536_v40 }
 0x73e   :  { %v4488_v55 = vmul.f32 %v10538_v32, %v10538_v32  ;;  %v4517_v34 = vrot.slane %v4516_v62, 1  ;;  %v4490_v45 = vmul.f32 %v10540_v14, %v10540_v14  ;;  %v4492_v46 = vmul.f32 %v10542_v15, %v10542_v15 }
 0x73f   :  { %v4494_v22 = vmul.f32 %v4480_v50, %v12091_v53  ;;  %v4496_v58 = vmul.f32 %v4482_v7, %v12092_v48  ;;  %v4498_v23 = vmul.f32 %v4484_v3, %v12094_v18  ;;  %v4500_v39 = vmul.f32 %v4486_v11, %v12095_v35  ;;  %v4670_v50 = vld [vmem:[%s11742_s17] ss:$8 sm:$0x3]  ;;  %v6713_v7 = vld [vmem:[%s11742_s17 + $0x1] ss:$8 sm:$0x3] }
 0x740   :  { %v4502_v53 = vmul.f32 %v4488_v55, %v12096_v52  ;;  %v4518_v48 = vadd.f32 %v4517_v34, %v4516_v62  ;;  %v4504_v16 = vmul.f32 %v4490_v45, %v12097_v1  ;;  %v4506_v18 = vmul.f32 %v4492_v46, %v12098_v5  ;;  %v6715_v55 = vld [vmem:[%s11742_s17 + $0x3] ss:$8 sm:$0x3] }
 0x741   :  { %v4519_v21 = vadd.f32 %v4496_v58, %v4494_v22  ;;  %v10577_v62 = vperm.slane %v4424_v4, 0  ;;  %v4583_v11 = vperm.slane %v4424_v4, 1  ;;  %v6714_v22 = vld [vmem:[%s11742_s17 + $0x2] ss:$8 sm:$0x3]  ;;  %v10590_v34 = vperm.slane %v4670_v50, 1 }
 0x742   :  { %v4531_v26 = vmul.f32 0.02, %v4518_v48  ;;  %v10592_v45 = vperm.slane %v6713_v7, 0  ;;  %v10603_v48 = vperm.slane %v6714_v22, 1 }
 0x743   :  { %v4520_v61 = vadd.f32 %v4519_v21, %v4498_v23  ;;  %v6716_v23 = vld [vmem:[%s11742_s17 + $0x4] ss:$8 sm:$0x3]  ;;  %v10588_v21 = vperm.slane %v4670_v50, 0 }
 0x744   :  { %v4533_v12 = vadd.f32 1e-05, %v4531_v26 }
 0x745   :  { %v4521_v49 = vadd.f32 %v4520_v61, %v4500_v39  ;;  %v10594_v39 = vperm.slane %v6713_v7, 1 }
 0x746   :  { %7046 = vrsqrt.f32 %v4533_v12  ;;  %vm4541_vm3 = vweird.f32 %v4533_v12 }
 0x747   :  { %v4522_v9 = vadd.f32 %v4521_v49, %v4502_v53  ;;  %v10598_v53 = vperm.slane %v6714_v22, 0  ;;  %v6717_v49 = vld [vmem:[%s11742_s17 + $0x5] ss:$8 sm:$0x3] }
 0x749   :  { %v4523_v47 = vadd.f32 %v4522_v9, %v4504_v16  ;;  %v10605_v16 = vperm.slane %v6715_v55, 0  ;;  %v10607_v9 = vperm.slane %v6715_v55, 1 }
 0x74b   :  { %v4524_v31 = vadd.f32 %v4523_v47, %v4506_v18  ;;  %v10609_v18 = vperm.slane %v6716_v23, 0 }
 0x74c   :  { %v7047_v54 = vpop.eup %7046 }
 0x74d   :  { %v4525_v33 = vrot.slane %v4524_v31, 4  ;;  %v4536_v38 = vmul.f32 %v7047_v54, %v4533_v12  ;;  %vm4542_vm0 = vweird.f32 %v7047_v54 }
 0x74e   :  { %vm4543_vm5 = vmor %vm4541_vm3, %vm4542_vm0 }
 0x74f   :  { %v4526_v19 = vadd.f32 %v4525_v33, %v4524_v31  ;;  %v4537_v1 = vmul.f32 %v7047_v54, %v4536_v38  ;;  %v10614_v33 = vperm.slane %v6716_v23, 1 }
 0x751   :  { %v4527_v35 = vrot.slane %v4526_v19, 2  ;;  %v4538_v2 = vmul.f32 0.5, %v4537_v1 }
 0x753   :  { %v4528_v43 = vadd.f32 %v4527_v35, %v4526_v19  ;;  %v4539_v41 = vsub.f32 1.5, %v4538_v2 }
 0x755   :  { %v4529_v10 = vrot.slane %v4528_v43, 1  ;;  %v4540_v28 = vmul.f32 %v7047_v54, %v4539_v41 }
 0x757   :  { %v4530_v6 = vadd.f32 %v4529_v10, %v4528_v43  ;;  %v4544_v60 = vsel %vm4543_vm5, %v7047_v54, %v4540_v28  ;;  %v10619_v43 = vperm.slane %v6717_v49, 0 }
 0x759   :  { %v4532_v52 = vmul.f32 0.02, %v4530_v6 }
 0x75b   :  { %v4534_v37 = vadd.f32 1e-05, %v4532_v52 }
 0x75d   :  { %7048 = vrsqrt.f32 %v4534_v37  ;;  %vm4551_vm1 = vweird.f32 %v4534_v37 }
 0x763   :  { %v7049_v25 = vpop.eup %7048 }
 0x764   :  { %v4546_v5 = vmul.f32 %v7049_v25, %v4534_v37  ;;  %vm4552_vm15 = vweird.f32 %v7049_v25 }
 0x765   :  { %vm4553_vm2 = vmor %vm4551_vm1, %vm4552_vm15 }
 0x766   :  { %v4547_v24 = vmul.f32 %v7049_v25, %v4546_v5 }
 0x768   :  { %v4548_v27 = vmul.f32 0.5, %v4547_v24 }
 0x76a   :  { %v4549_v51 = vsub.f32 1.5, %v4548_v27 }
 0x76c   :  { %v4550_v17 = vmul.f32 %v7049_v25, %v4549_v51 }
 0x76e   :  { %v4554_v42 = vsel %vm4553_vm2, %v7049_v25, %v4550_v17 }
 0x76f   :  { %v4557_v13 = vrot.slane %v4554_v42, 7 }
 0x771   :  { %v4559_v3 = vsel %vm4558_vm4, %v4544_v60, %v4557_v13 }
 0x772   :  { %v4561_v58 = vmul.f32 %v4559_v3, %v4423_v29 }
 0x774   :  { %v10596_v61 = vperm.slane %v4561_v58, 0  ;;  %v4564_v46 = vperm.slane %v4561_v58, 1 }
 0x776   :  { %v4568_v47 = vmul.f32 %v4564_v46, %v10530_v57  ;;  %v4570_v26 = vmul.f32 %v4564_v46, %v10532_v36  ;;  %v4572_v31 = vmul.f32 %v4564_v46, %v10534_v44  ;;  %v4574_v12 = vmul.f32 %v4564_v46, %v10536_v40 }
 0x777   :  { %v4576_v19 = vmul.f32 %v4564_v46, %v10538_v32  ;;  %v4578_v35 = vmul.f32 %v4564_v46, %v10540_v14  ;;  %v4569_v10 = vmul.f32 %v10596_v61, %v10454_v20  ;;  %v4580_v6 = vmul.f32 %v4564_v46, %v10542_v15 }
 0x778   :  { %v4587_v57 = vadd.f32 %v4583_v11, %v4568_v47  ;;  %v4589_v54 = vadd.f32 %v4583_v11, %v4570_v26  ;;  %v4591_v36 = vadd.f32 %v4583_v11, %v4572_v31  ;;  %v4593_v52 = vadd.f32 %v4583_v11, %v4574_v12  ;;  %v12103_v47 = vld [vmem:[#allocation14_spill] sm:$0xff] }
 0x779   :  { %v4595_v44 = vadd.f32 %v4583_v11, %v4576_v19  ;;  %v4597_v37 = vadd.f32 %v4583_v11, %v4578_v35  ;;  %v4599_v38 = vadd.f32 %v4583_v11, %v4580_v6  ;;  %v4571_v32 = vmul.f32 %v10596_v61, %v10457_v0  ;;  %v12104_v35 = vld [vmem:[#allocation19_spill] sm:$0xff] }
 0x77a   :  { %v4601_v1 = vmul.f32 0.2, %v4587_v57  ;;  %v4603_v40 = vmul.f32 0.2, %v4589_v54  ;;  %v4605_v14 = vmul.f32 0.2, %v4591_v36  ;;  %v4573_v2 = vmul.f32 %v10596_v61, %v10459_v8 }
 0x77b   :  { %v4607_v25 = vmul.f32 0.2, %v4593_v52  ;;  %v10628_v20 = vperm.slane %v6717_v49, 1  ;;  %v10632_v15 = vmul.f32 %v10596_v61, %v10463_v56  ;;  %v10636_v5 = vmul.f32 %v10596_v61, %v10465_v30 }
 0x77c   :  { %v4609_v24 = vmul.f32 0.2, %v4595_v44  ;;  %v10638_v41 = vmax.f32 %v4589_v54, %v4603_v40  ;;  %v4611_v27 = vmul.f32 0.2, %v4597_v37  ;;  %v4613_v0 = vmul.f32 0.2, %v4599_v38 }
 0x77d   :  { %v10640_v51 = vmax.f32 %v4591_v36, %v4605_v14  ;;  %v4588_v28 = vadd.f32 %v10577_v62, %v4569_v10  ;;  %v10643_v8 = vmax.f32 %v4587_v57, %v4601_v1  ;;  %v10645_v17 = vmax.f32 %v4593_v52, %v4607_v25 }
 0x77e   :  { %v4590_v56 = vadd.f32 %v10577_v62, %v4571_v32  ;;  %v4592_v4 = vadd.f32 %v10577_v62, %v4573_v2  ;;  %v11900_v30 = vrot.slane %v10638_v41, 2  ;;  %v11896_v13 = vrot.slane %v10638_v41, 3 }
 0x77f   :  { %v4602_v42 = vmul.f32 0.2, %v4588_v28  ;;  %v11884_v29 = vrot.slane %v10640_v51, 2  ;;  %v10652_v60 = vmax.f32 %v4595_v44, %v4609_v24  ;;  %v11882_v3 = vrot.slane %v10640_v51, 3  ;;  %v12105_v24 = vld [vmem:[#allocation25_spill] sm:$0xff] }
 0x780   :  { %v4604_v50 = vmul.f32 0.2, %v4590_v56  ;;  %v4606_v7 = vmul.f32 0.2, %v4592_v4  ;;  %v4784_v55 = vrot.slane %v10638_v41, 4  ;;  %v4786_v23 = vrot.slane %v10640_v51, 4 }
 0x781   :  { %12101 = vst [vmem:[#allocation70_spill] sm:$0xff] %v10652_v60  ;;  %v10655_v11 = vmax.f32 %v4588_v28, %v4602_v42  ;;  %v4651_v58 = vsel %vm2466_vm8, %v11900_v30, %v11884_v29  ;;  %v4727_v31 = vsel %vm2530_vm9, %v11896_v13, %v11882_v3  ;;  %v11890_v40 = vrot.slane %v10645_v17, 4 }
 0x782   :  { %v10665_v46 = vmax.f32 %v4590_v56, %v4604_v50  ;;  %v10667_v49 = vmax.f32 %v4592_v4, %v4606_v7  ;;  %v4661_v26 = vmul.f32 %v4651_v58, %v12103_v47  ;;  %v4737_v10 = vmul.f32 %v4727_v31, %v12104_v35 }
 0x783   :  { %v11903_v12 = vrot.slane %v10655_v11, 2  ;;  %v11897_v19 = vrot.slane %v10655_v11, 3  ;;  %v4783_v6 = vrot.slane %v10655_v11, 4  ;;  %v10691_v32 = vsel %vm2595_vm10, %v4784_v55, %v4786_v23 }
 0x784   :  { %v11886_v57 = vrot.slane %v10665_v46, 2  ;;  %v4681_v54 = vmul.f32 %v10590_v34, %v4661_v26  ;;  %v11883_v36 = vrot.slane %v10665_v46, 3  ;;  %v4785_v52 = vrot.slane %v10665_v46, 4 }
 0x785   :  { %v4758_v44 = vmul.f32 %v10594_v39, %v4737_v10  ;;  %v11887_v1 = vrot.slane %v10667_v49, 4  ;;  %v4814_v28 = vmul.f32 %v10691_v32, %v12105_v24  ;;  %v10719_v7 = vmax.f32 %v4597_v37, %v4611_v27 }
 0x786   :  { %v4650_v14 = vsel %vm2466_vm8, %v11903_v12, %v11886_v57  ;;  %v4726_v25 = vsel %vm2530_vm9, %v11897_v19, %v11883_v36  ;;  %v10709_v2 = vsel %vm2595_vm10, %v4783_v6, %v4785_v52  ;;  %v10721_v58 = vmax.f32 %v4599_v38, %v4613_v0  ;;  %v12107_v38 = vld [vmem:[#allocation24_spill] sm:$0xff]  ;;  %v12111_v57 = vld [vmem:[#allocation61_spill] sm:$0xff] }
 0x787   :  { %v4660_v56 = vmul.f32 %v4650_v14, %v12103_v47  ;;  %v4736_v4 = vmul.f32 %v4726_v25, %v12104_v35  ;;  %v4772_v42 = vadd.f32 %v4758_v44, %v4681_v54  ;;  %v4801_v50 = vsel %vm2595_vm10, %v4785_v52, %v11887_v1 }
 0x788   :  { %v4813_v26 = vmul.f32 %v10709_v2, %v12105_v24  ;;  %v4835_v31 = vmul.f32 %v10603_v48, %v4814_v28  ;;  %v11893_v35 = vrot.slane %v10655_v11, 7  ;;  %v11892_v54 = vrot.slane %v10638_v41, 7  ;;  %v12109_v24 = vld [vmem:[#allocation39_spill] sm:$0xff] }
 0x789   :  { %v4680_v10 = vmul.f32 %v10588_v21, %v4660_v56  ;;  %v4757_v47 = vmul.f32 %v10592_v45, %v4736_v4  ;;  %v10734_v37 = vsel %vm2595_vm10, %v4786_v23, %v11890_v40  ;;  %v10737_v27 = vmul.f32 %v4801_v50, %v12107_v38  ;;  %v12134_v38 = vld [vmem:[#allocation15_spill] sm:$0xff] }
 0x78a   :  { %12106 = vst [vmem:[#allocation64_spill] sm:$0xff] %v10734_v37  ;;  %v4834_v0 = vmul.f32 %v10598_v53, %v4813_v26  ;;  %v4849_v52 = vadd.f32 %v4835_v31, %v4772_v42  ;;  %v11885_v14 = vrot.slane %v10665_v46, 7  ;;  %v11888_v25 = vrot.slane %v10640_v51, 7  ;;  %v6718_v42 = vld [vmem:[%s11742_s17 + $0x6] ss:$8 sm:$0x3] }
 0x78b   :  { %12108 = vst [vmem:[#allocation67_spill] sm:$0xff] %v10737_v27  ;;  %v4771_v44 = vadd.f32 %v4757_v47, %v4680_v10  ;;  %v4939_v28 = vmul.f32 %v10665_v46, %v12109_v24  ;;  %v4940_v56 = vmul.f32 %v10640_v51, %v12109_v24  ;;  %v11891_v23 = vrot.slane %v10665_v46, 1  ;;  %v12110_v24 = vld [vmem:[#allocation35_spill] sm:$0xff] }
 0x78c   :  { %v11895_v4 = vrot.slane %v10640_v51, 1  ;;  %v11889_v3 = vrot.slane %v10667_v49, 1  ;;  %v4880_v31 = vsel %vm2660_vm12, %v11893_v35, %v11885_v14  ;;  %v4881_v10 = vsel %vm2660_vm12, %v11892_v54, %v11888_v25 }
 0x78d   :  { %v4848_v26 = vadd.f32 %v4834_v0, %v4771_v44  ;;  %v4960_v47 = vmul.f32 %v10609_v18, %v4939_v28  ;;  %v4890_v36 = vmul.f32 %v4880_v31, %v12110_v24  ;;  %v4891_v0 = vmul.f32 %v4881_v10, %v12110_v24  ;;  %v12112_v24 = vld [vmem:[#allocation43_spill] sm:$0xff] }
 0x78e   :  { %v4961_v44 = vmul.f32 %v10614_v33, %v4940_v56  ;;  %v11894_v29 = vrot.slane %v10645_v17, 1  ;;  %v5004_v14 = vsel %vm2775_vm13, %v11891_v23, %v11889_v3  ;;  %v5065_v1 = vmul.f32 %v4801_v50, %v12111_v57 }
 0x78f   :  { %v5066_v28 = vmul.f32 %v10734_v37, %v12111_v57  ;;  %v10778_v25 = vperm.slane %v6718_v42, 0  ;;  %v4911_v31 = vmul.f32 %v10605_v16, %v4890_v36  ;;  %v4912_v56 = vmul.f32 %v10607_v9, %v4891_v0  ;;  %v6719_v36 = vld [vmem:[%s11742_s17 + $0x7] ss:$8 sm:$0x3] }
 0x790   :  { %v5005_v10 = vsel %vm2775_vm13, %v11895_v4, %v11894_v29  ;;  %v5016_v3 = vmul.f32 %v5004_v14, %v12112_v24  ;;  %v10790_v40 = vperm.slane %v6718_v42, 1  ;;  %v11899_v23 = vrot.slane %v10665_v46, 5 }
 0x791   :  { %v5017_v50 = vmul.f32 %v5005_v10, %v12112_v24  ;;  %v5086_v57 = vmul.f32 %v10778_v25, %v5065_v1  ;;  %v4925_v0 = vadd.f32 %v4911_v31, %v4848_v26  ;;  %v4926_v54 = vadd.f32 %v4912_v56, %v4849_v52  ;;  %v12113_v31 = vld [vmem:[#allocation56_spill] sm:$0xff] }
 0x792   :  { %v5037_v35 = vmul.f32 %v10619_v43, %v5016_v3  ;;  %v11902_v29 = vrot.slane %v10640_v51, 5  ;;  %v5087_v10 = vmul.f32 %v10790_v40, %v5066_v28  ;;  %v11898_v42 = vrot.slane %v10667_v49, 5  ;;  %v6720_v3 = vld [vmem:[%s11742_s17 + $0x10] ss:$8 sm:$0x3] }
 0x793   :  { %v5038_v14 = vmul.f32 %v10628_v20, %v5017_v50  ;;  %v11901_v1 = vrot.slane %v10645_v17, 5  ;;  %v4974_v24 = vadd.f32 %v4960_v47, %v4925_v0  ;;  %v4975_v4 = vadd.f32 %v4961_v44, %v4926_v54 }
 0x794   :  { %v10803_v13 = vperm.slane %v6719_v36, 0  ;;  %v10805_v19 = vperm.slane %v6719_v36, 1  ;;  %v5130_v52 = vsel %vm2890_vm14, %v11899_v23, %v11898_v42  ;;  %v11911_v26 = vrot.slane %v10665_v46, 6 }
 0x795   :  { %v5131_v54 = vsel %vm2890_vm14, %v11902_v29, %v11901_v1  ;;  %v11907_v47 = vrot.slane %v10640_v51, 6  ;;  %v5051_v44 = vadd.f32 %v5037_v35, %v4974_v24  ;;  %v5052_v28 = vadd.f32 %v5038_v14, %v4975_v4 }
 0x796   :  { %v5142_v56 = vmul.f32 %v5130_v52, %v12113_v31  ;;  %v5143_v50 = vmul.f32 %v5131_v54, %v12113_v31  ;;  %v11905_v36 = vrot.slane %v10667_v49, 6  ;;  %v11904_v0 = vrot.slane %v10645_v17, 6 }
 0x797   :  { %v10828_v42 = vperm.slane %v6720_v3, 0  ;;  %v10830_v23 = vperm.slane %v6720_v3, 1  ;;  %v5100_v30 = vadd.f32 %v5086_v57, %v5051_v44  ;;  %v5101_v1 = vadd.f32 %v5087_v10, %v5052_v28  ;;  %v12114_v3 = vld [vmem:[#allocation66_spill] sm:$0xff] }
 0x798   :  { %v5163_v29 = vmul.f32 %v10803_v13, %v5142_v56  ;;  %v5164_v12 = vmul.f32 %v10805_v19, %v5143_v50  ;;  %v5207_v35 = vsel %vm2955_vm11, %v11911_v26, %v11905_v36  ;;  %v5208_v4 = vsel %vm2955_vm11, %v11907_v47, %v11904_v0  ;;  %v12116_v36 = vld [vmem:[#allocation16_spill] sm:$0xff]  ;;  %v12117_v26 = vld [vmem:[#allocation23_spill] sm:$0xff] }
 0x799   :  { %v4567_v57 = vmul.f32 %v10596_v61, %v10451_v59  ;;  %v4598_v14 = vadd.f32 %v10577_v62, %v10636_v5  ;;  %v5219_v52 = vmul.f32 %v5207_v35, %v12114_v3  ;;  %v5220_v54 = vmul.f32 %v5208_v4, %v12114_v3 }
 0x79a   :  { %v5177_v10 = vadd.f32 %v5163_v29, %v5100_v30  ;;  %v5178_v24 = vadd.f32 %v5164_v12, %v5101_v1  ;;  %v11916_v31 = vrot.slane %v10643_v8, 2  ;;  %v11906_v56 = vrot.slane %v10721_v58, 2 }
 0x79b   :  { %v4586_v44 = vadd.f32 %v10577_v62, %v4567_v57  ;;  %v4612_v28 = vmul.f32 0.2, %v4598_v14  ;;  %v5240_v50 = vmul.f32 %v10828_v42, %v5219_v52  ;;  %v5241_v59 = vmul.f32 %v10830_v23, %v5220_v54  ;;  %v12115_v57 = vld [vmem:[#allocation10_spill] sm:$0xff] }
 0x79c   :  { %v11912_v0 = vrot.slane %v10643_v8, 3  ;;  %v11909_v5 = vrot.slane %v10721_v58, 3  ;;  %v4655_v12 = vsel %vm2466_vm8, %v11906_v56, %v11916_v31  ;;  %v4782_v1 = vrot.slane %v10643_v8, 4  ;;  %v12120_v31 = vld [vmem:[#allocation33_spill] sm:$0xff] }
 0x79d   :  { %v4600_v30 = vmul.f32 0.2, %v4586_v44  ;;  %v10859_v29 = vmax.f32 %v4598_v14, %v4612_v28  ;;  %v5254_v35 = vadd.f32 %v5240_v50, %v5177_v10  ;;  %v5255_v4 = vadd.f32 %v5241_v59, %v5178_v24 }
 0x79e   :  { %v4657_v3 = vmul.f32 %v4655_v12, %v12115_v57  ;;  %v4731_v14 = vsel %vm2530_vm9, %v11909_v5, %v11912_v0  ;;  %v11908_v50 = vrot.slane %v10721_v58, 4  ;;  %v4936_v27 = vmul.f32 %v10643_v8, %v12120_v31 }
 0x79f   :  { %v10875_v52 = vmax.f32 %v4586_v44, %v4600_v30  ;;  %v11910_v54 = vrot.slane %v10859_v29, 2  ;;  %v11913_v28 = vrot.slane %v10859_v29, 3  ;;  %v4733_v56 = vmul.f32 %v4731_v14, %v12116_v36 }
 0x7a0   :  { %v5270_v47 = vadd.f32 %v5255_v4, %v5254_v35  ;;  %v4677_v10 = vmul.f32 %v10590_v34, %v4657_v3  ;;  %v11914_v24 = vrot.slane %v10859_v29, 4  ;;  %v4806_v35 = vsel %vm2595_vm10, %v4782_v1, %v4784_v55 }
 0x7a1   :  { %v11917_v59 = vrot.slane %v10875_v52, 2  ;;  %v11915_v12 = vrot.slane %v10875_v52, 3  ;;  %v4754_v44 = vmul.f32 %v10594_v39, %v4733_v56  ;;  %v4781_v30 = vrot.slane %v10875_v52, 4 }
 0x7a2   :  { %5271 = vadd.xlane.f32.xlu0 %v5270_v47  ;;  %v10895_v4 = vsel %vm2595_vm10, %v11908_v50, %v4782_v1  ;;  %v11921_v3 = vrot.slane %v10875_v52, 7  ;;  %v11920_v14 = vrot.slane %v10643_v8, 7 }
 0x7a3   :  { %v4654_v47 = vsel %vm2466_vm8, %v11910_v54, %v11917_v59  ;;  %v4730_v55 = vsel %vm2530_vm9, %v11913_v28, %v11915_v12  ;;  %v4768_v56 = vadd.f32 %v4754_v44, %v4677_v10  ;;  %v4805_v1 = vsel %vm2595_vm10, %v4781_v30, %v4783_v6  ;;  %v12118_v44 = vld [vmem:[#allocation22_spill] sm:$0xff] }
 0x7a4   :  { %v4656_v50 = vmul.f32 %v4654_v47, %v12115_v57  ;;  %v4732_v5 = vmul.f32 %v4730_v55, %v12116_v36  ;;  %v10921_v54 = vsel %vm2595_vm10, %v11914_v24, %v4781_v30  ;;  %v4810_v0 = vmul.f32 %v10895_v4, %v12117_v26 }
 0x7a5   :  { %v4809_v10 = vmul.f32 %v10921_v54, %v12117_v26  ;;  %v4811_v28 = vmul.f32 %v4805_v1, %v12118_v44  ;;  %v4812_v6 = vmul.f32 %v4806_v35, %v12118_v44  ;;  %v11918_v57 = vrot.slane %v10859_v29, 7 }
 0x7a6   :  { %v4676_v36 = vmul.f32 %v10588_v21, %v4656_v50  ;;  %v4753_v47 = vmul.f32 %v10592_v45, %v4732_v5  ;;  %v4831_v55 = vmul.f32 %v10603_v48, %v4810_v0  ;;  %v11919_v30 = vrot.slane %v10721_v58, 7 }
 0x7a7   :  { %v4830_v24 = vmul.f32 %v10598_v53, %v4809_v10  ;;  %v10936_v12 = vmul.f32 %v10598_v53, %v4811_v28  ;;  %v10939_v26 = vmul.f32 %v10603_v48, %v4812_v6  ;;  %v4884_v50 = vsel %vm2660_vm12, %v11918_v57, %v11921_v3  ;;  %v12119_v28 = vld [vmem:[#allocation32_spill] sm:$0xff] }
 0x7a8   :  { %v4767_v5 = vadd.f32 %v4753_v47, %v4676_v36  ;;  %v4845_v44 = vadd.f32 %v4831_v55, %v4768_v56  ;;  %v4885_v0 = vsel %vm2660_vm12, %v11919_v30, %v11920_v14  ;;  %v4886_v10 = vmul.f32 %v4884_v50, %v12119_v28 }
 0x7a9   :  { %v4887_v6 = vmul.f32 %v4885_v0, %v12119_v28  ;;  %v4935_v59 = vmul.f32 %v10875_v52, %v12120_v31  ;;  %v11923_v36 = vrot.slane %v10875_v52, 1  ;;  %v11924_v55 = vrot.slane %v10643_v8, 1 }
 0x7aa   :  { %v4844_v56 = vadd.f32 %v4830_v24, %v4767_v5  ;;  %v4907_v47 = vmul.f32 %v10605_v16, %v4886_v10  ;;  %v11927_v57 = vrot.slane %v10655_v11, 1  ;;  %v4957_v0 = vmul.f32 %v10614_v33, %v4936_v27  ;;  %v12121_v24 = vld [vmem:[#allocation54_spill] sm:$0xff] }
 0x7ab   :  { %v4908_v30 = vmul.f32 %v10607_v9, %v4887_v6  ;;  %v4956_v50 = vmul.f32 %v10609_v18, %v4935_v59  ;;  %v11925_v28 = vrot.slane %v10638_v41, 1  ;;  %v5061_v5 = vmul.f32 %v4805_v1, %v12121_v24  ;;  %v12122_v59 = vld [vmem:[#allocation37_spill] sm:$0xff] }
 0x7ac   :  { %v4921_v14 = vadd.f32 %v4907_v47, %v4844_v56  ;;  %v5008_v31 = vsel %vm2775_vm13, %v11923_v36, %v11927_v57  ;;  %v5062_v10 = vmul.f32 %v4806_v35, %v12121_v24  ;;  %v11926_v56 = vrot.slane %v10875_v52, 5 }
 0x7ad   :  { %v4922_v3 = vadd.f32 %v4908_v30, %v4845_v44  ;;  %v5009_v27 = vsel %vm2775_vm13, %v11924_v55, %v11925_v28  ;;  %v5012_v6 = vmul.f32 %v5008_v31, %v12122_v59  ;;  %v5082_v36 = vmul.f32 %v10778_v25, %v5061_v5 }
 0x7ae   :  { %v4970_v47 = vadd.f32 %v4956_v50, %v4921_v14  ;;  %v5013_v37 = vmul.f32 %v5009_v27, %v12122_v59  ;;  %v5083_v1 = vmul.f32 %v10790_v40, %v5062_v10  ;;  %v11929_v44 = vrot.slane %v10643_v8, 5  ;;  %v12123_v27 = vld [vmem:[#allocation48_spill] sm:$0xff] }
 0x7af   :  { %v4971_v35 = vadd.f32 %v4957_v0, %v4922_v3  ;;  %v5033_v30 = vmul.f32 %v10619_v43, %v5012_v6  ;;  %v5112_v24 = vrot.slane %v10655_v11, 5  ;;  %v11931_v31 = vrot.slane %v10638_v41, 5 }
 0x7b0   :  { %v5034_v55 = vmul.f32 %v10628_v20, %v5013_v37  ;;  %v11928_v28 = vrot.slane %v10875_v52, 6  ;;  %v11932_v14 = vrot.slane %v10643_v8, 6  ;;  %v11930_v0 = vrot.slane %v10655_v11, 6 }
 0x7b1   :  { %v5047_v50 = vadd.f32 %v5033_v30, %v4970_v47  ;;  %v5134_v3 = vsel %vm2890_vm14, %v11926_v56, %v5112_v24  ;;  %v11933_v5 = vrot.slane %v10638_v41, 6  ;;  %v5135_v37 = vsel %vm2890_vm14, %v11929_v44, %v11931_v31 }
 0x7b2   :  { %v5048_v10 = vadd.f32 %v5034_v55, %v4971_v35  ;;  %v5138_v59 = vmul.f32 %v5134_v3, %v12123_v27  ;;  %v12124_v6 = vrot.slane %v10655_v11, 2  ;;  %v12125_v47 = vrot.slane %v10875_v52, 2 }
 0x7b3   :  { %v5096_v56 = vadd.f32 %v5082_v36, %v5047_v50  ;;  %v5139_v57 = vmul.f32 %v5135_v37, %v12123_v27  ;;  %v5211_v55 = vsel %vm2955_vm11, %v11928_v28, %v11930_v0  ;;  %v5212_v35 = vsel %vm2955_vm11, %v11932_v14, %v11933_v5  ;;  %v12126_v36 = vld [vmem:[#allocation59_spill] sm:$0xff]  ;;  %v12129_v0 = vld [vmem:[#allocation9_spill] sm:$0xff] }
 0x7b4   :  { %v4652_v30 = vsel %vm2466_vm8, %v12125_v47, %v12124_v6  ;;  %v5097_v3 = vadd.f32 %v5083_v1, %v5048_v10  ;;  %v5159_v6 = vmul.f32 %v10803_v13, %v5138_v59  ;;  %v5215_v50 = vmul.f32 %v5211_v55, %v12126_v36 }
 0x7b5   :  { %v5216_v37 = vmul.f32 %v5212_v35, %v12126_v36  ;;  %v5160_v27 = vmul.f32 %v10805_v19, %v5139_v57  ;;  %v12127_v47 = vrot.slane %v10638_v41, 2  ;;  %v12128_v28 = vrot.slane %v10643_v8, 2 }
 0x7b6   :  { %v4658_v31 = vmul.f32 %v4652_v30, %v12129_v0  ;;  %v12130_v14 = vrot.slane %v10655_v11, 3  ;;  %v12131_v1 = vrot.slane %v10875_v52, 3  ;;  %v5173_v59 = vadd.f32 %v5159_v6, %v5096_v56 }
 0x7b7   :  { %v4653_v44 = vsel %vm2466_vm8, %v12128_v28, %v12127_v47  ;;  %v5236_v55 = vmul.f32 %v10828_v42, %v5215_v50  ;;  %v5237_v57 = vmul.f32 %v10830_v23, %v5216_v37  ;;  %v5174_v36 = vadd.f32 %v5160_v27, %v5097_v3 }
 0x7b8   :  { %v4728_v10 = vsel %vm2530_vm9, %v12131_v1, %v12130_v14  ;;  %v4659_v35 = vmul.f32 %v4653_v44, %v12129_v0  ;;  %v4678_v5 = vmul.f32 %v10588_v21, %v4658_v31  ;;  %v12132_v28 = vrot.slane %v10638_v41, 3 }
 0x7b9   :  { %v12133_v30 = vrot.slane %v10643_v8, 3  ;;  %v4734_v60 = vmul.f32 %v4728_v10, %v12134_v38  ;;  %v5250_v14 = vadd.f32 %v5236_v55, %v5173_v59  ;;  %v12135_v50 = vrot.slane %v10655_v11, 7  ;;  %v12139_v10 = vld [vmem:[#allocation31_spill] sm:$0xff] }
 0x7ba   :  { %v4679_v56 = vmul.f32 %v10590_v34, %v4659_v35  ;;  %v12136_v44 = vrot.slane %v10875_v52, 7  ;;  %v5251_v0 = vadd.f32 %v5237_v57, %v5174_v36  ;;  %v12137_v37 = vrot.slane %v10638_v41, 7  ;;  %v12140_v35 = vld [vmem:[#allocation38_spill] sm:$0xff] }
 0x7bb   :  { %v4729_v47 = vsel %vm2530_vm9, %v12133_v30, %v12132_v28  ;;  %v4755_v3 = vmul.f32 %v10592_v45, %v4734_v60  ;;  %v12138_v27 = vrot.slane %v10643_v8, 7  ;;  %v4937_v28 = vmul.f32 %v10655_v11, %v12140_v35 }
 0x7bc   :  { %v4735_v6 = vmul.f32 %v4729_v47, %v12134_v38  ;;  %v4882_v31 = vsel %vm2660_vm12, %v12136_v44, %v12135_v50  ;;  %v4938_v57 = vmul.f32 %v10638_v41, %v12140_v35  ;;  %v5264_v60 = vadd.f32 %v5251_v0, %v5250_v14 }
 0x7bd   :  { %v4883_v1 = vsel %vm2660_vm12, %v12138_v27, %v12137_v37  ;;  %v4888_v59 = vmul.f32 %v4882_v31, %v12139_v10  ;;  %v4769_v36 = vadd.f32 %v4755_v3, %v4678_v5  ;;  %v12141_v47 = vrot.slane %v10665_v46, 1 }
 0x7be   :  { %v4756_v38 = vmul.f32 %v10594_v39, %v4735_v6  ;;  %v4889_v55 = vmul.f32 %v4883_v1, %v12139_v10  ;;  %v12142_v50 = vrot.slane %v10655_v11, 1  ;;  %v4958_v37 = vmul.f32 %v10609_v18, %v4937_v28  ;;  %5265 = vadd.xlane.f32.xlu1 %v5264_v60  ;;  %v12145_v1 = vld [vmem:[#allocation36_spill] sm:$0xff] }
 0x7bf   :  { %v4909_v30 = vmul.f32 %v10605_v16, %v4888_v59  ;;  %v4959_v27 = vmul.f32 %v10614_v33, %v4938_v57  ;;  %v4846_v14 = vadd.f32 %v10936_v12, %v4769_v36  ;;  %v12143_v5 = vrot.slane %v10640_v51, 1  ;;  %v12146_v59 = vld [vmem:[#allocation60_spill] sm:$0xff] }
 0x7c0   :  { %v5006_v44 = vsel %vm2775_vm13, %v12142_v50, %v12141_v47  ;;  %v4770_v6 = vadd.f32 %v4756_v38, %v4679_v56  ;;  %v4910_v31 = vmul.f32 %v10607_v9, %v4889_v55  ;;  %v12144_v0 = vrot.slane %v10638_v41, 1 }
 0x7c1   :  { %v5014_v10 = vmul.f32 %v5006_v44, %v12145_v1  ;;  %v5063_v56 = vmul.f32 %v10709_v2, %v12146_v59  ;;  %v5064_v35 = vmul.f32 %v10691_v32, %v12146_v59  ;;  %v12147_v12 = vrot.slane %v10665_v46, 5 }
 0x7c2   :  { %v5007_v3 = vsel %vm2775_vm13, %v12144_v0, %v12143_v5  ;;  %v4847_v38 = vadd.f32 %v10939_v26, %v4770_v6  ;;  %v4923_v57 = vadd.f32 %v4909_v30, %v4846_v14  ;;  %v12148_v47 = vrot.slane %v10640_v51, 5  ;;  %v12150_v6 = vld [vmem:[#allocation53_spill] sm:$0xff] }
 0x7c3   :  { %v5015_v55 = vmul.f32 %v5007_v3, %v12145_v1  ;;  %v5132_v28 = vsel %vm2890_vm14, %v5112_v24, %v12147_v12  ;;  %v5035_v60 = vmul.f32 %v10619_v43, %v5014_v10  ;;  %v5084_v36 = vmul.f32 %v10778_v25, %v5063_v56 }
 0x7c4   :  { %v12149_v2 = vrot.slane %v10638_v41, 5  ;;  %v4924_v50 = vadd.f32 %v4910_v31, %v4847_v38  ;;  %v5085_v44 = vmul.f32 %v10790_v40, %v5064_v35  ;;  %v5140_v5 = vmul.f32 %v5132_v28, %v12150_v6 }
 0x7c5   :  { %v5036_v32 = vmul.f32 %v10628_v20, %v5015_v55  ;;  %v4972_v24 = vadd.f32 %v4958_v37, %v4923_v57  ;;  %v12151_v14 = vrot.slane %v10665_v46, 6  ;;  %v12152_v0 = vrot.slane %v10655_v11, 6  ;;  %v12155_v37 = vld [vmem:[#allocation57_spill] sm:$0xff] }
 0x7c6   :  { %v5133_v26 = vsel %vm2890_vm14, %v12149_v2, %v12148_v47  ;;  %v12153_v1 = vrot.slane %v10640_v51, 6  ;;  %v12154_v31 = vrot.slane %v10638_v41, 6  ;;  %v4973_v59 = vadd.f32 %v4959_v27, %v4924_v50 }
 0x7c7   :  { %v5141_v30 = vmul.f32 %v5133_v26, %v12150_v6  ;;  %v5209_v3 = vsel %vm2955_vm11, %v12152_v0, %v12151_v14  ;;  %v5161_v56 = vmul.f32 %v10803_v13, %v5140_v5  ;;  %v5049_v35 = vadd.f32 %v5035_v60, %v4972_v24  ;;  %v12157_v5 = vld [vmem:[#allocation20_spill] sm:$0xff] }
 0x7c8   :  { %v5210_v10 = vsel %vm2955_vm11, %v12154_v31, %v12153_v1  ;;  %v5217_v38 = vmul.f32 %v5209_v3, %v12155_v37  ;;  %v4596_v12 = vadd.f32 %v10577_v62, %v10632_v15  ;;  %v11949_v28 = vrot.slane %v10719_v7, 2  ;;  %v12159_v3 = vld [vmem:[#allocation29_spill] sm:$0xff] }
 0x7c9   :  { %v5218_v55 = vmul.f32 %v5210_v10, %v12155_v37  ;;  %v5162_v11 = vmul.f32 %v10805_v19, %v5141_v30  ;;  %v5050_v57 = vadd.f32 %v5036_v32, %v4973_v59  ;;  %v11944_v27 = vrot.slane %v10719_v7, 3  ;;  %v12161_v37 = vld [vmem:[#allocation30_spill] sm:$0xff] }
 0x7ca   :  { %v5238_v41 = vmul.f32 %v10828_v42, %v5217_v38  ;;  %v5098_v2 = vadd.f32 %v5084_v36, %v5049_v35  ;;  %v4610_v26 = vmul.f32 0.2, %v4596_v12  ;;  %v12156_v50 = vrot.slane %v10721_v58, 2 }
 0x7cb   :  { %v5239_v47 = vmul.f32 %v10830_v23, %v5218_v55  ;;  %v4792_v15 = vrot.slane %v10719_v7, 4  ;;  %v5099_v6 = vadd.f32 %v5085_v44, %v5050_v57  ;;  %v12158_v24 = vrot.slane %v10721_v58, 3 }
 0x7cc   :  { %v4643_v60 = vsel %vm2466_vm8, %v11949_v28, %v12156_v50  ;;  %v11941_v30 = vrot.slane %v10719_v7, 7  ;;  %v5175_v14 = vadd.f32 %v5161_v56, %v5098_v2  ;;  %v11152_v0 = vmax.f32 %v4596_v12, %v4610_v26  ;;  %v12191_v28 = vld [vmem:[#allocation72_spill] sm:$0xff] }
 0x7cd   :  { %v4669_v32 = vmul.f32 %v4643_v60, %v12157_v5  ;;  %v4719_v36 = vsel %vm2530_vm9, %v11944_v27, %v12158_v24  ;;  %v12160_v31 = vrot.slane %v10721_v58, 4  ;;  %v5176_v10 = vadd.f32 %v5162_v11, %v5099_v6 }
 0x7ce   :  { %v4745_v1 = vmul.f32 %v4719_v36, %v12159_v3  ;;  %v12162_v56 = vrot.slane %v10721_v58, 7  ;;  %v5252_v35 = vadd.f32 %v5238_v41, %v5175_v14  ;;  %v11951_v12 = vrot.slane %v11152_v0, 2  ;;  %v12165_v36 = vld [vmem:[#allocation47_spill] sm:$0xff] }
 0x7cf   :  { %v11161_v44 = vsel %vm2595_vm10, %v4792_v15, %v12160_v31  ;;  %v4689_v59 = vmul.f32 %v10590_v34, %v4669_v32  ;;  %v11946_v57 = vrot.slane %v11152_v0, 3  ;;  %v5253_v11 = vadd.f32 %v5239_v47, %v5176_v10 }
 0x7d0   :  { %v4822_v38 = vmul.f32 %v11161_v44, %v12161_v37  ;;  %v4873_v55 = vsel %vm2660_vm12, %v11941_v30, %v12162_v56  ;;  %v4766_v2 = vmul.f32 %v10594_v39, %v4745_v1  ;;  %v4791_v26 = vrot.slane %v11152_v0, 4 }
 0x7d1   :  { %v11942_v60 = vrot.slane %v11152_v0, 7  ;;  %v12163_v6 = vrot.slane %v10859_v29, 2  ;;  %v12164_v32 = vrot.slane %v10859_v29, 3  ;;  %v4899_v14 = vmul.f32 %v4873_v55, %v12165_v36 }
 0x7d2   :  { %v4843_v50 = vmul.f32 %v10603_v48, %v4822_v38  ;;  %v4780_v24 = vadd.f32 %v4766_v2, %v4689_v59  ;;  %v5267_v1 = vadd.f32 %v5253_v11, %v5252_v35  ;;  %v12166_v38 = vrot.slane %v10859_v29, 4  ;;  %v12168_v11 = vld [vmem:[#allocation52_spill] sm:$0xff] }
 0x7d3   :  { %v4642_v41 = vsel %vm2466_vm8, %v11951_v12, %v12163_v6  ;;  %v4718_v47 = vsel %vm2530_vm9, %v11946_v57, %v12164_v32  ;;  %v12167_v59 = vrot.slane %v10859_v29, 7  ;;  %v11953_v27 = vrot.slane %v10645_v17, 7 }
 0x7d4   :  { %v4668_v31 = vmul.f32 %v4642_v41, %v12157_v5  ;;  %v4744_v10 = vmul.f32 %v4718_v47, %v12159_v3  ;;  %v11199_v56 = vsel %vm2595_vm10, %v4791_v26, %v12166_v38  ;;  %v4857_v32 = vadd.f32 %v4843_v50, %v4780_v24  ;;  %5268 = vadd.xlane.f32.xlu2 %v5267_v1 }
 0x7d5   :  { %v4821_v6 = vmul.f32 %v11199_v56, %v12161_v37  ;;  %v4872_v5 = vsel %vm2660_vm12, %v11942_v60, %v12167_v59  ;;  %v4920_v3 = vmul.f32 %v10607_v9, %v4899_v14  ;;  %v4947_v37 = vmul.f32 %v10859_v29, %v12168_v11 }
 0x7d6   :  { %v4688_v55 = vmul.f32 %v10588_v21, %v4668_v31  ;;  %v4765_v35 = vmul.f32 %v10592_v45, %v4744_v10  ;;  %v4898_v2 = vmul.f32 %v4872_v5, %v12165_v36  ;;  %v4948_v47 = vmul.f32 %v10721_v58, %v12168_v11 }
 0x7d7   :  { %v4842_v50 = vmul.f32 %v10598_v53, %v4821_v6  ;;  %v4934_v41 = vadd.f32 %v4920_v3, %v4857_v32  ;;  %v11935_v24 = vrot.slane %v10859_v29, 1  ;;  %v4968_v1 = vmul.f32 %v10609_v18, %v4947_v37  ;;  %v12170_v32 = vld [vmem:[#allocation76_spill] sm:$0xff] }
 0x7d8   :  { %v4779_v38 = vadd.f32 %v4765_v35, %v4688_v55  ;;  %v4919_v14 = vmul.f32 %v10605_v16, %v4898_v2  ;;  %v11940_v31 = vrot.slane %v10721_v58, 1  ;;  %v4969_v36 = vmul.f32 %v10614_v33, %v4948_v47  ;;  %v12172_v2 = vld [vmem:[#allocation51_spill] sm:$0xff] }
 0x7d9   :  { %v12169_v10 = vrot.slane %v10875_v52, 1  ;;  %v5073_v59 = vmul.f32 %v10921_v54, %v12170_v32  ;;  %v5074_v5 = vmul.f32 %v10895_v4, %v12170_v32  ;;  %v12171_v55 = vrot.slane %v10643_v8, 1 }
 0x7da   :  { %v4856_v3 = vadd.f32 %v4842_v50, %v4779_v38  ;;  %v11936_v37 = vrot.slane %v10859_v29, 5  ;;  %v4983_v47 = vadd.f32 %v4969_v36, %v4934_v41  ;;  %v11938_v38 = vrot.slane %v10721_v58, 5  ;;  %v12174_v36 = vld [vmem:[#allocation73_spill] sm:$0xff] }
 0x7db   :  { %v5010_v6 = vsel %vm2775_vm13, %v11935_v24, %v12169_v10  ;;  %v5011_v35 = vsel %vm2775_vm13, %v11940_v31, %v12171_v55  ;;  %v5094_v54 = vmul.f32 %v10778_v25, %v5073_v59  ;;  %v5095_v24 = vmul.f32 %v10790_v40, %v5074_v5 }
 0x7dc   :  { %v5024_v11 = vmul.f32 %v5010_v6, %v12172_v2  ;;  %v5025_v10 = vmul.f32 %v5011_v35, %v12172_v2  ;;  %v4933_v4 = vadd.f32 %v4919_v14, %v4856_v3  ;;  %v12173_v32 = vrot.slane %v10875_v52, 5 }
 0x7dd   :  { %v11937_v59 = vrot.slane %v10859_v29, 6  ;;  %v11939_v5 = vrot.slane %v10721_v58, 6  ;;  %v12175_v3 = vrot.slane %v10643_v8, 5  ;;  %v4575_v2 = vmul.f32 %v10596_v61, %v10461_v63  ;;  %v12178_v61 = vld [vmem:[#allocation78_spill] sm:$0xff] }
 0x7de   :  { %v5045_v50 = vmul.f32 %v10619_v43, %v5024_v11  ;;  %v5136_v6 = vsel %vm2890_vm14, %v11936_v37, %v12173_v32  ;;  %v5046_v41 = vmul.f32 %v10628_v20, %v5025_v10  ;;  %v4982_v14 = vadd.f32 %v4968_v1, %v4933_v4 }
 0x7df   :  { %v5150_v55 = vmul.f32 %v5136_v6, %v12174_v36  ;;  %v5137_v35 = vsel %vm2890_vm14, %v11938_v38, %v12175_v3  ;;  %v11960_v11 = vrot.slane %v10667_v49, 2  ;;  %v12176_v37 = vrot.slane %v10875_v52, 6 }
 0x7e0   :  { %v5060_v10 = vadd.f32 %v5046_v41, %v4983_v47  ;;  %v5151_v32 = vmul.f32 %v5137_v35, %v12174_v36  ;;  %v5059_v4 = vadd.f32 %v5045_v50, %v4982_v14  ;;  %v12177_v3 = vrot.slane %v10643_v8, 6  ;;  %v12179_v14 = vld [vmem:[#allocation70_spill] sm:$0xff] }
 0x7e1   :  { %v5171_v6 = vmul.f32 %v10803_v13, %v5150_v55  ;;  %v5213_v1 = vsel %vm2955_vm11, %v11937_v59, %v12176_v37  ;;  %v4594_v41 = vadd.f32 %v10577_v62, %v4575_v2  ;;  %v11959_v35 = vrot.slane %v10645_v17, 2 }
 0x7e2   :  { %v5214_v63 = vsel %vm2955_vm11, %v11939_v5, %v12177_v3  ;;  %v5227_v47 = vmul.f32 %v5213_v1, %v12178_v61  ;;  %v5109_v36 = vadd.f32 %v5095_v24, %v5060_v10  ;;  %v5172_v52 = vmul.f32 %v10805_v19, %v5151_v32  ;;  %v12180_v32 = vld [vmem:[#allocation24_spill] sm:$0xff] }
 0x7e3   :  { %v5228_v55 = vmul.f32 %v5214_v63, %v12178_v61  ;;  %v5108_v37 = vadd.f32 %v5094_v54, %v5059_v4  ;;  %v4608_v8 = vmul.f32 0.2, %v4594_v41  ;;  %v11947_v59 = vrot.slane %v12179_v14, 2  ;;  %v12181_v4 = vld [vmem:[#allocation64_spill] sm:$0xff] }
 0x7e4   :  { %v5248_v50 = vmul.f32 %v10828_v42, %v5227_v47  ;;  %v5186_v38 = vadd.f32 %v5172_v52, %v5109_v36  ;;  %v11956_v1 = vrot.slane %v10667_v49, 3  ;;  %v11955_v62 = vrot.slane %v10645_v17, 3  ;;  %v12182_v47 = vld [vmem:[#allocation12_spill] sm:$0xff] }
 0x7e5   :  { %v5249_v3 = vmul.f32 %v10830_v23, %v5228_v55  ;;  %v5185_v24 = vadd.f32 %v5171_v6, %v5108_v37  ;;  %v11289_v2 = vmax.f32 %v4594_v41, %v4608_v8  ;;  %v4647_v54 = vsel %vm2466_vm8, %v11959_v35, %v11947_v59  ;;  %v12183_v8 = vld [vmem:[#allocation67_spill] sm:$0xff] }
 0x7e6   :  { %v11943_v10 = vrot.slane %v12179_v14, 3  ;;  %v4816_v63 = vmul.f32 %v12181_v4, %v12180_v32  ;;  %v4665_v36 = vmul.f32 %v4647_v54, %v12182_v47  ;;  %v4790_v52 = vrot.slane %v12179_v14, 4 }
 0x7e7   :  { %v5263_v61 = vadd.f32 %v5249_v3, %v5186_v38  ;;  %v5262_v6 = vadd.f32 %v5248_v50, %v5185_v24  ;;  %v11950_v41 = vrot.slane %v11289_v2, 2  ;;  %v11945_v55 = vrot.slane %v11289_v2, 3  ;;  %v12184_v3 = vld [vmem:[#allocation21_spill] sm:$0xff] }
 0x7e8   :  { %v4723_v37 = vsel %vm2530_vm9, %v11955_v62, %v11943_v10  ;;  %v11312_v32 = vmul.f32 %v10598_v53, %v12183_v8  ;;  %v4685_v38 = vmul.f32 %v10590_v34, %v4665_v36  ;;  %v4789_v50 = vrot.slane %v11289_v2, 4 }
 0x7e9   :  { %v4741_v54 = vmul.f32 %v4723_v37, %v12184_v3  ;;  %v5282_v24 = vadd.f32 %v5263_v61, %v5262_v6  ;;  %v4646_v4 = vsel %vm2466_vm8, %v11960_v11, %v11950_v41  ;;  %v4722_v8 = vsel %vm2530_vm9, %v11956_v1, %v11945_v55  ;;  %v12189_v55 = vld [vmem:[#allocation46_spill] sm:$0xff] }
 0x7ea   :  { %v12185_v36 = vrot.slane %v10645_v17, 4  ;;  %v4664_v61 = vmul.f32 %v4646_v4, %v12182_v47  ;;  %v4740_v6 = vmul.f32 %v4722_v8, %v12184_v3  ;;  %v4797_v31 = vsel %vm2595_vm10, %v4789_v50, %v4791_v26  ;;  %v12187_v47 = vld [vmem:[#allocation28_spill] sm:$0xff] }
 0x7eb   :  { %v4762_v5 = vmul.f32 %v10594_v39, %v4741_v54  ;;  %v11343_v30 = vmul.f32 %v10603_v48, %v4816_v63  ;;  %5283 = vadd.xlane.f32.xlu0 %v5282_v24  ;;  %v12186_v60 = vrot.slane %v10667_v49, 4  ;;  %v11954_v54 = vrot.slane %v10667_v49, 7 }
 0x7ec   :  { %v11333_v37 = vsel %vm2595_vm10, %v12185_v36, %v4790_v52  ;;  %v4684_v4 = vmul.f32 %v10588_v21, %v4664_v61  ;;  %v4761_v8 = vmul.f32 %v10592_v45, %v4740_v6  ;;  %v11362_v24 = vsel %vm2595_vm10, %v4790_v52, %v4792_v15 }
 0x7ed   :  { %v11349_v36 = vsel %vm2595_vm10, %v12186_v60, %v4789_v50  ;;  %v4818_v3 = vmul.f32 %v11333_v37, %v12187_v47  ;;  %v4776_v26 = vadd.f32 %v4762_v5, %v4685_v38  ;;  %v12188_v60 = vld [vmem:[#allocation27_spill] sm:$0xff]  ;;  %v11948_v5 = vrot.slane %v11289_v2, 7 }
 0x7ee   :  { %v4817_v63 = vmul.f32 %v11349_v36, %v12187_v47  ;;  %v11365_v50 = vmul.f32 %v4797_v31, %v12188_v60  ;;  %v4775_v61 = vadd.f32 %v4761_v8, %v4684_v4  ;;  %v11952_v38 = vrot.slane %v12179_v14, 7 }
 0x7ef   :  { %v4839_v10 = vmul.f32 %v10603_v48, %v4818_v3  ;;  %v4943_v57 = vmul.f32 %v11289_v2, %v12189_v55  ;;  %v4944_v15 = vmul.f32 %v12179_v14, %v12189_v55  ;;  %v11958_v52 = vrot.slane %v11289_v2, 1  ;;  %v12190_v55 = vld [vmem:[#allocation41_spill] sm:$0xff] }
 0x7f0   :  { %v4838_v6 = vmul.f32 %v10598_v53, %v4817_v63  ;;  %v4876_v3 = vsel %vm2660_vm12, %v11954_v54, %v11948_v5  ;;  %v4993_v4 = vrot.slane %v12179_v14, 1  ;;  %v11961_v5 = vrot.slane %v10719_v7, 1 }
 0x7f1   :  { %v4853_v47 = vadd.f32 %v4839_v10, %v4776_v26  ;;  %v4877_v10 = vsel %vm2660_vm12, %v11953_v27, %v11952_v38  ;;  %v4894_v8 = vmul.f32 %v4876_v3, %v12190_v55  ;;  %v4964_v63 = vmul.f32 %v10609_v18, %v4943_v57 }
 0x7f2   :  { %v4852_v59 = vadd.f32 %v4838_v6, %v4775_v61  ;;  %v4895_v26 = vmul.f32 %v4877_v10, %v12190_v55  ;;  %v4965_v61 = vmul.f32 %v10614_v33, %v4944_v15  ;;  %v11957_v6 = vrot.slane %v11152_v0, 1 }
 0x7f3   :  { %v5069_v41 = vmul.f32 %v4797_v31, %v12191_v28  ;;  %v5070_v12 = vmul.f32 %v11362_v24, %v12191_v28  ;;  %v4915_v38 = vmul.f32 %v10605_v16, %v4894_v8  ;;  %v11969_v3 = vrot.slane %v11289_v2, 5 }
 0x7f4   :  { %v4916_v27 = vmul.f32 %v10607_v9, %v4895_v26  ;;  %v11968_v10 = vrot.slane %v12179_v14, 5  ;;  %v5000_v57 = vsel %vm2775_vm13, %v11958_v52, %v11957_v6  ;;  %v5001_v28 = vsel %vm2775_vm13, %v4993_v4, %v11961_v5  ;;  %v12192_v26 = vld [vmem:[#allocation50_spill] sm:$0xff] }
 0x7f5   :  { %v5090_v31 = vmul.f32 %v10778_v25, %v5069_v41  ;;  %v5091_v15 = vmul.f32 %v10790_v40, %v5070_v12  ;;  %v4929_v55 = vadd.f32 %v4915_v38, %v4852_v59  ;;  %v5020_v54 = vmul.f32 %v5000_v57, %v12192_v26 }
 0x7f6   :  { %v4930_v8 = vadd.f32 %v4916_v27, %v4853_v47  ;;  %v5021_v62 = vmul.f32 %v5001_v28, %v12192_v26  ;;  %v11965_v1 = vrot.slane %v11152_v0, 5  ;;  %v11964_v6 = vrot.slane %v10719_v7, 5 }
 0x7f7   :  { %v11967_v52 = vrot.slane %v11289_v2, 6  ;;  %v11966_v35 = vrot.slane %v12179_v14, 6  ;;  %v4978_v11 = vadd.f32 %v4964_v63, %v4929_v55  ;;  %v5041_v41 = vmul.f32 %v10619_v43, %v5020_v54  ;;  %v12193_v63 = vld [vmem:[#allocation63_spill] sm:$0xff] }
 0x7f8   :  { %v4979_v5 = vadd.f32 %v4965_v61, %v4930_v8  ;;  %v5042_v12 = vmul.f32 %v10628_v20, %v5021_v62  ;;  %v5126_v27 = vsel %vm2890_vm14, %v11969_v3, %v11965_v1  ;;  %v5127_v59 = vsel %vm2890_vm14, %v11968_v10, %v11964_v6 }
 0x7f9   :  { %v11963_v38 = vrot.slane %v11152_v0, 6  ;;  %v11962_v54 = vrot.slane %v10719_v7, 6  ;;  %v5055_v47 = vadd.f32 %v5041_v41, %v4978_v11  ;;  %v5146_v61 = vmul.f32 %v5126_v27, %v12193_v63 }
 0x7fa   :  { %v5056_v62 = vadd.f32 %v5042_v12, %v4979_v5  ;;  %v5147_v57 = vmul.f32 %v5127_v59, %v12193_v63  ;;  %v12194_v11 = vrot.slane %v10667_v49, 2  ;;  %v12195_v5 = vrot.slane %v10665_v46, 2 }
 0x7fb   :  { %v5203_v28 = vsel %vm2955_vm11, %v11967_v52, %v11963_v38  ;;  %v5204_v55 = vsel %vm2955_vm11, %v11966_v35, %v11962_v54  ;;  %v12196_v26 = vrot.slane %v10645_v17, 2  ;;  %v12197_v41 = vrot.slane %v10640_v51, 2  ;;  %v12198_v38 = vld [vmem:[#allocation75_spill] sm:$0xff]  ;;  %v12199_v35 = vld [vmem:[#allocation13_spill] sm:$0xff] }
 0x7fc   :  { %v4648_v8 = vsel %vm2466_vm8, %v12195_v5, %v12194_v11  ;;  %v5104_v27 = vadd.f32 %v5090_v31, %v5055_v47  ;;  %v5105_v59 = vadd.f32 %v5091_v15, %v5056_v62  ;;  %v5167_v63 = vmul.f32 %v10803_v13, %v5146_v61 }
 0x7fd   :  { %v4649_v12 = vsel %vm2466_vm8, %v12197_v41, %v12196_v26  ;;  %v5168_v54 = vmul.f32 %v10805_v19, %v5147_v57  ;;  %v5223_v6 = vmul.f32 %v5203_v28, %v12198_v38  ;;  %v5224_v1 = vmul.f32 %v5204_v55, %v12198_v38  ;;  %v12204_v57 = vld [vmem:[#allocation18_spill] sm:$0xff] }
 0x7fe   :  { %v4662_v52 = vmul.f32 %v4648_v8, %v12199_v35  ;;  %v4663_v11 = vmul.f32 %v4649_v12, %v12199_v35  ;;  %v5181_v5 = vadd.f32 %v5167_v63, %v5104_v27  ;;  %v12200_v3 = vrot.slane %v10667_v49, 3 }
 0x7ff   :  { %v5182_v10 = vadd.f32 %v5168_v54, %v5105_v59  ;;  %v12201_v26 = vrot.slane %v10665_v46, 3  ;;  %v12202_v15 = vrot.slane %v10645_v17, 3  ;;  %v12203_v47 = vrot.slane %v10640_v51, 3  ;;  %v12209_v59 = vld [vmem:[#allocation34_spill] sm:$0xff] }
 0x800   :  { %v5244_v62 = vmul.f32 %v10828_v42, %v5223_v6  ;;  %v5245_v35 = vmul.f32 %v10830_v23, %v5224_v1  ;;  %v4682_v54 = vmul.f32 %v10588_v21, %v4662_v52  ;;  %v4683_v61 = vmul.f32 %v10590_v34, %v4663_v11 }
 0x801   :  { %v4724_v31 = vsel %vm2530_vm9, %v12201_v26, %v12200_v3  ;;  %v4725_v38 = vsel %vm2530_vm9, %v12203_v47, %v12202_v15  ;;  %v12205_v3 = vrot.slane %v10667_v49, 7  ;;  %v12206_v8 = vrot.slane %v10665_v46, 7  ;;  %v12210_v15 = vld [vmem:[#allocation44_spill] sm:$0xff] }
 0x802   :  { %v4738_v28 = vmul.f32 %v4724_v31, %v12204_v57  ;;  %v4739_v55 = vmul.f32 %v4725_v38, %v12204_v57  ;;  %v12207_v12 = vrot.slane %v10645_v17, 7  ;;  %v12208_v6 = vrot.slane %v10640_v51, 7 }
 0x803   :  { %v4878_v41 = vsel %vm2660_vm12, %v12206_v8, %v12205_v3  ;;  %v5258_v52 = vadd.f32 %v5244_v62, %v5181_v5  ;;  %v5259_v27 = vadd.f32 %v5245_v35, %v5182_v10  ;;  %v11505_v26 = vmul.f32 %v11362_v24, %v12188_v60  ;;  %v12214_v8 = vld [vmem:[#allocation42_spill] sm:$0xff] }
 0x804   :  { %v4879_v1 = vsel %vm2660_vm12, %v12208_v6, %v12207_v12  ;;  %v4892_v63 = vmul.f32 %v4878_v41, %v12209_v59  ;;  %v4759_v46 = vmul.f32 %v10592_v45, %v4738_v28  ;;  %v4760_v31 = vmul.f32 %v10594_v39, %v4739_v55  ;;  %v12215_v12 = vld [vmem:[#allocation69_spill] sm:$0xff] }
 0x805   :  { %v4893_v11 = vmul.f32 %v4879_v1, %v12209_v59  ;;  %v4941_v51 = vmul.f32 %v10667_v49, %v12210_v15  ;;  %v5276_v47 = vadd.f32 %v5259_v27, %v5258_v52  ;;  %v4942_v10 = vmul.f32 %v10645_v17, %v12210_v15 }
 0x806   :  { %v4913_v38 = vmul.f32 %v10605_v16, %v4892_v63  ;;  %v12211_v5 = vrot.slane %v11289_v2, 1  ;;  %v12212_v62 = vrot.slane %v10667_v49, 1  ;;  %v4773_v60 = vadd.f32 %v4759_v46, %v4682_v54 }
 0x807   :  { %v4774_v35 = vadd.f32 %v4760_v31, %v4683_v61  ;;  %v4914_v57 = vmul.f32 %v10607_v9, %v4893_v11  ;;  %v4962_v28 = vmul.f32 %v10609_v18, %v4941_v51  ;;  %5277 = vadd.xlane.f32.xlu1 %v5276_v47  ;;  %v12213_v55 = vrot.slane %v10645_v17, 1  ;;  %v12220_v51 = vld [vmem:[#allocation55_spill] sm:$0xff] }
 0x808   :  { %v5002_v24 = vsel %vm2775_vm13, %v12212_v62, %v12211_v5  ;;  %v5067_v6 = vmul.f32 %v11349_v36, %v12215_v12  ;;  %v5068_v54 = vmul.f32 %v11333_v37, %v12215_v12  ;;  %v4850_v61 = vadd.f32 %v11312_v32, %v4773_v60  ;;  %v12227_v12 = vld [vmem:[#allocation65_spill] sm:$0xff] }
 0x809   :  { %v5003_v3 = vsel %vm2775_vm13, %v12213_v55, %v4993_v4  ;;  %v5018_v41 = vmul.f32 %v5002_v24, %v12214_v8  ;;  %v4851_v1 = vadd.f32 %v11343_v30, %v4774_v35  ;;  %v12216_v27 = vrot.slane %v11289_v2, 5 }
 0x80a   :  { %v5019_v52 = vmul.f32 %v5003_v3, %v12214_v8  ;;  %v12217_v59 = vrot.slane %v10667_v49, 5  ;;  %v4963_v63 = vmul.f32 %v10614_v33, %v4942_v10  ;;  %v5088_v11 = vmul.f32 %v10778_v25, %v5067_v6 }
 0x80b   :  { %v5039_v36 = vmul.f32 %v10619_v43, %v5018_v41  ;;  %v12218_v37 = vrot.slane %v12179_v14, 5  ;;  %v12219_v32 = vrot.slane %v10645_v17, 5  ;;  %v4927_v46 = vadd.f32 %v4913_v38, %v4850_v61 }
 0x80c   :  { %v5128_v4 = vsel %vm2890_vm14, %v12217_v59, %v12216_v27  ;;  %v4928_v31 = vadd.f32 %v4914_v57, %v4851_v1  ;;  %v5089_v15 = vmul.f32 %v10790_v40, %v5068_v54  ;;  %v12221_v10 = vrot.slane %v11289_v2, 6  ;;  %v12230_v59 = vld [vmem:[#allocation17_spill] sm:$0xff] }
 0x80d   :  { %v5129_v30 = vsel %vm2890_vm14, %v12219_v32, %v12218_v37  ;;  %v5144_v47 = vmul.f32 %v5128_v4, %v12220_v51  ;;  %v12222_v62 = vrot.slane %v10667_v49, 6  ;;  %v12223_v60 = vrot.slane %v12179_v14, 6 }
 0x80e   :  { %v5145_v5 = vmul.f32 %v5129_v30, %v12220_v51  ;;  %v12224_v35 = vrot.slane %v10645_v17, 6  ;;  %v12225_v57 = vrot.slane %v11152_v0, 2  ;;  %v12226_v55 = vrot.slane %v11289_v2, 2 }
 0x80f   :  { %v5205_v24 = vsel %vm2955_vm11, %v12222_v62, %v12221_v10  ;;  %v4976_v8 = vadd.f32 %v4962_v28, %v4927_v46  ;;  %v4977_v41 = vadd.f32 %v4963_v63, %v4928_v31  ;;  %v5040_v49 = vmul.f32 %v10628_v20, %v5019_v52 }
 0x810   :  { %v5206_v38 = vsel %vm2955_vm11, %v12224_v35, %v12223_v60  ;;  %v4644_v3 = vsel %vm2466_vm8, %v12226_v55, %v12225_v57  ;;  %v5221_v6 = vmul.f32 %v5205_v24, %v12227_v12  ;;  %v5165_v54 = vmul.f32 %v10803_v13, %v5144_v47  ;;  %v12235_v60 = vld [vmem:[#allocation26_spill] sm:$0xff] }
 0x811   :  { %v5222_v17 = vmul.f32 %v5206_v38, %v12227_v12  ;;  %v12228_v61 = vrot.slane %v10719_v7, 2  ;;  %v12229_v1 = vrot.slane %v12179_v14, 2  ;;  %v4666_v4 = vmul.f32 %v4644_v3, %v12230_v59  ;;  %v12240_v12 = vld [vmem:[#allocation40_spill] sm:$0xff] }
 0x812   :  { %v5053_v37 = vadd.f32 %v5039_v36, %v4976_v8  ;;  %v5054_v28 = vadd.f32 %v5040_v49, %v4977_v41  ;;  %v5166_v63 = vmul.f32 %v10805_v19, %v5145_v5  ;;  %v5242_v32 = vmul.f32 %v10828_v42, %v5221_v6 }
 0x813   :  { %v4645_v27 = vsel %vm2466_vm8, %v12229_v1, %v12228_v61  ;;  %v5243_v30 = vmul.f32 %v10830_v23, %v5222_v17  ;;  %v12231_v46 = vrot.slane %v11152_v0, 3  ;;  %v12232_v31 = vrot.slane %v11289_v2, 3  ;;  %v12241_v1 = vld [vmem:[#allocation45_spill] sm:$0xff] }
 0x814   :  { %v4667_v52 = vmul.f32 %v4645_v27, %v12230_v59  ;;  %v12233_v47 = vrot.slane %v10719_v7, 3  ;;  %v12234_v36 = vrot.slane %v12179_v14, 3  ;;  %v5102_v10 = vadd.f32 %v5088_v11, %v5053_v37 }
 0x815   :  { %v4720_v51 = vsel %vm2530_vm9, %v12232_v31, %v12231_v46  ;;  %v5103_v62 = vadd.f32 %v5089_v15, %v5054_v28  ;;  %v4686_v24 = vmul.f32 %v10588_v21, %v4666_v4  ;;  %v12236_v55 = vrot.slane %v11152_v0, 7 }
 0x816   :  { %v4721_v5 = vsel %vm2530_vm9, %v12234_v36, %v12233_v47  ;;  %v4742_v35 = vmul.f32 %v4720_v51, %v12235_v60  ;;  %v4687_v38 = vmul.f32 %v10590_v34, %v4667_v52  ;;  %v12237_v3 = vrot.slane %v11289_v2, 7 }
 0x817   :  { %v4743_v57 = vmul.f32 %v4721_v5, %v12235_v60  ;;  %v12238_v41 = vrot.slane %v10719_v7, 7  ;;  %v12239_v11 = vrot.slane %v12179_v14, 7  ;;  %v5179_v15 = vadd.f32 %v5165_v54, %v5102_v10  ;;  %v12247_v5 = vld [vmem:[#allocation71_spill] sm:$0xff] }
 0x818   :  { %v4874_v8 = vsel %vm2660_vm12, %v12237_v3, %v12236_v55  ;;  %v5180_v49 = vadd.f32 %v5166_v63, %v5103_v62  ;;  %v4763_v34 = vmul.f32 %v10592_v45, %v4742_v35  ;;  %v4840_v17 = vmul.f32 %v10598_v53, %v11365_v50 }
 0x819   :  { %v4875_v21 = vsel %vm2660_vm12, %v12239_v11, %v12238_v41  ;;  %v4896_v6 = vmul.f32 %v4874_v8, %v12240_v12  ;;  %v4764_v2 = vmul.f32 %v10594_v39, %v4743_v57  ;;  %v4945_v27 = vmul.f32 %v11152_v0, %v12241_v1  ;;  %v12252_v41 = vld [vmem:[#allocation62_spill] sm:$0xff] }
 0x81a   :  { %v4897_v61 = vmul.f32 %v4875_v21, %v12240_v12  ;;  %v4841_v14 = vmul.f32 %v10603_v48, %v11505_v26  ;;  %v5256_v59 = vadd.f32 %v5242_v32, %v5179_v15  ;;  %v5257_v54 = vadd.f32 %v5243_v30, %v5180_v49 }
 0x81b   :  { %v4777_v4 = vadd.f32 %v4763_v34, %v4686_v24  ;;  %v4778_v37 = vadd.f32 %v4764_v2, %v4687_v38  ;;  %v4917_v45 = vmul.f32 %v10605_v16, %v4896_v6  ;;  %v4946_v28 = vmul.f32 %v10719_v7, %v12241_v1  ;;  %v12246_v16 = vld [vmem:[#allocation49_spill] sm:$0xff]  ;;  %v12257_v6 = vld [vmem:[#allocation74_spill] sm:$0xff] }
 0x81c   :  { %v12242_v53 = vrot.slane %v10859_v29, 1  ;;  %v12243_v39 = vrot.slane %v11152_v0, 1  ;;  %v5273_v63 = vadd.f32 %v5257_v54, %v5256_v59  ;;  %v12244_v48 = vrot.slane %v10721_v58, 1 }
 0x81d   :  { %v4854_v52 = vadd.f32 %v4840_v17, %v4777_v4  ;;  %v12245_v26 = vrot.slane %v10719_v7, 1  ;;  %v4855_v46 = vadd.f32 %v4841_v14, %v4778_v37  ;;  %v4918_v31 = vmul.f32 %v10607_v9, %v4897_v61  ;;  %v5272_v37 = vpop.xlane.xlu0 %5271 }
 0x81e   :  { %v4998_v50 = vsel %vm2775_vm13, %v12243_v39, %v12242_v53  ;;  %v4966_v51 = vmul.f32 %v10609_v18, %v4945_v27  ;;  %5274 = vadd.xlane.f32.xlu2 %v5273_v63  ;;  %v5071_v10 = vmul.f32 %v11199_v56, %v12247_v5  ;;  %v12248_v62 = vrot.slane %v10859_v29, 5 }
 0x81f   :  { %v4999_v32 = vsel %vm2775_vm13, %v12245_v26, %v12244_v48  ;;  %v5022_v30 = vmul.f32 %v4998_v50, %v12246_v16  ;;  %v4931_v36 = vadd.f32 %v4917_v45, %v4854_v52  ;;  %v12249_v24 = vrot.slane %v11152_v0, 5 }
 0x820   :  { %v5023_v47 = vmul.f32 %v4999_v32, %v12246_v16  ;;  %v12250_v35 = vrot.slane %v10721_v58, 5  ;;  %v12251_v9 = vrot.slane %v10719_v7, 5  ;;  %v4932_v38 = vadd.f32 %v4918_v31, %v4855_v46 }
 0x821   :  { %v5124_v60 = vsel %vm2890_vm14, %v12249_v24, %v12248_v62  ;;  %v4967_v57 = vmul.f32 %v10614_v33, %v4946_v28  ;;  %v5043_v55 = vmul.f32 %v10619_v43, %v5022_v30  ;;  %v5072_v56 = vmul.f32 %v11161_v44, %v12247_v5 }
 0x822   :  { %v5125_v18 = vsel %vm2890_vm14, %v12251_v9, %v12250_v35  ;;  %v4980_v3 = vadd.f32 %v4966_v51, %v4931_v36  ;;  %v5044_v8 = vmul.f32 %v10628_v20, %v5023_v47  ;;  %v5148_v11 = vmul.f32 %v5124_v60, %v12252_v41 }
 0x823   :  { %v12253_v21 = vrot.slane %v10859_v29, 6  ;;  %v12254_v15 = vrot.slane %v11152_v0, 6  ;;  %v4981_v34 = vadd.f32 %v4967_v57, %v4932_v38  ;;  %v5149_v33 = vmul.f32 %v5125_v18, %v12252_v41 }
 0x824   :  { %v12255_v43 = vrot.slane %v10721_v58, 6  ;;  %v12256_v12 = vrot.slane %v10719_v7, 6  ;;  %v24_v20 = vstv %s11743_s18  ;;  %v5057_v29 = vadd.f32 %v5043_v55, %v4980_v3 }
 0x825   :  { %v5201_v49 = vsel %vm2955_vm11, %v12254_v15, %v12253_v21  ;;  %v5092_v0 = vmul.f32 %v10778_v25, %v5071_v10  ;;  %25 = vst [vmem:[#allocation2] sm:$0x1] %v24_v20  ;;  %v5058_v2 = vadd.f32 %v5044_v8, %v4981_v34  ;;  %v5093_v61 = vmul.f32 %v10790_v40, %v5072_v56 }
 0x826   :  { %v5202_v44 = vsel %vm2955_vm11, %v12256_v12, %v12255_v43  ;;  %v5225_v17 = vmul.f32 %v5201_v49, %v12257_v6  ;;  %v5169_v7 = vmul.f32 %v10803_v13, %v5148_v11  ;;  %v5170_v27 = vmul.f32 %v10805_v19, %v5149_v33 }
 0x827   :  { %v5226_v58 = vmul.f32 %v5202_v44, %v12257_v6  ;;  %v5106_v1 = vadd.f32 %v5092_v0, %v5057_v29  ;;  %v5107_v22 = vadd.f32 %v5093_v61, %v5058_v2  ;;  %vm5429_vm8 = vcmask 7168  }
 0x828   :  { %v5246_v59 = vmul.f32 %v10828_v42, %v5225_v17 }
 0x829   :  { %v5183_v14 = vadd.f32 %v5169_v7, %v5106_v1  ;;  %v5184_v54 = vadd.f32 %v5170_v27, %v5107_v22  ;;  %v5247_v25 = vmul.f32 %v10830_v23, %v5226_v58 }
 0x82b   :  { %v5260_v4 = vadd.f32 %v5246_v59, %v5183_v14  ;;  %v5261_v45 = vadd.f32 %v5247_v25, %v5184_v54 }
 0x82c   :  { %v11688_v28 = vld [vmem:[#allocation2] ss:$0 sm:$0xff] }
 0x82d   :  { %v5279_v40 = vadd.f32 %v5261_v45, %v5260_v4  ;;  %v5291_v53 = vadd.f32 %v11688_v28, %v5272_v37 }
 0x82f   :  { %5280 = vadd.xlane.f32.xlu2 %v5279_v40  ;;  %v5298_v39 = vsub.f32 0.0, %v5291_v53 }
 0x831   :  { %v5307_v13 = vmul.f32 1.442695, %v5298_v39  ;;  %v5266_v52 = vpop.xlane.xlu1 %5265 }
 0x832   :  { %v5289_v23 = vadd.f32 %v11688_v28, %v5266_v52 }
 0x833   :  { %7050 = vpow2.f32 %v5307_v13 }
 0x834   :  { %v5296_v30 = vsub.f32 0.0, %v5289_v23 }
 0x836   :  { %v5303_v31 = vmul.f32 1.442695, %v5296_v30 }
 0x839   :  { %v7051_v50 = vpop.eup %7050 }
 0x83a   :  { %v5319_v19 = vadd.f32 1.0, %v7051_v50 }
 0x83c   :  { %7052 = vrcp.f32 %v5319_v19  ;;  %v5365_v26 = vand.u32 2147483648, %v5319_v19  ;;  %v5363_v16 = vand.u32 2147483647, %v5319_v19  ;;  %vm5359_vm7 = vweird.f32 %v5319_v19 }
 0x83d   :  { %7054 = vpow2.f32 %v5303_v31 }
 0x83e   :  { %v5366_v51 = vor.u32 1.1754944e-38, %v5365_v26  ;;  %vm5364_vm10 = vcmp.eq.f32.partialorder %v5363_v16, 8.507059e+37 }
 0x842   :  { %v7053_v63 = vpop.eup %7052 }
 0x843   :  { %v5355_v42 = vmul.f32 %v7053_v63, %v5319_v19  ;;  %vm5360_vm6 = vweird.f32 %v7053_v63  ;;  %v7055_v5 = vpop.eup %7054 }
 0x844   :  { %vm5361_vm9 = vmor %vm5359_vm7, %vm5360_vm6  ;;  %v5317_v10 = vadd.f32 1.0, %v7055_v5 }
 0x845   :  { %v5356_v48 = vsub.f32 1.0, %v5355_v42 }
 0x846   :  { %7056 = vrcp.f32 %v5317_v10  ;;  %v5335_v57 = vand.u32 2147483648, %v5317_v10  ;;  %v5333_v56 = vand.u32 2147483647, %v5317_v10  ;;  %vm5329_vm12 = vweird.f32 %v5317_v10 }
 0x847   :  { %v5357_v32 = vmul.f32 %v7053_v63, %v5356_v48  ;;  %v5269_v62 = vpop.xlane.xlu2 %5268 }
 0x848   :  { %v5290_v24 = vadd.f32 %v11688_v28, %v5269_v62  ;;  %v5336_v41 = vor.u32 1.1754944e-38, %v5335_v57  ;;  %vm5334_vm14 = vcmp.eq.f32.partialorder %v5333_v56, 8.507059e+37 }
 0x849   :  { %v5358_v46 = vadd.f32 %v7053_v63, %v5357_v32 }
 0x84a   :  { %v5297_v60 = vsub.f32 0.0, %v5290_v24 }
 0x84b   :  { %v5362_v47 = vsel %vm5361_vm9, %v7053_v63, %v5358_v46 }
 0x84c   :  { %v5367_v36 = vsel %vm5364_vm10, %v5366_v51, %v5362_v47  ;;  %v7057_v35 = vpop.eup %7056  ;;  %v5305_v9 = vmul.f32 1.442695, %v5297_v60 }
 0x84d   :  { %5432 = vst.msk [vmem:[%s11744_s19 + $0x10] sm:$0xff] %vm5429_vm8, %v5367_v36  ;;  %v5325_v18 = vmul.f32 %v7057_v35, %v5317_v10  ;;  %vm5330_vm11 = vweird.f32 %v7057_v35 }
 0x84e   :  { %7058 = vpow2.f32 %v5305_v9  ;;  %vm5331_vm13 = vmor %vm5329_vm12, %vm5330_vm11 }
 0x84f   :  { %v5326_v38 = vsub.f32 1.0, %v5325_v18 }
 0x851   :  { %v5327_v55 = vmul.f32 %v7057_v35, %v5326_v38 }
 0x853   :  { %v5328_v3 = vadd.f32 %v7057_v35, %v5327_v55 }
 0x854   :  { %v7059_v8 = vpop.eup %7058 }
 0x855   :  { %v5332_v11 = vsel %vm5331_vm13, %v7057_v35, %v5328_v3  ;;  %v5318_v21 = vadd.f32 1.0, %v7059_v8 }
 0x856   :  { %v5337_v15 = vsel %vm5334_vm14, %v5336_v41, %v5332_v11 }
 0x857   :  { %5430 = vst.msk [vmem:[%s11744_s19] sm:$0xff] %vm5429_vm8, %v5337_v15  ;;  %7060 = vrcp.f32 %v5318_v21  ;;  %v5350_v29 = vand.u32 2147483648, %v5318_v21  ;;  %v5348_v6 = vand.u32 2147483647, %v5318_v21  ;;  %vm5344_vm0 = vweird.f32 %v5318_v21 }
 0x859   :  { %v5351_v2 = vor.u32 1.1754944e-38, %v5350_v29  ;;  %vm5349_vm2 = vcmp.eq.f32.partialorder %v5348_v6, 8.507059e+37 }
 0x85d   :  { %v7061_v33 = vpop.eup %7060 }
 0x85e   :  { %v5284_v49 = vpop.xlane.xlu0 %5283  ;;  %v5340_v43 = vmul.f32 %v7061_v33, %v5318_v21  ;;  %vm5345_vm15 = vweird.f32 %v7061_v33 }
 0x85f   :  { %v5295_v34 = vadd.f32 %v11688_v28, %v5284_v49  ;;  %vm5346_vm1 = vmor %vm5344_vm0, %vm5345_vm15 }
 0x860   :  { %v5341_v44 = vsub.f32 1.0, %v5340_v43 }
 0x861   :  { %v5302_v12 = vsub.f32 0.0, %v5295_v34 }
 0x862   :  { %v5342_v0 = vmul.f32 %v7061_v33, %v5341_v44 }
 0x863   :  { %v5315_v20 = vmul.f32 1.442695, %v5302_v12 }
 0x864   :  { %v5343_v17 = vadd.f32 %v7061_v33, %v5342_v0 }
 0x865   :  { %7062 = vpow2.f32 %v5315_v20 }
 0x866   :  { %v5347_v61 = vsel %vm5346_vm1, %v7061_v33, %v5343_v17 }
 0x867   :  { %v5352_v58 = vsel %vm5349_vm2, %v5351_v2, %v5347_v61 }
 0x868   :  { %5431 = vst.msk [vmem:[%s11744_s19 + $0x8] sm:$0xff] %vm5429_vm8, %v5352_v58 }
 0x86b   :  { %v7063_v1 = vpop.eup %7062 }
 0x86c   :  { %v5323_v7 = vadd.f32 1.0, %v7063_v1 }
 0x86e   :  { %7064 = vrcp.f32 %v5323_v7  ;;  %v5425_v54 = vand.u32 2147483648, %v5323_v7  ;;  %v5423_v37 = vand.u32 2147483647, %v5323_v7  ;;  %vm5419_vm4 = vweird.f32 %v5323_v7 }
 0x870   :  { %v5426_v53 = vor.u32 1.1754944e-38, %v5425_v54  ;;  %vm5424_vm6 = vcmp.eq.f32.partialorder %v5423_v37, 8.507059e+37 }
 0x874   :  { %v7065_v22 = vpop.eup %7064 }
 0x875   :  { %v5415_v27 = vmul.f32 %v7065_v22, %v5323_v7  ;;  %vm5420_vm3 = vweird.f32 %v7065_v22 }
 0x876   :  { %vm5421_vm5 = vmor %vm5419_vm4, %vm5420_vm3 }
 0x877   :  { %v5416_v14 = vsub.f32 1.0, %v5415_v27 }
 0x879   :  { %v5417_v4 = vmul.f32 %v7065_v22, %v5416_v14 }
 0x87a   :  { %v5278_v59 = vpop.xlane.xlu1 %5277 }
 0x87b   :  { %v5293_v25 = vadd.f32 %v11688_v28, %v5278_v59  ;;  %v5418_v40 = vadd.f32 %v7065_v22, %v5417_v4 }
 0x87d   :  { %v5300_v45 = vsub.f32 0.0, %v5293_v25  ;;  %v5422_v13 = vsel %vm5421_vm5, %v7065_v22, %v5418_v40 }
 0x87e   :  { %v5427_v50 = vsel %vm5424_vm6, %v5426_v53, %v5422_v13 }
 0x87f   :  { %v5311_v39 = vmul.f32 1.442695, %v5300_v45  ;;  %5436 = vst.msk [vmem:[%s11744_s19 + $0x30] sm:$0xff] %vm5429_vm8, %v5427_v50 }
 0x881   :  { %7066 = vpow2.f32 %v5311_v39 }
 0x887   :  { %v7067_v19 = vpop.eup %7066 }
 0x888   :  { %v5321_v63 = vadd.f32 1.0, %v7067_v19 }
 0x88a   :  { %7068 = vrcp.f32 %v5321_v63  ;;  %v5395_v30 = vand.u32 2147483648, %v5321_v63  ;;  %v5393_v31 = vand.u32 2147483647, %v5321_v63  ;;  %vm5389_vm9 = vweird.f32 %v5321_v63 }
 0x88c   :  { %v5396_v36 = vor.u32 1.1754944e-38, %v5395_v30  ;;  %vm5394_vm11 = vcmp.eq.f32.partialorder %v5393_v31, 8.507059e+37 }
 0x890   :  { %v7069_v23 = vpop.eup %7068 }
 0x891   :  { %v5275_v42 = vpop.xlane.xlu2 %5274  ;;  %v5385_v32 = vmul.f32 %v7069_v23, %v5321_v63  ;;  %vm5390_vm7 = vweird.f32 %v7069_v23 }
 0x892   :  { %v5292_v52 = vadd.f32 %v11688_v28, %v5275_v42  ;;  %vm5391_vm10 = vmor %vm5389_vm9, %vm5390_vm7 }
 0x893   :  { %v5386_v16 = vsub.f32 1.0, %v5385_v32 }
 0x894   :  { %v5299_v48 = vsub.f32 0.0, %v5292_v52 }
 0x895   :  { %v5387_v46 = vmul.f32 %v7069_v23, %v5386_v16 }
 0x896   :  { %v5309_v26 = vmul.f32 1.442695, %v5299_v48 }
 0x897   :  { %v5388_v51 = vadd.f32 %v7069_v23, %v5387_v46 }
 0x898   :  { %7070 = vpow2.f32 %v5309_v26 }
 0x899   :  { %v5392_v5 = vsel %vm5391_vm10, %v7069_v23, %v5388_v51 }
 0x89a   :  { %v5397_v62 = vsel %vm5394_vm11, %v5396_v36, %v5392_v5 }
 0x89b   :  { %5434 = vst.msk [vmem:[%s11744_s19 + $0x20] sm:$0xff] %vm5429_vm8, %v5397_v62 }
 0x89e   :  { %v7071_v47 = vpop.eup %7070 }
 0x89f   :  { %v5320_v10 = vadd.f32 1.0, %v7071_v47 }
 0x8a1   :  { %7072 = vrcp.f32 %v5320_v10  ;;  %v5380_v55 = vand.u32 2147483648, %v5320_v10  ;;  %v5378_v3 = vand.u32 2147483647, %v5320_v10  ;;  %vm5374_vm13 = vweird.f32 %v5320_v10 }
 0x8a2   :  { %v5281_v24 = vpop.xlane.xlu2 %5280 }
 0x8a3   :  { %v5294_v60 = vadd.f32 %v11688_v28, %v5281_v24  ;;  %v5381_v11 = vor.u32 1.1754944e-38, %v5380_v55  ;;  %vm5379_vm15 = vcmp.eq.f32.partialorder %v5378_v3, 8.507059e+37 }
 0x8a5   :  { %v5301_v35 = vsub.f32 0.0, %v5294_v60 }
 0x8a7   :  { %v5313_v9 = vmul.f32 1.442695, %v5301_v35  ;;  %v7073_v18 = vpop.eup %7072 }
 0x8a8   :  { %v5370_v38 = vmul.f32 %v7073_v18, %v5320_v10  ;;  %vm5375_vm12 = vweird.f32 %v7073_v18 }
 0x8a9   :  { %7074 = vpow2.f32 %v5313_v9  ;;  %vm5376_vm14 = vmor %vm5374_vm13, %vm5375_vm12 }
 0x8aa   :  { %v5371_v57 = vsub.f32 1.0, %v5370_v38 }
 0x8ac   :  { %v5372_v56 = vmul.f32 %v7073_v18, %v5371_v57 }
 0x8ae   :  { %v5373_v41 = vadd.f32 %v7073_v18, %v5372_v56 }
 0x8af   :  { %v7075_v8 = vpop.eup %7074 }
 0x8b0   :  { %v5322_v21 = vadd.f32 1.0, %v7075_v8  ;;  %v5377_v15 = vsel %vm5376_vm14, %v7073_v18, %v5373_v41 }
 0x8b1   :  { %v5382_v49 = vsel %vm5379_vm15, %v5381_v11, %v5377_v15 }
 0x8b2   :  { %7076 = vrcp.f32 %v5322_v21  ;;  %5433 = vst.msk [vmem:[%s11744_s19 + $0x18] sm:$0xff] %vm5429_vm8, %v5382_v49  ;;  %v5410_v43 = vand.u32 2147483648, %v5322_v21  ;;  %v5408_v44 = vand.u32 2147483647, %v5322_v21  ;;  %vm5404_vm1 = vweird.f32 %v5322_v21 }
 0x8b4   :  { %v5411_v29 = vor.u32 1.1754944e-38, %v5410_v43  ;;  %vm5409_vm3 = vcmp.eq.f32.partialorder %v5408_v44, 8.507059e+37 }
 0x8b8   :  { %v7077_v28 = vpop.eup %7076 }
 0x8b9   :  { %v5400_v34 = vmul.f32 %v7077_v28, %v5322_v21  ;;  %vm5405_vm0 = vweird.f32 %v7077_v28 }
 0x8ba   :  { %vm5406_vm2 = vmor %vm5404_vm1, %vm5405_vm0 }
 0x8bb   :  { %v5401_v33 = vsub.f32 1.0, %v5400_v34 }
 0x8bd   :  { %v5402_v12 = vmul.f32 %v7077_v28, %v5401_v33 }
 0x8bf   :  { %v5403_v20 = vadd.f32 %v7077_v28, %v5402_v12 }
 0x8c1   :  { %v5407_v0 = vsel %vm5406_vm2, %v7077_v28, %v5403_v20 }
 0x8c2   :  { %v5412_v6 = vsel %vm5409_vm3, %v5411_v29, %v5407_v0 }
 0x8c3   :  { %5435 = vst.msk [vmem:[%s11744_s19 + $0x28] sm:$0xff] %vm5429_vm8, %v5412_v6 }

</bundles_post_ra>
